<compile_context>
chip_gen: v5e
topology: v5e:2x2
jax: 0.10.0
libtpu: 0.0.40
codegen_flags: <defaults>
</compile_context>

<pallas_src>
import math
import functools

import jax
import jax.numpy as jnp
from jax.experimental import pallas as pl
from jax.experimental.pallas import tpu as pltpu

LANE = 128


def _round_up(x, m):
    return ((x + m - 1) // m) * m


# ---------------------------------------------------------------------------
# Pallas kernel: single-K matmul (+ optional 2nd matmul) + shift (+res) + act
# ---------------------------------------------------------------------------

def _gelu_tanh(x):
    # tanh-form GELU: the transcendental goes to the EUP slot (free vs. VALU).
    c = math.sqrt(2.0 / math.pi)
    return 0.5 * x * (1.0 + jnp.tanh(c * (x + 0.044715 * (x * x * x))))


def _apply_act(x, act):
    if act == "relu":
        return jnp.maximum(x, 0.0)
    if act == "gelu":
        return _gelu_tanh(x)
    return x


def _make_kernel(act, with_mm2, with_residual):
    def kernel(*refs):
        it = iter(refs)
        x_ref, w_ref, b_ref = next(it), next(it), next(it)
        if with_mm2:
            x2_ref, w2_ref, b2_ref = next(it), next(it), next(it)
        if with_residual:
            r_ref = next(it)
        o_ref = next(it)

        acc = jnp.dot(x_ref[...], w_ref[...],
                      preferred_element_type=jnp.float32)
        acc = acc + b_ref[...]
        if with_mm2:
            acc = acc + jnp.dot(x2_ref[...], w2_ref[...],
                                preferred_element_type=jnp.float32)
            acc = acc + b2_ref[...]
        if with_residual:
            acc = acc + r_ref[...].astype(jnp.float32)
        o_ref[...] = _apply_act(acc, act).astype(o_ref.dtype)
    return kernel


def _pick_tm(M, cap=512):
    # Small layers: one full-dim block (legal; avoids per-step overhead on
    # 1-TC v5e/v6e).  Large layers: balanced multiple-of-8 tiles (v7x 2-TC).
    if M <= cap:
        return M
    nb = -(-M // cap)
    return min(cap, _round_up(-(-M // nb), 8))


def fused_matmul(x, w, shift, act="none", residual=None, mm2=None,
                 out_dtype=jnp.bfloat16):
    """act(x @ w + shift [+ x2 @ w2 + shift2] [+ residual]).

    x: (M, K) (cast to bf16); w: (K, Cpad) bf16, Cpad % 128 == 0, BN scale
    pre-folded; shift: (1, Cpad) f32; residual: (M, Cpad) (padded cols zero);
    mm2: optional (x2, w2, shift2) second matmul added before activation.
    Accumulation is f32; output is (M, Cpad) in out_dtype.
    """
    M, K = x.shape
    Kw, Cpad = w.shape
    assert K == Kw and Cpad % LANE == 0
    # TODO(synk): K-dim grid tiling (f32 acc scratch) if Cin ever outgrows a
    # single VMEM block; every layer of this config is far below the limit.
    assert K <= 4096, "single-K fast path only"

    x = x.astype(jnp.bfloat16)
    tm = _pick_tm(M)
    grid = (pl.cdiv(M, tm),)

    in_specs = [
        pl.BlockSpec((tm, K), lambda i: (i, 0)),
        pl.BlockSpec((K, Cpad), lambda i: (0, 0)),     # resident weight
        pl.BlockSpec((1, Cpad), lambda i: (0, 0)),
    ]
    args = [x, w, shift]
    if mm2 is not None:
        x2, w2, shift2 = mm2
        K2 = x2.shape[1]
        assert x2.shape[0] == M and w2.shape == (K2, Cpad)
        in_specs += [
            pl.BlockSpec((tm, K2), lambda i: (i, 0)),
            pl.BlockSpec((K2, Cpad), lambda i: (0, 0)),
            pl.BlockSpec((1, Cpad), lambda i: (0, 0)),
        ]
        args += [x2.astype(jnp.bfloat16), w2, shift2]
    if residual is not None:
        assert residual.shape == (M, Cpad)
        in_specs.append(pl.BlockSpec((tm, Cpad), lambda i: (i, 0)))
        args.append(residual.astype(jnp.bfloat16))

    return pl.pallas_call(
        _make_kernel(act, mm2 is not None, residual is not None),
        out_shape=jax.ShapeDtypeStruct((M, Cpad), out_dtype),
        grid=grid,
        in_specs=in_specs,
        out_specs=pl.BlockSpec((tm, Cpad), lambda i: (i, 0)),
        compiler_params=pltpu.CompilerParams(
            dimension_semantics=("parallel",)),
    )(*args)


# ---------------------------------------------------------------------------
# Conv / pool glue (all shapes static; runs inside the same jit)
# ---------------------------------------------------------------------------

def _im2col(x, KH, KW, stride, padding, cin):
    # Channel truncation to the real `cin` is fused into each spatial slice,
    # so lane-padded producer outputs never need a separate slice kernel.
    N, H, W, _ = x.shape
    if padding:
        x = jnp.pad(x, ((0, 0), (padding, padding), (padding, padding), (0, 0)))
    Hp, Wp = H + 2 * padding, W + 2 * padding
    OH = (Hp - KH) // stride + 1
    OW = (Wp - KW) // stride + 1
    cols = []
    for kh in range(KH):
        for kw in range(KW):
            cols.append(x[:, kh:kh + stride * (OH - 1) + 1:stride,
                            kw:kw + stride * (OW - 1) + 1:stride, :cin])
    patches = jnp.concatenate(cols, axis=-1)          # (N, OH, OW, KH*KW*cin)
    return patches.reshape(N * OH * OW, KH * KW * cin), OH, OW


def conv_kxk(x, arrs, k, stride, padding, cin, act):
    """KxK conv: XLA im2col + Pallas matmul.  Output keeps 128-lane padding."""
    N = x.shape[0]
    patches, OH, OW = _im2col(x, k, k, stride, padding, cin)
    out = fused_matmul(patches, arrs["w"], arrs["shift"], act=act)
    return out.reshape(N, OH, OW, out.shape[-1])


def conv_1x1(x_pad, arrs, act, residual=None, ds=None):
    """1x1 conv consuming the producer's lane-padded channels directly.

    residual: same-shape padded tensor added before the activation.
    ds: (x2_pad, arrs2) -> fused second 1x1 matmul (identity downsample).
    """
    N, H, W, Cp = x_pad.shape
    lhs = x_pad.reshape(N * H * W, Cp)
    res = residual.reshape(N * H * W, residual.shape[-1]) if residual is not None else None
    mm2 = None
    if ds is not None:
        x2, arrs2 = ds
        mm2 = (x2.reshape(N * H * W, x2.shape[-1]), arrs2["w"], arrs2["shift"])
    out = fused_matmul(lhs, arrs["w"], arrs["shift"], act=act,
                       residual=res, mm2=mm2)
    return out.reshape(N, H, W, out.shape[-1])


def maxpool2d(x, ksize, stride):
    # TODO(synk): kept in XLA (reduce_window) per perf review.
    return jax.lax.reduce_window(
        x, jnp.array(-jnp.inf, x.dtype), jax.lax.max,
        (1, ksize, ksize, 1), (1, stride, stride, 1), "VALID")


def adaptive_avg_pool(x, out_hw=(5, 5)):
    N, H, W, C = x.shape
    OH, OW = out_hw
    if (H, W) == (OH, OW):
        return x.astype(jnp.float32)       # identity pool (this config's case)
    xf = x.astype(jnp.float32)
    rows = []
    for i in range(OH):
        h0, h1 = (i * H) // OH, -((-(i + 1) * H) // OH)
        cols = []
        for j in range(OW):
            w0, w1 = (j * W) // OW, -((-(j + 1) * W) // OW)
            cols.append(jnp.mean(xf[:, h0:h1, w0:w1, :], axis=(1, 2)))
        rows.append(jnp.stack(cols, axis=1))
    return jnp.stack(rows, axis=1)


def bottleneck_block(x, arrs, meta):
    s, oc = meta["stride"], meta["oc"]
    y1 = conv_1x1(x, arrs["w1"], act="relu")
    y2 = conv_kxk(y1, arrs["w2"], 3, s, 1, oc, act="relu")
    if meta["has_ds"]:
        x_sub = x if s == 1 else x[:, ::s, ::s, :]      # 1x1 stride-s conv lhs
        return conv_1x1(y2, arrs["w3"], act="relu", ds=(x_sub, arrs["dw"]))
    return conv_1x1(y2, arrs["w3"], act="relu", residual=x)


# ---------------------------------------------------------------------------
# Static architecture config + deterministic param init + one-time packing
# ---------------------------------------------------------------------------

def make_config(image_channels, out_channels, expansion, layers, num_classes):
    cfg = {"conv1": {"k": 7, "stride": 1, "pad": 3, "cin": image_channels},
           "num_classes": num_classes, "layers": []}
    in_ch = image_channels
    layer_out = [out_channels,
                 out_channels * expansion // 2,
                 out_channels * expansion,
                 out_channels * expansion * 2]
    layer_stride = [1, 2, 2, 2]
    for li in range(4):
        oc, stride = layer_out[li], layer_stride[li]
        blocks = []
        for bi in range(layers[li]):
            s = stride if bi == 0 else 1
            has_ds = (bi == 0) and (s != 1 or in_ch != oc * expansion)
            blocks.append({"stride": s, "has_ds": has_ds, "oc": oc,
                           "oce": oc * expansion, "cin": in_ch})
            in_ch = oc * expansion
        cfg["layers"].append(blocks)
    cfg["final_channels"] = in_ch
    cfg["fc_in"] = out_channels * expansion * 2 * expansion * 5 * 5
    return cfg


def _conv_params(key, cin, cout, k):
    k1, k2 = jax.random.split(key)
    fan_in = cin * k * k
    w = jax.random.normal(k1, (cout, cin, k, k), jnp.float32) * math.sqrt(2.0 / fan_in)
    b = jax.random.normal(k2, (cout,), jnp.float32) * 0.01
    return w, b


def _bn_params(key, c):
    k1, k2, k3, k4 = jax.random.split(key, 4)
    gamma = 1.0 + 0.1 * jax.random.normal(k1, (c,), jnp.float32)
    beta = 0.1 * jax.random.normal(k2, (c,), jnp.float32)
    mean = 0.1 * jax.random.normal(k3, (c,), jnp.float32)
    var = jnp.abs(1.0 + 0.1 * jax.random.normal(k4, (c,), jnp.float32))
    return gamma, beta, mean, var


def _pack_conv(w_oihw, b_conv, bn, cin_pad=None, eps=1e-5):
    """Fold BN into the weight/shift, OIHW -> (KH*KW*Cin[_pad], Cout_pad) bf16."""
    gamma, beta, mean, var = bn
    cout, cin, kh, kw = w_oihw.shape
    scale = gamma / jnp.sqrt(var + eps)
    shift = beta + scale * (b_conv - mean)
    cpad = _round_up(cout, LANE)
    w = w_oihw * scale[:, None, None, None]            # fold scale (f32)
    wmat = jnp.transpose(w, (2, 3, 1, 0)).reshape(kh * kw, cin, cout)
    if cin_pad is not None:                             # 1x1: padded-K input
        assert kh == 1 and kw == 1
        wmat = jnp.pad(wmat, ((0, 0), (0, cin_pad - cin), (0, 0)))
        cin = cin_pad
    wmat = wmat.reshape(kh * kw * cin, cout)
    wmat = jnp.pad(wmat, ((0, 0), (0, cpad - cout))).astype(jnp.bfloat16)
    shift = jnp.pad(shift, (0, cpad - cout)).reshape(1, cpad).astype(jnp.float32)
    return {"w": wmat, "shift": shift}


def init_packed_params(key, cfg, image_channels, num_classes):
    keys = iter(jax.random.split(key, 64))
    packed = {}
    w, b = _conv_params(next(keys), image_channels, image_channels, 7)
    packed["conv1"] = _pack_conv(w, b, _bn_params(next(keys), image_channels))

    packed["layers"] = []
    for blocks in cfg["layers"]:
        pblocks = []
        for meta in blocks:
            cin, oc, oce = meta["cin"], meta["oc"], meta["oce"]
            cin_pad = _round_up(cin, LANE)
            oc_pad = _round_up(oc, LANE)
            arrs = {}
            w, b = _conv_params(next(keys), cin, oc, 1)
            arrs["w1"] = _pack_conv(w, b, _bn_params(next(keys), oc), cin_pad=cin_pad)
            w, b = _conv_params(next(keys), oc, oc, 3)
            arrs["w2"] = _pack_conv(w, b, _bn_params(next(keys), oc))
            w, b = _conv_params(next(keys), oc, oce, 1)
            arrs["w3"] = _pack_conv(w, b, _bn_params(next(keys), oce), cin_pad=oc_pad)
            if meta["has_ds"]:
                w, b = _conv_params(next(keys), cin, oce, 1)
                arrs["dw"] = _pack_conv(w, b, _bn_params(next(keys), oce), cin_pad=cin_pad)
            pblocks.append(arrs)
        packed["layers"].append(pblocks)

    fc_in = cfg["fc_in"]
    kf1, kf2 = jax.random.split(next(keys))
    fc_w = jax.random.normal(kf1, (fc_in, num_classes), jnp.float32) * math.sqrt(1.0 / fc_in)
    fc_b = jax.random.normal(kf2, (num_classes,), jnp.float32) * 0.01
    ncp = _round_up(num_classes, LANE)
    packed["fc"] = {
        "w": jnp.pad(fc_w, ((0, 0), (0, ncp - num_classes))).astype(jnp.bfloat16),
        "shift": jnp.pad(fc_b, (0, ncp - num_classes)).reshape(1, ncp).astype(jnp.float32),
    }
    return packed


# ---------------------------------------------------------------------------
# Forward pass (config is static / closed over; packed is the traced pytree)
# ---------------------------------------------------------------------------

def resnet_forward(config, packed, x_nchw):
    x = jnp.transpose(x_nchw, (0, 2, 3, 1)).astype(jnp.bfloat16)   # NCHW -> NHWC
    c1 = config["conv1"]
    # conv1 + BN + GELU; output channels are lane-padded to 128 (padded cols
    # are exact zeros and stay zero through maxpool / all later layers).
    x = conv_kxk(x, packed["conv1"], c1["k"], c1["stride"], c1["pad"],
                 c1["cin"], act="gelu")
    x = maxpool2d(x, 5, 3)
    for arrs_blocks, meta_blocks in zip(packed["layers"], config["layers"]):
        for arrs, meta in zip(arrs_blocks, meta_blocks):
            x = bottleneck_block(x, arrs, meta)
    x = adaptive_avg_pool(x, (5, 5))
    N = x.shape[0]
    c_real = config["final_channels"]
    # flatten in PyTorch NCHW order (real channels only).
    feat = jnp.transpose(x[..., :c_real], (0, 3, 1, 2)).reshape(N, -1)
    fc = packed["fc"]
    logits = fused_matmul(feat, fc["w"], fc["shift"], act="none",
                          out_dtype=jnp.float32)
    return logits[:, :config["num_classes"]]


if __name__ == "__main__":
    key = jax.random.PRNGKey(0)
    kp, kx = jax.random.split(key)

    image_channels, out_channels, expansion, num_classes = 4, 4, 2, 10
    layers = [2, 1, 1, 1]

    config = make_config(image_channels, out_channels, expansion, layers, num_classes)
    packed = init_packed_params(kp, config, image_channels, num_classes)

    # 103x103 -> conv1 103 -> maxpool 33 -> stages 33/17/9/5 -> avgpool (5,5).
    x = jax.random.normal(kx, (2, image_channels, 103, 103), jnp.float32)  # NCHW

    fwd = jax.jit(functools.partial(resnet_forward, config))
    out = fwd(packed, x)
    jax.block_until_ready(out)
    assert out.shape == (2, num_classes)
    assert bool(jnp.all(jnp.isfinite(out)))
    print("KERNEL_OK")
</pallas_src>

<mosaic_0001>
module attributes {stable_mosaic.version = 11 : i64} {
  func.func @kernel(%arg0: i32, %arg1: memref<512x196xbf16, #tpu.memory_space<vmem>>, %arg2: memref<196x128xbf16, #tpu.memory_space<vmem>>, %arg3: memref<1x128xf32, #tpu.memory_space<vmem>>, %arg4: memref<512x128xbf16, #tpu.memory_space<vmem>>) attributes {dimension_semantics = [#tpu.dimension_semantics<parallel>], iteration_bounds = array<i64: 42>, scalar_prefetch = 0 : i64, scratch_operands = 0 : i64, tpu.core_type = #tpu.core_type<tc>, window_params = [{transform_indices = @transform_0, window_bounds = array<i64: 512, 196>}, {pipeline_mode = #tpu.pipeline_mode<synchronous>, transform_indices = @transform_1, window_bounds = array<i64: 196, 128>}, {pipeline_mode = #tpu.pipeline_mode<synchronous>, transform_indices = @transform_2, window_bounds = array<i64: 1, 128>}, {transform_indices = @transform_3, window_bounds = array<i64: 512, 128>}]} {
    %c0 = arith.constant 0 : index
    %c0_0 = arith.constant 0 : index
    %0 = vector.load %arg1[%c0, %c0_0] : memref<512x196xbf16, #tpu.memory_space<vmem>>, vector<512x196xbf16>
    %c0_1 = arith.constant 0 : index
    %c0_2 = arith.constant 0 : index
    %1 = vector.load %arg2[%c0_1, %c0_2] : memref<196x128xbf16, #tpu.memory_space<vmem>>, vector<196x128xbf16>
    %cst = arith.constant dense<0.000000e+00> : vector<512x128xf32>
    %2 = tpu.matmul %0, %1, %cst {dimension_numbers = #tpu.dot_dimension_numbers<[1], [0], [0], [1], [0, 0, 1, 1], [], []>} : vector<512x196xbf16>, vector<196x128xbf16>, vector<512x128xf32> -> vector<512x128xf32>
    %c0_3 = arith.constant 0 : index
    %c0_4 = arith.constant 0 : index
    %3 = vector.load %arg3[%c0_3, %c0_4] : memref<1x128xf32, #tpu.memory_space<vmem>>, vector<1x128xf32>
    %4 = vector.broadcast %3 : vector<1x128xf32> to vector<512x128xf32>
    %5 = arith.addf %2, %4 : vector<512x128xf32>
    %cst_5 = arith.constant 5.000000e-01 : f32
    %6 = vector.broadcast %cst_5 : f32 to vector<512x128xf32>
    %7 = arith.mulf %6, %5 : vector<512x128xf32>
    %8 = arith.mulf %5, %5 : vector<512x128xf32>
    %9 = arith.mulf %8, %5 : vector<512x128xf32>
    %cst_6 = arith.constant 4.471500e-02 : f32
    %10 = vector.broadcast %cst_6 : f32 to vector<512x128xf32>
    %11 = arith.mulf %10, %9 : vector<512x128xf32>
    %12 = arith.addf %5, %11 : vector<512x128xf32>
    %cst_7 = arith.constant 0.797884583 : f32
    %13 = vector.broadcast %cst_7 : f32 to vector<512x128xf32>
    %14 = arith.mulf %13, %12 : vector<512x128xf32>
    %15 = math.tanh %14 : vector<512x128xf32>
    %cst_8 = arith.constant 1.000000e+00 : f32
    %16 = vector.broadcast %cst_8 : f32 to vector<512x128xf32>
    %17 = arith.addf %16, %15 : vector<512x128xf32>
    %18 = arith.mulf %7, %17 : vector<512x128xf32>
    %19 = arith.truncf %18 : vector<512x128xf32> to vector<512x128xbf16>
    %c0_9 = arith.constant 0 : index
    %c0_10 = arith.constant 0 : index
    %20 = vector.load %arg4[%c0_9, %c0_10] : memref<512x128xbf16, #tpu.memory_space<vmem>>, vector<512x128xbf16>
    tpu.vector_store %arg4[%c0_9, %c0_10], %19 {strides = array<i32>} : memref<512x128xbf16, #tpu.memory_space<vmem>>, vector<512x128xbf16>,
    return
  }
  func.func @transform_0(%arg0: i32) -> (i32, i32) {
    %c0_i32 = arith.constant 0 : i32
    %c0_i32_0 = arith.constant 0 : i32
    return %arg0, %c0_i32 : i32, i32
  }
  func.func @transform_1(%arg0: i32) -> (i32, i32) {
    %c0_i32 = arith.constant 0 : i32
    %c0_i32_0 = arith.constant 0 : i32
    %c0_i32_1 = arith.constant 0 : i32
    return %c0_i32, %c0_i32_0 : i32, i32
  }
  func.func @transform_2(%arg0: i32) -> (i32, i32) {
    %c0_i32 = arith.constant 0 : i32
    %c0_i32_0 = arith.constant 0 : i32
    %c0_i32_1 = arith.constant 0 : i32
    return %c0_i32, %c0_i32_0 : i32, i32
  }
  func.func @transform_3(%arg0: i32) -> (i32, i32) {
    %c0_i32 = arith.constant 0 : i32
    %c0_i32_0 = arith.constant 0 : i32
    return %arg0, %c0_i32 : i32, i32
  }
}

module attributes {stable_mosaic.version = 11 : i64} {
  func.func @kernel(%arg0: i32, %arg1: memref<440x128xbf16, #tpu.memory_space<vmem>>, %arg2: memref<128x128xbf16, #tpu.memory_space<vmem>>, %arg3: memref<1x128xf32, #tpu.memory_space<vmem>>, %arg4: memref<440x128xbf16, #tpu.memory_space<vmem>>) attributes {dimension_semantics = [#tpu.dimension_semantics<parallel>], iteration_bounds = array<i64: 5>, scalar_prefetch = 0 : i64, scratch_operands = 0 : i64, tpu.core_type = #tpu.core_type<tc>, window_params = [{transform_indices = @transform_0, window_bounds = array<i64: 440, 128>}, {pipeline_mode = #tpu.pipeline_mode<synchronous>, transform_indices = @transform_1, window_bounds = array<i64: 128, 128>}, {pipeline_mode = #tpu.pipeline_mode<synchronous>, transform_indices = @transform_2, window_bounds = array<i64: 1, 128>}, {transform_indices = @transform_3, window_bounds = array<i64: 440, 128>}]} {
    %c0 = arith.constant 0 : index
    %c0_0 = arith.constant 0 : index
    %0 = vector.load %arg1[%c0, %c0_0] : memref<440x128xbf16, #tpu.memory_space<vmem>>, vector<440x128xbf16>
    %c0_1 = arith.constant 0 : index
    %c0_2 = arith.constant 0 : index
    %1 = vector.load %arg2[%c0_1, %c0_2] : memref<128x128xbf16, #tpu.memory_space<vmem>>, vector<128x128xbf16>
    %cst = arith.constant dense<0.000000e+00> : vector<440x128xf32>
    %2 = tpu.matmul %0, %1, %cst {dimension_numbers = #tpu.dot_dimension_numbers<[1], [0], [0], [1], [0, 0, 1, 1], [], []>} : vector<440x128xbf16>, vector<128x128xbf16>, vector<440x128xf32> -> vector<440x128xf32>
    %c0_3 = arith.constant 0 : index
    %c0_4 = arith.constant 0 : index
    %3 = vector.load %arg3[%c0_3, %c0_4] : memref<1x128xf32, #tpu.memory_space<vmem>>, vector<1x128xf32>
    %4 = vector.broadcast %3 : vector<1x128xf32> to vector<440x128xf32>
    %5 = arith.addf %2, %4 : vector<440x128xf32>
    %cst_5 = arith.constant 0.000000e+00 : f32
    %6 = vector.broadcast %cst_5 : f32 to vector<440x128xf32>
    %7 = arith.maximumf %5, %6 : vector<440x128xf32>
    %8 = arith.truncf %7 : vector<440x128xf32> to vector<440x128xbf16>
    %c0_6 = arith.constant 0 : index
    %c0_7 = arith.constant 0 : index
    %9 = vector.load %arg4[%c0_6, %c0_7] : memref<440x128xbf16, #tpu.memory_space<vmem>>, vector<440x128xbf16>
    tpu.vector_store %arg4[%c0_6, %c0_7], %8 {strides = array<i32>} : memref<440x128xbf16, #tpu.memory_space<vmem>>, vector<440x128xbf16>,
    return
  }
  func.func @transform_0(%arg0: i32) -> (i32, i32) {
    %c0_i32 = arith.constant 0 : i32
    %c0_i32_0 = arith.constant 0 : i32
    return %arg0, %c0_i32 : i32, i32
  }
  func.func @transform_1(%arg0: i32) -> (i32, i32) {
    %c0_i32 = arith.constant 0 : i32
    %c0_i32_0 = arith.constant 0 : i32
    %c0_i32_1 = arith.constant 0 : i32
    return %c0_i32, %c0_i32_0 : i32, i32
  }
  func.func @transform_2(%arg0: i32) -> (i32, i32) {
    %c0_i32 = arith.constant 0 : i32
    %c0_i32_0 = arith.constant 0 : i32
    %c0_i32_1 = arith.constant 0 : i32
    return %c0_i32, %c0_i32_0 : i32, i32
  }
  func.func @transform_3(%arg0: i32) -> (i32, i32) {
    %c0_i32 = arith.constant 0 : i32
    %c0_i32_0 = arith.constant 0 : i32
    return %arg0, %c0_i32 : i32, i32
  }
}

module attributes {stable_mosaic.version = 11 : i64} {
  func.func @kernel(%arg0: i32, %arg1: memref<440x36xbf16, #tpu.memory_space<vmem>>, %arg2: memref<36x128xbf16, #tpu.memory_space<vmem>>, %arg3: memref<1x128xf32, #tpu.memory_space<vmem>>, %arg4: memref<440x128xbf16, #tpu.memory_space<vmem>>) attributes {dimension_semantics = [#tpu.dimension_semantics<parallel>], iteration_bounds = array<i64: 5>, scalar_prefetch = 0 : i64, scratch_operands = 0 : i64, tpu.core_type = #tpu.core_type<tc>, window_params = [{transform_indices = @transform_0, window_bounds = array<i64: 440, 36>}, {pipeline_mode = #tpu.pipeline_mode<synchronous>, transform_indices = @transform_1, window_bounds = array<i64: 36, 128>}, {pipeline_mode = #tpu.pipeline_mode<synchronous>, transform_indices = @transform_2, window_bounds = array<i64: 1, 128>}, {transform_indices = @transform_3, window_bounds = array<i64: 440, 128>}]} {
    %c0 = arith.constant 0 : index
    %c0_0 = arith.constant 0 : index
    %0 = vector.load %arg1[%c0, %c0_0] : memref<440x36xbf16, #tpu.memory_space<vmem>>, vector<440x36xbf16>
    %c0_1 = arith.constant 0 : index
    %c0_2 = arith.constant 0 : index
    %1 = vector.load %arg2[%c0_1, %c0_2] : memref<36x128xbf16, #tpu.memory_space<vmem>>, vector<36x128xbf16>
    %cst = arith.constant dense<0.000000e+00> : vector<440x128xf32>
    %2 = tpu.matmul %0, %1, %cst {dimension_numbers = #tpu.dot_dimension_numbers<[1], [0], [0], [1], [0, 0, 1, 1], [], []>} : vector<440x36xbf16>, vector<36x128xbf16>, vector<440x128xf32> -> vector<440x128xf32>
    %c0_3 = arith.constant 0 : index
    %c0_4 = arith.constant 0 : index
    %3 = vector.load %arg3[%c0_3, %c0_4] : memref<1x128xf32, #tpu.memory_space<vmem>>, vector<1x128xf32>
    %4 = vector.broadcast %3 : vector<1x128xf32> to vector<440x128xf32>
    %5 = arith.addf %2, %4 : vector<440x128xf32>
    %cst_5 = arith.constant 0.000000e+00 : f32
    %6 = vector.broadcast %cst_5 : f32 to vector<440x128xf32>
    %7 = arith.maximumf %5, %6 : vector<440x128xf32>
    %8 = arith.truncf %7 : vector<440x128xf32> to vector<440x128xbf16>
    %c0_6 = arith.constant 0 : index
    %c0_7 = arith.constant 0 : index
    %9 = vector.load %arg4[%c0_6, %c0_7] : memref<440x128xbf16, #tpu.memory_space<vmem>>, vector<440x128xbf16>
    tpu.vector_store %arg4[%c0_6, %c0_7], %8 {strides = array<i32>} : memref<440x128xbf16, #tpu.memory_space<vmem>>, vector<440x128xbf16>,
    return
  }
  func.func @transform_0(%arg0: i32) -> (i32, i32) {
    %c0_i32 = arith.constant 0 : i32
    %c0_i32_0 = arith.constant 0 : i32
    return %arg0, %c0_i32 : i32, i32
  }
  func.func @transform_1(%arg0: i32) -> (i32, i32) {
    %c0_i32 = arith.constant 0 : i32
    %c0_i32_0 = arith.constant 0 : i32
    %c0_i32_1 = arith.constant 0 : i32
    return %c0_i32, %c0_i32_0 : i32, i32
  }
  func.func @transform_2(%arg0: i32) -> (i32, i32) {
    %c0_i32 = arith.constant 0 : i32
    %c0_i32_0 = arith.constant 0 : i32
    %c0_i32_1 = arith.constant 0 : i32
    return %c0_i32, %c0_i32_0 : i32, i32
  }
  func.func @transform_3(%arg0: i32) -> (i32, i32) {
    %c0_i32 = arith.constant 0 : i32
    %c0_i32_0 = arith.constant 0 : i32
    return %arg0, %c0_i32 : i32, i32
  }
}

module attributes {stable_mosaic.version = 11 : i64} {
  func.func @kernel(%arg0: i32, %arg1: memref<440x128xbf16, #tpu.memory_space<vmem>>, %arg2: memref<128x128xbf16, #tpu.memory_space<vmem>>, %arg3: memref<1x128xf32, #tpu.memory_space<vmem>>, %arg4: memref<440x128xbf16, #tpu.memory_space<vmem>>, %arg5: memref<128x128xbf16, #tpu.memory_space<vmem>>, %arg6: memref<1x128xf32, #tpu.memory_space<vmem>>, %arg7: memref<440x128xbf16, #tpu.memory_space<vmem>>) attributes {dimension_semantics = [#tpu.dimension_semantics<parallel>], iteration_bounds = array<i64: 5>, scalar_prefetch = 0 : i64, scratch_operands = 0 : i64, tpu.core_type = #tpu.core_type<tc>, window_params = [{transform_indices = @transform_0, window_bounds = array<i64: 440, 128>}, {pipeline_mode = #tpu.pipeline_mode<synchronous>, transform_indices = @transform_1, window_bounds = array<i64: 128, 128>}, {pipeline_mode = #tpu.pipeline_mode<synchronous>, transform_indices = @transform_2, window_bounds = array<i64: 1, 128>}, {transform_indices = @transform_3, window_bounds = array<i64: 440, 128>}, {pipeline_mode = #tpu.pipeline_mode<synchronous>, transform_indices = @transform_4, window_bounds = array<i64: 128, 128>}, {pipeline_mode = #tpu.pipeline_mode<synchronous>, transform_indices = @transform_5, window_bounds = array<i64: 1, 128>}, {transform_indices = @transform_6, window_bounds = array<i64: 440, 128>}]} {
    %c0 = arith.constant 0 : index
    %c0_0 = arith.constant 0 : index
    %0 = vector.load %arg1[%c0, %c0_0] : memref<440x128xbf16, #tpu.memory_space<vmem>>, vector<440x128xbf16>
    %c0_1 = arith.constant 0 : index
    %c0_2 = arith.constant 0 : index
    %1 = vector.load %arg2[%c0_1, %c0_2] : memref<128x128xbf16, #tpu.memory_space<vmem>>, vector<128x128xbf16>
    %cst = arith.constant dense<0.000000e+00> : vector<440x128xf32>
    %2 = tpu.matmul %0, %1, %cst {dimension_numbers = #tpu.dot_dimension_numbers<[1], [0], [0], [1], [0, 0, 1, 1], [], []>} : vector<440x128xbf16>, vector<128x128xbf16>, vector<440x128xf32> -> vector<440x128xf32>
    %c0_3 = arith.constant 0 : index
    %c0_4 = arith.constant 0 : index
    %3 = vector.load %arg3[%c0_3, %c0_4] : memref<1x128xf32, #tpu.memory_space<vmem>>, vector<1x128xf32>
    %4 = vector.broadcast %3 : vector<1x128xf32> to vector<440x128xf32>
    %5 = arith.addf %2, %4 : vector<440x128xf32>
    %c0_5 = arith.constant 0 : index
    %c0_6 = arith.constant 0 : index
    %6 = vector.load %arg4[%c0_5, %c0_6] : memref<440x128xbf16, #tpu.memory_space<vmem>>, vector<440x128xbf16>
    %c0_7 = arith.constant 0 : index
    %c0_8 = arith.constant 0 : index
    %7 = vector.load %arg5[%c0_7, %c0_8] : memref<128x128xbf16, #tpu.memory_space<vmem>>, vector<128x128xbf16>
    %cst_9 = arith.constant dense<0.000000e+00> : vector<440x128xf32>
    %8 = tpu.matmul %6, %7, %cst_9 {dimension_numbers = #tpu.dot_dimension_numbers<[1], [0], [0], [1], [0, 0, 1, 1], [], []>} : vector<440x128xbf16>, vector<128x128xbf16>, vector<440x128xf32> -> vector<440x128xf32>
    %9 = arith.addf %5, %8 : vector<440x128xf32>
    %c0_10 = arith.constant 0 : index
    %c0_11 = arith.constant 0 : index
    %10 = vector.load %arg6[%c0_10, %c0_11] : memref<1x128xf32, #tpu.memory_space<vmem>>, vector<1x128xf32>
    %11 = vector.broadcast %10 : vector<1x128xf32> to vector<440x128xf32>
    %12 = arith.addf %9, %11 : vector<440x128xf32>
    %cst_12 = arith.constant 0.000000e+00 : f32
    %13 = vector.broadcast %cst_12 : f32 to vector<440x128xf32>
    %14 = arith.maximumf %12, %13 : vector<440x128xf32>
    %15 = arith.truncf %14 : vector<440x128xf32> to vector<440x128xbf16>
    %c0_13 = arith.constant 0 : index
    %c0_14 = arith.constant 0 : index
    %16 = vector.load %arg7[%c0_13, %c0_14] : memref<440x128xbf16, #tpu.memory_space<vmem>>, vector<440x128xbf16>
    tpu.vector_store %arg7[%c0_13, %c0_14], %15 {strides = array<i32>} : memref<440x128xbf16, #tpu.memory_space<vmem>>, vector<440x128xbf16>,
    return
  }
  func.func @transform_0(%arg0: i32) -> (i32, i32) {
    %c0_i32 = arith.constant 0 : i32
    %c0_i32_0 = arith.constant 0 : i32
    return %arg0, %c0_i32 : i32, i32
  }
  func.func @transform_1(%arg0: i32) -> (i32, i32) {
    %c0_i32 = arith.constant 0 : i32
    %c0_i32_0 = arith.constant 0 : i32
    %c0_i32_1 = arith.constant 0 : i32
    return %c0_i32, %c0_i32_0 : i32, i32
  }
  func.func @transform_2(%arg0: i32) -> (i32, i32) {
    %c0_i32 = arith.constant 0 : i32
    %c0_i32_0 = arith.constant 0 : i32
    %c0_i32_1 = arith.constant 0 : i32
    return %c0_i32, %c0_i32_0 : i32, i32
  }
  func.func @transform_3(%arg0: i32) -> (i32, i32) {
    %c0_i32 = arith.constant 0 : i32
    %c0_i32_0 = arith.constant 0 : i32
    return %arg0, %c0_i32 : i32, i32
  }
  func.func @transform_4(%arg0: i32) -> (i32, i32) {
    %c0_i32 = arith.constant 0 : i32
    %c0_i32_0 = arith.constant 0 : i32
    %c0_i32_1 = arith.constant 0 : i32
    return %c0_i32, %c0_i32_0 : i32, i32
  }
  func.func @transform_5(%arg0: i32) -> (i32, i32) {
    %c0_i32 = arith.constant 0 : i32
    %c0_i32_0 = arith.constant 0 : i32
    %c0_i32_1 = arith.constant 0 : i32
    return %c0_i32, %c0_i32_0 : i32, i32
  }
  func.func @transform_6(%arg0: i32) -> (i32, i32) {
    %c0_i32 = arith.constant 0 : i32
    %c0_i32_0 = arith.constant 0 : i32
    return %arg0, %c0_i32 : i32, i32
  }
}

module attributes {stable_mosaic.version = 11 : i64} {
  func.func @kernel(%arg0: i32, %arg1: memref<440x128xbf16, #tpu.memory_space<vmem>>, %arg2: memref<128x128xbf16, #tpu.memory_space<vmem>>, %arg3: memref<1x128xf32, #tpu.memory_space<vmem>>, %arg4: memref<440x128xbf16, #tpu.memory_space<vmem>>, %arg5: memref<440x128xbf16, #tpu.memory_space<vmem>>) attributes {dimension_semantics = [#tpu.dimension_semantics<parallel>], iteration_bounds = array<i64: 5>, scalar_prefetch = 0 : i64, scratch_operands = 0 : i64, tpu.core_type = #tpu.core_type<tc>, window_params = [{transform_indices = @transform_0, window_bounds = array<i64: 440, 128>}, {pipeline_mode = #tpu.pipeline_mode<synchronous>, transform_indices = @transform_1, window_bounds = array<i64: 128, 128>}, {pipeline_mode = #tpu.pipeline_mode<synchronous>, transform_indices = @transform_2, window_bounds = array<i64: 1, 128>}, {transform_indices = @transform_3, window_bounds = array<i64: 440, 128>}, {transform_indices = @transform_4, window_bounds = array<i64: 440, 128>}]} {
    %c0 = arith.constant 0 : index
    %c0_0 = arith.constant 0 : index
    %0 = vector.load %arg1[%c0, %c0_0] : memref<440x128xbf16, #tpu.memory_space<vmem>>, vector<440x128xbf16>
    %c0_1 = arith.constant 0 : index
    %c0_2 = arith.constant 0 : index
    %1 = vector.load %arg2[%c0_1, %c0_2] : memref<128x128xbf16, #tpu.memory_space<vmem>>, vector<128x128xbf16>
    %cst = arith.constant dense<0.000000e+00> : vector<440x128xf32>
    %2 = tpu.matmul %0, %1, %cst {dimension_numbers = #tpu.dot_dimension_numbers<[1], [0], [0], [1], [0, 0, 1, 1], [], []>} : vector<440x128xbf16>, vector<128x128xbf16>, vector<440x128xf32> -> vector<440x128xf32>
    %c0_3 = arith.constant 0 : index
    %c0_4 = arith.constant 0 : index
    %3 = vector.load %arg3[%c0_3, %c0_4] : memref<1x128xf32, #tpu.memory_space<vmem>>, vector<1x128xf32>
    %4 = vector.broadcast %3 : vector<1x128xf32> to vector<440x128xf32>
    %5 = arith.addf %2, %4 : vector<440x128xf32>
    %c0_5 = arith.constant 0 : index
    %c0_6 = arith.constant 0 : index
    %6 = vector.load %arg4[%c0_5, %c0_6] : memref<440x128xbf16, #tpu.memory_space<vmem>>, vector<440x128xbf16>
    %7 = arith.extf %6 : vector<440x128xbf16> to vector<440x128xf32>
    %8 = arith.addf %5, %7 : vector<440x128xf32>
    %cst_7 = arith.constant 0.000000e+00 : f32
    %9 = vector.broadcast %cst_7 : f32 to vector<440x128xf32>
    %10 = arith.maximumf %8, %9 : vector<440x128xf32>
    %11 = arith.truncf %10 : vector<440x128xf32> to vector<440x128xbf16>
    %c0_8 = arith.constant 0 : index
    %c0_9 = arith.constant 0 : index
    %12 = vector.load %arg5[%c0_8, %c0_9] : memref<440x128xbf16, #tpu.memory_space<vmem>>, vector<440x128xbf16>
    tpu.vector_store %arg5[%c0_8, %c0_9], %11 {strides = array<i32>} : memref<440x128xbf16, #tpu.memory_space<vmem>>, vector<440x128xbf16>,
    return
  }
  func.func @transform_0(%arg0: i32) -> (i32, i32) {
    %c0_i32 = arith.constant 0 : i32
    %c0_i32_0 = arith.constant 0 : i32
    return %arg0, %c0_i32 : i32, i32
  }
  func.func @transform_1(%arg0: i32) -> (i32, i32) {
    %c0_i32 = arith.constant 0 : i32
    %c0_i32_0 = arith.constant 0 : i32
    %c0_i32_1 = arith.constant 0 : i32
    return %c0_i32, %c0_i32_0 : i32, i32
  }
  func.func @transform_2(%arg0: i32) -> (i32, i32) {
    %c0_i32 = arith.constant 0 : i32
    %c0_i32_0 = arith.constant 0 : i32
    %c0_i32_1 = arith.constant 0 : i32
    return %c0_i32, %c0_i32_0 : i32, i32
  }
  func.func @transform_3(%arg0: i32) -> (i32, i32) {
    %c0_i32 = arith.constant 0 : i32
    %c0_i32_0 = arith.constant 0 : i32
    return %arg0, %c0_i32 : i32, i32
  }
  func.func @transform_4(%arg0: i32) -> (i32, i32) {
    %c0_i32 = arith.constant 0 : i32
    %c0_i32_0 = arith.constant 0 : i32
    return %arg0, %c0_i32 : i32, i32
  }
}

module attributes {stable_mosaic.version = 11 : i64} {
  func.func @kernel(%arg0: i32, %arg1: memref<296x36xbf16, #tpu.memory_space<vmem>>, %arg2: memref<36x128xbf16, #tpu.memory_space<vmem>>, %arg3: memref<1x128xf32, #tpu.memory_space<vmem>>, %arg4: memref<296x128xbf16, #tpu.memory_space<vmem>>) attributes {dimension_semantics = [#tpu.dimension_semantics<parallel>], iteration_bounds = array<i64: 2>, scalar_prefetch = 0 : i64, scratch_operands = 0 : i64, tpu.core_type = #tpu.core_type<tc>, window_params = [{transform_indices = @transform_0, window_bounds = array<i64: 296, 36>}, {pipeline_mode = #tpu.pipeline_mode<synchronous>, transform_indices = @transform_1, window_bounds = array<i64: 36, 128>}, {pipeline_mode = #tpu.pipeline_mode<synchronous>, transform_indices = @transform_2, window_bounds = array<i64: 1, 128>}, {transform_indices = @transform_3, window_bounds = array<i64: 296, 128>}]} {
    %c0 = arith.constant 0 : index
    %c0_0 = arith.constant 0 : index
    %0 = vector.load %arg1[%c0, %c0_0] : memref<296x36xbf16, #tpu.memory_space<vmem>>, vector<296x36xbf16>
    %c0_1 = arith.constant 0 : index
    %c0_2 = arith.constant 0 : index
    %1 = vector.load %arg2[%c0_1, %c0_2] : memref<36x128xbf16, #tpu.memory_space<vmem>>, vector<36x128xbf16>
    %cst = arith.constant dense<0.000000e+00> : vector<296x128xf32>
    %2 = tpu.matmul %0, %1, %cst {dimension_numbers = #tpu.dot_dimension_numbers<[1], [0], [0], [1], [0, 0, 1, 1], [], []>} : vector<296x36xbf16>, vector<36x128xbf16>, vector<296x128xf32> -> vector<296x128xf32>
    %c0_3 = arith.constant 0 : index
    %c0_4 = arith.constant 0 : index
    %3 = vector.load %arg3[%c0_3, %c0_4] : memref<1x128xf32, #tpu.memory_space<vmem>>, vector<1x128xf32>
    %4 = vector.broadcast %3 : vector<1x128xf32> to vector<296x128xf32>
    %5 = arith.addf %2, %4 : vector<296x128xf32>
    %cst_5 = arith.constant 0.000000e+00 : f32
    %6 = vector.broadcast %cst_5 : f32 to vector<296x128xf32>
    %7 = arith.maximumf %5, %6 : vector<296x128xf32>
    %8 = arith.truncf %7 : vector<296x128xf32> to vector<296x128xbf16>
    %c0_6 = arith.constant 0 : index
    %c0_7 = arith.constant 0 : index
    %9 = vector.load %arg4[%c0_6, %c0_7] : memref<296x128xbf16, #tpu.memory_space<vmem>>, vector<296x128xbf16>
    tpu.vector_store %arg4[%c0_6, %c0_7], %8 {strides = array<i32>} : memref<296x128xbf16, #tpu.memory_space<vmem>>, vector<296x128xbf16>,
    return
  }
  func.func @transform_0(%arg0: i32) -> (i32, i32) {
    %c0_i32 = arith.constant 0 : i32
    %c0_i32_0 = arith.constant 0 : i32
    return %arg0, %c0_i32 : i32, i32
  }
  func.func @transform_1(%arg0: i32) -> (i32, i32) {
    %c0_i32 = arith.constant 0 : i32
    %c0_i32_0 = arith.constant 0 : i32
    %c0_i32_1 = arith.constant 0 : i32
    return %c0_i32, %c0_i32_0 : i32, i32
  }
  func.func @transform_2(%arg0: i32) -> (i32, i32) {
    %c0_i32 = arith.constant 0 : i32
    %c0_i32_0 = arith.constant 0 : i32
    %c0_i32_1 = arith.constant 0 : i32
    return %c0_i32, %c0_i32_0 : i32, i32
  }
  func.func @transform_3(%arg0: i32) -> (i32, i32) {
    %c0_i32 = arith.constant 0 : i32
    %c0_i32_0 = arith.constant 0 : i32
    return %arg0, %c0_i32 : i32, i32
  }
}

module attributes {stable_mosaic.version = 11 : i64} {
  func.func @kernel(%arg0: i32, %arg1: memref<296x128xbf16, #tpu.memory_space<vmem>>, %arg2: memref<128x128xbf16, #tpu.memory_space<vmem>>, %arg3: memref<1x128xf32, #tpu.memory_space<vmem>>, %arg4: memref<296x128xbf16, #tpu.memory_space<vmem>>, %arg5: memref<128x128xbf16, #tpu.memory_space<vmem>>, %arg6: memref<1x128xf32, #tpu.memory_space<vmem>>, %arg7: memref<296x128xbf16, #tpu.memory_space<vmem>>) attributes {dimension_semantics = [#tpu.dimension_semantics<parallel>], iteration_bounds = array<i64: 2>, scalar_prefetch = 0 : i64, scratch_operands = 0 : i64, tpu.core_type = #tpu.core_type<tc>, window_params = [{transform_indices = @transform_0, window_bounds = array<i64: 296, 128>}, {pipeline_mode = #tpu.pipeline_mode<synchronous>, transform_indices = @transform_1, window_bounds = array<i64: 128, 128>}, {pipeline_mode = #tpu.pipeline_mode<synchronous>, transform_indices = @transform_2, window_bounds = array<i64: 1, 128>}, {transform_indices = @transform_3, window_bounds = array<i64: 296, 128>}, {pipeline_mode = #tpu.pipeline_mode<synchronous>, transform_indices = @transform_4, window_bounds = array<i64: 128, 128>}, {pipeline_mode = #tpu.pipeline_mode<synchronous>, transform_indices = @transform_5, window_bounds = array<i64: 1, 128>}, {transform_indices = @transform_6, window_bounds = array<i64: 296, 128>}]} {
    %c0 = arith.constant 0 : index
    %c0_0 = arith.constant 0 : index
    %0 = vector.load %arg1[%c0, %c0_0] : memref<296x128xbf16, #tpu.memory_space<vmem>>, vector<296x128xbf16>
    %c0_1 = arith.constant 0 : index
    %c0_2 = arith.constant 0 : index
    %1 = vector.load %arg2[%c0_1, %c0_2] : memref<128x128xbf16, #tpu.memory_space<vmem>>, vector<128x128xbf16>
    %cst = arith.constant dense<0.000000e+00> : vector<296x128xf32>
    %2 = tpu.matmul %0, %1, %cst {dimension_numbers = #tpu.dot_dimension_numbers<[1], [0], [0], [1], [0, 0, 1, 1], [], []>} : vector<296x128xbf16>, vector<128x128xbf16>, vector<296x128xf32> -> vector<296x128xf32>
    %c0_3 = arith.constant 0 : index
    %c0_4 = arith.constant 0 : index
    %3 = vector.load %arg3[%c0_3, %c0_4] : memref<1x128xf32, #tpu.memory_space<vmem>>, vector<1x128xf32>
    %4 = vector.broadcast %3 : vector<1x128xf32> to vector<296x128xf32>
    %5 = arith.addf %2, %4 : vector<296x128xf32>
    %c0_5 = arith.constant 0 : index
    %c0_6 = arith.constant 0 : index
    %6 = vector.load %arg4[%c0_5, %c0_6] : memref<296x128xbf16, #tpu.memory_space<vmem>>, vector<296x128xbf16>
    %c0_7 = arith.constant 0 : index
    %c0_8 = arith.constant 0 : index
    %7 = vector.load %arg5[%c0_7, %c0_8] : memref<128x128xbf16, #tpu.memory_space<vmem>>, vector<128x128xbf16>
    %cst_9 = arith.constant dense<0.000000e+00> : vector<296x128xf32>
    %8 = tpu.matmul %6, %7, %cst_9 {dimension_numbers = #tpu.dot_dimension_numbers<[1], [0], [0], [1], [0, 0, 1, 1], [], []>} : vector<296x128xbf16>, vector<128x128xbf16>, vector<296x128xf32> -> vector<296x128xf32>
    %9 = arith.addf %5, %8 : vector<296x128xf32>
    %c0_10 = arith.constant 0 : index
    %c0_11 = arith.constant 0 : index
    %10 = vector.load %arg6[%c0_10, %c0_11] : memref<1x128xf32, #tpu.memory_space<vmem>>, vector<1x128xf32>
    %11 = vector.broadcast %10 : vector<1x128xf32> to vector<296x128xf32>
    %12 = arith.addf %9, %11 : vector<296x128xf32>
    %cst_12 = arith.constant 0.000000e+00 : f32
    %13 = vector.broadcast %cst_12 : f32 to vector<296x128xf32>
    %14 = arith.maximumf %12, %13 : vector<296x128xf32>
    %15 = arith.truncf %14 : vector<296x128xf32> to vector<296x128xbf16>
    %c0_13 = arith.constant 0 : index
    %c0_14 = arith.constant 0 : index
    %16 = vector.load %arg7[%c0_13, %c0_14] : memref<296x128xbf16, #tpu.memory_space<vmem>>, vector<296x128xbf16>
    tpu.vector_store %arg7[%c0_13, %c0_14], %15 {strides = array<i32>} : memref<296x128xbf16, #tpu.memory_space<vmem>>, vector<296x128xbf16>,
    return
  }
  func.func @transform_0(%arg0: i32) -> (i32, i32) {
    %c0_i32 = arith.constant 0 : i32
    %c0_i32_0 = arith.constant 0 : i32
    return %arg0, %c0_i32 : i32, i32
  }
  func.func @transform_1(%arg0: i32) -> (i32, i32) {
    %c0_i32 = arith.constant 0 : i32
    %c0_i32_0 = arith.constant 0 : i32
    %c0_i32_1 = arith.constant 0 : i32
    return %c0_i32, %c0_i32_0 : i32, i32
  }
  func.func @transform_2(%arg0: i32) -> (i32, i32) {
    %c0_i32 = arith.constant 0 : i32
    %c0_i32_0 = arith.constant 0 : i32
    %c0_i32_1 = arith.constant 0 : i32
    return %c0_i32, %c0_i32_0 : i32, i32
  }
  func.func @transform_3(%arg0: i32) -> (i32, i32) {
    %c0_i32 = arith.constant 0 : i32
    %c0_i32_0 = arith.constant 0 : i32
    return %arg0, %c0_i32 : i32, i32
  }
  func.func @transform_4(%arg0: i32) -> (i32, i32) {
    %c0_i32 = arith.constant 0 : i32
    %c0_i32_0 = arith.constant 0 : i32
    %c0_i32_1 = arith.constant 0 : i32
    return %c0_i32, %c0_i32_0 : i32, i32
  }
  func.func @transform_5(%arg0: i32) -> (i32, i32) {
    %c0_i32 = arith.constant 0 : i32
    %c0_i32_0 = arith.constant 0 : i32
    %c0_i32_1 = arith.constant 0 : i32
    return %c0_i32, %c0_i32_0 : i32, i32
  }
  func.func @transform_6(%arg0: i32) -> (i32, i32) {
    %c0_i32 = arith.constant 0 : i32
    %c0_i32_0 = arith.constant 0 : i32
    return %arg0, %c0_i32 : i32, i32
  }
}

module attributes {stable_mosaic.version = 11 : i64} {
  func.func @kernel(%arg0: i32, %arg1: memref<296x128xbf16, #tpu.memory_space<vmem>>, %arg2: memref<128x128xbf16, #tpu.memory_space<vmem>>, %arg3: memref<1x128xf32, #tpu.memory_space<vmem>>, %arg4: memref<296x128xbf16, #tpu.memory_space<vmem>>) attributes {dimension_semantics = [#tpu.dimension_semantics<parallel>], iteration_bounds = array<i64: 2>, scalar_prefetch = 0 : i64, scratch_operands = 0 : i64, tpu.core_type = #tpu.core_type<tc>, window_params = [{transform_indices = @transform_0, window_bounds = array<i64: 296, 128>}, {pipeline_mode = #tpu.pipeline_mode<synchronous>, transform_indices = @transform_1, window_bounds = array<i64: 128, 128>}, {pipeline_mode = #tpu.pipeline_mode<synchronous>, transform_indices = @transform_2, window_bounds = array<i64: 1, 128>}, {transform_indices = @transform_3, window_bounds = array<i64: 296, 128>}]} {
    %c0 = arith.constant 0 : index
    %c0_0 = arith.constant 0 : index
    %0 = vector.load %arg1[%c0, %c0_0] : memref<296x128xbf16, #tpu.memory_space<vmem>>, vector<296x128xbf16>
    %c0_1 = arith.constant 0 : index
    %c0_2 = arith.constant 0 : index
    %1 = vector.load %arg2[%c0_1, %c0_2] : memref<128x128xbf16, #tpu.memory_space<vmem>>, vector<128x128xbf16>
    %cst = arith.constant dense<0.000000e+00> : vector<296x128xf32>
    %2 = tpu.matmul %0, %1, %cst {dimension_numbers = #tpu.dot_dimension_numbers<[1], [0], [0], [1], [0, 0, 1, 1], [], []>} : vector<296x128xbf16>, vector<128x128xbf16>, vector<296x128xf32> -> vector<296x128xf32>
    %c0_3 = arith.constant 0 : index
    %c0_4 = arith.constant 0 : index
    %3 = vector.load %arg3[%c0_3, %c0_4] : memref<1x128xf32, #tpu.memory_space<vmem>>, vector<1x128xf32>
    %4 = vector.broadcast %3 : vector<1x128xf32> to vector<296x128xf32>
    %5 = arith.addf %2, %4 : vector<296x128xf32>
    %cst_5 = arith.constant 0.000000e+00 : f32
    %6 = vector.broadcast %cst_5 : f32 to vector<296x128xf32>
    %7 = arith.maximumf %5, %6 : vector<296x128xf32>
    %8 = arith.truncf %7 : vector<296x128xf32> to vector<296x128xbf16>
    %c0_6 = arith.constant 0 : index
    %c0_7 = arith.constant 0 : index
    %9 = vector.load %arg4[%c0_6, %c0_7] : memref<296x128xbf16, #tpu.memory_space<vmem>>, vector<296x128xbf16>
    tpu.vector_store %arg4[%c0_6, %c0_7], %8 {strides = array<i32>} : memref<296x128xbf16, #tpu.memory_space<vmem>>, vector<296x128xbf16>,
    return
  }
  func.func @transform_0(%arg0: i32) -> (i32, i32) {
    %c0_i32 = arith.constant 0 : i32
    %c0_i32_0 = arith.constant 0 : i32
    return %arg0, %c0_i32 : i32, i32
  }
  func.func @transform_1(%arg0: i32) -> (i32, i32) {
    %c0_i32 = arith.constant 0 : i32
    %c0_i32_0 = arith.constant 0 : i32
    %c0_i32_1 = arith.constant 0 : i32
    return %c0_i32, %c0_i32_0 : i32, i32
  }
  func.func @transform_2(%arg0: i32) -> (i32, i32) {
    %c0_i32 = arith.constant 0 : i32
    %c0_i32_0 = arith.constant 0 : i32
    %c0_i32_1 = arith.constant 0 : i32
    return %c0_i32, %c0_i32_0 : i32, i32
  }
  func.func @transform_3(%arg0: i32) -> (i32, i32) {
    %c0_i32 = arith.constant 0 : i32
    %c0_i32_0 = arith.constant 0 : i32
    return %arg0, %c0_i32 : i32, i32
  }
}

module attributes {stable_mosaic.version = 11 : i64} {
  func.func @kernel(%arg0: i32, %arg1: memref<162x72xbf16, #tpu.memory_space<vmem>>, %arg2: memref<72x128xbf16, #tpu.memory_space<vmem>>, %arg3: memref<1x128xf32, #tpu.memory_space<vmem>>, %arg4: memref<162x128xbf16, #tpu.memory_space<vmem>>) attributes {dimension_semantics = [#tpu.dimension_semantics<parallel>], iteration_bounds = array<i64: 1>, scalar_prefetch = 0 : i64, scratch_operands = 0 : i64, tpu.core_type = #tpu.core_type<tc>, window_params = [{transform_indices = @transform_0, window_bounds = array<i64: 162, 72>}, {pipeline_mode = #tpu.pipeline_mode<synchronous>, transform_indices = @transform_1, window_bounds = array<i64: 72, 128>}, {pipeline_mode = #tpu.pipeline_mode<synchronous>, transform_indices = @transform_2, window_bounds = array<i64: 1, 128>}, {transform_indices = @transform_3, window_bounds = array<i64: 162, 128>}]} {
    %c0 = arith.constant 0 : index
    %c0_0 = arith.constant 0 : index
    %0 = vector.load %arg1[%c0, %c0_0] : memref<162x72xbf16, #tpu.memory_space<vmem>>, vector<162x72xbf16>
    %c0_1 = arith.constant 0 : index
    %c0_2 = arith.constant 0 : index
    %1 = vector.load %arg2[%c0_1, %c0_2] : memref<72x128xbf16, #tpu.memory_space<vmem>>, vector<72x128xbf16>
    %cst = arith.constant dense<0.000000e+00> : vector<162x128xf32>
    %2 = tpu.matmul %0, %1, %cst {dimension_numbers = #tpu.dot_dimension_numbers<[1], [0], [0], [1], [0, 0, 1, 1], [], []>} : vector<162x72xbf16>, vector<72x128xbf16>, vector<162x128xf32> -> vector<162x128xf32>
    %c0_3 = arith.constant 0 : index
    %c0_4 = arith.constant 0 : index
    %3 = vector.load %arg3[%c0_3, %c0_4] : memref<1x128xf32, #tpu.memory_space<vmem>>, vector<1x128xf32>
    %4 = vector.broadcast %3 : vector<1x128xf32> to vector<162x128xf32>
    %5 = arith.addf %2, %4 : vector<162x128xf32>
    %cst_5 = arith.constant 0.000000e+00 : f32
    %6 = vector.broadcast %cst_5 : f32 to vector<162x128xf32>
    %7 = arith.maximumf %5, %6 : vector<162x128xf32>
    %8 = arith.truncf %7 : vector<162x128xf32> to vector<162x128xbf16>
    %c0_6 = arith.constant 0 : index
    %c0_7 = arith.constant 0 : index
    %9 = vector.load %arg4[%c0_6, %c0_7] : memref<162x128xbf16, #tpu.memory_space<vmem>>, vector<162x128xbf16>
    tpu.vector_store %arg4[%c0_6, %c0_7], %8 {strides = array<i32>} : memref<162x128xbf16, #tpu.memory_space<vmem>>, vector<162x128xbf16>,
    return
  }
  func.func @transform_0(%arg0: i32) -> (i32, i32) {
    %c0_i32 = arith.constant 0 : i32
    %c0_i32_0 = arith.constant 0 : i32
    return %arg0, %c0_i32 : i32, i32
  }
  func.func @transform_1(%arg0: i32) -> (i32, i32) {
    %c0_i32 = arith.constant 0 : i32
    %c0_i32_0 = arith.constant 0 : i32
    %c0_i32_1 = arith.constant 0 : i32
    return %c0_i32, %c0_i32_0 : i32, i32
  }
  func.func @transform_2(%arg0: i32) -> (i32, i32) {
    %c0_i32 = arith.constant 0 : i32
    %c0_i32_0 = arith.constant 0 : i32
    %c0_i32_1 = arith.constant 0 : i32
    return %c0_i32, %c0_i32_0 : i32, i32
  }
  func.func @transform_3(%arg0: i32) -> (i32, i32) {
    %c0_i32 = arith.constant 0 : i32
    %c0_i32_0 = arith.constant 0 : i32
    return %arg0, %c0_i32 : i32, i32
  }
}

module attributes {stable_mosaic.version = 11 : i64} {
  func.func @kernel(%arg0: i32, %arg1: memref<162x128xbf16, #tpu.memory_space<vmem>>, %arg2: memref<128x128xbf16, #tpu.memory_space<vmem>>, %arg3: memref<1x128xf32, #tpu.memory_space<vmem>>, %arg4: memref<162x128xbf16, #tpu.memory_space<vmem>>, %arg5: memref<128x128xbf16, #tpu.memory_space<vmem>>, %arg6: memref<1x128xf32, #tpu.memory_space<vmem>>, %arg7: memref<162x128xbf16, #tpu.memory_space<vmem>>) attributes {dimension_semantics = [#tpu.dimension_semantics<parallel>], iteration_bounds = array<i64: 1>, scalar_prefetch = 0 : i64, scratch_operands = 0 : i64, tpu.core_type = #tpu.core_type<tc>, window_params = [{transform_indices = @transform_0, window_bounds = array<i64: 162, 128>}, {pipeline_mode = #tpu.pipeline_mode<synchronous>, transform_indices = @transform_1, window_bounds = array<i64: 128, 128>}, {pipeline_mode = #tpu.pipeline_mode<synchronous>, transform_indices = @transform_2, window_bounds = array<i64: 1, 128>}, {transform_indices = @transform_3, window_bounds = array<i64: 162, 128>}, {pipeline_mode = #tpu.pipeline_mode<synchronous>, transform_indices = @transform_4, window_bounds = array<i64: 128, 128>}, {pipeline_mode = #tpu.pipeline_mode<synchronous>, transform_indices = @transform_5, window_bounds = array<i64: 1, 128>}, {transform_indices = @transform_6, window_bounds = array<i64: 162, 128>}]} {
    %c0 = arith.constant 0 : index
    %c0_0 = arith.constant 0 : index
    %0 = vector.load %arg1[%c0, %c0_0] : memref<162x128xbf16, #tpu.memory_space<vmem>>, vector<162x128xbf16>
    %c0_1 = arith.constant 0 : index
    %c0_2 = arith.constant 0 : index
    %1 = vector.load %arg2[%c0_1, %c0_2] : memref<128x128xbf16, #tpu.memory_space<vmem>>, vector<128x128xbf16>
    %cst = arith.constant dense<0.000000e+00> : vector<162x128xf32>
    %2 = tpu.matmul %0, %1, %cst {dimension_numbers = #tpu.dot_dimension_numbers<[1], [0], [0], [1], [0, 0, 1, 1], [], []>} : vector<162x128xbf16>, vector<128x128xbf16>, vector<162x128xf32> -> vector<162x128xf32>
    %c0_3 = arith.constant 0 : index
    %c0_4 = arith.constant 0 : index
    %3 = vector.load %arg3[%c0_3, %c0_4] : memref<1x128xf32, #tpu.memory_space<vmem>>, vector<1x128xf32>
    %4 = vector.broadcast %3 : vector<1x128xf32> to vector<162x128xf32>
    %5 = arith.addf %2, %4 : vector<162x128xf32>
    %c0_5 = arith.constant 0 : index
    %c0_6 = arith.constant 0 : index
    %6 = vector.load %arg4[%c0_5, %c0_6] : memref<162x128xbf16, #tpu.memory_space<vmem>>, vector<162x128xbf16>
    %c0_7 = arith.constant 0 : index
    %c0_8 = arith.constant 0 : index
    %7 = vector.load %arg5[%c0_7, %c0_8] : memref<128x128xbf16, #tpu.memory_space<vmem>>, vector<128x128xbf16>
    %cst_9 = arith.constant dense<0.000000e+00> : vector<162x128xf32>
    %8 = tpu.matmul %6, %7, %cst_9 {dimension_numbers = #tpu.dot_dimension_numbers<[1], [0], [0], [1], [0, 0, 1, 1], [], []>} : vector<162x128xbf16>, vector<128x128xbf16>, vector<162x128xf32> -> vector<162x128xf32>
    %9 = arith.addf %5, %8 : vector<162x128xf32>
    %c0_10 = arith.constant 0 : index
    %c0_11 = arith.constant 0 : index
    %10 = vector.load %arg6[%c0_10, %c0_11] : memref<1x128xf32, #tpu.memory_space<vmem>>, vector<1x128xf32>
    %11 = vector.broadcast %10 : vector<1x128xf32> to vector<162x128xf32>
    %12 = arith.addf %9, %11 : vector<162x128xf32>
    %cst_12 = arith.constant 0.000000e+00 : f32
    %13 = vector.broadcast %cst_12 : f32 to vector<162x128xf32>
    %14 = arith.maximumf %12, %13 : vector<162x128xf32>
    %15 = arith.truncf %14 : vector<162x128xf32> to vector<162x128xbf16>
    %c0_13 = arith.constant 0 : index
    %c0_14 = arith.constant 0 : index
    %16 = vector.load %arg7[%c0_13, %c0_14] : memref<162x128xbf16, #tpu.memory_space<vmem>>, vector<162x128xbf16>
    tpu.vector_store %arg7[%c0_13, %c0_14], %15 {strides = array<i32>} : memref<162x128xbf16, #tpu.memory_space<vmem>>, vector<162x128xbf16>,
    return
  }
  func.func @transform_0(%arg0: i32) -> (i32, i32) {
    %c0_i32 = arith.constant 0 : i32
    %c0_i32_0 = arith.constant 0 : i32
    return %arg0, %c0_i32 : i32, i32
  }
  func.func @transform_1(%arg0: i32) -> (i32, i32) {
    %c0_i32 = arith.constant 0 : i32
    %c0_i32_0 = arith.constant 0 : i32
    %c0_i32_1 = arith.constant 0 : i32
    return %c0_i32, %c0_i32_0 : i32, i32
  }
  func.func @transform_2(%arg0: i32) -> (i32, i32) {
    %c0_i32 = arith.constant 0 : i32
    %c0_i32_0 = arith.constant 0 : i32
    %c0_i32_1 = arith.constant 0 : i32
    return %c0_i32, %c0_i32_0 : i32, i32
  }
  func.func @transform_3(%arg0: i32) -> (i32, i32) {
    %c0_i32 = arith.constant 0 : i32
    %c0_i32_0 = arith.constant 0 : i32
    return %arg0, %c0_i32 : i32, i32
  }
  func.func @transform_4(%arg0: i32) -> (i32, i32) {
    %c0_i32 = arith.constant 0 : i32
    %c0_i32_0 = arith.constant 0 : i32
    %c0_i32_1 = arith.constant 0 : i32
    return %c0_i32, %c0_i32_0 : i32, i32
  }
  func.func @transform_5(%arg0: i32) -> (i32, i32) {
    %c0_i32 = arith.constant 0 : i32
    %c0_i32_0 = arith.constant 0 : i32
    %c0_i32_1 = arith.constant 0 : i32
    return %c0_i32, %c0_i32_0 : i32, i32
  }
  func.func @transform_6(%arg0: i32) -> (i32, i32) {
    %c0_i32 = arith.constant 0 : i32
    %c0_i32_0 = arith.constant 0 : i32
    return %arg0, %c0_i32 : i32, i32
  }
}

module attributes {stable_mosaic.version = 11 : i64} {
  func.func @kernel(%arg0: i32, %arg1: memref<162x128xbf16, #tpu.memory_space<vmem>>, %arg2: memref<128x128xbf16, #tpu.memory_space<vmem>>, %arg3: memref<1x128xf32, #tpu.memory_space<vmem>>, %arg4: memref<162x128xbf16, #tpu.memory_space<vmem>>) attributes {dimension_semantics = [#tpu.dimension_semantics<parallel>], iteration_bounds = array<i64: 1>, scalar_prefetch = 0 : i64, scratch_operands = 0 : i64, tpu.core_type = #tpu.core_type<tc>, window_params = [{transform_indices = @transform_0, window_bounds = array<i64: 162, 128>}, {pipeline_mode = #tpu.pipeline_mode<synchronous>, transform_indices = @transform_1, window_bounds = array<i64: 128, 128>}, {pipeline_mode = #tpu.pipeline_mode<synchronous>, transform_indices = @transform_2, window_bounds = array<i64: 1, 128>}, {transform_indices = @transform_3, window_bounds = array<i64: 162, 128>}]} {
    %c0 = arith.constant 0 : index
    %c0_0 = arith.constant 0 : index
    %0 = vector.load %arg1[%c0, %c0_0] : memref<162x128xbf16, #tpu.memory_space<vmem>>, vector<162x128xbf16>
    %c0_1 = arith.constant 0 : index
    %c0_2 = arith.constant 0 : index
    %1 = vector.load %arg2[%c0_1, %c0_2] : memref<128x128xbf16, #tpu.memory_space<vmem>>, vector<128x128xbf16>
    %cst = arith.constant dense<0.000000e+00> : vector<162x128xf32>
    %2 = tpu.matmul %0, %1, %cst {dimension_numbers = #tpu.dot_dimension_numbers<[1], [0], [0], [1], [0, 0, 1, 1], [], []>} : vector<162x128xbf16>, vector<128x128xbf16>, vector<162x128xf32> -> vector<162x128xf32>
    %c0_3 = arith.constant 0 : index
    %c0_4 = arith.constant 0 : index
    %3 = vector.load %arg3[%c0_3, %c0_4] : memref<1x128xf32, #tpu.memory_space<vmem>>, vector<1x128xf32>
    %4 = vector.broadcast %3 : vector<1x128xf32> to vector<162x128xf32>
    %5 = arith.addf %2, %4 : vector<162x128xf32>
    %cst_5 = arith.constant 0.000000e+00 : f32
    %6 = vector.broadcast %cst_5 : f32 to vector<162x128xf32>
    %7 = arith.maximumf %5, %6 : vector<162x128xf32>
    %8 = arith.truncf %7 : vector<162x128xf32> to vector<162x128xbf16>
    %c0_6 = arith.constant 0 : index
    %c0_7 = arith.constant 0 : index
    %9 = vector.load %arg4[%c0_6, %c0_7] : memref<162x128xbf16, #tpu.memory_space<vmem>>, vector<162x128xbf16>
    tpu.vector_store %arg4[%c0_6, %c0_7], %8 {strides = array<i32>} : memref<162x128xbf16, #tpu.memory_space<vmem>>, vector<162x128xbf16>,
    return
  }
  func.func @transform_0(%arg0: i32) -> (i32, i32) {
    %c0_i32 = arith.constant 0 : i32
    %c0_i32_0 = arith.constant 0 : i32
    return %arg0, %c0_i32 : i32, i32
  }
  func.func @transform_1(%arg0: i32) -> (i32, i32) {
    %c0_i32 = arith.constant 0 : i32
    %c0_i32_0 = arith.constant 0 : i32
    %c0_i32_1 = arith.constant 0 : i32
    return %c0_i32, %c0_i32_0 : i32, i32
  }
  func.func @transform_2(%arg0: i32) -> (i32, i32) {
    %c0_i32 = arith.constant 0 : i32
    %c0_i32_0 = arith.constant 0 : i32
    %c0_i32_1 = arith.constant 0 : i32
    return %c0_i32, %c0_i32_0 : i32, i32
  }
  func.func @transform_3(%arg0: i32) -> (i32, i32) {
    %c0_i32 = arith.constant 0 : i32
    %c0_i32_0 = arith.constant 0 : i32
    return %arg0, %c0_i32 : i32, i32
  }
}

module attributes {stable_mosaic.version = 11 : i64} {
  func.func @kernel(%arg0: i32, %arg1: memref<50x144xbf16, #tpu.memory_space<vmem>>, %arg2: memref<144x128xbf16, #tpu.memory_space<vmem>>, %arg3: memref<1x128xf32, #tpu.memory_space<vmem>>, %arg4: memref<50x128xbf16, #tpu.memory_space<vmem>>) attributes {dimension_semantics = [#tpu.dimension_semantics<parallel>], iteration_bounds = array<i64: 1>, scalar_prefetch = 0 : i64, scratch_operands = 0 : i64, tpu.core_type = #tpu.core_type<tc>, window_params = [{transform_indices = @transform_0, window_bounds = array<i64: 50, 144>}, {pipeline_mode = #tpu.pipeline_mode<synchronous>, transform_indices = @transform_1, window_bounds = array<i64: 144, 128>}, {pipeline_mode = #tpu.pipeline_mode<synchronous>, transform_indices = @transform_2, window_bounds = array<i64: 1, 128>}, {transform_indices = @transform_3, window_bounds = array<i64: 50, 128>}]} {
    %c0 = arith.constant 0 : index
    %c0_0 = arith.constant 0 : index
    %0 = vector.load %arg1[%c0, %c0_0] : memref<50x144xbf16, #tpu.memory_space<vmem>>, vector<50x144xbf16>
    %c0_1 = arith.constant 0 : index
    %c0_2 = arith.constant 0 : index
    %1 = vector.load %arg2[%c0_1, %c0_2] : memref<144x128xbf16, #tpu.memory_space<vmem>>, vector<144x128xbf16>
    %cst = arith.constant dense<0.000000e+00> : vector<50x128xf32>
    %2 = tpu.matmul %0, %1, %cst {dimension_numbers = #tpu.dot_dimension_numbers<[1], [0], [0], [1], [0, 0, 1, 1], [], []>} : vector<50x144xbf16>, vector<144x128xbf16>, vector<50x128xf32> -> vector<50x128xf32>
    %c0_3 = arith.constant 0 : index
    %c0_4 = arith.constant 0 : index
    %3 = vector.load %arg3[%c0_3, %c0_4] : memref<1x128xf32, #tpu.memory_space<vmem>>, vector<1x128xf32>
    %4 = vector.broadcast %3 : vector<1x128xf32> to vector<50x128xf32>
    %5 = arith.addf %2, %4 : vector<50x128xf32>
    %cst_5 = arith.constant 0.000000e+00 : f32
    %6 = vector.broadcast %cst_5 : f32 to vector<50x128xf32>
    %7 = arith.maximumf %5, %6 : vector<50x128xf32>
    %8 = arith.truncf %7 : vector<50x128xf32> to vector<50x128xbf16>
    %c0_6 = arith.constant 0 : index
    %c0_7 = arith.constant 0 : index
    %9 = vector.load %arg4[%c0_6, %c0_7] : memref<50x128xbf16, #tpu.memory_space<vmem>>, vector<50x128xbf16>
    tpu.vector_store %arg4[%c0_6, %c0_7], %8 {strides = array<i32>} : memref<50x128xbf16, #tpu.memory_space<vmem>>, vector<50x128xbf16>,
    return
  }
  func.func @transform_0(%arg0: i32) -> (i32, i32) {
    %c0_i32 = arith.constant 0 : i32
    %c0_i32_0 = arith.constant 0 : i32
    return %arg0, %c0_i32 : i32, i32
  }
  func.func @transform_1(%arg0: i32) -> (i32, i32) {
    %c0_i32 = arith.constant 0 : i32
    %c0_i32_0 = arith.constant 0 : i32
    %c0_i32_1 = arith.constant 0 : i32
    return %c0_i32, %c0_i32_0 : i32, i32
  }
  func.func @transform_2(%arg0: i32) -> (i32, i32) {
    %c0_i32 = arith.constant 0 : i32
    %c0_i32_0 = arith.constant 0 : i32
    %c0_i32_1 = arith.constant 0 : i32
    return %c0_i32, %c0_i32_0 : i32, i32
  }
  func.func @transform_3(%arg0: i32) -> (i32, i32) {
    %c0_i32 = arith.constant 0 : i32
    %c0_i32_0 = arith.constant 0 : i32
    return %arg0, %c0_i32 : i32, i32
  }
}

module attributes {stable_mosaic.version = 11 : i64} {
  func.func @kernel(%arg0: i32, %arg1: memref<50x128xbf16, #tpu.memory_space<vmem>>, %arg2: memref<128x128xbf16, #tpu.memory_space<vmem>>, %arg3: memref<1x128xf32, #tpu.memory_space<vmem>>, %arg4: memref<50x128xbf16, #tpu.memory_space<vmem>>, %arg5: memref<128x128xbf16, #tpu.memory_space<vmem>>, %arg6: memref<1x128xf32, #tpu.memory_space<vmem>>, %arg7: memref<50x128xbf16, #tpu.memory_space<vmem>>) attributes {dimension_semantics = [#tpu.dimension_semantics<parallel>], iteration_bounds = array<i64: 1>, scalar_prefetch = 0 : i64, scratch_operands = 0 : i64, tpu.core_type = #tpu.core_type<tc>, window_params = [{transform_indices = @transform_0, window_bounds = array<i64: 50, 128>}, {pipeline_mode = #tpu.pipeline_mode<synchronous>, transform_indices = @transform_1, window_bounds = array<i64: 128, 128>}, {pipeline_mode = #tpu.pipeline_mode<synchronous>, transform_indices = @transform_2, window_bounds = array<i64: 1, 128>}, {transform_indices = @transform_3, window_bounds = array<i64: 50, 128>}, {pipeline_mode = #tpu.pipeline_mode<synchronous>, transform_indices = @transform_4, window_bounds = array<i64: 128, 128>}, {pipeline_mode = #tpu.pipeline_mode<synchronous>, transform_indices = @transform_5, window_bounds = array<i64: 1, 128>}, {transform_indices = @transform_6, window_bounds = array<i64: 50, 128>}]} {
    %c0 = arith.constant 0 : index
    %c0_0 = arith.constant 0 : index
    %0 = vector.load %arg1[%c0, %c0_0] : memref<50x128xbf16, #tpu.memory_space<vmem>>, vector<50x128xbf16>
    %c0_1 = arith.constant 0 : index
    %c0_2 = arith.constant 0 : index
    %1 = vector.load %arg2[%c0_1, %c0_2] : memref<128x128xbf16, #tpu.memory_space<vmem>>, vector<128x128xbf16>
    %cst = arith.constant dense<0.000000e+00> : vector<50x128xf32>
    %2 = tpu.matmul %0, %1, %cst {dimension_numbers = #tpu.dot_dimension_numbers<[1], [0], [0], [1], [0, 0, 1, 1], [], []>} : vector<50x128xbf16>, vector<128x128xbf16>, vector<50x128xf32> -> vector<50x128xf32>
    %c0_3 = arith.constant 0 : index
    %c0_4 = arith.constant 0 : index
    %3 = vector.load %arg3[%c0_3, %c0_4] : memref<1x128xf32, #tpu.memory_space<vmem>>, vector<1x128xf32>
    %4 = vector.broadcast %3 : vector<1x128xf32> to vector<50x128xf32>
    %5 = arith.addf %2, %4 : vector<50x128xf32>
    %c0_5 = arith.constant 0 : index
    %c0_6 = arith.constant 0 : index
    %6 = vector.load %arg4[%c0_5, %c0_6] : memref<50x128xbf16, #tpu.memory_space<vmem>>, vector<50x128xbf16>
    %c0_7 = arith.constant 0 : index
    %c0_8 = arith.constant 0 : index
    %7 = vector.load %arg5[%c0_7, %c0_8] : memref<128x128xbf16, #tpu.memory_space<vmem>>, vector<128x128xbf16>
    %cst_9 = arith.constant dense<0.000000e+00> : vector<50x128xf32>
    %8 = tpu.matmul %6, %7, %cst_9 {dimension_numbers = #tpu.dot_dimension_numbers<[1], [0], [0], [1], [0, 0, 1, 1], [], []>} : vector<50x128xbf16>, vector<128x128xbf16>, vector<50x128xf32> -> vector<50x128xf32>
    %9 = arith.addf %5, %8 : vector<50x128xf32>
    %c0_10 = arith.constant 0 : index
    %c0_11 = arith.constant 0 : index
    %10 = vector.load %arg6[%c0_10, %c0_11] : memref<1x128xf32, #tpu.memory_space<vmem>>, vector<1x128xf32>
    %11 = vector.broadcast %10 : vector<1x128xf32> to vector<50x128xf32>
    %12 = arith.addf %9, %11 : vector<50x128xf32>
    %cst_12 = arith.constant 0.000000e+00 : f32
    %13 = vector.broadcast %cst_12 : f32 to vector<50x128xf32>
    %14 = arith.maximumf %12, %13 : vector<50x128xf32>
    %15 = arith.truncf %14 : vector<50x128xf32> to vector<50x128xbf16>
    %c0_13 = arith.constant 0 : index
    %c0_14 = arith.constant 0 : index
    %16 = vector.load %arg7[%c0_13, %c0_14] : memref<50x128xbf16, #tpu.memory_space<vmem>>, vector<50x128xbf16>
    tpu.vector_store %arg7[%c0_13, %c0_14], %15 {strides = array<i32>} : memref<50x128xbf16, #tpu.memory_space<vmem>>, vector<50x128xbf16>,
    return
  }
  func.func @transform_0(%arg0: i32) -> (i32, i32) {
    %c0_i32 = arith.constant 0 : i32
    %c0_i32_0 = arith.constant 0 : i32
    return %arg0, %c0_i32 : i32, i32
  }
  func.func @transform_1(%arg0: i32) -> (i32, i32) {
    %c0_i32 = arith.constant 0 : i32
    %c0_i32_0 = arith.constant 0 : i32
    %c0_i32_1 = arith.constant 0 : i32
    return %c0_i32, %c0_i32_0 : i32, i32
  }
  func.func @transform_2(%arg0: i32) -> (i32, i32) {
    %c0_i32 = arith.constant 0 : i32
    %c0_i32_0 = arith.constant 0 : i32
    %c0_i32_1 = arith.constant 0 : i32
    return %c0_i32, %c0_i32_0 : i32, i32
  }
  func.func @transform_3(%arg0: i32) -> (i32, i32) {
    %c0_i32 = arith.constant 0 : i32
    %c0_i32_0 = arith.constant 0 : i32
    return %arg0, %c0_i32 : i32, i32
  }
  func.func @transform_4(%arg0: i32) -> (i32, i32) {
    %c0_i32 = arith.constant 0 : i32
    %c0_i32_0 = arith.constant 0 : i32
    %c0_i32_1 = arith.constant 0 : i32
    return %c0_i32, %c0_i32_0 : i32, i32
  }
  func.func @transform_5(%arg0: i32) -> (i32, i32) {
    %c0_i32 = arith.constant 0 : i32
    %c0_i32_0 = arith.constant 0 : i32
    %c0_i32_1 = arith.constant 0 : i32
    return %c0_i32, %c0_i32_0 : i32, i32
  }
  func.func @transform_6(%arg0: i32) -> (i32, i32) {
    %c0_i32 = arith.constant 0 : i32
    %c0_i32_0 = arith.constant 0 : i32
    return %arg0, %c0_i32 : i32, i32
  }
}

module attributes {stable_mosaic.version = 11 : i64} {
  func.func @kernel(%arg0: i32, %arg1: memref<2x800xbf16, #tpu.memory_space<vmem>>, %arg2: memref<800x128xbf16, #tpu.memory_space<vmem>>, %arg3: memref<1x128xf32, #tpu.memory_space<vmem>>, %arg4: memref<2x128xf32, #tpu.memory_space<vmem>>) attributes {dimension_semantics = [#tpu.dimension_semantics<parallel>], iteration_bounds = array<i64: 1>, scalar_prefetch = 0 : i64, scratch_operands = 0 : i64, tpu.core_type = #tpu.core_type<tc>, window_params = [{transform_indices = @transform_0, window_bounds = array<i64: 2, 800>}, {pipeline_mode = #tpu.pipeline_mode<synchronous>, transform_indices = @transform_1, window_bounds = array<i64: 800, 128>}, {pipeline_mode = #tpu.pipeline_mode<synchronous>, transform_indices = @transform_2, window_bounds = array<i64: 1, 128>}, {transform_indices = @transform_3, window_bounds = array<i64: 2, 128>}]} {
    %c0 = arith.constant 0 : index
    %c0_0 = arith.constant 0 : index
    %0 = vector.load %arg1[%c0, %c0_0] : memref<2x800xbf16, #tpu.memory_space<vmem>>, vector<2x800xbf16>
    %c0_1 = arith.constant 0 : index
    %c0_2 = arith.constant 0 : index
    %1 = vector.load %arg2[%c0_1, %c0_2] : memref<800x128xbf16, #tpu.memory_space<vmem>>, vector<800x128xbf16>
    %cst = arith.constant dense<0.000000e+00> : vector<2x128xf32>
    %2 = tpu.matmul %0, %1, %cst {dimension_numbers = #tpu.dot_dimension_numbers<[1], [0], [0], [1], [0, 0, 1, 1], [], []>} : vector<2x800xbf16>, vector<800x128xbf16>, vector<2x128xf32> -> vector<2x128xf32>
    %c0_3 = arith.constant 0 : index
    %c0_4 = arith.constant 0 : index
    %3 = vector.load %arg3[%c0_3, %c0_4] : memref<1x128xf32, #tpu.memory_space<vmem>>, vector<1x128xf32>
    %4 = vector.broadcast %3 : vector<1x128xf32> to vector<2x128xf32>
    %5 = arith.addf %2, %4 : vector<2x128xf32>
    %c0_5 = arith.constant 0 : index
    %c0_6 = arith.constant 0 : index
    %6 = vector.load %arg4[%c0_5, %c0_6] : memref<2x128xf32, #tpu.memory_space<vmem>>, vector<2x128xf32>
    tpu.vector_store %arg4[%c0_5, %c0_6], %5 {strides = array<i32>} : memref<2x128xf32, #tpu.memory_space<vmem>>, vector<2x128xf32>,
    return
  }
  func.func @transform_0(%arg0: i32) -> (i32, i32) {
    %c0_i32 = arith.constant 0 : i32
    %c0_i32_0 = arith.constant 0 : i32
    return %arg0, %c0_i32 : i32, i32
  }
  func.func @transform_1(%arg0: i32) -> (i32, i32) {
    %c0_i32 = arith.constant 0 : i32
    %c0_i32_0 = arith.constant 0 : i32
    %c0_i32_1 = arith.constant 0 : i32
    return %c0_i32, %c0_i32_0 : i32, i32
  }
  func.func @transform_2(%arg0: i32) -> (i32, i32) {
    %c0_i32 = arith.constant 0 : i32
    %c0_i32_0 = arith.constant 0 : i32
    %c0_i32_1 = arith.constant 0 : i32
    return %c0_i32, %c0_i32_0 : i32, i32
  }
  func.func @transform_3(%arg0: i32) -> (i32, i32) {
    %c0_i32 = arith.constant 0 : i32
    %c0_i32_0 = arith.constant 0 : i32
    return %arg0, %c0_i32 : i32, i32
  }
}

</mosaic_0001>

<bundles_post_ra>
// kernel: resnet_forward.17
= control target key start
LH: loop header
LB: loop body
LE: loop exit
PB: predicated region body
PF: predicated region fallthrough
CT: control target
= control target key end

     0   :  { %s3111_s12 = smov 0   ;;  %s3113_s13 = smov 0   ;;  %s4096_s0 = inlined_call_operand.vmem [shape: bf16[21218,196], index: 0, kind: input, shape index: {}]   ;;  %s4097_s1 = inlined_call_operand.vmem [shape: bf16[196,128], index: 1, kind: input, shape index: {}]   ;;  %s4098_s2 = inlined_call_operand.vmem [shape: f32[1,128], index: 2, kind: input, shape index: {}]   ;;  %s4099_s3 = inlined_call_operand.vmem [shape: bf16[21218,128], index: 3, kind: output, shape index: {}]  }
   0x1   :  { %s3115_s14 = smov 0  }
   0x2 LB: > { %s3124_s15 = sadd.s32 4294967295, %s3057_s14   ;;  %s3126_s16 = sadd.s32 1, %s3057_s14   ;;  %s3057_s14 = sphi %s3115_s14, %s4108_s14   ;;  %s3053_s13 = sphi %s3113_s13, %s4107_s13   ;;  %s3049_s12 = sphi %s3111_s12, %s4106_s12  }
   0x3   : > { %s85_s17 = ssub.s32 %s3057_s14, %s3126_s16  ;;  %s88_s18 = sadd.s32 1, %s3053_s13 }
   0x4   : > { %p86_p0 = scmp.eq.s32.totalorder %s85_s17, 0  ;;  %p98_p1 = scmp.ne.s32.totalorder %s3053_s13, %s3049_s12 }
   0x5   : > { %p99_p2 = scmp.eq.s32.totalorder %s3124_s15, 41  ;;  %p2143_p3 = scmp.ge.s32.totalorder %s3057_s14, 1 }
   0x6   : > { %s3134_s19 = scalar_select %p86_p0, %s3053_s13, %s88_s18  }
   0x7   : > { %p3136_p4 = por %p99_p2, %p98_p1  ;;  %p149_p5 = scmp.lt.s32.totalorder %s3057_s14, 43 }
   0x9   : > { %p150_p6 = pnand %p2143_p3, %p149_p5 }
   0xa   : > { %s3147_s25 = sshll.u32 (!%p150_p6), %s3124_s15, 6  ;;  %s175_s8 = sand.u32 (!%p150_p6), 1, %s3049_s12  }
   0xb   : > { %153 = sbr.rel (%p150_p6) target bundleno = 522 (0x20a), region = 32  ;;  %p184_p7 = scmp.lt.s32.totalorder (!%p150_p6), %s3147_s25, 2652 }
   0xc   : > { %s2144_s12 = sshll.u32 (!%p150_p6), %s175_s8, 8 }
   0xd   : > { %s3357_s9 = scalar_lea.vmem (!%p150_p6), [#allocation2], %s2144_s12  }
  0x10   : > { %v2573_v0 = vld [vmem:[%s4097_s1 + $0x38] sm:$0xff]  ;;  %v289_v1 = vld [vmem:[%s4097_s1 + $0x60] sm:$0x3]  ;;  %vm754_vm0 = vcmask 1041408   ;;  %v2572_v3 = vld [vmem:[%s4097_s1 + $0x30] sm:$0xff]  ;;  %s185_s5 = scalar_select %p184_p7, %s3147_s25, 2652 }
  0x11   : > { %v631_v2 = vunpack.c.l.b16 %v289_v1  ;;  %758 = vmatpush.bf16.msra.mxu0 %v2573_v0  ;;  %2772 = vmatpush.bf16.msra.mxu2 %v2573_v0  ;;  %v2577_v6 = vld [vmem:[%s4097_s1 + $0x58] sm:$0xff]  ;;  %v2571_v7 = vld [vmem:[%s4097_s1 + $0x28] sm:$0xff]  ;;  %v2576_v8 = vld [vmem:[%s4097_s1 + $0x50] sm:$0xff]  ;;  %vm657_vm1 = vcmask 556032   ;;  %s1808_s14 = ssub.s32 (%p3136_p4), 2653, %s3147_s25  ;;  %s2578_s17 = sshll.u32 (%p3136_p4), %s3124_s15, 8 }
  0x12   : > { %v2570_v9 = vld [vmem:[%s4097_s1 + $0x20] sm:$0xff]  ;;  %s2501_s10 = sshll.u32 %s185_s5, 3  ;;  %v2575_v10 = vld [vmem:[%s4097_s1 + $0x48] sm:$0xff]  ;;  %v2569_v11 = vld [vmem:[%s4097_s1 + $0x18] sm:$0xff]  ;;  %p1809_p8 = scmp.lt.s32.totalorder (%p3136_p4), %s1808_s14, 64 }
  0x13   : > { %v644_v4 = vpack.c.b16 %v631_v2, %v631_v2  ;;  %s3175_s23 = scalar_lea.vmem %s4096_s0, %s2501_s10  ;;  %v2574_v12 = vld [vmem:[%s4097_s1 + $0x40] sm:$0xff]  ;;  %v2568_v13 = vld [vmem:[%s4097_s1 + $0x10] sm:$0xff]  ;;  %v2567_v19 = vld [vmem:[%s4097_s1 + $0x8] sm:$0xff]  ;;  %s3961_s22 = scalar_lea.vmem (%p3136_p4), %s4099_s3, %s2578_s17  }
  0x14   : > { %v2502_v14 = vld [vmem:[%s3175_s23 + $0x4] sm:$0xf]  ;;  %v2152_v15 = vld [vmem:[%s3175_s23 + $0x8] sm:$0xf0]  ;;  %v2536_v16 = vld [vmem:[%s3175_s23 + $0x114] sm:$0xf] }
  0x15   : > { %v756_v5 = vsel %vm754_vm0, %v644_v4, 0  ;;  %759 = vmatpush.bf16.msra.mxu0 %v2572_v3  ;;  %2773 = vmatpush.bf16.msra.mxu2 %v2572_v3  ;;  %v2288_v17 = vld [vmem:[%s3175_s23 + $0x118] sm:$0xf0]  ;;  %v2155_v18 = vor.u32 %v2502_v14, %v2152_v15  ;;  %v2566_v21 = vld [vmem:[%s4097_s1] sm:$0xff]  ;;  %v2503_v23 = vld [vmem:[%s3175_s23 + $0x4] sm:$0xf0] }
  0x16   : > { %930 = vmatpush.bf16.msra.mxu1 %v756_v5  ;;  %2780 = vmatpush.bf16.msra.mxu3 %v756_v5  ;;  %v2291_v20 = vor.u32 %v2536_v16, %v2288_v17  ;;  %v2150_v22 = vld [vmem:[%s3175_s23] sm:$0xf]  ;;  %v2535_v25 = vld [vmem:[%s3175_s23 + $0x104] sm:$0xf0]  ;;  %v2504_v28 = vld [vmem:[%s3175_s23 + $0x14] sm:$0xf] }
  0x17   : > { %v2278_v24 = vld [vmem:[%s3175_s23 + $0x100] sm:$0xf]  ;;  %v2151_v26 = vor.u32 %v2503_v23, %v2150_v22  ;;  %v2160_v29 = vld [vmem:[%s3175_s23 + $0x18] sm:$0xf0]  ;;  %v2538_v30 = vld [vmem:[%s3175_s23 + $0x124] sm:$0xf] }
  0x18   : > { %v2279_v27 = vor.u32 %v2535_v25, %v2278_v24  ;;  %v2296_v31 = vld [vmem:[%s3175_s23 + $0x128] sm:$0xf0]  ;;  %v2163_v32 = vor.u32 %v2504_v28, %v2160_v29  ;;  %v2158_v34 = vld [vmem:[%s3175_s23 + $0x10] sm:$0xf]  ;;  %v2505_v35 = vld [vmem:[%s3175_s23 + $0x14] sm:$0xf0] }
  0x19   : > { %760 = vmatpush.bf16.msra.mxu0 %v2571_v7  ;;  %2774 = vmatpush.bf16.msra.mxu2 %v2571_v7  ;;  %v2299_v33 = vor.u32 %v2538_v30, %v2296_v31  ;;  %v2286_v36 = vld [vmem:[%s3175_s23 + $0x110] sm:$0xf]  ;;  %v2537_v37 = vld [vmem:[%s3175_s23 + $0x114] sm:$0xf0]  ;;  %v2159_v38 = vor.u32 %v2505_v35, %v2158_v34  ;;  %v2506_v40 = vld [vmem:[%s3175_s23 + $0x24] sm:$0xf] }
  0x1a   : > { %931 = vmatpush.bf16.msra.mxu1 %v2577_v6  ;;  %2781 = vmatpush.bf16.msra.mxu3 %v2577_v6  ;;  %v2287_v39 = vor.u32 %v2537_v37, %v2286_v36  ;;  %v2168_v41 = vld [vmem:[%s3175_s23 + $0x28] sm:$0xf0]  ;;  %v2540_v42 = vld [vmem:[%s3175_s23 + $0x134] sm:$0xf]  ;;  %v2304_v43 = vld [vmem:[%s3175_s23 + $0x138] sm:$0xf0] }
  0x1b   : > { %v2171_v44 = vor.u32 %v2506_v40, %v2168_v41  ;;  %v2307_v45 = vor.u32 %v2540_v42, %v2304_v43  ;;  %v2166_v46 = vld [vmem:[%s3175_s23 + $0x20] sm:$0xf]  ;;  %v2507_v47 = vld [vmem:[%s3175_s23 + $0x24] sm:$0xf0]  ;;  %v2508_v52 = vld [vmem:[%s3175_s23 + $0x34] sm:$0xf] }
  0x1c   : > { %v2294_v48 = vld [vmem:[%s3175_s23 + $0x120] sm:$0xf]  ;;  %v2539_v49 = vld [vmem:[%s3175_s23 + $0x124] sm:$0xf0]  ;;  %v2167_v50 = vor.u32 %v2507_v47, %v2166_v46  ;;  %v2176_v53 = vld [vmem:[%s3175_s23 + $0x38] sm:$0xf0] }
  0x1d   : > { %761 = vmatpush.bf16.msra.mxu0 %v2570_v9  ;;  %2775 = vmatpush.bf16.msra.mxu2 %v2570_v9  ;;  %v2295_v51 = vor.u32 %v2539_v49, %v2294_v48  ;;  %v2542_v54 = vld [vmem:[%s3175_s23 + $0x144] sm:$0xf]  ;;  %v2312_v55 = vld [vmem:[%s3175_s23 + $0x148] sm:$0xf0]  ;;  %v2179_v56 = vor.u32 %v2508_v52, %v2176_v53  ;;  %v2174_v58 = vld [vmem:[%s3175_s23 + $0x30] sm:$0xf] }
  0x1e   : > { %932 = vmatpush.bf16.msra.mxu1 %v2576_v8  ;;  %2782 = vmatpush.bf16.msra.mxu3 %v2576_v8  ;;  %v2315_v57 = vor.u32 %v2542_v54, %v2312_v55  ;;  %v2509_v59 = vld [vmem:[%s3175_s23 + $0x34] sm:$0xf0]  ;;  %v2302_v60 = vld [vmem:[%s3175_s23 + $0x130] sm:$0xf]  ;;  %v2510_v0 = vld [vmem:[%s3175_s23 + $0x44] sm:$0xf] }
  0x1f   : > { %v2541_v61 = vld [vmem:[%s3175_s23 + $0x134] sm:$0xf0]  ;;  %v2175_v62 = vor.u32 %v2509_v59, %v2174_v58  ;;  %v2184_v1 = vld [vmem:[%s3175_s23 + $0x48] sm:$0xf0]  ;;  %v2544_v2 = vld [vmem:[%s3175_s23 + $0x154] sm:$0xf] }
  0x20   : > { %v2303_v63 = vor.u32 %v2541_v61, %v2302_v60  ;;  %v2320_v3 = vld [vmem:[%s3175_s23 + $0x158] sm:$0xf0]  ;;  %v2187_v4 = vor.u32 %v2510_v0, %v2184_v1  ;;  %v2182_v6 = vld [vmem:[%s3175_s23 + $0x40] sm:$0xf]  ;;  %v2511_v7 = vld [vmem:[%s3175_s23 + $0x44] sm:$0xf0] }
  0x21   : > { %762 = vmatpush.bf16.msra.mxu0 %v2569_v11  ;;  %2776 = vmatpush.bf16.msra.mxu2 %v2569_v11  ;;  %v2323_v5 = vor.u32 %v2544_v2, %v2320_v3  ;;  %v2310_v8 = vld [vmem:[%s3175_s23 + $0x140] sm:$0xf]  ;;  %v2543_v9 = vld [vmem:[%s3175_s23 + $0x144] sm:$0xf0]  ;;  %v2546_v14 = vld [vmem:[%s3175_s23 + $0x164] sm:$0xf] }
  0x22   : > { %933 = vmatpush.bf16.msra.mxu1 %v2575_v10  ;;  %2783 = vmatpush.bf16.msra.mxu3 %v2575_v10  ;;  %v2183_v10 = vor.u32 %v2511_v7, %v2182_v6  ;;  %v2311_v11 = vor.u32 %v2543_v9, %v2310_v8  ;;  %v2328_v15 = vld [vmem:[%s3175_s23 + $0x168] sm:$0xf0]  ;;  %v2514_v24 = vld [vmem:[%s3175_s23 + $0x64] sm:$0xf]  ;;  %v2198_v30 = vld [vmem:[%s3175_s23 + $0x60] sm:$0xf] }
  0x23   : > { %v2331_v17 = vor.u32 %v2546_v14, %v2328_v15  ;;  %v2200_v25 = vld [vmem:[%s3175_s23 + $0x68] sm:$0xf0]  ;;  %v2515_v31 = vld [vmem:[%s3175_s23 + $0x64] sm:$0xf0]  ;;  %v2516_v36 = vld [vmem:[%s3175_s23 + $0x74] sm:$0xf] }
  0x24   : > { %v2203_v28 = vor.u32 %v2514_v24, %v2200_v25  ;;  %v2199_v34 = vor.u32 %v2515_v31, %v2198_v30  ;;  %v2208_v37 = vld [vmem:[%s3175_s23 + $0x78] sm:$0xf0]  ;;  %v2206_v42 = vld [vmem:[%s3175_s23 + $0x70] sm:$0xf]  ;;  %v2517_v43 = vld [vmem:[%s3175_s23 + $0x74] sm:$0xf0] }
  0x25   : > { %763 = vmatpush.bf16.msra.mxu0 %v2568_v13  ;;  %2777 = vmatpush.bf16.msra.mxu2 %v2568_v13  ;;  %v2192_v13 = vld [vmem:[%s3175_s23 + $0x58] sm:$0xf0]  ;;  %v2211_v40 = vor.u32 %v2516_v36, %v2208_v37  ;;  %v2207_v46 = vor.u32 %v2517_v43, %v2206_v42  ;;  %v2518_v48 = vld [vmem:[%s3175_s23 + $0x84] sm:$0xf]  ;;  %v2216_v49 = vld [vmem:[%s3175_s23 + $0x88] sm:$0xf0] }
  0x26   : > { %934 = vmatpush.bf16.msra.mxu1 %v2574_v12  ;;  %2784 = vmatpush.bf16.msra.mxu3 %v2574_v12  ;;  %v2512_v12 = vld [vmem:[%s3175_s23 + $0x54] sm:$0xf]  ;;  %v2219_v52 = vor.u32 %v2518_v48, %v2216_v49  ;;  %v2214_v55 = vld [vmem:[%s3175_s23 + $0x80] sm:$0xf]  ;;  %v2551_v59 = vld [vmem:[%s3175_s23 + $0x184] sm:$0xf0] }
  0x27   : > { %v2195_v16 = vor.u32 %v2512_v12, %v2192_v13  ;;  %v2342_v58 = vld [vmem:[%s3175_s23 + $0x180] sm:$0xf]  ;;  %v2520_v3 = vld [vmem:[%s3175_s23 + $0x94] sm:$0xf]  ;;  %v2554_v6 = vld [vmem:[%s3175_s23 + $0x1a4] sm:$0xf] }
  0x28   : > { %v2343_v0 = vor.u32 %v2551_v59, %v2342_v58  ;;  %v2360_v7 = vld [vmem:[%s3175_s23 + $0x1a8] sm:$0xf0]  ;;  %v2522_v36 = vld [vmem:[%s3175_s23 + $0xa4] sm:$0xf]  ;;  %v2523_v58 = vld [vmem:[%s3175_s23 + $0xa4] sm:$0xf0] }
  0x29   : > { %2452 = vmatmul.msk.bf16.vlgmr.msra.gmra.mxu1 %vm657_vm1, %v2155_v18  ;;  %764 = vmatpush.bf16.msra.mxu0 %v2567_v19  ;;  %v2190_v18 = vld [vmem:[%s3175_s23 + $0x50] sm:$0xf]  ;;  %v2363_v14 = vor.u32 %v2554_v6, %v2360_v7  ;;  %v2232_v37 = vld [vmem:[%s3175_s23 + $0xa8] sm:$0xf0] }
  0x2a   : > { %2469 = vmatmul.msk.bf16.vlgmr.msra.gmra.mxu3 %vm657_vm1, %v2291_v20  ;;  %2778 = vmatpush.bf16.msra.mxu2 %v2567_v19  ;;  %v2513_v19 = vld [vmem:[%s3175_s23 + $0x54] sm:$0xf0]  ;;  %v2318_v20 = vld [vmem:[%s3175_s23 + $0x150] sm:$0xf] }
  0x2b   : > { %v2191_v22 = vor.u32 %v2513_v19, %v2190_v18  ;;  %v2222_v19 = vld [vmem:[%s3175_s23 + $0x90] sm:$0xf] }
  0x2d   : > { %765 = vmatpush.bf16.msra.mxu0 %v2566_v21 }
  0x2e   : > { %2779 = vmatpush.bf16.msra.mxu2 %v2566_v21  ;;  %v2545_v21 = vld [vmem:[%s3175_s23 + $0x154] sm:$0xf0] }
  0x2f   : > { %v2319_v23 = vor.u32 %v2545_v21, %v2318_v20  ;;  %v2521_v20 = vld [vmem:[%s3175_s23 + $0x94] sm:$0xf0] }
  0x30   : > { %766 = vmatmul.bf16.vlgmr.msra.gmra.mxu0 %v2151_v26  ;;  %v2548_v26 = vld [vmem:[%s3175_s23 + $0x174] sm:$0xf] }
  0x31   : > { %846 = vmatmul.bf16.vlgmr.msra.gmra.mxu2 %v2279_v27  ;;  %v2336_v27 = vld [vmem:[%s3175_s23 + $0x178] sm:$0xf0] }
  0x32   : > { %v2339_v29 = vor.u32 %v2548_v26, %v2336_v27  ;;  %v2223_v27 = vor.u32 %v2521_v20, %v2222_v19 }
  0x39   : > { %2453 = vmatmul.msk.bf16.gmra.mxu1 %vm657_vm1, %v2163_v32  ;;  %v2326_v32 = vld [vmem:[%s3175_s23 + $0x160] sm:$0xf] }
  0x3a   : > { %2470 = vmatmul.msk.bf16.gmra.mxu3 %vm657_vm1, %v2299_v33  ;;  %v2547_v33 = vld [vmem:[%s3175_s23 + $0x164] sm:$0xf0] }
  0x3b   : > { %v2327_v35 = vor.u32 %v2547_v33, %v2326_v32 }
  0x40   : > { %771 = vmatmul.bf16.gmra.mxu0 %v2159_v38  ;;  %v2550_v38 = vld [vmem:[%s3175_s23 + $0x184] sm:$0xf] }
  0x41   : > { %851 = vmatmul.bf16.gmra.mxu2 %v2287_v39  ;;  %v2344_v39 = vld [vmem:[%s3175_s23 + $0x188] sm:$0xf0] }
  0x42   : > { %v2347_v41 = vor.u32 %v2550_v38, %v2344_v39 }
  0x49   : > { %2454 = vmatmul.msk.bf16.gmra.mxu1 %vm657_vm1, %v2171_v44  ;;  %v2334_v44 = vld [vmem:[%s3175_s23 + $0x170] sm:$0xf] }
  0x4a   : > { %2471 = vmatmul.msk.bf16.gmra.mxu3 %vm657_vm1, %v2307_v45  ;;  %v2549_v45 = vld [vmem:[%s3175_s23 + $0x174] sm:$0xf0] }
  0x4b   : > { %v2335_v47 = vor.u32 %v2549_v45, %v2334_v44  ;;  %v2235_v44 = vor.u32 %v2522_v36, %v2232_v37 }
  0x50   : > { %776 = vmatmul.bf16.gmra.mxu0 %v2167_v50  ;;  %v2552_v50 = vld [vmem:[%s3175_s23 + $0x194] sm:$0xf] }
  0x51   : > { %856 = vmatmul.bf16.gmra.mxu2 %v2295_v51  ;;  %v2352_v51 = vld [vmem:[%s3175_s23 + $0x198] sm:$0xf0] }
  0x52   : > { %v2355_v54 = vor.u32 %v2552_v50, %v2352_v51 }
  0x59   : > { %2455 = vmatmul.msk.bf16.gmra.mxu1 %vm657_vm1, %v2179_v56  ;;  %v2519_v56 = vld [vmem:[%s3175_s23 + $0x84] sm:$0xf0] }
  0x5a   : > { %2472 = vmatmul.msk.bf16.gmra.mxu3 %vm657_vm1, %v2315_v57  ;;  %v3280_v57 = vld [vmem:[%s4098_s2] ss:$0 sm:$0xff]  ;;  %v2215_v60 = vor.u32 %v2519_v56, %v2214_v55 }
  0x5b   : > { %v2230_v56 = vld [vmem:[%s3175_s23 + $0xa0] sm:$0xf] }
  0x60   : > { %781 = vmatmul.bf16.gmra.mxu0 %v2175_v62 }
  0x61   : > { %861 = vmatmul.bf16.gmra.mxu2 %v2303_v63 }
  0x69   : > { %2456 = vmatmul.msk.bf16.gmra.mxu1 %vm657_vm1, %v2187_v4  ;;  %v2224_v4 = vld [vmem:[%s3175_s23 + $0x98] sm:$0xf0] }
  0x6a   : > { %2473 = vmatmul.msk.bf16.gmra.mxu3 %vm657_vm1, %v2323_v5 }
  0x70   : > { %786 = vmatmul.bf16.gmra.mxu0 %v2183_v10  ;;  %v2227_v10 = vor.u32 %v2520_v3, %v2224_v4 }
  0x71   : > { %866 = vmatmul.bf16.gmra.mxu2 %v2311_v11 }
  0x79   : > { %2457 = vmatmul.msk.bf16.gmra.mxu1 %vm657_vm1, %v2195_v16 }
  0x7a   : > { %2474 = vmatmul.msk.bf16.gmra.mxu3 %vm657_vm1, %v2331_v17 }
  0x80   : > { %791 = vmatmul.bf16.gmra.mxu0 %v2191_v22  ;;  %v2350_v22 = vld [vmem:[%s3175_s23 + $0x190] sm:$0xf] }
  0x81   : > { %871 = vmatmul.bf16.gmra.mxu2 %v2319_v23  ;;  %v2553_v23 = vld [vmem:[%s3175_s23 + $0x194] sm:$0xf0] }
  0x82   : > { %v2351_v31 = vor.u32 %v2553_v23, %v2350_v22 }
  0x89   : > { %2458 = vmatmul.msk.bf16.gmra.mxu1 %vm657_vm1, %v2203_v28 }
  0x8a   : > { %2475 = vmatmul.msk.bf16.gmra.mxu3 %vm657_vm1, %v2339_v29 }
  0x90   : > { %796 = vmatmul.bf16.gmra.mxu0 %v2199_v34 }
  0x91   : > { %876 = vmatmul.bf16.gmra.mxu2 %v2327_v35 }
  0x99   : > { %2459 = vmatmul.msk.bf16.gmra.mxu1 %vm657_vm1, %v2211_v40  ;;  %v2556_v40 = vld [vmem:[%s3175_s23 + $0x1b4] sm:$0xf] }
  0x9a   : > { %2476 = vmatmul.msk.bf16.gmra.mxu3 %vm657_vm1, %v2347_v41  ;;  %v2368_v41 = vld [vmem:[%s3175_s23 + $0x1b8] sm:$0xf0] }
  0x9b   : > { %v2371_v49 = vor.u32 %v2556_v40, %v2368_v41 }
  0xa0   : > { %801 = vmatmul.bf16.gmra.mxu0 %v2207_v46 }
  0xa1   : > { %881 = vmatmul.bf16.gmra.mxu2 %v2335_v47 }
  0xa6   : > { %v936_v53 = vpop.f32.mrf.mxu1 }
  0xa9   : > { %2460 = vmatmul.msk.bf16.gmra.mxu1 %vm657_vm1, %v2219_v52 }
  0xaa   : > { %2477 = vmatmul.msk.bf16.gmra.mxu3 %vm657_vm1, %v2355_v54 }
  0xad   : > { %v3284_v61 = vpop.f32.mrf.mxu3  ;;  %v767_v63 = vpop.f32.mrf.mxu0 }
  0xae   : > { %v938_v62 = vpop.f32.mrf.mxu1  ;;  %v768_v1 = vadd.f32 %v3280_v57, %v767_v63  ;;  %v2555_v63 = vld [vmem:[%s3175_s23 + $0x1a4] sm:$0xf0] }
  0xb0   : > { %v3287_v2 = vadd.f32 %v936_v53, %v768_v1  ;;  %806 = vmatmul.bf16.gmra.mxu0 %v2215_v60 }
  0xb1   : > { %886 = vmatmul.bf16.gmra.mxu2 %v2343_v0 }
  0xb2   : > { %v1160_v5 = vmul.f32 %v3287_v2, %v3287_v2  ;;  %v1096_v1 = vmul.f32 0.5, %v3287_v2 }
  0xb4   : > { %v1224_v8 = vmul.f32 %v1160_v5, %v3287_v2  ;;  %v3296_v9 = vpop.f32.mrf.mxu2 }
  0xb5   : > { %v3298_v11 = vpop.f32.mrf.mxu3  ;;  %v769_v13 = vpop.f32.mrf.mxu0 }
  0xb6   : > { %v941_v12 = vpop.f32.mrf.mxu1  ;;  %v1288_v15 = vmul.f32 0.044715, %v1224_v8  ;;  %v770_v16 = vadd.f32 %v3280_v57, %v769_v13 }
  0xb8   : > { %v1352_v17 = vadd.f32 %v1288_v15, %v3287_v2  ;;  %v939_v18 = vadd.f32 %v938_v62, %v770_v16  ;;  %v2358_v62 = vld [vmem:[%s3175_s23 + $0x1a0] sm:$0xf] }
  0xb9   : > { %2461 = vmatmul.msk.bf16.gmra.mxu1 %vm657_vm1, %v2227_v10  ;;  %v2231_v10 = vor.u32 %v2523_v58, %v2230_v56  ;;  %v2238_v56 = vld [vmem:[%s3175_s23 + $0xb0] sm:$0xf]  ;;  %v2525_v58 = vld [vmem:[%s3175_s23 + $0xb4] sm:$0xf0] }
  0xba   : > { %2478 = vmatmul.msk.bf16.gmra.mxu3 %vm657_vm1, %v2363_v14  ;;  %v1161_v21 = vmul.f32 %v939_v18, %v939_v18  ;;  %v1416_v24 = vmul.f32 0.7978846, %v1352_v17  ;;  %v1097_v3 = vmul.f32 0.5, %v939_v18 }
  0xbc   : > { %v1225_v25 = vmul.f32 %v1161_v21, %v939_v18  ;;  %v3308_v26 = vpop.f32.mrf.mxu2  ;;  %2874 = vtanh.f32 %v1416_v24 }
  0xbd   : > { %v3310_v28 = vpop.f32.mrf.mxu3  ;;  %v772_v30 = vpop.f32.mrf.mxu0 }
  0xbe   : > { %v943_v29 = vpop.f32.mrf.mxu1  ;;  %v1289_v32 = vmul.f32 0.044715, %v1225_v25  ;;  %v773_v33 = vadd.f32 %v3280_v57, %v772_v30  ;;  %v2240_v30 = vld [vmem:[%s3175_s23 + $0xb8] sm:$0xf0] }
  0xc0   : > { %v1353_v34 = vadd.f32 %v1289_v32, %v939_v18  ;;  %v3313_v35 = vadd.f32 %v941_v12, %v773_v33  ;;  %811 = vmatmul.bf16.gmra.mxu0 %v2223_v27  ;;  %v2359_v12 = vor.u32 %v2555_v63, %v2358_v62  ;;  %v2558_v32 = vld [vmem:[%s3175_s23 + $0x1c4] sm:$0xf]  ;;  %v2376_v33 = vld [vmem:[%s3175_s23 + $0x1c8] sm:$0xf0] }
  0xc1   : > { %891 = vmatmul.bf16.gmra.mxu2 %v2351_v31 }
  0xc2   : > { %v1417_v38 = vmul.f32 0.7978846, %v1353_v34  ;;  %v1162_v39 = vmul.f32 %v3313_v35, %v3313_v35  ;;  %v2875_v50 = vpop.eup %2874 }
  0xc3   : > { %v1544_v59 = vadd.f32 1.0, %v2875_v50 }
  0xc4   : > { %2876 = vtanh.f32 %v1417_v38  ;;  %v1226_v42 = vmul.f32 %v1162_v39, %v3313_v35  ;;  %v852_v43 = vpop.f32.mrf.mxu2 }
  0xc5   : > { %v3322_v45 = vpop.f32.mrf.mxu3  ;;  %v853_v46 = vadd.f32 %v3280_v57, %v852_v43  ;;  %v774_v48 = vpop.f32.mrf.mxu0  ;;  %v1608_v14 = vmul.f32 %v1544_v59, %v1096_v1  ;;  %v2366_v59 = vld [vmem:[%s3175_s23 + $0x1b0] sm:$0xf] }
  0xc6   : > { %v946_v47 = vpop.f32.mrf.mxu1  ;;  %v1290_v51 = vmul.f32 0.044715, %v1226_v42  ;;  %v775_v52 = vadd.f32 %v3280_v57, %v774_v48 }
  0xc7   : > { %v3327_v53 = vadd.f32 %v3284_v61, %v853_v46  ;;  %v2379_v46 = vor.u32 %v2558_v32, %v2376_v33 }
  0xc8   : > { %v1354_v54 = vadd.f32 %v1290_v51, %v3313_v35  ;;  %v3331_v55 = vadd.f32 %v943_v29, %v775_v52  ;;  %v2524_v29 = vld [vmem:[%s3175_s23 + $0xb4] sm:$0xf] }
  0xc9   : > { %2462 = vmatmul.msk.bf16.gmra.mxu1 %vm657_vm1, %v2235_v44  ;;  %v1194_v60 = vmul.f32 %v3327_v53, %v3327_v53  ;;  %v2243_v39 = vor.u32 %v2524_v29, %v2240_v30  ;;  %v1130_v33 = vmul.f32 0.5, %v3327_v53 }
  0xca   : > { %2479 = vmatmul.msk.bf16.gmra.mxu3 %vm657_vm1, %v2371_v49  ;;  %v2877_v0 = vpop.eup %2876  ;;  %v1163_v61 = vmul.f32 %v3331_v55, %v3331_v55  ;;  %v1418_v6 = vmul.f32 0.7978846, %v1354_v54 }
  0xcb   : > { %v1545_v4 = vadd.f32 1.0, %v2877_v0  ;;  %v1258_v5 = vmul.f32 %v1194_v60, %v3327_v53  ;;  %v2557_v0 = vld [vmem:[%s3175_s23 + $0x1b4] sm:$0xf0] }
  0xcc   : > { %v1227_v7 = vmul.f32 %v1163_v61, %v3331_v55  ;;  %v854_v8 = vpop.f32.mrf.mxu2  ;;  %2878 = vtanh.f32 %v1418_v6 }
  0xcd   : > { %v3346_v13 = vpop.f32.mrf.mxu3  ;;  %v1609_v15 = vmul.f32 %v1545_v4, %v1097_v3  ;;  %v1322_v16 = vmul.f32 0.044715, %v1258_v5  ;;  %v855_v17 = vadd.f32 %v3280_v57, %v854_v8  ;;  %v777_v18 = vpop.f32.mrf.mxu0  ;;  %v1099_v3 = vmul.f32 0.5, %v3331_v55 }
  0xce   : > { %v948_v2 = vpop.f32.mrf.mxu1  ;;  %v1291_v19 = vmul.f32 0.044715, %v1227_v7  ;;  %v778_v20 = vadd.f32 %v3280_v57, %v777_v18 }
  0xcf   : > { %v2584_v21 = vpack.c.bf16 %v1609_v15, %v1608_v14  ;;  %v1386_v22 = vadd.f32 %v1322_v16, %v3327_v53  ;;  %v3352_v23 = vadd.f32 %v3298_v11, %v855_v17 }
  0xd0   : > { %v1355_v24 = vadd.f32 %v1291_v19, %v3331_v55  ;;  %v3355_v25 = vadd.f32 %v946_v47, %v778_v20  ;;  %816 = vmatmul.bf16.gmra.mxu0 %v2231_v10  ;;  %v2239_v10 = vor.u32 %v2525_v58, %v2238_v56 }
  0xd1   : > { %2585 = vst [vmem:[%s3357_s9] sm:$0xff] %v2584_v21   ;;  %v1195_v27 = vmul.f32 %v3352_v23, %v3352_v23  ;;  %896 = vmatmul.bf16.gmra.mxu2 %v2359_v12  ;;  %v1450_v34 = vmul.f32 0.7978846, %v1386_v22  ;;  %v2367_v12 = vor.u32 %v2557_v0, %v2366_v59 }
  0xd2   : > { %v1419_v31 = vmul.f32 0.7978846, %v1355_v24  ;;  %v1164_v11 = vmul.f32 %v3355_v25, %v3355_v25  ;;  %v2879_v47 = vpop.eup %2878 }
  0xd3   : > { %v1259_v36 = vmul.f32 %v1195_v27, %v3352_v23  ;;  %v1546_v60 = vadd.f32 1.0, %v2879_v47 }
  0xd4   : > { %2880 = vtanh.f32 %v1419_v31  ;;  %v1228_v37 = vmul.f32 %v1164_v11, %v3355_v25  ;;  %v857_v38 = vpop.f32.mrf.mxu2  ;;  %v2526_v31 = vld [vmem:[%s3175_s23 + $0xc4] sm:$0xf]  ;;  %v2248_v11 = vld [vmem:[%s3175_s23 + $0xc8] sm:$0xf0] }
  0xd5   : > { %v3370_v40 = vpop.f32.mrf.mxu3  ;;  %v1323_v41 = vmul.f32 0.044715, %v1259_v36  ;;  %v858_v42 = vadd.f32 %v3280_v57, %v857_v38  ;;  %v779_v44 = vpop.f32.mrf.mxu0  ;;  %2882 = vtanh.f32 %v1450_v34  ;;  %v1131_v36 = vmul.f32 0.5, %v3352_v23 }
  0xd6   : > { %v951_v43 = vpop.f32.mrf.mxu1  ;;  %v1292_v48 = vmul.f32 0.044715, %v1228_v37  ;;  %v780_v49 = vadd.f32 %v3280_v57, %v779_v44  ;;  %v2251_v44 = vor.u32 %v2526_v31, %v2248_v11 }
  0xd7   : > { %v1387_v50 = vadd.f32 %v1323_v41, %v3352_v23  ;;  %v3376_v51 = vadd.f32 %v3310_v28, %v858_v42  ;;  %v1098_v28 = vmul.f32 0.5, %v3313_v35  ;;  %v2384_v41 = vld [vmem:[%s3175_s23 + $0x1d8] sm:$0xf0] }
  0xd8   : > { %v1356_v52 = vadd.f32 %v1292_v48, %v3355_v25  ;;  %v3379_v54 = vadd.f32 %v948_v2, %v780_v49 }
  0xd9   : > { %2463 = vmatmul.msk.bf16.gmra.mxu1 %vm657_vm1, %v2243_v39  ;;  %v1451_v62 = vmul.f32 0.7978846, %v1387_v50  ;;  %v1196_v63 = vmul.f32 %v3376_v51, %v3376_v51  ;;  %v1610_v16 = vmul.f32 %v1546_v60, %v1098_v28  ;;  %v2246_v28 = vld [vmem:[%s3175_s23 + $0xc0] sm:$0xf] }
  0xda   : > { %2480 = vmatmul.msk.bf16.gmra.mxu3 %vm657_vm1, %v2379_v46  ;;  %v2881_v61 = vpop.eup %2880  ;;  %v1165_v1 = vmul.f32 %v3379_v54, %v3379_v54  ;;  %v1420_v6 = vmul.f32 0.7978846, %v1356_v52 }
  0xdb   : > { %v1547_v4 = vadd.f32 1.0, %v2881_v61  ;;  %2884 = vtanh.f32 %v1451_v62  ;;  %v1260_v5 = vmul.f32 %v1196_v63, %v3376_v51  ;;  %v2883_v15 = vpop.eup %2882 }
  0xdc   : > { %v1229_v7 = vmul.f32 %v1165_v1, %v3379_v54  ;;  %v859_v8 = vpop.f32.mrf.mxu2  ;;  %v1578_v27 = vadd.f32 1.0, %v2883_v15  ;;  %2886 = vtanh.f32 %v1420_v6 }
  0xdd   : > { %v3395_v14 = vpop.f32.mrf.mxu3  ;;  %v1611_v35 = vmul.f32 %v1547_v4, %v1099_v3  ;;  %v1324_v17 = vmul.f32 0.044715, %v1260_v5  ;;  %v860_v55 = vadd.f32 %v3280_v57, %v859_v8  ;;  %v782_v18 = vpop.f32.mrf.mxu0  ;;  %v2527_v4 = vld [vmem:[%s3175_s23 + $0xc4] sm:$0xf0]  ;;  %v2374_v5 = vld [vmem:[%s3175_s23 + $0x1c0] sm:$0xf] }
  0xde   : > { %v953_v2 = vpop.f32.mrf.mxu1  ;;  %v1293_v19 = vmul.f32 0.044715, %v1229_v7  ;;  %v783_v20 = vadd.f32 %v3280_v57, %v782_v18  ;;  %v1642_v46 = vmul.f32 %v1578_v27, %v1130_v33 }
  0xdf   : > { %v2589_v21 = vpack.c.bf16 %v1611_v35, %v1610_v16  ;;  %v1388_v22 = vadd.f32 %v1324_v17, %v3376_v51  ;;  %v3401_v24 = vadd.f32 %v3322_v45, %v860_v55  ;;  %v2560_v45 = vld [vmem:[%s3175_s23 + $0x1d4] sm:$0xf]  ;;  %v1101_v16 = vmul.f32 0.5, %v3379_v54 }
  0xe0   : > { %v1357_v29 = vadd.f32 %v1293_v19, %v3379_v54  ;;  %v3404_v30 = vadd.f32 %v951_v43, %v783_v20  ;;  %821 = vmatmul.bf16.gmra.mxu0 %v2239_v10  ;;  %v2387_v58 = vor.u32 %v2560_v45, %v2384_v41  ;;  %v2559_v10 = vld [vmem:[%s3175_s23 + $0x1c4] sm:$0xf0]  ;;  %v2247_v19 = vor.u32 %v2527_v4, %v2246_v28  ;;  %v2528_v41 = vld [vmem:[%s3175_s23 + $0xd4] sm:$0xf] }
  0xe1   : > { %v2885_v32 = vpop.eup %2884  ;;  %2741 = vst [vmem:[%s3357_s9 + $0x8] sm:$0xff] %v2589_v21   ;;  %v1197_v34 = vmul.f32 %v3401_v24, %v3401_v24  ;;  %901 = vmatmul.bf16.gmra.mxu2 %v2367_v12  ;;  %v1452_v42 = vmul.f32 0.7978846, %v1388_v22  ;;  %v1100_v12 = vmul.f32 0.5, %v3355_v25  ;;  %v2375_v20 = vor.u32 %v2559_v10, %v2374_v5 }
  0xe2   : > { %v1579_v37 = vadd.f32 1.0, %v2885_v32  ;;  %v1421_v38 = vmul.f32 0.7978846, %v1357_v29  ;;  %v1166_v39 = vmul.f32 %v3404_v30, %v3404_v30  ;;  %v2887_v59 = vpop.eup %2886 }
  0xe3   : > { %v1261_v43 = vmul.f32 %v1197_v34, %v3401_v24  ;;  %v1548_v6 = vadd.f32 1.0, %v2887_v59 }
  0xe4   : > { %v1643_v53 = vmul.f32 %v1579_v37, %v1131_v36  ;;  %2888 = vtanh.f32 %v1421_v38  ;;  %v1230_v47 = vmul.f32 %v1166_v39, %v3404_v30  ;;  %v862_v48 = vpop.f32.mrf.mxu2 }
  0xe5   : > { %v3419_v49 = vpop.f32.mrf.mxu3  ;;  %v1325_v23 = vmul.f32 0.044715, %v1261_v43  ;;  %v863_v50 = vadd.f32 %v3280_v57, %v862_v48  ;;  %v784_v56 = vpop.f32.mrf.mxu0  ;;  %2890 = vtanh.f32 %v1452_v42  ;;  %v1612_v27 = vmul.f32 %v1548_v6, %v1100_v12  ;;  %v2256_v42 = vld [vmem:[%s3175_s23 + $0xd8] sm:$0xf0]  ;;  %v2254_v12 = vld [vmem:[%s3175_s23 + $0xd0] sm:$0xf] }
  0xe6   : > { %v956_v52 = vpop.f32.mrf.mxu1  ;;  %v2669_v60 = vpack.c.bf16 %v1643_v53, %v1642_v46  ;;  %v1294_v62 = vmul.f32 0.044715, %v1230_v47  ;;  %v785_v63 = vadd.f32 %v3280_v57, %v784_v56  ;;  %v1133_v53 = vmul.f32 0.5, %v3401_v24 }
  0xe7   : > { %v1389_v0 = vadd.f32 %v1325_v23, %v3401_v24  ;;  %v3425_v61 = vadd.f32 %v3346_v13, %v863_v50  ;;  %v2392_v50 = vld [vmem:[%s3175_s23 + $0x1e8] sm:$0xf0] }
  0xe8   : > { %2757 = vst [vmem:[%s3357_s9 + $0x88] sm:$0xff] %v2669_v60   ;;  %v1358_v1 = vadd.f32 %v1294_v62, %v3404_v30  ;;  %v3430_v3 = vadd.f32 %v953_v2, %v785_v63 }
  0xe9   : > { %2464 = vmatmul.msk.bf16.gmra.mxu1 %vm657_vm1, %v2251_v44  ;;  %v1453_v7 = vmul.f32 0.7978846, %v1389_v0  ;;  %v1198_v8 = vmul.f32 %v3425_v61, %v3425_v61  ;;  %v1132_v44 = vmul.f32 0.5, %v3376_v51 }
  0xea   : > { %2481 = vmatmul.msk.bf16.gmra.mxu3 %vm657_vm1, %v2387_v58  ;;  %v2889_v13 = vpop.eup %2888  ;;  %v1167_v15 = vmul.f32 %v3430_v3, %v3430_v3  ;;  %v1422_v55 = vmul.f32 0.7978846, %v1358_v1  ;;  %v2259_v58 = vor.u32 %v2528_v41, %v2256_v42 }
  0xeb   : > { %v1549_v35 = vadd.f32 1.0, %v2889_v13  ;;  %2892 = vtanh.f32 %v1453_v7  ;;  %v1262_v17 = vmul.f32 %v1198_v8, %v3425_v61  ;;  %v2891_v22 = vpop.eup %2890 }
  0xec   : > { %v1231_v2 = vmul.f32 %v1167_v15, %v3430_v3  ;;  %v864_v18 = vpop.f32.mrf.mxu2  ;;  %v1580_v37 = vadd.f32 1.0, %v2891_v22  ;;  %2894 = vtanh.f32 %v1422_v55 }
  0xed   : > { %v3445_v21 = vpop.f32.mrf.mxu3  ;;  %v1613_v25 = vmul.f32 %v1549_v35, %v1101_v16  ;;  %v1326_v29 = vmul.f32 0.044715, %v1262_v17  ;;  %v865_v54 = vadd.f32 %v3280_v57, %v864_v18  ;;  %v787_v11 = vpop.f32.mrf.mxu0  ;;  %v2529_v35 = vld [vmem:[%s3175_s23 + $0xd4] sm:$0xf0]  ;;  %v2382_v17 = vld [vmem:[%s3175_s23 + $0x1d0] sm:$0xf] }
  0xee   : > { %v958_v31 = vpop.f32.mrf.mxu1  ;;  %v1295_v32 = vmul.f32 0.044715, %v1231_v2  ;;  %v788_v33 = vadd.f32 %v3280_v57, %v787_v11  ;;  %v1644_v59 = vmul.f32 %v1580_v37, %v1132_v44 }
  0xef   : > { %v2594_v34 = vpack.c.bf16 %v1613_v25, %v1612_v27  ;;  %v1390_v45 = vadd.f32 %v1326_v29, %v3425_v61  ;;  %v3451_v36 = vadd.f32 %v3370_v40, %v865_v54  ;;  %v2562_v40 = vld [vmem:[%s3175_s23 + $0x1e4] sm:$0xf]  ;;  %v1103_v27 = vmul.f32 0.5, %v3430_v3 }
  0xf0   : > { %v1359_v38 = vadd.f32 %v1295_v32, %v3430_v3  ;;  %v3454_v39 = vadd.f32 %v956_v52, %v788_v33  ;;  %826 = vmatmul.bf16.gmra.mxu0 %v2247_v19  ;;  %v2395_v4 = vor.u32 %v2562_v40, %v2392_v50  ;;  %v2561_v19 = vld [vmem:[%s3175_s23 + $0x1d4] sm:$0xf0]  ;;  %v2255_v32 = vor.u32 %v2529_v35, %v2254_v12  ;;  %v2530_v50 = vld [vmem:[%s3175_s23 + $0xe4] sm:$0xf] }
  0xf1   : > { %v2893_v43 = vpop.eup %2892  ;;  %2742 = vst [vmem:[%s3357_s9 + $0x10] sm:$0xff] %v2594_v34   ;;  %v1199_v46 = vmul.f32 %v3451_v36, %v3451_v36  ;;  %906 = vmatmul.bf16.gmra.mxu2 %v2375_v20  ;;  %v1454_v52 = vmul.f32 0.7978846, %v1390_v45  ;;  %v1102_v20 = vmul.f32 0.5, %v3404_v30  ;;  %v2383_v33 = vor.u32 %v2561_v19, %v2382_v17 }
  0xf2   : > { %v1581_v47 = vadd.f32 1.0, %v2893_v43  ;;  %v1423_v48 = vmul.f32 0.7978846, %v1359_v38  ;;  %v1168_v23 = vmul.f32 %v3454_v39, %v3454_v39  ;;  %v2895_v5 = vpop.eup %2894 }
  0xf3   : > { %v1263_v56 = vmul.f32 %v1199_v46, %v3451_v36  ;;  %v1550_v55 = vadd.f32 1.0, %v2895_v5 }
  0xf4   : > { %v1645_v51 = vmul.f32 %v1581_v47, %v1133_v53  ;;  %2896 = vtanh.f32 %v1423_v48  ;;  %v1232_v60 = vmul.f32 %v1168_v23, %v3454_v39  ;;  %v867_v62 = vpop.f32.mrf.mxu2 }
  0xf5   : > { %v3469_v63 = vpop.f32.mrf.mxu3  ;;  %v1327_v24 = vmul.f32 0.044715, %v1263_v56  ;;  %v868_v0 = vadd.f32 %v3280_v57, %v867_v62  ;;  %v789_v1 = vpop.f32.mrf.mxu0  ;;  %2898 = vtanh.f32 %v1454_v52  ;;  %v1614_v37 = vmul.f32 %v1550_v55, %v1102_v20  ;;  %v2264_v52 = vld [vmem:[%s3175_s23 + $0xe8] sm:$0xf0]  ;;  %v2262_v20 = vld [vmem:[%s3175_s23 + $0xe0] sm:$0xf] }
  0xf6   : > { %v961_v28 = vpop.f32.mrf.mxu1  ;;  %v2674_v6 = vpack.c.bf16 %v1645_v51, %v1644_v59  ;;  %v1296_v7 = vmul.f32 0.044715, %v1232_v60  ;;  %v790_v8 = vadd.f32 %v3280_v57, %v789_v1  ;;  %v1135_v51 = vmul.f32 0.5, %v3451_v36 }
  0xf7   : > { %v1391_v10 = vadd.f32 %v1327_v24, %v3451_v36  ;;  %v3475_v13 = vadd.f32 %v3395_v14, %v868_v0  ;;  %v2400_v0 = vld [vmem:[%s3175_s23 + $0x1f8] sm:$0xf0] }
  0xf8   : > { %2758 = vst [vmem:[%s3357_s9 + $0x90] sm:$0xff] %v2674_v6   ;;  %v1360_v15 = vadd.f32 %v1296_v7, %v3454_v39  ;;  %v3480_v16 = vadd.f32 %v958_v31, %v790_v8 }
  0xf9   : > { %2465 = vmatmul.msk.bf16.gmra.mxu1 %vm657_vm1, %v2259_v58  ;;  %v1455_v2 = vmul.f32 0.7978846, %v1391_v10  ;;  %v1200_v18 = vmul.f32 %v3475_v13, %v3475_v13  ;;  %v1134_v58 = vmul.f32 0.5, %v3425_v61 }
  0xfa   : > { %2482 = vmatmul.msk.bf16.gmra.mxu3 %vm657_vm1, %v2395_v4  ;;  %v2897_v14 = vpop.eup %2896  ;;  %v1169_v22 = vmul.f32 %v3480_v16, %v3480_v16  ;;  %v1424_v54 = vmul.f32 0.7978846, %v1360_v15  ;;  %v2267_v4 = vor.u32 %v2530_v50, %v2264_v52 }
  0xfb   : > { %v1551_v25 = vadd.f32 1.0, %v2897_v14  ;;  %2900 = vtanh.f32 %v1455_v2  ;;  %v1264_v29 = vmul.f32 %v1200_v18, %v3475_v13  ;;  %v2899_v45 = vpop.eup %2898 }
  0xfc   : > { %v1233_v31 = vmul.f32 %v1169_v22, %v3480_v16  ;;  %v869_v11 = vpop.f32.mrf.mxu2  ;;  %v1582_v47 = vadd.f32 1.0, %v2899_v45  ;;  %2902 = vtanh.f32 %v1424_v54 }
  0xfd   : > { %v3495_v34 = vpop.f32.mrf.mxu3  ;;  %v1615_v30 = vmul.f32 %v1551_v25, %v1103_v27  ;;  %v1328_v38 = vmul.f32 0.044715, %v1264_v29  ;;  %v870_v3 = vadd.f32 %v3280_v57, %v869_v11  ;;  %v792_v42 = vpop.f32.mrf.mxu0  ;;  %v2531_v25 = vld [vmem:[%s3175_s23 + $0xe4] sm:$0xf0]  ;;  %v2390_v29 = vld [vmem:[%s3175_s23 + $0x1e0] sm:$0xf] }
  0xfe   : > { %v963_v41 = vpop.f32.mrf.mxu1  ;;  %v1297_v43 = vmul.f32 0.044715, %v1233_v31  ;;  %v793_v44 = vadd.f32 %v3280_v57, %v792_v42  ;;  %v1646_v5 = vmul.f32 %v1582_v47, %v1134_v58 }
  0xff   : > { %v2599_v46 = vpack.c.bf16 %v1615_v30, %v1614_v37  ;;  %v1392_v40 = vadd.f32 %v1328_v38, %v3475_v13  ;;  %v3501_v53 = vadd.f32 %v3419_v49, %v870_v3  ;;  %v2564_v49 = vld [vmem:[%s3175_s23 + $0x1f4] sm:$0xf]  ;;  %v1105_v37 = vmul.f32 0.5, %v3480_v16 }
 0x100   : > { %v1361_v48 = vadd.f32 %v1297_v43, %v3480_v16  ;;  %v3504_v23 = vadd.f32 %v961_v28, %v793_v44  ;;  %831 = vmatmul.bf16.gmra.mxu0 %v2255_v32  ;;  %v2403_v35 = vor.u32 %v2564_v49, %v2400_v0  ;;  %v2563_v32 = vld [vmem:[%s3175_s23 + $0x1e4] sm:$0xf0]  ;;  %v2263_v43 = vor.u32 %v2531_v25, %v2262_v20  ;;  %v2532_v0 = vld [vmem:[%s3175_s23 + $0xf4] sm:$0xf] }
 0x101   : > { %v2901_v56 = vpop.eup %2900  ;;  %2743 = vst [vmem:[%s3357_s9 + $0x18] sm:$0xff] %v2599_v46   ;;  %v1201_v59 = vmul.f32 %v3501_v53, %v3501_v53  ;;  %911 = vmatmul.bf16.gmra.mxu2 %v2383_v33  ;;  %v1456_v28 = vmul.f32 0.7978846, %v1392_v40  ;;  %v1104_v33 = vmul.f32 0.5, %v3454_v39  ;;  %v2391_v44 = vor.u32 %v2563_v32, %v2390_v29 }
 0x102   : > { %v1583_v60 = vadd.f32 1.0, %v2901_v56  ;;  %v1425_v62 = vmul.f32 0.7978846, %v1361_v48  ;;  %v1170_v24 = vmul.f32 %v3504_v23, %v3504_v23  ;;  %v2903_v17 = vpop.eup %2902 }
 0x103   : > { %v1265_v1 = vmul.f32 %v1201_v59, %v3501_v53  ;;  %v1552_v54 = vadd.f32 1.0, %v2903_v17 }
 0x104   : > { %v1647_v61 = vmul.f32 %v1583_v60, %v1135_v51  ;;  %2904 = vtanh.f32 %v1425_v62  ;;  %v1234_v6 = vmul.f32 %v1170_v24, %v3504_v23  ;;  %v872_v7 = vpop.f32.mrf.mxu2 }
 0x105   : > { %v3519_v8 = vpop.f32.mrf.mxu3  ;;  %v1329_v36 = vmul.f32 0.044715, %v1265_v1  ;;  %v873_v10 = vadd.f32 %v3280_v57, %v872_v7  ;;  %v794_v15 = vpop.f32.mrf.mxu0  ;;  %2906 = vtanh.f32 %v1456_v28  ;;  %v1616_v47 = vmul.f32 %v1552_v54, %v1104_v33  ;;  %v2272_v28 = vld [vmem:[%s3175_s23 + $0xf8] sm:$0xf0]  ;;  %v2533_v33 = vld [vmem:[%s3175_s23 + $0xf4] sm:$0xf0] }
 0x106   : > { %v966_v12 = vpop.f32.mrf.mxu1  ;;  %v2679_v55 = vpack.c.bf16 %v1647_v61, %v1646_v5  ;;  %v1298_v2 = vmul.f32 0.044715, %v1234_v6  ;;  %v795_v18 = vadd.f32 %v3280_v57, %v794_v15 }
 0x107   : > { %v1393_v19 = vadd.f32 %v1329_v36, %v3501_v53  ;;  %v3525_v14 = vadd.f32 %v3445_v21, %v873_v10 }
 0x108   : > { %2759 = vst [vmem:[%s3357_s9 + $0x98] sm:$0xff] %v2679_v55   ;;  %v1362_v22 = vadd.f32 %v1298_v2, %v3504_v23  ;;  %v3530_v27 = vadd.f32 %v963_v41, %v795_v18 }
 0x109   : > { %2466 = vmatmul.msk.bf16.gmra.mxu1 %vm657_vm1, %v2267_v4  ;;  %v1457_v31 = vmul.f32 0.7978846, %v1393_v19  ;;  %v1202_v11 = vmul.f32 %v3525_v14, %v3525_v14  ;;  %v1136_v4 = vmul.f32 0.5, %v3475_v13 }
 0x10a   : > { %2483 = vmatmul.msk.bf16.gmra.mxu3 %vm657_vm1, %v2403_v35  ;;  %v2905_v21 = vpop.eup %2904  ;;  %v1171_v45 = vmul.f32 %v3530_v27, %v3530_v27  ;;  %v1426_v3 = vmul.f32 0.7978846, %v1362_v22 }
 0x10b   : > { %v1553_v30 = vadd.f32 1.0, %v2905_v21  ;;  %2908 = vtanh.f32 %v1457_v31  ;;  %v1266_v38 = vmul.f32 %v1202_v11, %v3525_v14  ;;  %v2907_v40 = vpop.eup %2906  ;;  %v2270_v11 = vld [vmem:[%s3175_s23 + $0xf0] sm:$0xf] }
 0x10c   : > { %v1235_v41 = vmul.f32 %v1171_v45, %v3530_v27  ;;  %v874_v42 = vpop.f32.mrf.mxu2  ;;  %v1584_v60 = vadd.f32 1.0, %v2907_v40  ;;  %2910 = vtanh.f32 %v1426_v3  ;;  %v2398_v45 = vld [vmem:[%s3175_s23 + $0x1f0] sm:$0xf]  ;;  %v2565_v3 = vld [vmem:[%s3175_s23 + $0x1f4] sm:$0xf0] }
 0x10d   : > { %v3545_v46 = vpop.f32.mrf.mxu3  ;;  %v1617_v39 = vmul.f32 %v1553_v30, %v1105_v37  ;;  %v1330_v48 = vmul.f32 0.044715, %v1266_v38  ;;  %v875_v16 = vadd.f32 %v3280_v57, %v874_v42  ;;  %v797_v52 = vpop.f32.mrf.mxu0 }
 0x10e   : > { %v968_v50 = vpop.f32.mrf.mxu1  ;;  %v1299_v56 = vmul.f32 0.044715, %v1235_v41  ;;  %v798_v58 = vadd.f32 %v3280_v57, %v797_v52  ;;  %v1648_v15 = vmul.f32 %v1584_v60, %v1136_v4 }
 0x10f   : > { %v2604_v59 = vpack.c.bf16 %v1617_v39, %v1616_v47  ;;  %v1394_v49 = vadd.f32 %v1330_v48, %v3525_v14  ;;  %v3551_v51 = vadd.f32 %v3469_v63, %v875_v16  ;;  %v1137_v63 = vmul.f32 0.5, %v3501_v53 }
 0x110   : > { %v1363_v62 = vadd.f32 %v1299_v56, %v3530_v27  ;;  %v3554_v24 = vadd.f32 %v966_v12, %v798_v58  ;;  %836 = vmatmul.bf16.gmra.mxu0 %v2263_v43  ;;  %v2275_v12 = vor.u32 %v2532_v0, %v2272_v28  ;;  %v1107_v43 = vmul.f32 0.5, %v3530_v27 }
 0x111   : > { %v2909_v1 = vpop.eup %2908  ;;  %2744 = vst [vmem:[%s3357_s9 + $0x20] sm:$0xff] %v2604_v59   ;;  %v1203_v5 = vmul.f32 %v3551_v51, %v3551_v51  ;;  %916 = vmatmul.bf16.gmra.mxu2 %v2391_v44  ;;  %v1458_v36 = vmul.f32 0.7978846, %v1394_v49  ;;  %v2271_v16 = vor.u32 %v2533_v33, %v2270_v11 }
 0x112   : > { %v1585_v61 = vadd.f32 1.0, %v2909_v1  ;;  %v1427_v6 = vmul.f32 0.7978846, %v1363_v62  ;;  %v1172_v7 = vmul.f32 %v3554_v24, %v3554_v24  ;;  %v2911_v20 = vpop.eup %2910 }
 0x113   : > { %v1267_v10 = vmul.f32 %v1203_v5, %v3551_v51  ;;  %v1554_v37 = vadd.f32 1.0, %v2911_v20 }
 0x114   : > { %v1649_v35 = vmul.f32 %v1585_v61, %v1137_v63  ;;  %2912 = vtanh.f32 %v1427_v6  ;;  %v1236_v13 = vmul.f32 %v1172_v7, %v3554_v24  ;;  %v877_v17 = vpop.f32.mrf.mxu2  ;;  %v2534_v6 = vld [vmem:[%s3175_s23 + $0x104] sm:$0xf]  ;;  %v2280_v7 = vld [vmem:[%s3175_s23 + $0x108] sm:$0xf0] }
 0x115   : > { %v3567_v55 = vpop.f32.mrf.mxu3  ;;  %v1331_v53 = vmul.f32 0.044715, %v1267_v10  ;;  %v878_v2 = vadd.f32 %v3280_v57, %v877_v17  ;;  %v799_v19 = vpop.f32.mrf.mxu0  ;;  %2914 = vtanh.f32 %v1458_v36  ;;  %v1138_v10 = vmul.f32 0.5, %v3525_v14 }
 0x116   : > { %v971_v18 = vpop.f32.mrf.mxu1  ;;  %v2684_v22 = vpack.c.bf16 %v1649_v35, %v1648_v15  ;;  %v1300_v25 = vmul.f32 0.044715, %v1236_v13  ;;  %v800_v29 = vadd.f32 %v3280_v57, %v799_v19 }
 0x117   : > { %v1395_v54 = vadd.f32 %v1331_v53, %v3551_v51  ;;  %v3573_v31 = vadd.f32 %v3495_v34, %v878_v2  ;;  %v1106_v34 = vmul.f32 0.5, %v3504_v23  ;;  %v2283_v2 = vor.u32 %v2534_v6, %v2280_v7 }
 0x118   : > { %2760 = vst [vmem:[%s3357_s9 + $0xa0] sm:$0xff] %v2684_v22   ;;  %v1364_v32 = vadd.f32 %v1300_v25, %v3554_v24  ;;  %v3578_v21 = vadd.f32 %v968_v50, %v800_v29  ;;  %v2399_v50 = vor.u32 %v2565_v3, %v2398_v45 }
 0x119   : > { %2467 = vmatmul.msk.bf16.gmra.mxu1 %vm657_vm1, %v2275_v12  ;;  %v1459_v30 = vmul.f32 0.7978846, %v1395_v54  ;;  %v1204_v38 = vmul.f32 %v3573_v31, %v3573_v31  ;;  %v1618_v58 = vmul.f32 %v1554_v37, %v1106_v34 }
 0x11a   : > { %v2913_v41 = vpop.eup %2912  ;;  %v1173_v42 = vmul.f32 %v3578_v21, %v3578_v21  ;;  %v1428_v47 = vmul.f32 0.7978846, %v1364_v32 }
 0x11b   : > { %v1555_v44 = vadd.f32 1.0, %v2913_v41  ;;  %2916 = vtanh.f32 %v1459_v30  ;;  %v1268_v40 = vmul.f32 %v1204_v38, %v3573_v31  ;;  %v2915_v56 = vpop.eup %2914 }
 0x11c   : > { %v1237_v39 = vmul.f32 %v1173_v42, %v3578_v21  ;;  %v879_v48 = vpop.f32.mrf.mxu2  ;;  %v1586_v5 = vadd.f32 1.0, %v2915_v56  ;;  %2918 = vtanh.f32 %v1428_v47 }
 0x11d   : > { %v3592_v52 = vpop.f32.mrf.mxu3  ;;  %v1619_v23 = vmul.f32 %v1555_v44, %v1107_v43  ;;  %v1332_v59 = vmul.f32 0.044715, %v1268_v40  ;;  %v880_v27 = vadd.f32 %v3280_v57, %v879_v48  ;;  %v802_v60 = vpop.f32.mrf.mxu0 }
 0x11e   : > { %v973_v49 = vpop.f32.mrf.mxu1  ;;  %v1301_v62 = vmul.f32 0.044715, %v1237_v39  ;;  %v803_v0 = vadd.f32 %v3280_v57, %v802_v60 }
 0x11f   : > { %v2609_v28 = vpack.c.bf16 %v1619_v23, %v1618_v58  ;;  %v1396_v1 = vadd.f32 %v1332_v59, %v3573_v31  ;;  %v3598_v4 = vadd.f32 %v3519_v8, %v880_v27  ;;  %v1139_v8 = vmul.f32 0.5, %v3551_v51 }
 0x120   : > { %v1365_v63 = vadd.f32 %v1301_v62, %v3578_v21  ;;  %v3601_v61 = vadd.f32 %v971_v18, %v803_v0  ;;  %841 = vmatmul.bf16.gmra.mxu0 %v2271_v16  ;;  %v1650_v18 = vmul.f32 %v1586_v5, %v1138_v10 }
 0x121   : > { %v2917_v36 = vpop.eup %2916  ;;  %2745 = vst [vmem:[%s3357_s9 + $0x28] sm:$0xff] %v2609_v28   ;;  %v1205_v12 = vmul.f32 %v3598_v4, %v3598_v4  ;;  %921 = vmatmul.bf16.gmra.mxu2 %v2399_v50  ;;  %v1460_v17 = vmul.f32 0.7978846, %v1396_v1 }
 0x122   : > { %v1587_v15 = vadd.f32 1.0, %v2917_v36  ;;  %v1429_v35 = vmul.f32 0.7978846, %v1365_v63  ;;  %v1174_v13 = vmul.f32 %v3601_v61, %v3601_v61  ;;  %v2919_v11 = vpop.eup %2918  ;;  %v1140_v36 = vmul.f32 0.5, %v3573_v31 }
 0x123   : > { %v1269_v53 = vmul.f32 %v1205_v12, %v3598_v4  ;;  %v1556_v41 = vadd.f32 1.0, %v2919_v11  ;;  %v1141_v12 = vmul.f32 0.5, %v3598_v4 }
 0x124   : > { %v1651_v19 = vmul.f32 %v1587_v15, %v1139_v8  ;;  %2920 = vtanh.f32 %v1429_v35  ;;  %v1238_v14 = vmul.f32 %v1174_v13, %v3601_v61  ;;  %v882_v20 = vpop.f32.mrf.mxu2 }
 0x125   : > { %v3614_v22 = vpop.f32.mrf.mxu3  ;;  %v1333_v25 = vmul.f32 0.044715, %v1269_v53  ;;  %v883_v51 = vadd.f32 %v3280_v57, %v882_v20  ;;  %v804_v54 = vpop.f32.mrf.mxu0  ;;  %2922 = vtanh.f32 %v1460_v17 }
 0x126   : > { %v976_v29 = vpop.f32.mrf.mxu1  ;;  %v2689_v32 = vpack.c.bf16 %v1651_v19, %v1650_v18  ;;  %v1302_v33 = vmul.f32 0.044715, %v1238_v14  ;;  %v805_v45 = vadd.f32 %v3280_v57, %v804_v54  ;;  %v1108_v57 = vmul.f32 0.5, %v3554_v24  ;;  %v3640_v24 = vld [vmem:[%s4098_s2] ss:$0 sm:$0xff] }
 0x127   : > { %v1397_v37 = vadd.f32 %v1333_v25, %v3598_v4  ;;  %v3620_v30 = vadd.f32 %v3545_v46, %v883_v51  ;;  %v1109_v46 = vmul.f32 0.5, %v3578_v21 }
 0x128   : > { %2761 = vst [vmem:[%s3357_s9 + $0xa8] sm:$0xff] %v2689_v32   ;;  %v1366_v38 = vadd.f32 %v1302_v33, %v3601_v61  ;;  %v3624_v3 = vadd.f32 %v973_v49, %v805_v45  ;;  %v1620_v58 = vmul.f32 %v1556_v41, %v1108_v57 }
 0x129   : > { %2468 = vmatmul.msk.bf16.gmra.mxu1 %vm657_vm1, %v2283_v2  ;;  %v1461_v34 = vmul.f32 0.7978846, %v1397_v37  ;;  %v1206_v42 = vmul.f32 %v3620_v30, %v3620_v30 }
 0x12a   : > { %v2921_v43 = vpop.eup %2920  ;;  %v1175_v44 = vmul.f32 %v3624_v3, %v3624_v3  ;;  %v1430_v39 = vmul.f32 0.7978846, %v1366_v38  ;;  %v1111_v57 = vmul.f32 0.5, %v3624_v3 }
 0x12b   : > { %v1557_v40 = vadd.f32 1.0, %v2921_v43  ;;  %2924 = vtanh.f32 %v1461_v34  ;;  %v1270_v47 = vmul.f32 %v1206_v42, %v3620_v30  ;;  %v2923_v56 = vpop.eup %2922  ;;  %v1110_v42 = vmul.f32 0.5, %v3601_v61 }
 0x12c   : > { %v1239_v48 = vmul.f32 %v1175_v44, %v3624_v3  ;;  %v884_v16 = vpop.f32.mrf.mxu2  ;;  %v1588_v5 = vadd.f32 1.0, %v2923_v56  ;;  %2926 = vtanh.f32 %v1430_v39 }
 0x12d   : > { %v3635_v50 = vpop.f32.mrf.mxu3  ;;  %v1621_v23 = vmul.f32 %v1557_v40, %v1109_v46  ;;  %v1334_v59 = vmul.f32 0.044715, %v1270_v47  ;;  %v885_v21 = vadd.f32 %v3640_v24, %v884_v16  ;;  %v807_v49 = vpop.f32.mrf.mxu0 }
 0x12e   : > { %v978_v27 = vpop.f32.mrf.mxu1  ;;  %v1303_v60 = vmul.f32 0.044715, %v1239_v48  ;;  %v808_v62 = vadd.f32 %v3640_v24, %v807_v49  ;;  %v1652_v17 = vmul.f32 %v1588_v5, %v1140_v36 }
 0x12f   : > { %v2614_v0 = vpack.c.bf16 %v1621_v23, %v1620_v58  ;;  %v1398_v28 = vadd.f32 %v1334_v59, %v3620_v30  ;;  %v3646_v1 = vadd.f32 %v3567_v55, %v885_v21 }
 0x130   : > { %v1367_v63 = vadd.f32 %v1303_v60, %v3624_v3  ;;  %v3649_v6 = vadd.f32 %v976_v29, %v808_v62 }
 0x131   : > { %v2925_v7 = vpop.eup %2924  ;;  %2746 = vst [vmem:[%s3357_s9 + $0x30] sm:$0xff] %v2614_v0   ;;  %v1207_v10 = vmul.f32 %v3646_v1, %v3646_v1  ;;  %v1462_v35 = vmul.f32 0.7978846, %v1398_v28  ;;  %v1143_v36 = vmul.f32 0.5, %v3646_v1 }
 0x132   : > { %v1589_v8 = vadd.f32 1.0, %v2925_v7  ;;  %v1431_v15 = vmul.f32 0.7978846, %v1367_v63  ;;  %v1176_v55 = vmul.f32 %v3649_v6, %v3649_v6  ;;  %v2927_v20 = vpop.eup %2926  ;;  %v1142_v63 = vmul.f32 0.5, %v3620_v30 }
 0x133   : > { %v1271_v13 = vmul.f32 %v1207_v10, %v3646_v1  ;;  %v1558_v37 = vadd.f32 1.0, %v2927_v20 }
 0x134   : > { %v1653_v53 = vmul.f32 %v1589_v8, %v1141_v12  ;;  %2928 = vtanh.f32 %v1431_v15  ;;  %v1240_v31 = vmul.f32 %v1176_v55, %v3649_v6  ;;  %v887_v2 = vpop.f32.mrf.mxu2 }
 0x135   : > { %v1335_v18 = vmul.f32 0.044715, %v1271_v13  ;;  %v888_v19 = vadd.f32 %v3640_v24, %v887_v2  ;;  %v809_v4 = vpop.f32.mrf.mxu0  ;;  %v3662_v54 = vpop.f32.mrf.mxu3  ;;  %2930 = vtanh.f32 %v1462_v35  ;;  %v1622_v48 = vmul.f32 %v1558_v37, %v1110_v42 }
 0x136   : > { %v981_v14 = vpop.f32.mrf.mxu1  ;;  %v2694_v25 = vpack.c.bf16 %v1653_v53, %v1652_v17  ;;  %v1304_v51 = vmul.f32 0.044715, %v1240_v31  ;;  %v810_v29 = vadd.f32 %v3640_v24, %v809_v4 }
 0x137   : > { %v1399_v11 = vadd.f32 %v1335_v18, %v3646_v1  ;;  %v3666_v32 = vadd.f32 %v3592_v52, %v888_v19 }
 0x138   : > { %2762 = vst [vmem:[%s3357_s9 + $0xb0] sm:$0xff] %v2694_v25   ;;  %v1368_v33 = vadd.f32 %v1304_v51, %v3649_v6  ;;  %v3670_v45 = vadd.f32 %v978_v27, %v810_v29 }
 0x139   : > { %v1463_v38 = vmul.f32 0.7978846, %v1399_v11  ;;  %v1208_v41 = vmul.f32 %v3666_v32, %v3666_v32 }
 0x13a   : > { %v2929_v34 = vpop.eup %2928  ;;  %v1177_v43 = vmul.f32 %v3670_v45, %v3670_v45  ;;  %v1432_v46 = vmul.f32 0.7978846, %v1368_v33 }
 0x13b   : > { %v1559_v52 = vadd.f32 1.0, %v2929_v34  ;;  %2932 = vtanh.f32 %v1463_v38  ;;  %v1272_v44 = vmul.f32 %v1208_v41, %v3666_v32  ;;  %v2931_v39 = vpop.eup %2930  ;;  %v1112_v38 = vmul.f32 0.5, %v3649_v6 }
 0x13c   : > { %v1241_v40 = vmul.f32 %v1177_v43, %v3670_v45  ;;  %v889_v47 = vpop.f32.mrf.mxu2  ;;  %v1590_v60 = vadd.f32 1.0, %v2931_v39  ;;  %2934 = vtanh.f32 %v1432_v46 }
 0x13d   : > { %v1623_v16 = vmul.f32 %v1559_v52, %v1111_v57  ;;  %v1336_v56 = vmul.f32 0.044715, %v1272_v44  ;;  %v890_v61 = vadd.f32 %v3640_v24, %v889_v47  ;;  %v812_v23 = vpop.f32.mrf.mxu0  ;;  %v3689_v28 = vpop.f32.mrf.mxu3 }
 0x13e   : > { %v983_v58 = vpop.f32.mrf.mxu1  ;;  %v1305_v59 = vmul.f32 0.044715, %v1241_v40  ;;  %v813_v3 = vadd.f32 %v3640_v24, %v812_v23  ;;  %v1654_v55 = vmul.f32 %v1590_v60, %v1142_v63  ;;  %v1144_v60 = vmul.f32 0.5, %v3666_v32 }
 0x13f   : > { %v2619_v21 = vpack.c.bf16 %v1623_v16, %v1622_v48  ;;  %v1400_v27 = vadd.f32 %v1336_v56, %v3666_v32  ;;  %v3684_v49 = vadd.f32 %v3614_v22, %v890_v61 }
 0x140   : > { %v1369_v62 = vadd.f32 %v1305_v59, %v3670_v45  ;;  %v3687_v0 = vadd.f32 %v981_v14, %v813_v3 }
 0x141   : > { %v2933_v5 = vpop.eup %2932  ;;  %2747 = vst [vmem:[%s3357_s9 + $0x38] sm:$0xff] %v2619_v21   ;;  %v1209_v7 = vmul.f32 %v3684_v49, %v3684_v49  ;;  %v1464_v8 = vmul.f32 0.7978846, %v1400_v27 }
 0x142   : > { %v1591_v10 = vadd.f32 1.0, %v2933_v5  ;;  %v1433_v22 = vmul.f32 0.7978846, %v1369_v62  ;;  %v1178_v12 = vmul.f32 %v3687_v0, %v3687_v0  ;;  %v2935_v2 = vpop.eup %2934  ;;  %v1145_v5 = vmul.f32 0.5, %v3684_v49 }
 0x143   : > { %v1273_v15 = vmul.f32 %v1209_v7, %v3684_v49  ;;  %v1560_v29 = vadd.f32 1.0, %v2935_v2 }
 0x144   : > { %v1655_v35 = vmul.f32 %v1591_v10, %v1143_v36  ;;  %2936 = vtanh.f32 %v1433_v22  ;;  %v1242_v30 = vmul.f32 %v1178_v12, %v3687_v0  ;;  %v892_v13 = vpop.f32.mrf.mxu2 }
 0x145   : > { %v1337_v17 = vmul.f32 0.044715, %v1273_v15  ;;  %v893_v53 = vadd.f32 %v3640_v24, %v892_v13  ;;  %v814_v1 = vpop.f32.mrf.mxu0  ;;  %2938 = vtanh.f32 %v1464_v8  ;;  %v3715_v34 = vpop.f32.mrf.mxu3  ;;  %v1624_v40 = vmul.f32 %v1560_v29, %v1112_v38 }
 0x146   : > { %v986_v31 = vpop.f32.mrf.mxu1  ;;  %v2699_v18 = vpack.c.bf16 %v1655_v35, %v1654_v55  ;;  %v1306_v19 = vmul.f32 0.044715, %v1242_v30  ;;  %v815_v14 = vadd.f32 %v3640_v24, %v814_v1 }
 0x147   : > { %v1401_v4 = vadd.f32 %v1337_v17, %v3684_v49  ;;  %v3704_v20 = vadd.f32 %v3635_v50, %v893_v53  ;;  %v1113_v50 = vmul.f32 0.5, %v3670_v45 }
 0x148   : > { %2763 = vst [vmem:[%s3357_s9 + $0xb8] sm:$0xff] %v2699_v18   ;;  %v1370_v25 = vadd.f32 %v1306_v19, %v3687_v0  ;;  %v3708_v51 = vadd.f32 %v983_v58, %v815_v14 }
 0x149   : > { %v1465_v11 = vmul.f32 0.7978846, %v1401_v4  ;;  %v1210_v33 = vmul.f32 %v3704_v20, %v3704_v20 }
 0x14a   : > { %v2937_v37 = vpop.eup %2936  ;;  %v1179_v41 = vmul.f32 %v3708_v51, %v3708_v51  ;;  %v1434_v57 = vmul.f32 0.7978846, %v1370_v25 }
 0x14b   : > { %v1561_v42 = vadd.f32 1.0, %v2937_v37  ;;  %2940 = vtanh.f32 %v1465_v11  ;;  %v1274_v43 = vmul.f32 %v1210_v33, %v3704_v20  ;;  %v2939_v46 = vpop.eup %2938  ;;  %v1114_v11 = vmul.f32 0.5, %v3687_v0 }
 0x14c   : > { %v1243_v52 = vmul.f32 %v1179_v41, %v3708_v51  ;;  %v894_v44 = vpop.f32.mrf.mxu2  ;;  %v1592_v59 = vadd.f32 1.0, %v2939_v46  ;;  %2942 = vtanh.f32 %v1434_v57  ;;  %v1115_v37 = vmul.f32 0.5, %v3708_v51 }
 0x14d   : > { %v1625_v47 = vmul.f32 %v1561_v42, %v1113_v50  ;;  %v1338_v6 = vmul.f32 0.044715, %v1274_v43  ;;  %v895_v39 = vadd.f32 %v3640_v24, %v894_v44  ;;  %v817_v16 = vpop.f32.mrf.mxu0  ;;  %v3738_v15 = vpop.f32.mrf.mxu3 }
 0x14e   : > { %v988_v48 = vpop.f32.mrf.mxu1  ;;  %v1307_v56 = vmul.f32 0.044715, %v1243_v52  ;;  %v818_v45 = vadd.f32 %v3640_v24, %v817_v16  ;;  %v1656_v22 = vmul.f32 %v1592_v59, %v1144_v60  ;;  %v1146_v59 = vmul.f32 0.5, %v3704_v20 }
 0x14f   : > { %v2624_v61 = vpack.c.bf16 %v1625_v47, %v1624_v40  ;;  %v1402_v58 = vadd.f32 %v1338_v6, %v3704_v20  ;;  %v3724_v23 = vadd.f32 %v3662_v54, %v895_v39 }
 0x150   : > { %v1371_v3 = vadd.f32 %v1307_v56, %v3708_v51  ;;  %v3727_v21 = vadd.f32 %v986_v31, %v818_v45 }
 0x151   : > { %v2941_v27 = vpop.eup %2940  ;;  %2748 = vst [vmem:[%s3357_s9 + $0x40] sm:$0xff] %v2624_v61   ;;  %v1211_v62 = vmul.f32 %v3724_v23, %v3724_v23  ;;  %v1466_v36 = vmul.f32 0.7978846, %v1402_v58 }
 0x152   : > { %v1593_v63 = vadd.f32 1.0, %v2941_v27  ;;  %v1435_v7 = vmul.f32 0.7978846, %v1371_v3  ;;  %v1180_v54 = vmul.f32 %v3727_v21, %v3727_v21  ;;  %v2943_v13 = vpop.eup %2942  ;;  %v1147_v27 = vmul.f32 0.5, %v3724_v23 }
 0x153   : > { %v1275_v10 = vmul.f32 %v1211_v62, %v3724_v23  ;;  %v1562_v14 = vadd.f32 1.0, %v2943_v13 }
 0x154   : > { %v1657_v12 = vmul.f32 %v1593_v63, %v1145_v5  ;;  %2944 = vtanh.f32 %v1435_v7  ;;  %v1244_v32 = vmul.f32 %v1180_v54, %v3727_v21  ;;  %v897_v8 = vpop.f32.mrf.mxu2 }
 0x155   : > { %v1339_v55 = vmul.f32 0.044715, %v1275_v10  ;;  %v898_v49 = vadd.f32 %v3640_v24, %v897_v8  ;;  %v819_v30 = vpop.f32.mrf.mxu0  ;;  %2946 = vtanh.f32 %v1466_v36  ;;  %v1626_v57 = vmul.f32 %v1562_v14, %v1114_v11  ;;  %v1073_v6 = vpop.f32.mrf.mxu3 }
 0x156   : > { %v991_v35 = vpop.f32.mrf.mxu1  ;;  %v2704_v17 = vpack.c.bf16 %v1657_v12, %v1656_v22  ;;  %v1308_v53 = vmul.f32 0.044715, %v1244_v32  ;;  %v820_v31 = vadd.f32 %v3640_v24, %v819_v30 }
 0x157   : > { %v1403_v1 = vadd.f32 %v1339_v55, %v3724_v23  ;;  %v3744_v2 = vadd.f32 %v3689_v28, %v898_v49 }
 0x158   : > { %2764 = vst [vmem:[%s3357_s9 + $0xc0] sm:$0xff] %v2704_v17   ;;  %v1372_v18 = vadd.f32 %v1308_v53, %v3727_v21  ;;  %v3748_v19 = vadd.f32 %v988_v48, %v820_v31 }
 0x159   : > { %v1467_v4 = vmul.f32 0.7978846, %v1403_v1  ;;  %v1212_v25 = vmul.f32 %v3744_v2, %v3744_v2 }
 0x15a   : > { %v2945_v29 = vpop.eup %2944  ;;  %v1181_v33 = vmul.f32 %v3748_v19, %v3748_v19  ;;  %v1436_v41 = vmul.f32 0.7978846, %v1372_v18 }
 0x15b   : > { %v1563_v28 = vadd.f32 1.0, %v2945_v29  ;;  %2948 = vtanh.f32 %v1467_v4  ;;  %v1276_v38 = vmul.f32 %v1212_v25, %v3744_v2  ;;  %v2947_v43 = vpop.eup %2946  ;;  %v1116_v4 = vmul.f32 0.5, %v3727_v21 }
 0x15c   : > { %v1245_v50 = vmul.f32 %v1181_v33, %v3748_v19  ;;  %v899_v42 = vpop.f32.mrf.mxu2  ;;  %v1594_v56 = vadd.f32 1.0, %v2947_v43  ;;  %2950 = vtanh.f32 %v1436_v41 }
 0x15d   : > { %v1627_v52 = vmul.f32 %v1563_v28, %v1115_v37  ;;  %v1340_v44 = vmul.f32 0.044715, %v1276_v38  ;;  %v900_v0 = vadd.f32 %v3640_v24, %v899_v42  ;;  %v822_v40 = vpop.f32.mrf.mxu0  ;;  %v1076_v53 = vpop.f32.mrf.mxu3 }
 0x15e   : > { %v993_v46 = vpop.f32.mrf.mxu1  ;;  %v1309_v47 = vmul.f32 0.044715, %v1245_v50  ;;  %v823_v51 = vadd.f32 %v3640_v24, %v822_v40  ;;  %v1658_v7 = vmul.f32 %v1594_v56, %v1146_v59 }
 0x15f   : > { %v2629_v39 = vpack.c.bf16 %v1627_v52, %v1626_v57  ;;  %v1404_v48 = vadd.f32 %v1340_v44, %v3744_v2  ;;  %v3762_v16 = vadd.f32 %v3715_v34, %v900_v0 }
 0x160   : > { %v1373_v45 = vadd.f32 %v1309_v47, %v3748_v19  ;;  %v3765_v61 = vadd.f32 %v991_v35, %v823_v51 }
 0x161   : > { %v2949_v58 = vpop.eup %2948  ;;  %2749 = vst [vmem:[%s3357_s9 + $0x48] sm:$0xff] %v2629_v39   ;;  %v1213_v3 = vmul.f32 %v3762_v16, %v3762_v16  ;;  %v1468_v5 = vmul.f32 0.7978846, %v1404_v48  ;;  %v1148_v48 = vmul.f32 0.5, %v3744_v2 }
 0x162   : > { %v1595_v60 = vadd.f32 1.0, %v2949_v58  ;;  %v1437_v62 = vmul.f32 0.7978846, %v1373_v45  ;;  %v1182_v34 = vmul.f32 %v3765_v61, %v3765_v61  ;;  %v2951_v32 = vpop.eup %2950  ;;  %v1149_v45 = vmul.f32 0.5, %v3762_v16 }
 0x163   : > { %v1277_v63 = vmul.f32 %v1213_v3, %v3762_v16  ;;  %v1564_v31 = vadd.f32 1.0, %v2951_v32 }
 0x164   : > { %v1659_v54 = vmul.f32 %v1595_v60, %v1147_v27  ;;  %2952 = vtanh.f32 %v1437_v62  ;;  %v1246_v20 = vmul.f32 %v1182_v34, %v3765_v61  ;;  %v902_v36 = vpop.f32.mrf.mxu2 }
 0x165   : > { %v1341_v10 = vmul.f32 0.044715, %v1277_v63  ;;  %v903_v22 = vadd.f32 %v3640_v24, %v902_v36  ;;  %v824_v23 = vpop.f32.mrf.mxu0  ;;  %2954 = vtanh.f32 %v1468_v5  ;;  %v1628_v41 = vmul.f32 %v1564_v31, %v1116_v4  ;;  %v1078_v3 = vpop.f32.mrf.mxu3 }
 0x166   : > { %v996_v12 = vpop.f32.mrf.mxu1  ;;  %v2709_v8 = vpack.c.bf16 %v1659_v54, %v1658_v7  ;;  %v1310_v55 = vmul.f32 0.044715, %v1246_v20  ;;  %v825_v49 = vadd.f32 %v3640_v24, %v824_v23  ;;  %v1118_v31 = vmul.f32 0.5, %v3765_v61 }
 0x167   : > { %v1405_v35 = vadd.f32 %v1341_v10, %v3762_v16  ;;  %v3780_v30 = vadd.f32 %v3738_v15, %v903_v22  ;;  %v1117_v15 = vmul.f32 0.5, %v3748_v19 }
 0x168   : > { %2765 = vst [vmem:[%s3357_s9 + $0xc8] sm:$0xff] %v2709_v8   ;;  %v1374_v13 = vadd.f32 %v1310_v55, %v3765_v61  ;;  %v3784_v17 = vadd.f32 %v993_v46, %v825_v49 }
 0x169   : > { %v1469_v1 = vmul.f32 0.7978846, %v1405_v35  ;;  %v1214_v18 = vmul.f32 %v3780_v30, %v3780_v30 }
 0x16a   : > { %v2953_v14 = vpop.eup %2952  ;;  %v1183_v25 = vmul.f32 %v3784_v17, %v3784_v17  ;;  %v1438_v33 = vmul.f32 0.7978846, %v1374_v13 }
 0x16b   : > { %v1565_v29 = vadd.f32 1.0, %v2953_v14  ;;  %2956 = vtanh.f32 %v1469_v1  ;;  %v1278_v11 = vmul.f32 %v1214_v18, %v3780_v30  ;;  %v2955_v38 = vpop.eup %2954  ;;  %v1119_v18 = vmul.f32 0.5, %v3784_v17 }
 0x16c   : > { %v1247_v37 = vmul.f32 %v1183_v25, %v3784_v17  ;;  %v904_v28 = vpop.f32.mrf.mxu2  ;;  %v1596_v40 = vadd.f32 1.0, %v2955_v38  ;;  %2958 = vtanh.f32 %v1438_v33 }
 0x16d   : > { %v1629_v50 = vmul.f32 %v1565_v29, %v1117_v15  ;;  %v1342_v42 = vmul.f32 0.044715, %v1278_v11  ;;  %v905_v21 = vadd.f32 %v3640_v24, %v904_v28  ;;  %v827_v57 = vpop.f32.mrf.mxu0  ;;  %v1081_v29 = vpop.f32.mrf.mxu3 }
 0x16e   : > { %v998_v43 = vpop.f32.mrf.mxu1  ;;  %v1311_v52 = vmul.f32 0.044715, %v1247_v37  ;;  %v828_v19 = vadd.f32 %v3640_v24, %v827_v57  ;;  %v1660_v62 = vmul.f32 %v1596_v40, %v1148_v48 }
 0x16f   : > { %v2634_v44 = vpack.c.bf16 %v1629_v50, %v1628_v41  ;;  %v1406_v0 = vadd.f32 %v1342_v42, %v3780_v30  ;;  %v3797_v46 = vadd.f32 %v1073_v6, %v905_v21 }
 0x170   : > { %v1375_v47 = vadd.f32 %v1311_v52, %v3784_v17  ;;  %v3800_v51 = vadd.f32 %v996_v12, %v828_v19 }
 0x171   : > { %v2957_v39 = vpop.eup %2956  ;;  %2750 = vst [vmem:[%s3357_s9 + $0x50] sm:$0xff] %v2634_v44   ;;  %v1215_v56 = vmul.f32 %v3797_v46, %v3797_v46  ;;  %v1470_v27 = vmul.f32 0.7978846, %v1406_v0  ;;  %v1150_v0 = vmul.f32 0.5, %v3780_v30 }
 0x172   : > { %v1597_v58 = vadd.f32 1.0, %v2957_v39  ;;  %v1439_v59 = vmul.f32 0.7978846, %v1375_v47  ;;  %v1184_v6 = vmul.f32 %v3800_v51, %v3800_v51  ;;  %v2959_v20 = vpop.eup %2958  ;;  %v1151_v47 = vmul.f32 0.5, %v3797_v46 }
 0x173   : > { %v1279_v60 = vmul.f32 %v1215_v56, %v3797_v46  ;;  %v1566_v55 = vadd.f32 1.0, %v2959_v20 }
 0x174   : > { %v1661_v34 = vmul.f32 %v1597_v58, %v1149_v45  ;;  %2960 = vtanh.f32 %v1439_v59  ;;  %v1248_v2 = vmul.f32 %v1184_v6, %v3800_v51  ;;  %v907_v5 = vpop.f32.mrf.mxu2 }
 0x175   : > { %v1343_v63 = vmul.f32 0.044715, %v1279_v60  ;;  %v908_v7 = vadd.f32 %v3640_v24, %v907_v5  ;;  %v829_v54 = vpop.f32.mrf.mxu0  ;;  %2962 = vtanh.f32 %v1470_v27  ;;  %v1630_v33 = vmul.f32 %v1566_v55, %v1118_v31 }
 0x176   : > { %v1001_v16 = vpop.f32.mrf.mxu1  ;;  %v2714_v36 = vpack.c.bf16 %v1661_v34, %v1660_v62  ;;  %v1312_v10 = vmul.f32 0.044715, %v1248_v2  ;;  %v830_v22 = vadd.f32 %v3640_v24, %v829_v54  ;;  %v1120_v55 = vmul.f32 0.5, %v3800_v51 }
 0x177   : > { %v1407_v12 = vadd.f32 %v1343_v63, %v3797_v46  ;;  %v3814_v23 = vadd.f32 %v1076_v53, %v908_v7  ;;  %v1083_v7 = vpop.f32.mrf.mxu3 }
 0x178   : > { %2766 = vst [vmem:[%s3357_s9 + $0xd0] sm:$0xff] %v2714_v36   ;;  %v1376_v32 = vadd.f32 %v1312_v10, %v3800_v51  ;;  %v3818_v8 = vadd.f32 %v998_v43, %v830_v22 }
 0x179   : > { %v1471_v49 = vmul.f32 0.7978846, %v1407_v12  ;;  %v1216_v35 = vmul.f32 %v3814_v23, %v3814_v23 }
 0x17a   : > { %v2961_v13 = vpop.eup %2960  ;;  %v1185_v1 = vmul.f32 %v3818_v8, %v3818_v8  ;;  %v1440_v4 = vmul.f32 0.7978846, %v1376_v32 }
 0x17b   : > { %v1567_v53 = vadd.f32 1.0, %v2961_v13  ;;  %2964 = vtanh.f32 %v1471_v49  ;;  %v1280_v14 = vmul.f32 %v1216_v35, %v3814_v23  ;;  %v2963_v11 = vpop.eup %2962  ;;  %v1121_v35 = vmul.f32 0.5, %v3818_v8 }
 0x17c   : > { %v1249_v25 = vmul.f32 %v1185_v1, %v3818_v8  ;;  %v909_v15 = vpop.f32.mrf.mxu2  ;;  %v1598_v57 = vadd.f32 1.0, %v2963_v11  ;;  %2966 = vtanh.f32 %v1440_v4 }
 0x17d   : > { %v1631_v37 = vmul.f32 %v1567_v53, %v1119_v18  ;;  %v1344_v28 = vmul.f32 0.044715, %v1280_v14  ;;  %v910_v61 = vadd.f32 %v3640_v24, %v909_v15  ;;  %v832_v41 = vpop.f32.mrf.mxu0 }
 0x17e   : > { %v1003_v38 = vpop.f32.mrf.mxu1  ;;  %v1313_v50 = vmul.f32 0.044715, %v1249_v25  ;;  %v833_v17 = vadd.f32 %v3640_v24, %v832_v41  ;;  %v1662_v59 = vmul.f32 %v1598_v57, %v1150_v0 }
 0x17f   : > { %v2639_v42 = vpack.c.bf16 %v1631_v37, %v1630_v33  ;;  %v1408_v21 = vadd.f32 %v1344_v28, %v3814_v23  ;;  %v3831_v43 = vadd.f32 %v1078_v3, %v910_v61 }
 0x180   : > { %v1377_v52 = vadd.f32 %v1313_v50, %v3818_v8  ;;  %v3834_v19 = vadd.f32 %v1001_v16, %v833_v17  ;;  %v1086_v17 = vpop.f32.mrf.mxu3 }
 0x181   : > { %v2965_v44 = vpop.eup %2964  ;;  %2751 = vst [vmem:[%s3357_s9 + $0x58] sm:$0xff] %v2639_v42   ;;  %v1217_v40 = vmul.f32 %v3831_v43, %v3831_v43  ;;  %v1472_v45 = vmul.f32 0.7978846, %v1408_v21  ;;  %v1152_v21 = vmul.f32 0.5, %v3814_v23 }
 0x182   : > { %v1599_v39 = vadd.f32 1.0, %v2965_v44  ;;  %v1441_v48 = vmul.f32 0.7978846, %v1377_v52  ;;  %v1186_v56 = vmul.f32 %v3834_v19, %v3834_v19  ;;  %v2967_v34 = vpop.eup %2966  ;;  %v1153_v52 = vmul.f32 0.5, %v3831_v43 }
 0x183   : > { %v1281_v58 = vmul.f32 %v1217_v40, %v3831_v43  ;;  %v1568_v10 = vadd.f32 1.0, %v2967_v34 }
 0x184   : > { %v1663_v6 = vmul.f32 %v1599_v39, %v1151_v47  ;;  %2968 = vtanh.f32 %v1441_v48  ;;  %v1250_v30 = vmul.f32 %v1186_v56, %v3834_v19  ;;  %v912_v3 = vpop.f32.mrf.mxu2 }
 0x185   : > { %v1345_v27 = vmul.f32 0.044715, %v1281_v58  ;;  %v913_v60 = vadd.f32 %v3640_v24, %v912_v3  ;;  %v834_v46 = vpop.f32.mrf.mxu0  ;;  %2970 = vtanh.f32 %v1472_v45  ;;  %v1632_v4 = vmul.f32 %v1568_v10, %v1120_v55 }
 0x186   : > { %v1006_v62 = vpop.f32.mrf.mxu1  ;;  %v2719_v2 = vpack.c.bf16 %v1663_v6, %v1662_v59  ;;  %v1314_v5 = vmul.f32 0.044715, %v1250_v30  ;;  %v835_v63 = vadd.f32 %v3640_v24, %v834_v46 }
 0x187   : > { %v1409_v16 = vadd.f32 %v1345_v27, %v3831_v43  ;;  %v3848_v54 = vadd.f32 %v1081_v29, %v913_v60 }
 0x188   : > { %2767 = vst [vmem:[%s3357_s9 + $0xd8] sm:$0xff] %v2719_v2   ;;  %v1378_v20 = vadd.f32 %v1314_v5, %v3834_v19  ;;  %v3852_v36 = vadd.f32 %v1003_v38, %v835_v63 }
 0x189   : > { %v1473_v22 = vmul.f32 0.7978846, %v1409_v16  ;;  %v1218_v12 = vmul.f32 %v3848_v54, %v3848_v54 }
 0x18a   : > { %v2969_v32 = vpop.eup %2968  ;;  %v1187_v49 = vmul.f32 %v3852_v36, %v3852_v36  ;;  %v1442_v1 = vmul.f32 0.7978846, %v1378_v20  ;;  %v1122_v20 = vmul.f32 0.5, %v3834_v19  ;;  %v1123_v10 = vmul.f32 0.5, %v3852_v36 }
 0x18b   : > { %v1569_v13 = vadd.f32 1.0, %v2969_v32  ;;  %2972 = vtanh.f32 %v1473_v22  ;;  %v1282_v31 = vmul.f32 %v1218_v12, %v3848_v54  ;;  %v2971_v14 = vpop.eup %2970  ;;  %v1088_v12 = vpop.f32.mrf.mxu3 }
 0x18c   : > { %v1251_v18 = vmul.f32 %v1187_v49, %v3852_v36  ;;  %v914_v53 = vpop.f32.mrf.mxu2  ;;  %v1600_v38 = vadd.f32 1.0, %v2971_v14  ;;  %2974 = vtanh.f32 %v1442_v1 }
 0x18d   : > { %v1633_v25 = vmul.f32 %v1569_v13, %v1121_v35  ;;  %v1346_v15 = vmul.f32 0.044715, %v1282_v31  ;;  %v915_v51 = vadd.f32 %v3640_v24, %v914_v53  ;;  %v837_v11 = vpop.f32.mrf.mxu0 }
 0x18e   : > { %v1008_v29 = vpop.f32.mrf.mxu1  ;;  %v1315_v33 = vmul.f32 0.044715, %v1251_v18  ;;  %v838_v8 = vadd.f32 %v3640_v24, %v837_v11  ;;  %v1664_v48 = vmul.f32 %v1600_v38, %v1152_v21 }
 0x18f   : > { %v2644_v37 = vpack.c.bf16 %v1633_v25, %v1632_v4  ;;  %v1410_v28 = vadd.f32 %v1346_v15, %v3848_v54  ;;  %v3865_v61 = vadd.f32 %v1083_v7, %v915_v51 }
 0x190   : > { %v1379_v41 = vadd.f32 %v1315_v33, %v3852_v36  ;;  %v3868_v50 = vadd.f32 %v1006_v62, %v838_v8 }
 0x191   : > { %v2973_v42 = vpop.eup %2972  ;;  %2752 = vst [vmem:[%s3357_s9 + $0x60] sm:$0xff] %v2644_v37   ;;  %v1219_v57 = vmul.f32 %v3865_v61, %v3865_v61  ;;  %v1474_v47 = vmul.f32 0.7978846, %v1410_v28  ;;  %v1154_v28 = vmul.f32 0.5, %v3848_v54 }
 0x192   : > { %v1601_v44 = vadd.f32 1.0, %v2973_v42  ;;  %v1443_v0 = vmul.f32 0.7978846, %v1379_v41  ;;  %v1188_v40 = vmul.f32 %v3868_v50, %v3868_v50  ;;  %v2975_v30 = vpop.eup %2974  ;;  %v1155_v41 = vmul.f32 0.5, %v3865_v61 }
 0x193   : > { %v1283_v39 = vmul.f32 %v1219_v57, %v3865_v61  ;;  %v1570_v5 = vadd.f32 1.0, %v2975_v30  ;;  %v848_v57 = vadd.f32 %v3640_v24, %v3296_v9 }
 0x194   : > { %v1665_v56 = vmul.f32 %v1601_v44, %v1153_v52  ;;  %2976 = vtanh.f32 %v1443_v0  ;;  %v1252_v23 = vmul.f32 %v1188_v40, %v3868_v50  ;;  %v917_v45 = vpop.f32.mrf.mxu2 }
 0x195   : > { %v1347_v58 = vmul.f32 0.044715, %v1283_v39  ;;  %v918_v59 = vadd.f32 %v3640_v24, %v917_v45  ;;  %v839_v43 = vpop.f32.mrf.mxu0  ;;  %2978 = vtanh.f32 %v1474_v47  ;;  %v1634_v1 = vmul.f32 %v1570_v5, %v1122_v20  ;;  %v1091_v47 = vpop.f32.mrf.mxu3 }
 0x196   : > { %v1011_v6 = vpop.f32.mrf.mxu1  ;;  %v2724_v3 = vpack.c.bf16 %v1665_v56, %v1664_v48  ;;  %v1316_v27 = vmul.f32 0.044715, %v1252_v23  ;;  %v840_v60 = vadd.f32 %v3640_v24, %v839_v43 }
 0x197   : > { %v1411_v62 = vadd.f32 %v1347_v58, %v3865_v61  ;;  %v3882_v46 = vadd.f32 %v1086_v17, %v918_v59 }
 0x198   : > { %2768 = vst [vmem:[%s3357_s9 + $0xe0] sm:$0xff] %v2724_v3   ;;  %v1380_v34 = vadd.f32 %v1316_v27, %v3868_v50  ;;  %v3886_v2 = vadd.f32 %v1008_v29, %v840_v60 }
 0x199   : > { %v1475_v63 = vmul.f32 0.7978846, %v1411_v62  ;;  %v1220_v7 = vmul.f32 %v3882_v46, %v3882_v46 }
 0x19a   : > { %v2977_v16 = vpop.eup %2976  ;;  %v1189_v22 = vmul.f32 %v3886_v2, %v3886_v2  ;;  %v1444_v55 = vmul.f32 0.7978846, %v1380_v34 }
 0x19b   : > { %v1571_v32 = vadd.f32 1.0, %v2977_v16  ;;  %2980 = vtanh.f32 %v1475_v63  ;;  %v1284_v49 = vmul.f32 %v1220_v7, %v3882_v46  ;;  %v2979_v31 = vpop.eup %2978  ;;  %v1124_v7 = vmul.f32 0.5, %v3868_v50 }
 0x19c   : > { %v1253_v35 = vmul.f32 %v1189_v22, %v3886_v2  ;;  %v919_v13 = vpop.f32.mrf.mxu2  ;;  %2982 = vtanh.f32 %v1444_v55  ;;  %v1602_v11 = vadd.f32 1.0, %v2979_v31  ;;  %v1125_v16 = vmul.f32 0.5, %v3886_v2 }
 0x19d   : > { %v1635_v18 = vmul.f32 %v1571_v32, %v1123_v10  ;;  %v1348_v53 = vmul.f32 0.044715, %v1284_v49  ;;  %v920_v19 = vadd.f32 %v3640_v24, %v919_v13  ;;  %v842_v14 = vpop.f32.mrf.mxu0  ;;  %v850_v32 = vadd.f32 %v3640_v24, %v3308_v26 }
 0x19e   : > { %v1013_v36 = vpop.f32.mrf.mxu1  ;;  %v1317_v4 = vmul.f32 0.044715, %v1253_v35  ;;  %v843_v25 = vadd.f32 %v3640_v24, %v842_v14  ;;  %v1666_v0 = vmul.f32 %v1602_v11, %v1154_v28 }
 0x19f   : > { %v2649_v15 = vpack.c.bf16 %v1635_v18, %v1634_v1  ;;  %v1412_v51 = vadd.f32 %v1348_v53, %v3882_v46  ;;  %v3899_v29 = vadd.f32 %v1088_v12, %v920_v19 }
 0x1a0   : > { %v1381_v33 = vadd.f32 %v1317_v4, %v3886_v2  ;;  %v3902_v8 = vadd.f32 %v1011_v6, %v843_v25 }
 0x1a1   : > { %v2981_v37 = vpop.eup %2980  ;;  %2753 = vst [vmem:[%s3357_s9 + $0x68] sm:$0xff] %v2649_v15   ;;  %v1221_v38 = vmul.f32 %v3899_v29, %v3899_v29  ;;  %v1476_v52 = vmul.f32 0.7978846, %v1412_v51 }
 0x1a2   : > { %v1603_v17 = vadd.f32 1.0, %v2981_v37  ;;  %v1445_v42 = vmul.f32 0.7978846, %v1381_v33  ;;  %v1190_v21 = vmul.f32 %v3902_v8, %v3902_v8  ;;  %v2983_v61 = vpop.eup %2982  ;;  %v1156_v37 = vmul.f32 0.5, %v3882_v46 }
 0x1a3   : > { %v1285_v44 = vmul.f32 %v1221_v38, %v3899_v29  ;;  %v1572_v3 = vadd.f32 1.0, %v2983_v61  ;;  %v1157_v38 = vmul.f32 0.5, %v3899_v29 }
 0x1a4   : > { %v1667_v40 = vmul.f32 %v1603_v17, %v1155_v41  ;;  %2984 = vtanh.f32 %v1445_v42  ;;  %v1254_v54 = vmul.f32 %v1190_v21, %v3902_v8  ;;  %v922_v39 = vpop.f32.mrf.mxu2 }
 0x1a5   : > { %v1349_v48 = vmul.f32 0.044715, %v1285_v44  ;;  %v923_v56 = vadd.f32 %v3640_v24, %v922_v39  ;;  %v844_v45 = vpop.f32.mrf.mxu0  ;;  %2986 = vtanh.f32 %v1476_v52  ;;  %v1636_v55 = vmul.f32 %v1572_v3, %v1124_v7 }
 0x1a6   : > { %v1016_v23 = vpop.f32.mrf.mxu1  ;;  %v2729_v58 = vpack.c.bf16 %v1667_v40, %v1666_v0  ;;  %v1318_v59 = vmul.f32 0.044715, %v1254_v54  ;;  %v845_v6 = vadd.f32 %v3640_v24, %v844_v45 }
 0x1a7   : > { %v3916_v9 = vadd.f32 %v1016_v23, %v848_v57  ;;  %v1413_v43 = vadd.f32 %v1349_v48, %v3899_v29  ;;  %v3920_v30 = vadd.f32 %v1091_v47, %v923_v56 }
 0x1a8   : > { %2769 = vst [vmem:[%s3357_s9 + $0xe8] sm:$0xff] %v2729_v58   ;;  %v1382_v27 = vadd.f32 %v1318_v59, %v3902_v8  ;;  %v3926_v62 = vadd.f32 %v1013_v36, %v845_v6  ;;  %v1093_v36 = vpop.f32.mrf.mxu3  ;;  %v1126_v58 = vmul.f32 0.5, %v3902_v8 }
 0x1a9   : > { %v1192_v60 = vmul.f32 %v3916_v9, %v3916_v9  ;;  %v1477_v34 = vmul.f32 0.7978846, %v1413_v43  ;;  %v1222_v5 = vmul.f32 %v3920_v30, %v3920_v30 }
 0x1aa   : > { %v2985_v63 = vpop.eup %2984  ;;  %v1191_v12 = vmul.f32 %v3926_v62, %v3926_v62  ;;  %v1446_v49 = vmul.f32 0.7978846, %v1382_v27  ;;  %v1127_v59 = vmul.f32 0.5, %v3926_v62 }
 0x1ab   : > { %v1256_v20 = vmul.f32 %v1192_v60, %v3916_v9  ;;  %v1573_v10 = vadd.f32 1.0, %v2985_v63  ;;  %2988 = vtanh.f32 %v1477_v34  ;;  %v1286_v22 = vmul.f32 %v1222_v5, %v3920_v30  ;;  %v2987_v31 = vpop.eup %2986 }
 0x1ac   : > { %v924_v13 = vpop.f32.mrf.mxu2  ;;  %v1255_v1 = vmul.f32 %v1191_v12, %v3926_v62  ;;  %v1604_v51 = vadd.f32 1.0, %v2987_v31  ;;  %2990 = vtanh.f32 %v1446_v49 }
 0x1ad   : > { %v1320_v35 = vmul.f32 0.044715, %v1256_v20  ;;  %v1637_v50 = vmul.f32 %v1573_v10, %v1125_v16  ;;  %v1350_v2 = vmul.f32 0.044715, %v1286_v22  ;;  %v925_v18 = vadd.f32 %v3640_v24, %v924_v13 }
 0x1ae   : > { %v1018_v53 = vpop.f32.mrf.mxu1  ;;  %v1319_v25 = vmul.f32 0.044715, %v1255_v1  ;;  %v1668_v44 = vmul.f32 %v1604_v51, %v1156_v37  ;;  %v1128_v16 = vmul.f32 0.5, %v3916_v9  ;;  %v1158_v22 = vmul.f32 0.5, %v3920_v30 }
 0x1af   : > { %v1384_v19 = vadd.f32 %v1320_v35, %v3916_v9  ;;  %v1019_v14 = vadd.f32 %v1018_v53, %v850_v32  ;;  %v2654_v4 = vpack.c.bf16 %v1637_v50, %v1636_v55  ;;  %v1414_v26 = vadd.f32 %v1350_v2, %v3920_v30 }
 0x1b0   : > { %v1094_v15 = vadd.f32 %v1093_v36, %v925_v18  ;;  %v1383_v28 = vadd.f32 %v1319_v25, %v3926_v62 }
 0x1b1   : > { %v1193_v11 = vmul.f32 %v1019_v14, %v1019_v14  ;;  %v2989_v33 = vpop.eup %2988  ;;  %2754 = vst [vmem:[%s3357_s9 + $0x70] sm:$0xff] %v2654_v4   ;;  %v1448_v17 = vmul.f32 0.7978846, %v1384_v19  ;;  %v1478_v21 = vmul.f32 0.7978846, %v1414_v26  ;;  %v1129_v20 = vmul.f32 0.5, %v1019_v14 }
 0x1b2   : > { %v1223_v24 = vmul.f32 %v1094_v15, %v1094_v15  ;;  %v1605_v41 = vadd.f32 1.0, %v2989_v33  ;;  %v1447_v57 = vmul.f32 0.7978846, %v1383_v28  ;;  %v2991_v39 = vpop.eup %2990  ;;  %v1159_v8 = vmul.f32 0.5, %v1094_v15 }
 0x1b3   : > { %v1257_v42 = vmul.f32 %v1193_v11, %v1019_v14  ;;  %v1574_v56 = vadd.f32 1.0, %v2991_v39 }
 0x1b4   : > { %v1287_v52 = vmul.f32 %v1223_v24, %v1094_v15  ;;  %v1669_v0 = vmul.f32 %v1605_v41, %v1157_v38  ;;  %2992 = vtanh.f32 %v1447_v57 }
 0x1b5   : > { %v1321_v40 = vmul.f32 0.044715, %v1257_v42  ;;  %2994 = vtanh.f32 %v1448_v17  ;;  %v1638_v3 = vmul.f32 %v1574_v56, %v1126_v58 }
 0x1b6   : > { %v1351_v54 = vmul.f32 0.044715, %v1287_v52  ;;  %v2734_v46 = vpack.c.bf16 %v1669_v0, %v1668_v44  ;;  %2996 = vtanh.f32 %v1478_v21 }
 0x1b7   : > { %v1385_v47 = vadd.f32 %v1321_v40, %v1019_v14 }
 0x1b8   : > { %v1415_v61 = vadd.f32 %v1351_v54, %v1094_v15  ;;  %2770 = vst [vmem:[%s3357_s9 + $0xf0] sm:$0xff] %v2734_v46  }
 0x1b9   : > { %v1449_v29 = vmul.f32 0.7978846, %v1385_v47 }
 0x1ba   : > { %v1479_v48 = vmul.f32 0.7978846, %v1415_v61  ;;  %v2993_v23 = vpop.eup %2992 }
 0x1bb   : > { %2998 = vtanh.f32 %v1449_v29  ;;  %v2995_v45 = vpop.eup %2994  ;;  %v1575_v6 = vadd.f32 1.0, %v2993_v23 }
 0x1bc   : > { %3000 = vtanh.f32 %v1479_v48  ;;  %v2997_v43 = vpop.eup %2996  ;;  %v1576_v60 = vadd.f32 1.0, %v2995_v45 }
 0x1bd   : > { %v1639_v27 = vmul.f32 %v1575_v6, %v1127_v59  ;;  %v1606_v5 = vadd.f32 1.0, %v2997_v43 }
 0x1be   : > { %v1640_v12 = vmul.f32 %v1576_v60, %v1128_v16 }
 0x1bf   : > { %v2659_v63 = vpack.c.bf16 %v1639_v27, %v1638_v3  ;;  %v1670_v55 = vmul.f32 %v1606_v5, %v1158_v22 }
 0x1c1   : > { %v2999_v34 = vpop.eup %2998  ;;  %2755 = vst [vmem:[%s3357_s9 + $0x78] sm:$0xff] %v2659_v63  }
 0x1c2   : > { %v3001_v7 = vpop.eup %3000  ;;  %v1577_v10 = vadd.f32 1.0, %v2999_v34 }
 0x1c3   : > { %v1607_v62 = vadd.f32 1.0, %v3001_v7 }
 0x1c4   : > { %v1641_v32 = vmul.f32 %v1577_v10, %v1129_v20 }
 0x1c5   : > { %v1671_v49 = vmul.f32 %v1607_v62, %v1159_v8  ;;  %1806 = sbr.rel (!%p3136_p4) target bundleno = 522 (0x20a), region = 36 }
 0x1c6   : > { %v2664_v35 = vpack.c.bf16 %v1641_v32, %v1640_v12 }
 0x1c7   : > { %v2739_v13 = vpack.c.bf16 %v1671_v49, %v1670_v55 }
 0x1c8   : > { %2756 = vst [vmem:[%s3357_s9 + $0x80] sm:$0xff] %v2664_v35  }
 0x1c9   : > { %2771 = vst [vmem:[%s3357_s9 + $0xf8] sm:$0xff] %v2739_v13  }
 0x1ca   : > { %s4110_s14 = smov (!%p1809_p8, %s1808_s14), 64 }
 0x1cb   : > { %s2486_s23 = sshll.u32 %s4110_s14, 2 }
 0x1cc   : > { %p2489_p9 = scmp.eq.s32.totalorder %s2486_s23, 0 }
 0x1cd   : > { %s3967_s24 = sshrl.u32 (!%p2489_p9), %s4110_s14, 5 }
 0x1ce   : > { %1817 = sbr.rel (%p2489_p9) target bundleno = 522 (0x20a), region = 40  ;;  %p2490_p10 = scmp.le.s32.totalorder (!%p2489_p9), %s3967_s24, 0 }
 0x1d3   : > { %2096 = sbr.rel (%p2490_p10) target bundleno = 505 (0x1f9), region = 112  ;;  %s4101_s15 = smov (!%p2490_p10), %s3961_s22 }
 0x1d4   : > { %s4102_s20 = smov (!%p2490_p10), %s3357_s9  ;;  %s3976_s25 = smov (!%p2490_p10), 0  }
 0x1d5   : > { %s3978_s26 = smov (!%p2490_p10), 0  }
 0x1d8 LB: >> { %v1834_v9 = vld [vmem:[%s3065_s20] sm:$0xf]  ;;  %v1836_v30 = vld [vmem:[%s3065_s20 + $0x4] sm:$0xf]  ;;  %v1838_v31 = vld [vmem:[%s3065_s20 + $0x8] sm:$0xf]  ;;  %s3073_s26 = sphi %s3978_s26, %s1828_s26   ;;  %s3069_s25 = sphi %s3976_s25, %s4105_s25   ;;  %s3065_s20 = sphi %s4102_s20, %s4104_s20   ;;  %s3061_s15 = sphi %s4101_s15, %s4103_s15  }
 0x1d9   : >> { %1835 = vst [vmem:[%s3061_s15] sm:$0xf] %v1834_v9  ;;  %v1840_v50 = vld [vmem:[%s3065_s20 + $0xc] sm:$0xf]  ;;  %v1842_v2 = vld [vmem:[%s3065_s20 + $0x10] sm:$0xf]  ;;  %s1898_s27 = sadd.s32 1, %s3069_s25 }
 0x1da   : >> { %1837 = vst [vmem:[%s3061_s15 + $0x4] sm:$0xf] %v1836_v30  ;;  %v1844_v1 = vld [vmem:[%s3065_s20 + $0x14] sm:$0xf]  ;;  %v1846_v18 = vld [vmem:[%s3065_s20 + $0x18] sm:$0xf]  ;;  %p1899_p11 = scmp.ge.s32.totalorder %s1898_s27, %s3967_s24 }
 0x1db   : >> { %1839 = vst [vmem:[%s3061_s15 + $0x8] sm:$0xf] %v1838_v31  ;;  %v1848_v53 = vld [vmem:[%s3065_s20 + $0x1c] sm:$0xf]  ;;  %v1850_v19 = vld [vmem:[%s3065_s20 + $0x20] sm:$0xf] }
 0x1dc   : >> { %1841 = vst [vmem:[%s3061_s15 + $0xc] sm:$0xf] %v1840_v50  ;;  %v1852_v36 = vld [vmem:[%s3065_s20 + $0x24] sm:$0xf]  ;;  %v1854_v14 = vld [vmem:[%s3065_s20 + $0x28] sm:$0xf] }
 0x1dd   : >> { %1843 = vst [vmem:[%s3061_s15 + $0x10] sm:$0xf] %v1842_v2  ;;  %v1856_v4 = vld [vmem:[%s3065_s20 + $0x2c] sm:$0xf]  ;;  %v1858_v26 = vld [vmem:[%s3065_s20 + $0x30] sm:$0xf] }
 0x1de   : >> { %1845 = vst [vmem:[%s3061_s15 + $0x14] sm:$0xf] %v1844_v1  ;;  %v1860_v25 = vld [vmem:[%s3065_s20 + $0x34] sm:$0xf]  ;;  %v1862_v15 = vld [vmem:[%s3065_s20 + $0x38] sm:$0xf] }
 0x1df   : >> { %1847 = vst [vmem:[%s3061_s15 + $0x18] sm:$0xf] %v1846_v18  ;;  %v1864_v51 = vld [vmem:[%s3065_s20 + $0x3c] sm:$0xf]  ;;  %v1866_v11 = vld [vmem:[%s3065_s20 + $0x40] sm:$0xf] }
 0x1e0   : >> { %1849 = vst [vmem:[%s3061_s15 + $0x1c] sm:$0xf] %v1848_v53  ;;  %v1868_v33 = vld [vmem:[%s3065_s20 + $0x44] sm:$0xf]  ;;  %s4112_s27 = smov (%p1899_p11, %s1898_s27), 0  ;;  %s1828_s26 = sadd.s32 1, %s3073_s26  }
 0x1e1   : >> { %1851 = vst [vmem:[%s3061_s15 + $0x20] sm:$0xf] %v1850_v19  ;;  %v1870_v37 = vld [vmem:[%s3065_s20 + $0x48] sm:$0xf]  ;;  %v1872_v28 = vld [vmem:[%s3065_s20 + $0x4c] sm:$0xf]  ;;  %p1827_p12 = scmp.ge.s32.totalorder %s1828_s26, %s3967_s24  ;;  %s4105_s25 = smov %s4112_s27 }
 0x1e2   : >> { %1853 = vst [vmem:[%s3061_s15 + $0x24] sm:$0xf] %v1852_v36  ;;  %s2491_s28 = sshll.u32 %s4112_s27, 7  ;;  %v1874_v24 = vld [vmem:[%s3065_s20 + $0x50] sm:$0xf] }
 0x1e3   : >> { %1855 = vst [vmem:[%s3061_s15 + $0x28] sm:$0xf] %v1854_v14  ;;  %s4037_s29 = scalar_lea.vmem %s3357_s9, %s2491_s28 [#allocation2]   ;;  %s1904_s30 = scalar_lea.vmem %s3961_s22, %s2491_s28   ;;  %v1876_v38 = vld [vmem:[%s3065_s20 + $0x54] sm:$0xf]  ;;  %v1878_v41 = vld [vmem:[%s3065_s20 + $0x58] sm:$0xf] }
 0x1e4   : >> { %1857 = vst [vmem:[%s3061_s15 + $0x2c] sm:$0xf] %v1856_v4  ;;  %v1880_v17 = vld [vmem:[%s3065_s20 + $0x5c] sm:$0xf]  ;;  %v1882_v42 = vld [vmem:[%s3065_s20 + $0x60] sm:$0xf] }
 0x1e5   : >> { %1859 = vst [vmem:[%s3061_s15 + $0x30] sm:$0xf] %v1858_v26  ;;  %v1884_v21 = vld [vmem:[%s3065_s20 + $0x64] sm:$0xf]  ;;  %v1886_v57 = vld [vmem:[%s3065_s20 + $0x68] sm:$0xf] }
 0x1e6   : >> { %1861 = vst [vmem:[%s3061_s15 + $0x34] sm:$0xf] %v1860_v25  ;;  %v1888_v52 = vld [vmem:[%s3065_s20 + $0x6c] sm:$0xf]  ;;  %v1890_v44 = vld [vmem:[%s3065_s20 + $0x70] sm:$0xf] }
 0x1e7   : >> { %1863 = vst [vmem:[%s3061_s15 + $0x38] sm:$0xf] %v1862_v15  ;;  %v1892_v0 = vld [vmem:[%s3065_s20 + $0x74] sm:$0xf]  ;;  %v1894_v40 = vld [vmem:[%s3065_s20 + $0x78] sm:$0xf] }
 0x1e8   : >> { %1865 = vst [vmem:[%s3061_s15 + $0x3c] sm:$0xf] %v1864_v51  ;;  %v1896_v54 = vld [vmem:[%s3065_s20 + $0x7c] sm:$0xf]  ;;  %s4104_s20 = smov %s4037_s29 }
 0x1e9   : >> { %1867 = vst [vmem:[%s3061_s15 + $0x40] sm:$0xf] %v1866_v11 }
 0x1ea   : >> { %1869 = vst [vmem:[%s3061_s15 + $0x44] sm:$0xf] %v1868_v33 }
 0x1eb   : >> { %1871 = vst [vmem:[%s3061_s15 + $0x48] sm:$0xf] %v1870_v37 }
 0x1ec   : >> { %1873 = vst [vmem:[%s3061_s15 + $0x4c] sm:$0xf] %v1872_v28 }
 0x1ed   : >> { %1875 = vst [vmem:[%s3061_s15 + $0x50] sm:$0xf] %v1874_v24 }
 0x1ee   : >> { %1877 = vst [vmem:[%s3061_s15 + $0x54] sm:$0xf] %v1876_v38 }
 0x1ef   : >> { %1879 = vst [vmem:[%s3061_s15 + $0x58] sm:$0xf] %v1878_v41 }
 0x1f0   : >> { %1881 = vst [vmem:[%s3061_s15 + $0x5c] sm:$0xf] %v1880_v17 }
 0x1f1   : >> { %1883 = vst [vmem:[%s3061_s15 + $0x60] sm:$0xf] %v1882_v42 }
 0x1f2   : >> { %1885 = vst [vmem:[%s3061_s15 + $0x64] sm:$0xf] %v1884_v21 }
 0x1f3   : >> { %1887 = vst [vmem:[%s3061_s15 + $0x68] sm:$0xf] %v1886_v57 }
 0x1f4   : >> { %1889 = vst [vmem:[%s3061_s15 + $0x6c] sm:$0xf] %v1888_v52  ;;  %1830 = sbr.rel (!%p1827_p12) target bundleno = 472 (0x1d8), region = 118 }
 0x1f5   : >> { %1891 = vst [vmem:[%s3061_s15 + $0x70] sm:$0xf] %v1890_v44 }
 0x1f6   : >> { %1893 = vst [vmem:[%s3061_s15 + $0x74] sm:$0xf] %v1892_v0 }
 0x1f7   : >> { %1895 = vst [vmem:[%s3061_s15 + $0x78] sm:$0xf] %v1894_v40 }
 0x1f8   : >> { %1897 = vst [vmem:[%s3061_s15 + $0x7c] sm:$0xf] %v1896_v54  ;;  %s4103_s15 = smov %s1904_s30 }
 0x1f9 PF: > { %s4078_s4 = sand.u32 31, %s4110_s14   ;;  %s2579_s5 = sshll.u32 %s3967_s24, 7 }
 0x1fa   : > { %s1909_s6 = scalar_lea.vmem %s3357_s9, %s2579_s5 [#allocation2]   ;;  %s1911_s7 = scalar_lea.vmem %s3961_s22, %s2579_s5  }
 0x1fb   : > { %p2496_p13 = scmp.le.s32.totalorder %s4078_s4, 0 }
 0x1fc   : > { %s3075_s8 = smov (!%p2496_p13), %s1911_s7   ;;  %s3079_s12 = smov (!%p2496_p13), %s1909_s6  }
 0x1fd   : > { %2110 = sbr.rel (%p2496_p13) target bundleno = 522 (0x20a), region = 123  ;;  %s3083_s10 = smov (!%p2496_p13), 0  }
 0x1fe   : > { %s3087_s11 = smov (!%p2496_p13), 0  }
 0x202 LB: >> { %v1921_v46 = vld [vmem:[%s3081_s12] sm:$0xf]  ;;  %s1923_s14 = sadd.s32 1, %s3085_s10  ;;  %s1915_s11 = sadd.s32 1, %s3089_s11   ;;  %s3089_s11 = sphi %s3087_s11, %s1915_s11   ;;  %s3085_s10 = sphi %s3083_s10, %s3084_s10   ;;  %s3081_s12 = sphi %s3079_s12, %s1928_s12   ;;  %s3077_s8 = sphi %s3075_s8, %s1929_s8  }
 0x203   : >> { %1922 = vst [vmem:[%s3077_s8] sm:$0xf] %v1921_v46  ;;  %p1924_p0 = scmp.ge.s32.totalorder %s1923_s14, %s4078_s4  ;;  %p1914_p1 = scmp.ge.s32.totalorder %s1915_s11, %s4078_s4 }
 0x205   : >> { %s4114_s14 = smov (%p1924_p0, %s1923_s14), 0  ;;  %1917 = sbr.rel (!%p1914_p1) target bundleno = 514 (0x202), region = 129 }
 0x206   : >> { %s2497_s9 = sshll.u32 %s4114_s14, 2  ;;  %s3084_s10 = smov %s4114_s14  }
 0x207   : >> { %s1928_s12 = scalar_lea.vmem %s1909_s6, %s2497_s9 [#allocation2]   ;;  %s1929_s8 = scalar_lea.vmem %s1911_s7, %s2497_s9  }
 0x20a PF: > { %p10_p2 = scmp.ge.s32.totalorder %s3126_s16, 44   ;;  %s4106_s12 = smov %s3053_s13 }
 0x20b   : > { %s4107_s13 = smov %s3134_s19  ;;  %s4108_s14 = smov %s3126_s16 }
 0x20c   :  { %12 = sbr.rel (!%p10_p2) target bundleno = 2 (0x2), region = 140 }

// kernel: resnet_forward.18
= control target key start
LH: loop header
LB: loop body
LE: loop exit
PB: predicated region body
PF: predicated region fallthrough
CT: control target
= control target key end

     0   :  { %s1715_s12 = smov 0   ;;  %s1717_s13 = smov 0   ;;  %s2039_s0 = inlined_call_operand.vmem [shape: bf16[2178,128], index: 0, kind: input, shape index: {}]   ;;  %s2040_s1 = inlined_call_operand.vmem [shape: bf16[128,128], index: 1, kind: input, shape index: {}]   ;;  %s2041_s2 = inlined_call_operand.vmem [shape: f32[1,128], index: 2, kind: input, shape index: {}]   ;;  %s2042_s3 = inlined_call_operand.vmem [shape: bf16[2178,128], index: 3, kind: output, shape index: {}]  }
   0x1   :  { %s1719_s14 = smov 0  }
   0x2 LB: > { %s1728_s15 = sadd.s32 4294967295, %s1661_s14   ;;  %s1730_s16 = sadd.s32 1, %s1661_s14   ;;  %s1661_s14 = sphi %s1719_s14, %s2051_s14   ;;  %s1657_s13 = sphi %s1717_s13, %s2050_s13   ;;  %s1653_s12 = sphi %s1715_s12, %s2049_s12  }
   0x3   : > { %s85_s17 = ssub.s32 %s1661_s14, %s1730_s16  ;;  %s88_s18 = sadd.s32 1, %s1657_s13 }
   0x4   : > { %p86_p0 = scmp.eq.s32.totalorder %s85_s17, 0  ;;  %p98_p1 = scmp.ne.s32.totalorder %s1657_s13, %s1653_s12 }
   0x5   : > { %p99_p2 = scmp.eq.s32.totalorder %s1728_s15, 4  ;;  %p1137_p3 = scmp.ge.s32.totalorder %s1661_s14, 1 }
   0x6   : > { %s1738_s19 = scalar_select %p86_p0, %s1657_s13, %s88_s18  }
   0x7   : > { %p1740_p4 = por %p99_p2, %p98_p1  ;;  %p146_p5 = scmp.lt.s32.totalorder %s1661_s14, 6 }
   0x9   : > { %p147_p6 = pnand %p1137_p3, %p146_p5 }
   0xa   : > { %s1757_s29 = smul.u32 (!%p147_p6), 55, %s1728_s15  ;;  %s170_s24 = sand.u32 (!%p147_p6), 1, %s1653_s12  }
   0xb   : > { %150 = sbr.rel (%p147_p6) target bundleno = 356 (0x164), region = 32 }
   0xc   : > { %p178_p7 = scmp.lt.s32.totalorder (!%p147_p6), %s1757_s29, 272  ;;  %s1517_s25 = smul.u32 (!%p147_p6), 220, %s170_s24 }
   0xe   : > { %s1818_s12 = scalar_lea.vmem (!%p147_p6), [#allocation2], %s1517_s25  }
  0x10   : > { %v1328_v0 = vld [vmem:[%s2040_s1 + $0x38] sm:$0xff]  ;;  %v1327_v1 = vld [vmem:[%s2040_s1 + $0x30] sm:$0xff]  ;;  %v1326_v2 = vld [vmem:[%s2040_s1 + $0x28] sm:$0xff]  ;;  %s179_s7 = scalar_select %p178_p7, %s1757_s29, 272 }
  0x11   : > { %481 = vmatpush.bf16.msra.mxu0 %v1328_v0  ;;  %1493 = vmatpush.bf16.msra.mxu1 %v1328_v0  ;;  %v1325_v3 = vld [vmem:[%s2040_s1 + $0x20] sm:$0xff]  ;;  %v1324_v4 = vld [vmem:[%s2040_s1 + $0x18] sm:$0xff]  ;;  %v1323_v5 = vld [vmem:[%s2040_s1 + $0x10] sm:$0xff]  ;;  %s802_s26 = ssub.s32 (%p1740_p4), 273, %s1757_s29  ;;  %s1329_s27 = smul.u32 (%p1740_p4), 220, %s1728_s15 }
  0x12   : > { %1494 = vmatpush.bf16.msra.mxu2 %v1328_v0  ;;  %1495 = vmatpush.bf16.msra.mxu3 %v1328_v0  ;;  %v1322_v6 = vld [vmem:[%s2040_s1 + $0x8] sm:$0xff]  ;;  %s1138_s10 = sshll.u32 %s179_s7, 2  ;;  %v1321_v7 = vld [vmem:[%s2040_s1] sm:$0xff]  ;;  %p803_p8 = scmp.lt.s32.totalorder (%p1740_p4), %s802_s26, 55 }
  0x13   : > { %s1776_s21 = scalar_lea.vmem %s2039_s0, %s1138_s10  ;;  %v1809_v40 = vld [vmem:[%s2041_s2] ss:$0 sm:$0xff]  ;;  %s1904_s4 = scalar_lea.vmem (%p1740_p4), %s2042_s3, %s1329_s27  }
  0x14   : > { %v1294_v8 = vld [vmem:[%s1776_s21] sm:$0xff]  ;;  %v1301_v9 = vld [vmem:[%s1776_s21 + $0x38] sm:$0xff]  ;;  %v1308_v10 = vld [vmem:[%s1776_s21 + $0x70] sm:$0xff] }
  0x15   : > { %482 = vmatpush.bf16.msra.mxu0 %v1327_v1  ;;  %1496 = vmatpush.bf16.msra.mxu1 %v1327_v1  ;;  %v1315_v11 = vld [vmem:[%s1776_s21 + $0xa8] sm:$0xff]  ;;  %v1302_v13 = vld [vmem:[%s1776_s21 + $0x40] sm:$0xff]  ;;  %v1309_v14 = vld [vmem:[%s1776_s21 + $0x78] sm:$0xff] }
  0x16   : > { %1497 = vmatpush.bf16.msra.mxu2 %v1327_v1  ;;  %1498 = vmatpush.bf16.msra.mxu3 %v1327_v1  ;;  %v1295_v12 = vld [vmem:[%s1776_s21 + $0x8] sm:$0xff]  ;;  %v1316_v15 = vld [vmem:[%s1776_s21 + $0xb0] sm:$0xff]  ;;  %v1310_v18 = vld [vmem:[%s1776_s21 + $0x80] sm:$0xff] }
  0x17   : > { %v1296_v16 = vld [vmem:[%s1776_s21 + $0x10] sm:$0xff]  ;;  %v1303_v17 = vld [vmem:[%s1776_s21 + $0x48] sm:$0xff]  ;;  %v1317_v19 = vld [vmem:[%s1776_s21 + $0xb8] sm:$0xff] }
  0x18   : > { %v1297_v20 = vld [vmem:[%s1776_s21 + $0x18] sm:$0xff]  ;;  %v1304_v21 = vld [vmem:[%s1776_s21 + $0x50] sm:$0xff]  ;;  %v1311_v22 = vld [vmem:[%s1776_s21 + $0x88] sm:$0xff] }
  0x19   : > { %483 = vmatpush.bf16.msra.mxu0 %v1326_v2  ;;  %1499 = vmatpush.bf16.msra.mxu1 %v1326_v2  ;;  %v1318_v23 = vld [vmem:[%s1776_s21 + $0xc0] sm:$0xff]  ;;  %v1305_v25 = vld [vmem:[%s1776_s21 + $0x58] sm:$0xff]  ;;  %v1312_v26 = vld [vmem:[%s1776_s21 + $0x90] sm:$0xff] }
  0x1a   : > { %1500 = vmatpush.bf16.msra.mxu2 %v1326_v2  ;;  %1501 = vmatpush.bf16.msra.mxu3 %v1326_v2  ;;  %v1298_v24 = vld [vmem:[%s1776_s21 + $0x20] sm:$0xff]  ;;  %v1319_v27 = vld [vmem:[%s1776_s21 + $0xc8] sm:$0xff]  ;;  %v1313_v30 = vld [vmem:[%s1776_s21 + $0x98] sm:$0xff] }
  0x1b   : > { %v1299_v28 = vld [vmem:[%s1776_s21 + $0x28] sm:$0xff]  ;;  %v1306_v29 = vld [vmem:[%s1776_s21 + $0x60] sm:$0xff]  ;;  %v1320_v31 = vld [vmem:[%s1776_s21 + $0xd0] sm:$0xff] }
  0x1c   : > { %v246_v32 = vld [vmem:[%s1776_s21 + $0xd8] sm:$0xf]  ;;  %v1300_v34 = vld [vmem:[%s1776_s21 + $0x30] sm:$0xff]  ;;  %v1307_v35 = vld [vmem:[%s1776_s21 + $0x68] sm:$0xff] }
  0x1d   : > { %484 = vmatpush.bf16.msra.mxu0 %v1325_v3  ;;  %1502 = vmatpush.bf16.msra.mxu1 %v1325_v3  ;;  %v376_v33 = vunpack.c.l.b16 %v246_v32  ;;  %v1314_v36 = vld [vmem:[%s1776_s21 + $0xa0] sm:$0xff] }
  0x1e   : > { %1503 = vmatpush.bf16.msra.mxu2 %v1325_v3  ;;  %1504 = vmatpush.bf16.msra.mxu3 %v1325_v3 }
  0x1f   : > { %v404_v37 = vpack.c.b16 %v376_v33, %v376_v33 }
  0x21   : > { %485 = vmatpush.bf16.msra.mxu0 %v1324_v4  ;;  %1505 = vmatpush.bf16.msra.mxu1 %v1324_v4 }
  0x22   : > { %1506 = vmatpush.bf16.msra.mxu2 %v1324_v4  ;;  %1507 = vmatpush.bf16.msra.mxu3 %v1324_v4 }
  0x25   : > { %486 = vmatpush.bf16.msra.mxu0 %v1323_v5  ;;  %1508 = vmatpush.bf16.msra.mxu1 %v1323_v5 }
  0x26   : > { %1509 = vmatpush.bf16.msra.mxu2 %v1323_v5  ;;  %1510 = vmatpush.bf16.msra.mxu3 %v1323_v5 }
  0x29   : > { %487 = vmatpush.bf16.msra.mxu0 %v1322_v6  ;;  %1511 = vmatpush.bf16.msra.mxu1 %v1322_v6 }
  0x2a   : > { %1512 = vmatpush.bf16.msra.mxu2 %v1322_v6  ;;  %1513 = vmatpush.bf16.msra.mxu3 %v1322_v6 }
  0x2d   : > { %488 = vmatpush.bf16.msra.mxu0 %v1321_v7  ;;  %1514 = vmatpush.bf16.msra.mxu1 %v1321_v7 }
  0x2e   : > { %1515 = vmatpush.bf16.msra.mxu2 %v1321_v7  ;;  %1516 = vmatpush.bf16.msra.mxu3 %v1321_v7 }
  0x30   : > { %489 = vmatmul.bf16.vlgmr.msra.gmra.mxu0 %v1294_v8  ;;  %524 = vmatmul.bf16.vlgmr.msra.gmra.mxu1 %v1301_v9 }
  0x31   : > { %559 = vmatmul.bf16.vlgmr.msra.gmra.mxu2 %v1308_v10  ;;  %594 = vmatmul.bf16.vlgmr.msra.gmra.mxu3 %v1315_v11 }
  0x40   : > { %494 = vmatmul.bf16.gmra.mxu0 %v1295_v12  ;;  %529 = vmatmul.bf16.gmra.mxu1 %v1302_v13 }
  0x41   : > { %564 = vmatmul.bf16.gmra.mxu2 %v1309_v14  ;;  %599 = vmatmul.bf16.gmra.mxu3 %v1316_v15 }
  0x50   : > { %499 = vmatmul.bf16.gmra.mxu0 %v1296_v16  ;;  %534 = vmatmul.bf16.gmra.mxu1 %v1303_v17 }
  0x51   : > { %569 = vmatmul.bf16.gmra.mxu2 %v1310_v18  ;;  %604 = vmatmul.bf16.gmra.mxu3 %v1317_v19 }
  0x60   : > { %504 = vmatmul.bf16.gmra.mxu0 %v1297_v20  ;;  %539 = vmatmul.bf16.gmra.mxu1 %v1304_v21 }
  0x61   : > { %574 = vmatmul.bf16.gmra.mxu2 %v1311_v22  ;;  %609 = vmatmul.bf16.gmra.mxu3 %v1318_v23 }
  0x70   : > { %509 = vmatmul.bf16.gmra.mxu0 %v1298_v24  ;;  %544 = vmatmul.bf16.gmra.mxu1 %v1305_v25 }
  0x71   : > { %579 = vmatmul.bf16.gmra.mxu2 %v1312_v26  ;;  %614 = vmatmul.bf16.gmra.mxu3 %v1319_v27 }
  0x80   : > { %514 = vmatmul.bf16.gmra.mxu0 %v1299_v28  ;;  %549 = vmatmul.bf16.gmra.mxu1 %v1306_v29 }
  0x81   : > { %584 = vmatmul.bf16.gmra.mxu2 %v1313_v30  ;;  %619 = vmatmul.bf16.gmra.mxu3 %v1320_v31 }
  0x90   : > { %519 = vmatmul.bf16.gmra.mxu0 %v1300_v34  ;;  %554 = vmatmul.bf16.gmra.mxu1 %v1307_v35 }
  0x91   : > { %589 = vmatmul.bf16.gmra.mxu2 %v1314_v36  ;;  %624 = vmatmul.bf16.gmra.mxu3 %v404_v37 }
  0xad   : > { %v490_v38 = vpop.f32.mrf.mxu0  ;;  %v525_v39 = vpop.f32.mrf.mxu1 }
  0xae   : > { %v491_v41 = vadd.f32 %v1809_v40, %v490_v38  ;;  %v526_v42 = vadd.f32 %v1809_v40, %v525_v39 }
  0xb0   : > { %v629_v49 = vmax.f32 %v491_v41, 0.0  ;;  %v643_v50 = vmax.f32 %v526_v42, 0.0 }
  0xb4   : > { %v560_v43 = vpop.f32.mrf.mxu2  ;;  %v595_v44 = vpop.f32.mrf.mxu3 }
  0xb5   : > { %v492_v45 = vpop.f32.mrf.mxu0  ;;  %v527_v46 = vpop.f32.mrf.mxu1  ;;  %v596_v53 = vadd.f32 %v1809_v40, %v595_v44  ;;  %v561_v56 = vadd.f32 %v1809_v40, %v560_v43 }
  0xb6   : > { %v493_v47 = vadd.f32 %v1809_v40, %v492_v45  ;;  %v528_v48 = vadd.f32 %v1809_v40, %v527_v46 }
  0xb7   : > { %v671_v59 = vmax.f32 %v596_v53, 0.0  ;;  %v657_v0 = vmax.f32 %v561_v56, 0.0 }
  0xb8   : > { %v630_v51 = vmax.f32 %v493_v47, 0.0  ;;  %v644_v52 = vmax.f32 %v528_v48, 0.0 }
  0xba   : > { %v1335_v54 = vpack.c.bf16 %v630_v51, %v629_v49  ;;  %v1370_v55 = vpack.c.bf16 %v644_v52, %v643_v50 }
  0xbc   : > { %1336 = vst [vmem:[%s1818_s12] sm:$0xff] %v1335_v54   ;;  %v562_v57 = vpop.f32.mrf.mxu2  ;;  %v597_v58 = vpop.f32.mrf.mxu3 }
  0xbd   : > { %1473 = vst [vmem:[%s1818_s12 + $0x38] sm:$0xff] %v1370_v55   ;;  %v563_v60 = vadd.f32 %v1809_v40, %v562_v57  ;;  %v598_v61 = vadd.f32 %v1809_v40, %v597_v58  ;;  %v495_v62 = vpop.f32.mrf.mxu0  ;;  %v530_v63 = vpop.f32.mrf.mxu1 }
  0xbe   : > { %v496_v5 = vadd.f32 %v1809_v40, %v495_v62  ;;  %v531_v6 = vadd.f32 %v1809_v40, %v530_v63 }
  0xbf   : > { %v658_v1 = vmax.f32 %v563_v60, 0.0  ;;  %v672_v2 = vmax.f32 %v598_v61, 0.0 }
  0xc0   : > { %v631_v13 = vmax.f32 %v496_v5, 0.0  ;;  %v645_v14 = vmax.f32 %v531_v6, 0.0 }
  0xc1   : > { %v1405_v3 = vpack.c.bf16 %v658_v1, %v657_v0  ;;  %v1440_v4 = vpack.c.bf16 %v672_v2, %v671_v59 }
  0xc3   : > { %1480 = vst [vmem:[%s1818_s12 + $0x70] sm:$0xff] %v1405_v3  }
  0xc4   : > { %1487 = vst [vmem:[%s1818_s12 + $0xa8] sm:$0xff] %v1440_v4   ;;  %v565_v7 = vpop.f32.mrf.mxu2  ;;  %v600_v8 = vpop.f32.mrf.mxu3 }
  0xc5   : > { %v497_v9 = vpop.f32.mrf.mxu0  ;;  %v532_v10 = vpop.f32.mrf.mxu1  ;;  %v601_v17 = vadd.f32 %v1809_v40, %v600_v8  ;;  %v566_v20 = vadd.f32 %v1809_v40, %v565_v7 }
  0xc6   : > { %v498_v11 = vadd.f32 %v1809_v40, %v497_v9  ;;  %v533_v12 = vadd.f32 %v1809_v40, %v532_v10 }
  0xc7   : > { %v673_v23 = vmax.f32 %v601_v17, 0.0  ;;  %v659_v28 = vmax.f32 %v566_v20, 0.0 }
  0xc8   : > { %v632_v15 = vmax.f32 %v498_v11, 0.0  ;;  %v646_v16 = vmax.f32 %v533_v12, 0.0 }
  0xca   : > { %v1340_v18 = vpack.c.bf16 %v632_v15, %v631_v13  ;;  %v1375_v19 = vpack.c.bf16 %v646_v16, %v645_v14 }
  0xcc   : > { %1467 = vst [vmem:[%s1818_s12 + $0x8] sm:$0xff] %v1340_v18   ;;  %v567_v21 = vpop.f32.mrf.mxu2  ;;  %v602_v22 = vpop.f32.mrf.mxu3 }
  0xcd   : > { %1474 = vst [vmem:[%s1818_s12 + $0x40] sm:$0xff] %v1375_v19   ;;  %v568_v24 = vadd.f32 %v1809_v40, %v567_v21  ;;  %v603_v25 = vadd.f32 %v1809_v40, %v602_v22  ;;  %v500_v26 = vpop.f32.mrf.mxu0  ;;  %v535_v27 = vpop.f32.mrf.mxu1 }
  0xce   : > { %v501_v33 = vadd.f32 %v1809_v40, %v500_v26  ;;  %v536_v34 = vadd.f32 %v1809_v40, %v535_v27 }
  0xcf   : > { %v660_v29 = vmax.f32 %v568_v24, 0.0  ;;  %v674_v30 = vmax.f32 %v603_v25, 0.0 }
  0xd0   : > { %v633_v42 = vmax.f32 %v501_v33, 0.0  ;;  %v647_v43 = vmax.f32 %v536_v34, 0.0 }
  0xd1   : > { %v1410_v31 = vpack.c.bf16 %v660_v29, %v659_v28  ;;  %v1445_v32 = vpack.c.bf16 %v674_v30, %v673_v23 }
  0xd3   : > { %1481 = vst [vmem:[%s1818_s12 + $0x78] sm:$0xff] %v1410_v31  }
  0xd4   : > { %1488 = vst [vmem:[%s1818_s12 + $0xb0] sm:$0xff] %v1445_v32   ;;  %v570_v35 = vpop.f32.mrf.mxu2  ;;  %v605_v36 = vpop.f32.mrf.mxu3 }
  0xd5   : > { %v502_v37 = vpop.f32.mrf.mxu0  ;;  %v537_v38 = vpop.f32.mrf.mxu1  ;;  %v606_v46 = vadd.f32 %v1809_v40, %v605_v36  ;;  %v571_v49 = vadd.f32 %v1809_v40, %v570_v35 }
  0xd6   : > { %v503_v39 = vadd.f32 %v1809_v40, %v502_v37  ;;  %v538_v41 = vadd.f32 %v1809_v40, %v537_v38 }
  0xd7   : > { %v675_v52 = vmax.f32 %v606_v46, 0.0  ;;  %v661_v57 = vmax.f32 %v571_v49, 0.0 }
  0xd8   : > { %v634_v44 = vmax.f32 %v503_v39, 0.0  ;;  %v648_v45 = vmax.f32 %v538_v41, 0.0 }
  0xda   : > { %v1345_v47 = vpack.c.bf16 %v634_v44, %v633_v42  ;;  %v1380_v48 = vpack.c.bf16 %v648_v45, %v647_v43 }
  0xdc   : > { %1468 = vst [vmem:[%s1818_s12 + $0x10] sm:$0xff] %v1345_v47   ;;  %v572_v50 = vpop.f32.mrf.mxu2  ;;  %v607_v51 = vpop.f32.mrf.mxu3 }
  0xdd   : > { %1475 = vst [vmem:[%s1818_s12 + $0x48] sm:$0xff] %v1380_v48   ;;  %v573_v53 = vadd.f32 %v1809_v40, %v572_v50  ;;  %v608_v54 = vadd.f32 %v1809_v40, %v607_v51  ;;  %v505_v55 = vpop.f32.mrf.mxu0  ;;  %v540_v56 = vpop.f32.mrf.mxu1 }
  0xde   : > { %v506_v62 = vadd.f32 %v1809_v40, %v505_v55  ;;  %v541_v63 = vadd.f32 %v1809_v40, %v540_v56 }
  0xdf   : > { %v662_v58 = vmax.f32 %v573_v53, 0.0  ;;  %v676_v59 = vmax.f32 %v608_v54, 0.0 }
  0xe0   : > { %v635_v6 = vmax.f32 %v506_v62, 0.0  ;;  %v649_v7 = vmax.f32 %v541_v63, 0.0 }
  0xe1   : > { %v1415_v60 = vpack.c.bf16 %v662_v58, %v661_v57  ;;  %v1450_v61 = vpack.c.bf16 %v676_v59, %v675_v52 }
  0xe3   : > { %1482 = vst [vmem:[%s1818_s12 + $0x80] sm:$0xff] %v1415_v60  }
  0xe4   : > { %1489 = vst [vmem:[%s1818_s12 + $0xb8] sm:$0xff] %v1450_v61   ;;  %v575_v0 = vpop.f32.mrf.mxu2  ;;  %v610_v1 = vpop.f32.mrf.mxu3 }
  0xe5   : > { %v507_v2 = vpop.f32.mrf.mxu0  ;;  %v542_v3 = vpop.f32.mrf.mxu1  ;;  %v611_v10 = vadd.f32 %v1809_v40, %v610_v1  ;;  %v576_v13 = vadd.f32 %v1809_v40, %v575_v0 }
  0xe6   : > { %v508_v4 = vadd.f32 %v1809_v40, %v507_v2  ;;  %v543_v5 = vadd.f32 %v1809_v40, %v542_v3 }
  0xe7   : > { %v677_v16 = vmax.f32 %v611_v10, 0.0  ;;  %v663_v21 = vmax.f32 %v576_v13, 0.0 }
  0xe8   : > { %v636_v8 = vmax.f32 %v508_v4, 0.0  ;;  %v650_v9 = vmax.f32 %v543_v5, 0.0 }
  0xea   : > { %v1350_v11 = vpack.c.bf16 %v636_v8, %v635_v6  ;;  %v1385_v12 = vpack.c.bf16 %v650_v9, %v649_v7 }
  0xec   : > { %1469 = vst [vmem:[%s1818_s12 + $0x18] sm:$0xff] %v1350_v11   ;;  %v577_v14 = vpop.f32.mrf.mxu2  ;;  %v612_v15 = vpop.f32.mrf.mxu3 }
  0xed   : > { %1476 = vst [vmem:[%s1818_s12 + $0x50] sm:$0xff] %v1385_v12   ;;  %v578_v17 = vadd.f32 %v1809_v40, %v577_v14  ;;  %v613_v18 = vadd.f32 %v1809_v40, %v612_v15  ;;  %v510_v19 = vpop.f32.mrf.mxu0  ;;  %v545_v20 = vpop.f32.mrf.mxu1 }
  0xee   : > { %v511_v26 = vadd.f32 %v1809_v40, %v510_v19  ;;  %v546_v27 = vadd.f32 %v1809_v40, %v545_v20 }
  0xef   : > { %v664_v22 = vmax.f32 %v578_v17, 0.0  ;;  %v678_v23 = vmax.f32 %v613_v18, 0.0 }
  0xf0   : > { %v637_v34 = vmax.f32 %v511_v26, 0.0  ;;  %v651_v35 = vmax.f32 %v546_v27, 0.0 }
  0xf1   : > { %v1420_v24 = vpack.c.bf16 %v664_v22, %v663_v21  ;;  %v1455_v25 = vpack.c.bf16 %v678_v23, %v677_v16 }
  0xf3   : > { %1483 = vst [vmem:[%s1818_s12 + $0x88] sm:$0xff] %v1420_v24  }
  0xf4   : > { %1490 = vst [vmem:[%s1818_s12 + $0xc0] sm:$0xff] %v1455_v25   ;;  %v580_v28 = vpop.f32.mrf.mxu2  ;;  %v615_v29 = vpop.f32.mrf.mxu3 }
  0xf5   : > { %v512_v30 = vpop.f32.mrf.mxu0  ;;  %v547_v31 = vpop.f32.mrf.mxu1  ;;  %v616_v38 = vadd.f32 %v1809_v40, %v615_v29  ;;  %v581_v42 = vadd.f32 %v1809_v40, %v580_v28 }
  0xf6   : > { %v513_v32 = vadd.f32 %v1809_v40, %v512_v30  ;;  %v548_v33 = vadd.f32 %v1809_v40, %v547_v31 }
  0xf7   : > { %v679_v45 = vmax.f32 %v616_v38, 0.0  ;;  %v665_v50 = vmax.f32 %v581_v42, 0.0 }
  0xf8   : > { %v638_v36 = vmax.f32 %v513_v32, 0.0  ;;  %v652_v37 = vmax.f32 %v548_v33, 0.0 }
  0xfa   : > { %v1355_v39 = vpack.c.bf16 %v638_v36, %v637_v34  ;;  %v1390_v41 = vpack.c.bf16 %v652_v37, %v651_v35 }
  0xfc   : > { %1470 = vst [vmem:[%s1818_s12 + $0x20] sm:$0xff] %v1355_v39   ;;  %v582_v43 = vpop.f32.mrf.mxu2  ;;  %v617_v44 = vpop.f32.mrf.mxu3 }
  0xfd   : > { %1477 = vst [vmem:[%s1818_s12 + $0x58] sm:$0xff] %v1390_v41   ;;  %v583_v46 = vadd.f32 %v1809_v40, %v582_v43  ;;  %v618_v47 = vadd.f32 %v1809_v40, %v617_v44  ;;  %v515_v48 = vpop.f32.mrf.mxu0  ;;  %v550_v49 = vpop.f32.mrf.mxu1 }
  0xfe   : > { %v516_v55 = vadd.f32 %v1809_v40, %v515_v48  ;;  %v551_v56 = vadd.f32 %v1809_v40, %v550_v49 }
  0xff   : > { %v666_v51 = vmax.f32 %v583_v46, 0.0  ;;  %v680_v52 = vmax.f32 %v618_v47, 0.0 }
 0x100   : > { %v639_v63 = vmax.f32 %v516_v55, 0.0  ;;  %v653_v0 = vmax.f32 %v551_v56, 0.0 }
 0x101   : > { %v1425_v53 = vpack.c.bf16 %v666_v51, %v665_v50  ;;  %v1460_v54 = vpack.c.bf16 %v680_v52, %v679_v45 }
 0x103   : > { %1484 = vst [vmem:[%s1818_s12 + $0x90] sm:$0xff] %v1425_v53  }
 0x104   : > { %1491 = vst [vmem:[%s1818_s12 + $0xc8] sm:$0xff] %v1460_v54   ;;  %v585_v57 = vpop.f32.mrf.mxu2  ;;  %v620_v58 = vpop.f32.mrf.mxu3 }
 0x105   : > { %v517_v59 = vpop.f32.mrf.mxu0  ;;  %v552_v60 = vpop.f32.mrf.mxu1  ;;  %v621_v3 = vadd.f32 %v1809_v40, %v620_v58  ;;  %v586_v6 = vadd.f32 %v1809_v40, %v585_v57 }
 0x106   : > { %v518_v61 = vadd.f32 %v1809_v40, %v517_v59  ;;  %v553_v62 = vadd.f32 %v1809_v40, %v552_v60 }
 0x107   : > { %v681_v9 = vmax.f32 %v621_v3, 0.0  ;;  %v667_v14 = vmax.f32 %v586_v6, 0.0 }
 0x108   : > { %v640_v1 = vmax.f32 %v518_v61, 0.0  ;;  %v654_v2 = vmax.f32 %v553_v62, 0.0 }
 0x10a   : > { %v1360_v4 = vpack.c.bf16 %v640_v1, %v639_v63  ;;  %v1395_v5 = vpack.c.bf16 %v654_v2, %v653_v0 }
 0x10c   : > { %1471 = vst [vmem:[%s1818_s12 + $0x28] sm:$0xff] %v1360_v4   ;;  %v587_v7 = vpop.f32.mrf.mxu2  ;;  %v622_v8 = vpop.f32.mrf.mxu3 }
 0x10d   : > { %1478 = vst [vmem:[%s1818_s12 + $0x60] sm:$0xff] %v1395_v5   ;;  %v588_v10 = vadd.f32 %v1809_v40, %v587_v7  ;;  %v623_v11 = vadd.f32 %v1809_v40, %v622_v8  ;;  %v520_v12 = vpop.f32.mrf.mxu0  ;;  %v555_v13 = vpop.f32.mrf.mxu1 }
 0x10e   : > { %v521_v19 = vadd.f32 %v1809_v40, %v520_v12  ;;  %v556_v20 = vadd.f32 %v1809_v40, %v555_v13 }
 0x10f   : > { %v668_v15 = vmax.f32 %v588_v10, 0.0  ;;  %v682_v16 = vmax.f32 %v623_v11, 0.0 }
 0x110   : > { %v641_v29 = vmax.f32 %v521_v19, 0.0  ;;  %v655_v30 = vmax.f32 %v556_v20, 0.0 }
 0x111   : > { %v1430_v17 = vpack.c.bf16 %v668_v15, %v667_v14  ;;  %v1465_v18 = vpack.c.bf16 %v682_v16, %v681_v9 }
 0x113   : > { %1485 = vst [vmem:[%s1818_s12 + $0x98] sm:$0xff] %v1430_v17  }
 0x114   : > { %1492 = vst [vmem:[%s1818_s12 + $0xd0] sm:$0xff] %v1465_v18   ;;  %v590_v21 = vpop.f32.mrf.mxu2  ;;  %v625_v22 = vpop.f32.mrf.mxu3 }
 0x115   : > { %v626_v23 = vadd.f32 %v1809_v40, %v625_v22  ;;  %v522_v24 = vpop.f32.mrf.mxu0  ;;  %v557_v25 = vpop.f32.mrf.mxu1  ;;  %v591_v36 = vadd.f32 %v1809_v40, %v590_v21 }
 0x116   : > { %v523_v26 = vadd.f32 %v1809_v40, %v522_v24  ;;  %v558_v27 = vadd.f32 %v1809_v40, %v557_v25 }
 0x117   : > { %v683_v28 = vmax.f32 %v626_v23, 0.0  ;;  %v669_v41 = vmax.f32 %v591_v36, 0.0 }
 0x118   : > { %v642_v31 = vmax.f32 %v523_v26, 0.0  ;;  %v656_v32 = vmax.f32 %v558_v27, 0.0 }
 0x119   : > { %v738_v33 = vpack.c.bf16 %v683_v28, %v683_v28 }
 0x11a   : > { %v1365_v34 = vpack.c.bf16 %v642_v31, %v641_v29  ;;  %v1400_v35 = vpack.c.bf16 %v656_v32, %v655_v30 }
 0x11b   : > { %793 = vst [vmem:[%s1818_s12 + $0xd8] sm:$0xf] %v738_v33 }
 0x11c   : > { %1472 = vst [vmem:[%s1818_s12 + $0x30] sm:$0xff] %v1365_v34   ;;  %v592_v37 = vpop.f32.mrf.mxu2  ;;  %v627_v38 = vpop.f32.mrf.mxu3 }
 0x11d   : > { %1479 = vst [vmem:[%s1818_s12 + $0x68] sm:$0xff] %v1400_v35   ;;  %v593_v39 = vadd.f32 %v1809_v40, %v592_v37 }
 0x11f   : > { %v670_v42 = vmax.f32 %v593_v39, 0.0  ;;  %800 = sbr.rel (!%p1740_p4) target bundleno = 356 (0x164), region = 36 }
 0x121   : > { %v1435_v43 = vpack.c.bf16 %v670_v42, %v669_v41 }
 0x123   : > { %1486 = vst [vmem:[%s1818_s12 + $0xa0] sm:$0xff] %v1435_v43  }
 0x124   : > { %s2053_s26 = smov (!%p803_p8, %s802_s26), 55 }
 0x125   : > { %s1279_s5 = sshll.u32 %s2053_s26, 2 }
 0x126   : > { %p1282_p9 = scmp.eq.s32.totalorder %s1279_s5, 0 }
 0x127   : > { %s1910_s6 = sshrl.u32 (!%p1282_p9), %s2053_s26, 5 }
 0x128   : > { %811 = sbr.rel (%p1282_p9) target bundleno = 356 (0x164), region = 40  ;;  %p1283_p10 = scmp.le.s32.totalorder (!%p1282_p9), %s1910_s6, 0 }
 0x12d   : > { %1090 = sbr.rel (%p1283_p10) target bundleno = 339 (0x153), region = 112  ;;  %s2044_s15 = smov (!%p1283_p10), %s1904_s4 }
 0x12e   : > { %s2045_s20 = smov (!%p1283_p10), %s1818_s12  ;;  %s1919_s29 = smov (!%p1283_p10), 0  }
 0x12f   : > { %s1921_s7 = smov (!%p1283_p10), 0  }
 0x132 LB: >> { %v828_v40 = vld [vmem:[%s1669_s20] sm:$0xf]  ;;  %v830_v44 = vld [vmem:[%s1669_s20 + $0x4] sm:$0xf]  ;;  %v832_v45 = vld [vmem:[%s1669_s20 + $0x8] sm:$0xf]  ;;  %s1677_s7 = sphi %s1921_s7, %s822_s7   ;;  %s1673_s29 = sphi %s1919_s29, %s2048_s29   ;;  %s1669_s20 = sphi %s2045_s20, %s2047_s20   ;;  %s1665_s15 = sphi %s2044_s15, %s2046_s15  }
 0x133   : >> { %829 = vst [vmem:[%s1665_s15] sm:$0xf] %v828_v40  ;;  %v834_v46 = vld [vmem:[%s1669_s20 + $0xc] sm:$0xf]  ;;  %v836_v47 = vld [vmem:[%s1669_s20 + $0x10] sm:$0xf]  ;;  %s892_s8 = sadd.s32 1, %s1673_s29 }
 0x134   : >> { %831 = vst [vmem:[%s1665_s15 + $0x4] sm:$0xf] %v830_v44  ;;  %v838_v48 = vld [vmem:[%s1669_s20 + $0x14] sm:$0xf]  ;;  %v840_v49 = vld [vmem:[%s1669_s20 + $0x18] sm:$0xf]  ;;  %p893_p11 = scmp.ge.s32.totalorder %s892_s8, %s1910_s6 }
 0x135   : >> { %833 = vst [vmem:[%s1665_s15 + $0x8] sm:$0xf] %v832_v45  ;;  %v842_v50 = vld [vmem:[%s1669_s20 + $0x1c] sm:$0xf]  ;;  %v844_v51 = vld [vmem:[%s1669_s20 + $0x20] sm:$0xf] }
 0x136   : >> { %835 = vst [vmem:[%s1665_s15 + $0xc] sm:$0xf] %v834_v46  ;;  %v846_v52 = vld [vmem:[%s1669_s20 + $0x24] sm:$0xf]  ;;  %v848_v53 = vld [vmem:[%s1669_s20 + $0x28] sm:$0xf] }
 0x137   : >> { %837 = vst [vmem:[%s1665_s15 + $0x10] sm:$0xf] %v836_v47  ;;  %v850_v54 = vld [vmem:[%s1669_s20 + $0x2c] sm:$0xf]  ;;  %v852_v55 = vld [vmem:[%s1669_s20 + $0x30] sm:$0xf] }
 0x138   : >> { %839 = vst [vmem:[%s1665_s15 + $0x14] sm:$0xf] %v838_v48  ;;  %v854_v56 = vld [vmem:[%s1669_s20 + $0x34] sm:$0xf]  ;;  %v856_v57 = vld [vmem:[%s1669_s20 + $0x38] sm:$0xf] }
 0x139   : >> { %841 = vst [vmem:[%s1665_s15 + $0x18] sm:$0xf] %v840_v49  ;;  %v858_v58 = vld [vmem:[%s1669_s20 + $0x3c] sm:$0xf]  ;;  %v860_v59 = vld [vmem:[%s1669_s20 + $0x40] sm:$0xf] }
 0x13a   : >> { %843 = vst [vmem:[%s1665_s15 + $0x1c] sm:$0xf] %v842_v50  ;;  %v862_v60 = vld [vmem:[%s1669_s20 + $0x44] sm:$0xf]  ;;  %s2055_s8 = smov (%p893_p11, %s892_s8), 0  ;;  %s822_s7 = sadd.s32 1, %s1677_s7  }
 0x13b   : >> { %845 = vst [vmem:[%s1665_s15 + $0x20] sm:$0xf] %v844_v51  ;;  %v864_v61 = vld [vmem:[%s1669_s20 + $0x48] sm:$0xf]  ;;  %v866_v62 = vld [vmem:[%s1669_s20 + $0x4c] sm:$0xf]  ;;  %p821_p12 = scmp.ge.s32.totalorder %s822_s7, %s1910_s6  ;;  %s2048_s29 = smov %s2055_s8 }
 0x13c   : >> { %847 = vst [vmem:[%s1665_s15 + $0x24] sm:$0xf] %v846_v52  ;;  %s1284_s9 = sshll.u32 %s2055_s8, 7  ;;  %v868_v63 = vld [vmem:[%s1669_s20 + $0x50] sm:$0xf] }
 0x13d   : >> { %849 = vst [vmem:[%s1665_s15 + $0x28] sm:$0xf] %v848_v53  ;;  %s1980_s10 = scalar_lea.vmem %s1818_s12, %s1284_s9 [#allocation2]   ;;  %s898_s11 = scalar_lea.vmem %s1904_s4, %s1284_s9   ;;  %v870_v0 = vld [vmem:[%s1669_s20 + $0x54] sm:$0xf]  ;;  %v872_v1 = vld [vmem:[%s1669_s20 + $0x58] sm:$0xf] }
 0x13e   : >> { %851 = vst [vmem:[%s1665_s15 + $0x2c] sm:$0xf] %v850_v54  ;;  %v874_v2 = vld [vmem:[%s1669_s20 + $0x5c] sm:$0xf]  ;;  %v876_v3 = vld [vmem:[%s1669_s20 + $0x60] sm:$0xf] }
 0x13f   : >> { %853 = vst [vmem:[%s1665_s15 + $0x30] sm:$0xf] %v852_v55  ;;  %v878_v4 = vld [vmem:[%s1669_s20 + $0x64] sm:$0xf]  ;;  %v880_v5 = vld [vmem:[%s1669_s20 + $0x68] sm:$0xf] }
 0x140   : >> { %855 = vst [vmem:[%s1665_s15 + $0x34] sm:$0xf] %v854_v56  ;;  %v882_v6 = vld [vmem:[%s1669_s20 + $0x6c] sm:$0xf]  ;;  %v884_v7 = vld [vmem:[%s1669_s20 + $0x70] sm:$0xf] }
 0x141   : >> { %857 = vst [vmem:[%s1665_s15 + $0x38] sm:$0xf] %v856_v57  ;;  %v886_v8 = vld [vmem:[%s1669_s20 + $0x74] sm:$0xf]  ;;  %v888_v9 = vld [vmem:[%s1669_s20 + $0x78] sm:$0xf] }
 0x142   : >> { %859 = vst [vmem:[%s1665_s15 + $0x3c] sm:$0xf] %v858_v58  ;;  %v890_v10 = vld [vmem:[%s1669_s20 + $0x7c] sm:$0xf]  ;;  %s2047_s20 = smov %s1980_s10 }
 0x143   : >> { %861 = vst [vmem:[%s1665_s15 + $0x40] sm:$0xf] %v860_v59 }
 0x144   : >> { %863 = vst [vmem:[%s1665_s15 + $0x44] sm:$0xf] %v862_v60 }
 0x145   : >> { %865 = vst [vmem:[%s1665_s15 + $0x48] sm:$0xf] %v864_v61 }
 0x146   : >> { %867 = vst [vmem:[%s1665_s15 + $0x4c] sm:$0xf] %v866_v62 }
 0x147   : >> { %869 = vst [vmem:[%s1665_s15 + $0x50] sm:$0xf] %v868_v63 }
 0x148   : >> { %871 = vst [vmem:[%s1665_s15 + $0x54] sm:$0xf] %v870_v0 }
 0x149   : >> { %873 = vst [vmem:[%s1665_s15 + $0x58] sm:$0xf] %v872_v1 }
 0x14a   : >> { %875 = vst [vmem:[%s1665_s15 + $0x5c] sm:$0xf] %v874_v2 }
 0x14b   : >> { %877 = vst [vmem:[%s1665_s15 + $0x60] sm:$0xf] %v876_v3 }
 0x14c   : >> { %879 = vst [vmem:[%s1665_s15 + $0x64] sm:$0xf] %v878_v4 }
 0x14d   : >> { %881 = vst [vmem:[%s1665_s15 + $0x68] sm:$0xf] %v880_v5 }
 0x14e   : >> { %883 = vst [vmem:[%s1665_s15 + $0x6c] sm:$0xf] %v882_v6  ;;  %824 = sbr.rel (!%p821_p12) target bundleno = 306 (0x132), region = 118 }
 0x14f   : >> { %885 = vst [vmem:[%s1665_s15 + $0x70] sm:$0xf] %v884_v7 }
 0x150   : >> { %887 = vst [vmem:[%s1665_s15 + $0x74] sm:$0xf] %v886_v8 }
 0x151   : >> { %889 = vst [vmem:[%s1665_s15 + $0x78] sm:$0xf] %v888_v9 }
 0x152   : >> { %891 = vst [vmem:[%s1665_s15 + $0x7c] sm:$0xf] %v890_v10  ;;  %s2046_s15 = smov %s898_s11 }
 0x153 PF: > { %s2021_s14 = sand.u32 31, %s2053_s26   ;;  %s1330_s17 = sshll.u32 %s1910_s6, 7 }
 0x154   : > { %s903_s18 = scalar_lea.vmem %s1818_s12, %s1330_s17 [#allocation2]   ;;  %s905_s21 = scalar_lea.vmem %s1904_s4, %s1330_s17  }
 0x155   : > { %p1289_p13 = scmp.le.s32.totalorder %s2021_s14, 0 }
 0x156   : > { %s1679_s22 = smov (!%p1289_p13), %s905_s21   ;;  %s1683_s23 = smov (!%p1289_p13), %s903_s18  }
 0x157   : > { %1104 = sbr.rel (%p1289_p13) target bundleno = 356 (0x164), region = 123  ;;  %s1687_s24 = smov (!%p1289_p13), 0  }
 0x158   : > { %s1691_s25 = smov (!%p1289_p13), 0  }
 0x15c LB: >> { %v915_v11 = vld [vmem:[%s1685_s23] sm:$0xf]  ;;  %s917_s26 = sadd.s32 1, %s1689_s24  ;;  %s909_s25 = sadd.s32 1, %s1693_s25   ;;  %s1693_s25 = sphi %s1691_s25, %s909_s25   ;;  %s1689_s24 = sphi %s1687_s24, %s1688_s24   ;;  %s1685_s23 = sphi %s1683_s23, %s922_s23   ;;  %s1681_s22 = sphi %s1679_s22, %s923_s22  }
 0x15d   : >> { %916 = vst [vmem:[%s1681_s22] sm:$0xf] %v915_v11  ;;  %p918_p0 = scmp.ge.s32.totalorder %s917_s26, %s2021_s14  ;;  %p908_p1 = scmp.ge.s32.totalorder %s909_s25, %s2021_s14 }
 0x15f   : >> { %s2057_s26 = smov (%p918_p0, %s917_s26), 0  ;;  %911 = sbr.rel (!%p908_p1) target bundleno = 348 (0x15c), region = 129 }
 0x160   : >> { %s1290_s12 = sshll.u32 %s2057_s26, 2  ;;  %s1688_s24 = smov %s2057_s26  }
 0x161   : >> { %s922_s23 = scalar_lea.vmem %s903_s18, %s1290_s12 [#allocation2]   ;;  %s923_s22 = scalar_lea.vmem %s905_s21, %s1290_s12  }
 0x164 PF: > { %p10_p2 = scmp.ge.s32.totalorder %s1730_s16, 7   ;;  %s2049_s12 = smov %s1657_s13 }
 0x165   : > { %s2050_s13 = smov %s1738_s19  ;;  %s2051_s14 = smov %s1730_s16 }
 0x166   :  { %12 = sbr.rel (!%p10_p2) target bundleno = 2 (0x2), region = 140 }

// kernel: resnet_forward.19
= control target key start
LH: loop header
LB: loop body
LE: loop exit
PB: predicated region body
PF: predicated region fallthrough
CT: control target
= control target key end

     0   :  { %s1716_s12 = smov 0   ;;  %s1718_s13 = smov 0   ;;  %s2053_s0 = inlined_call_operand.vmem [shape: bf16[2178,36], index: 0, kind: input, shape index: {}]   ;;  %s2054_s1 = inlined_call_operand.vmem [shape: bf16[36,128], index: 1, kind: input, shape index: {}]   ;;  %s2055_s2 = inlined_call_operand.vmem [shape: f32[1,128], index: 2, kind: input, shape index: {}]   ;;  %s2056_s3 = inlined_call_operand.vmem [shape: bf16[2178,128], index: 3, kind: output, shape index: {}]  }
   0x1   :  { %s1720_s14 = smov 0  }
   0x2 LB: > { %s1729_s15 = sadd.s32 4294967295, %s1662_s14   ;;  %s1731_s16 = sadd.s32 1, %s1662_s14   ;;  %s1662_s14 = sphi %s1720_s14, %s2065_s14   ;;  %s1658_s13 = sphi %s1718_s13, %s2064_s13   ;;  %s1654_s12 = sphi %s1716_s12, %s2063_s12  }
   0x3   : > { %s85_s17 = ssub.s32 %s1662_s14, %s1731_s16  ;;  %s88_s18 = sadd.s32 1, %s1658_s13 }
   0x4   : > { %p86_p0 = scmp.eq.s32.totalorder %s85_s17, 0  ;;  %p98_p1 = scmp.ne.s32.totalorder %s1658_s13, %s1654_s12 }
   0x5   : > { %p99_p2 = scmp.eq.s32.totalorder %s1729_s15, 4  ;;  %p1155_p3 = scmp.ge.s32.totalorder %s1662_s14, 1 }
   0x6   : > { %s1739_s19 = scalar_select %p86_p0, %s1658_s13, %s88_s18  }
   0x7   : > { %p1741_p4 = por %p99_p2, %p98_p1  ;;  %p146_p5 = scmp.lt.s32.totalorder %s1662_s14, 6 }
   0x9   : > { %p147_p6 = pnand %p1155_p3, %p146_p5 }
   0xa   : > { %s1749_s23 = smul.u32 (!%p147_p6), 55, %s1729_s15  ;;  %s170_s8 = sand.u32 (!%p147_p6), 1, %s1654_s12  }
   0xb   : > { %150 = sbr.rel (%p147_p6) target bundleno = 341 (0x155), region = 32 }
   0xc   : > { %p178_p7 = scmp.lt.s32.totalorder (!%p147_p6), %s1749_s23, 272  ;;  %s1518_s9 = smul.u32 (!%p147_p6), 220, %s170_s8 }
   0xe   : > { %s1832_s10 = scalar_lea.vmem (!%p147_p6), [#allocation2], %s1518_s9  }
  0x10   : > { %v252_v0 = vld [vmem:[%s2054_s1 + $0x10] sm:$0x3]  ;;  %vm495_vm0 = vcmask 1041408   ;;  %s179_s24 = scalar_select %p178_p7, %s1749_s23, 272  ;;  %v1344_v4 = vld [vmem:[%s2054_s1 + $0x8] sm:$0xff]  ;;  %v1343_v5 = vld [vmem:[%s2054_s1] sm:$0xff] }
  0x11   : > { %v404_v1 = vunpack.c.l.b16 %v252_v0  ;;  %vm410_vm1 = vcmask 293888   ;;  %v1823_v38 = vld [vmem:[%s2055_s2] ss:$0 sm:$0xff]  ;;  %s820_s11 = ssub.s32 (%p1741_p4), 273, %s1749_s23  ;;  %s1345_s12 = smul.u32 (%p1741_p4), 220, %s1729_s15 }
  0x12   : > { %s1156_s27 = sshll.u32 %s179_s24, 2  ;;  %p821_p8 = scmp.lt.s32.totalorder (%p1741_p4), %s820_s11, 55 }
  0x13   : > { %v407_v2 = vpack.c.b16 %v404_v1, %v404_v1  ;;  %s1762_s5 = scalar_lea.vmem %s2053_s0, %s1156_s27  ;;  %s1918_s18 = scalar_lea.vmem (%p1741_p4), %s2056_s3, %s1345_s12  }
  0x14   : > { %v1316_v6 = vld [vmem:[%s1762_s5] sm:$0xff]  ;;  %v1323_v7 = vld [vmem:[%s1762_s5 + $0x38] sm:$0xff]  ;;  %v1330_v8 = vld [vmem:[%s1762_s5 + $0x70] sm:$0xff] }
  0x15   : > { %v497_v3 = vsel %vm495_vm0, %v407_v2, 0  ;;  %v1337_v9 = vld [vmem:[%s1762_s5 + $0xa8] sm:$0xff]  ;;  %v1324_v11 = vld [vmem:[%s1762_s5 + $0x40] sm:$0xff]  ;;  %v1331_v12 = vld [vmem:[%s1762_s5 + $0x78] sm:$0xff] }
  0x16   : > { %504 = vmatpush.bf16.msra.mxu0 %v497_v3  ;;  %1509 = vmatpush.bf16.msra.mxu1 %v497_v3  ;;  %v1317_v10 = vld [vmem:[%s1762_s5 + $0x8] sm:$0xff]  ;;  %v1338_v13 = vld [vmem:[%s1762_s5 + $0xb0] sm:$0xff]  ;;  %v1332_v16 = vld [vmem:[%s1762_s5 + $0x80] sm:$0xff] }
  0x17   : > { %1510 = vmatpush.bf16.msra.mxu2 %v497_v3  ;;  %1511 = vmatpush.bf16.msra.mxu3 %v497_v3  ;;  %v1318_v14 = vld [vmem:[%s1762_s5 + $0x10] sm:$0xff]  ;;  %v1325_v15 = vld [vmem:[%s1762_s5 + $0x48] sm:$0xff]  ;;  %v1339_v17 = vld [vmem:[%s1762_s5 + $0xb8] sm:$0xff] }
  0x18   : > { %v1319_v18 = vld [vmem:[%s1762_s5 + $0x18] sm:$0xff]  ;;  %v1326_v19 = vld [vmem:[%s1762_s5 + $0x50] sm:$0xff]  ;;  %v1333_v20 = vld [vmem:[%s1762_s5 + $0x88] sm:$0xff] }
  0x19   : > { %v1340_v21 = vld [vmem:[%s1762_s5 + $0xc0] sm:$0xff]  ;;  %v1327_v23 = vld [vmem:[%s1762_s5 + $0x58] sm:$0xff]  ;;  %v1334_v24 = vld [vmem:[%s1762_s5 + $0x90] sm:$0xff] }
  0x1a   : > { %505 = vmatpush.bf16.msra.mxu0 %v1344_v4  ;;  %1512 = vmatpush.bf16.msra.mxu1 %v1344_v4  ;;  %v1320_v22 = vld [vmem:[%s1762_s5 + $0x20] sm:$0xff]  ;;  %v1341_v25 = vld [vmem:[%s1762_s5 + $0xc8] sm:$0xff]  ;;  %v1335_v28 = vld [vmem:[%s1762_s5 + $0x98] sm:$0xff] }
  0x1b   : > { %1513 = vmatpush.bf16.msra.mxu2 %v1344_v4  ;;  %1514 = vmatpush.bf16.msra.mxu3 %v1344_v4  ;;  %v1321_v26 = vld [vmem:[%s1762_s5 + $0x28] sm:$0xff]  ;;  %v1328_v27 = vld [vmem:[%s1762_s5 + $0x60] sm:$0xff]  ;;  %v1342_v29 = vld [vmem:[%s1762_s5 + $0xd0] sm:$0xff] }
  0x1c   : > { %v247_v30 = vld [vmem:[%s1762_s5 + $0xd8] sm:$0xf]  ;;  %v1322_v32 = vld [vmem:[%s1762_s5 + $0x30] sm:$0xff]  ;;  %v1329_v33 = vld [vmem:[%s1762_s5 + $0x68] sm:$0xff] }
  0x1d   : > { %v366_v31 = vunpack.c.l.b16 %v247_v30  ;;  %v1336_v34 = vld [vmem:[%s1762_s5 + $0xa0] sm:$0xff] }
  0x1e   : > { %506 = vmatpush.bf16.msra.mxu0 %v1343_v5  ;;  %1515 = vmatpush.bf16.msra.mxu1 %v1343_v5 }
  0x1f   : > { %1516 = vmatpush.bf16.msra.mxu2 %v1343_v5  ;;  %1517 = vmatpush.bf16.msra.mxu3 %v1343_v5  ;;  %v394_v35 = vpack.c.b16 %v366_v31, %v366_v31 }
  0x21   : > { %1273 = vmatmul.msk.bf16.vlgmr.msra.gmra.mxu0 %vm410_vm1, %v1316_v6  ;;  %1280 = vmatmul.msk.bf16.vlgmr.msra.gmra.mxu1 %vm410_vm1, %v1323_v7 }
  0x22   : > { %1287 = vmatmul.msk.bf16.vlgmr.msra.gmra.mxu2 %vm410_vm1, %v1330_v8  ;;  %1294 = vmatmul.msk.bf16.vlgmr.msra.gmra.mxu3 %vm410_vm1, %v1337_v9 }
  0x31   : > { %1274 = vmatmul.msk.bf16.gmra.mxu0 %vm410_vm1, %v1317_v10  ;;  %1281 = vmatmul.msk.bf16.gmra.mxu1 %vm410_vm1, %v1324_v11 }
  0x32   : > { %1288 = vmatmul.msk.bf16.gmra.mxu2 %vm410_vm1, %v1331_v12  ;;  %1295 = vmatmul.msk.bf16.gmra.mxu3 %vm410_vm1, %v1338_v13 }
  0x41   : > { %1275 = vmatmul.msk.bf16.gmra.mxu0 %vm410_vm1, %v1318_v14  ;;  %1282 = vmatmul.msk.bf16.gmra.mxu1 %vm410_vm1, %v1325_v15 }
  0x42   : > { %1289 = vmatmul.msk.bf16.gmra.mxu2 %vm410_vm1, %v1332_v16  ;;  %1296 = vmatmul.msk.bf16.gmra.mxu3 %vm410_vm1, %v1339_v17 }
  0x51   : > { %1276 = vmatmul.msk.bf16.gmra.mxu0 %vm410_vm1, %v1319_v18  ;;  %1283 = vmatmul.msk.bf16.gmra.mxu1 %vm410_vm1, %v1326_v19 }
  0x52   : > { %1290 = vmatmul.msk.bf16.gmra.mxu2 %vm410_vm1, %v1333_v20  ;;  %1297 = vmatmul.msk.bf16.gmra.mxu3 %vm410_vm1, %v1340_v21 }
  0x61   : > { %1277 = vmatmul.msk.bf16.gmra.mxu0 %vm410_vm1, %v1320_v22  ;;  %1284 = vmatmul.msk.bf16.gmra.mxu1 %vm410_vm1, %v1327_v23 }
  0x62   : > { %1291 = vmatmul.msk.bf16.gmra.mxu2 %vm410_vm1, %v1334_v24  ;;  %1298 = vmatmul.msk.bf16.gmra.mxu3 %vm410_vm1, %v1341_v25 }
  0x71   : > { %1278 = vmatmul.msk.bf16.gmra.mxu0 %vm410_vm1, %v1321_v26  ;;  %1285 = vmatmul.msk.bf16.gmra.mxu1 %vm410_vm1, %v1328_v27 }
  0x72   : > { %1292 = vmatmul.msk.bf16.gmra.mxu2 %vm410_vm1, %v1335_v28  ;;  %1299 = vmatmul.msk.bf16.gmra.mxu3 %vm410_vm1, %v1342_v29 }
  0x81   : > { %1279 = vmatmul.msk.bf16.gmra.mxu0 %vm410_vm1, %v1322_v32  ;;  %1286 = vmatmul.msk.bf16.gmra.mxu1 %vm410_vm1, %v1329_v33 }
  0x82   : > { %1293 = vmatmul.msk.bf16.gmra.mxu2 %vm410_vm1, %v1336_v34  ;;  %1300 = vmatmul.msk.bf16.gmra.mxu3 %vm410_vm1, %v394_v35 }
  0x9e   : > { %v508_v36 = vpop.f32.mrf.mxu0  ;;  %v543_v37 = vpop.f32.mrf.mxu1 }
  0x9f   : > { %v509_v39 = vadd.f32 %v1823_v38, %v508_v36  ;;  %v544_v40 = vadd.f32 %v1823_v38, %v543_v37 }
  0xa1   : > { %v647_v47 = vmax.f32 %v509_v39, 0.0  ;;  %v661_v48 = vmax.f32 %v544_v40, 0.0 }
  0xa5   : > { %v578_v41 = vpop.f32.mrf.mxu2  ;;  %v613_v42 = vpop.f32.mrf.mxu3 }
  0xa6   : > { %v510_v43 = vpop.f32.mrf.mxu0  ;;  %v545_v44 = vpop.f32.mrf.mxu1  ;;  %v614_v51 = vadd.f32 %v1823_v38, %v613_v42  ;;  %v579_v54 = vadd.f32 %v1823_v38, %v578_v41 }
  0xa7   : > { %v511_v45 = vadd.f32 %v1823_v38, %v510_v43  ;;  %v546_v46 = vadd.f32 %v1823_v38, %v545_v44 }
  0xa8   : > { %v689_v57 = vmax.f32 %v614_v51, 0.0  ;;  %v675_v62 = vmax.f32 %v579_v54, 0.0 }
  0xa9   : > { %v648_v49 = vmax.f32 %v511_v45, 0.0  ;;  %v662_v50 = vmax.f32 %v546_v46, 0.0 }
  0xab   : > { %v1351_v52 = vpack.c.bf16 %v648_v49, %v647_v47  ;;  %v1386_v53 = vpack.c.bf16 %v662_v50, %v661_v48 }
  0xad   : > { %1352 = vst [vmem:[%s1832_s10] sm:$0xff] %v1351_v52   ;;  %v580_v55 = vpop.f32.mrf.mxu2  ;;  %v615_v56 = vpop.f32.mrf.mxu3 }
  0xae   : > { %1489 = vst [vmem:[%s1832_s10 + $0x38] sm:$0xff] %v1386_v53   ;;  %v581_v58 = vadd.f32 %v1823_v38, %v580_v55  ;;  %v616_v59 = vadd.f32 %v1823_v38, %v615_v56  ;;  %v513_v60 = vpop.f32.mrf.mxu0  ;;  %v548_v61 = vpop.f32.mrf.mxu1 }
  0xaf   : > { %v514_v3 = vadd.f32 %v1823_v38, %v513_v60  ;;  %v549_v4 = vadd.f32 %v1823_v38, %v548_v61 }
  0xb0   : > { %v676_v63 = vmax.f32 %v581_v58, 0.0  ;;  %v690_v0 = vmax.f32 %v616_v59, 0.0 }
  0xb1   : > { %v649_v11 = vmax.f32 %v514_v3, 0.0  ;;  %v663_v12 = vmax.f32 %v549_v4, 0.0 }
  0xb2   : > { %v1421_v1 = vpack.c.bf16 %v676_v63, %v675_v62  ;;  %v1456_v2 = vpack.c.bf16 %v690_v0, %v689_v57 }
  0xb4   : > { %1496 = vst [vmem:[%s1832_s10 + $0x70] sm:$0xff] %v1421_v1  }
  0xb5   : > { %1503 = vst [vmem:[%s1832_s10 + $0xa8] sm:$0xff] %v1456_v2   ;;  %v583_v5 = vpop.f32.mrf.mxu2  ;;  %v618_v6 = vpop.f32.mrf.mxu3 }
  0xb6   : > { %v515_v7 = vpop.f32.mrf.mxu0  ;;  %v550_v8 = vpop.f32.mrf.mxu1  ;;  %v619_v15 = vadd.f32 %v1823_v38, %v618_v6  ;;  %v584_v18 = vadd.f32 %v1823_v38, %v583_v5 }
  0xb7   : > { %v516_v9 = vadd.f32 %v1823_v38, %v515_v7  ;;  %v551_v10 = vadd.f32 %v1823_v38, %v550_v8 }
  0xb8   : > { %v691_v21 = vmax.f32 %v619_v15, 0.0  ;;  %v677_v26 = vmax.f32 %v584_v18, 0.0 }
  0xb9   : > { %v650_v13 = vmax.f32 %v516_v9, 0.0  ;;  %v664_v14 = vmax.f32 %v551_v10, 0.0 }
  0xbb   : > { %v1356_v16 = vpack.c.bf16 %v650_v13, %v649_v11  ;;  %v1391_v17 = vpack.c.bf16 %v664_v14, %v663_v12 }
  0xbd   : > { %1483 = vst [vmem:[%s1832_s10 + $0x8] sm:$0xff] %v1356_v16   ;;  %v585_v19 = vpop.f32.mrf.mxu2  ;;  %v620_v20 = vpop.f32.mrf.mxu3 }
  0xbe   : > { %1490 = vst [vmem:[%s1832_s10 + $0x40] sm:$0xff] %v1391_v17   ;;  %v586_v22 = vadd.f32 %v1823_v38, %v585_v19  ;;  %v621_v23 = vadd.f32 %v1823_v38, %v620_v20  ;;  %v518_v24 = vpop.f32.mrf.mxu0  ;;  %v553_v25 = vpop.f32.mrf.mxu1 }
  0xbf   : > { %v519_v31 = vadd.f32 %v1823_v38, %v518_v24  ;;  %v554_v32 = vadd.f32 %v1823_v38, %v553_v25 }
  0xc0   : > { %v678_v27 = vmax.f32 %v586_v22, 0.0  ;;  %v692_v28 = vmax.f32 %v621_v23, 0.0 }
  0xc1   : > { %v651_v40 = vmax.f32 %v519_v31, 0.0  ;;  %v665_v41 = vmax.f32 %v554_v32, 0.0 }
  0xc2   : > { %v1426_v29 = vpack.c.bf16 %v678_v27, %v677_v26  ;;  %v1461_v30 = vpack.c.bf16 %v692_v28, %v691_v21 }
  0xc4   : > { %1497 = vst [vmem:[%s1832_s10 + $0x78] sm:$0xff] %v1426_v29  }
  0xc5   : > { %1504 = vst [vmem:[%s1832_s10 + $0xb0] sm:$0xff] %v1461_v30   ;;  %v588_v33 = vpop.f32.mrf.mxu2  ;;  %v623_v34 = vpop.f32.mrf.mxu3 }
  0xc6   : > { %v520_v35 = vpop.f32.mrf.mxu0  ;;  %v555_v36 = vpop.f32.mrf.mxu1  ;;  %v624_v44 = vadd.f32 %v1823_v38, %v623_v34  ;;  %v589_v47 = vadd.f32 %v1823_v38, %v588_v33 }
  0xc7   : > { %v521_v37 = vadd.f32 %v1823_v38, %v520_v35  ;;  %v556_v39 = vadd.f32 %v1823_v38, %v555_v36 }
  0xc8   : > { %v693_v50 = vmax.f32 %v624_v44, 0.0  ;;  %v679_v55 = vmax.f32 %v589_v47, 0.0 }
  0xc9   : > { %v652_v42 = vmax.f32 %v521_v37, 0.0  ;;  %v666_v43 = vmax.f32 %v556_v39, 0.0 }
  0xcb   : > { %v1361_v45 = vpack.c.bf16 %v652_v42, %v651_v40  ;;  %v1396_v46 = vpack.c.bf16 %v666_v43, %v665_v41 }
  0xcd   : > { %1484 = vst [vmem:[%s1832_s10 + $0x10] sm:$0xff] %v1361_v45   ;;  %v590_v48 = vpop.f32.mrf.mxu2  ;;  %v625_v49 = vpop.f32.mrf.mxu3 }
  0xce   : > { %1491 = vst [vmem:[%s1832_s10 + $0x48] sm:$0xff] %v1396_v46   ;;  %v591_v51 = vadd.f32 %v1823_v38, %v590_v48  ;;  %v626_v52 = vadd.f32 %v1823_v38, %v625_v49  ;;  %v523_v53 = vpop.f32.mrf.mxu0  ;;  %v558_v54 = vpop.f32.mrf.mxu1 }
  0xcf   : > { %v524_v60 = vadd.f32 %v1823_v38, %v523_v53  ;;  %v559_v61 = vadd.f32 %v1823_v38, %v558_v54 }
  0xd0   : > { %v680_v56 = vmax.f32 %v591_v51, 0.0  ;;  %v694_v57 = vmax.f32 %v626_v52, 0.0 }
  0xd1   : > { %v653_v4 = vmax.f32 %v524_v60, 0.0  ;;  %v667_v5 = vmax.f32 %v559_v61, 0.0 }
  0xd2   : > { %v1431_v58 = vpack.c.bf16 %v680_v56, %v679_v55  ;;  %v1466_v59 = vpack.c.bf16 %v694_v57, %v693_v50 }
  0xd4   : > { %1498 = vst [vmem:[%s1832_s10 + $0x80] sm:$0xff] %v1431_v58  }
  0xd5   : > { %1505 = vst [vmem:[%s1832_s10 + $0xb8] sm:$0xff] %v1466_v59   ;;  %v593_v62 = vpop.f32.mrf.mxu2  ;;  %v628_v63 = vpop.f32.mrf.mxu3 }
  0xd6   : > { %v525_v0 = vpop.f32.mrf.mxu0  ;;  %v560_v1 = vpop.f32.mrf.mxu1  ;;  %v629_v8 = vadd.f32 %v1823_v38, %v628_v63  ;;  %v594_v11 = vadd.f32 %v1823_v38, %v593_v62 }
  0xd7   : > { %v526_v2 = vadd.f32 %v1823_v38, %v525_v0  ;;  %v561_v3 = vadd.f32 %v1823_v38, %v560_v1 }
  0xd8   : > { %v695_v14 = vmax.f32 %v629_v8, 0.0  ;;  %v681_v19 = vmax.f32 %v594_v11, 0.0 }
  0xd9   : > { %v654_v6 = vmax.f32 %v526_v2, 0.0  ;;  %v668_v7 = vmax.f32 %v561_v3, 0.0 }
  0xdb   : > { %v1366_v9 = vpack.c.bf16 %v654_v6, %v653_v4  ;;  %v1401_v10 = vpack.c.bf16 %v668_v7, %v667_v5 }
  0xdd   : > { %1485 = vst [vmem:[%s1832_s10 + $0x18] sm:$0xff] %v1366_v9   ;;  %v595_v12 = vpop.f32.mrf.mxu2  ;;  %v630_v13 = vpop.f32.mrf.mxu3 }
  0xde   : > { %1492 = vst [vmem:[%s1832_s10 + $0x50] sm:$0xff] %v1401_v10   ;;  %v596_v15 = vadd.f32 %v1823_v38, %v595_v12  ;;  %v631_v16 = vadd.f32 %v1823_v38, %v630_v13  ;;  %v528_v17 = vpop.f32.mrf.mxu0  ;;  %v563_v18 = vpop.f32.mrf.mxu1 }
  0xdf   : > { %v529_v24 = vadd.f32 %v1823_v38, %v528_v17  ;;  %v564_v25 = vadd.f32 %v1823_v38, %v563_v18 }
  0xe0   : > { %v682_v20 = vmax.f32 %v596_v15, 0.0  ;;  %v696_v21 = vmax.f32 %v631_v16, 0.0 }
  0xe1   : > { %v655_v32 = vmax.f32 %v529_v24, 0.0  ;;  %v669_v33 = vmax.f32 %v564_v25, 0.0 }
  0xe2   : > { %v1436_v22 = vpack.c.bf16 %v682_v20, %v681_v19  ;;  %v1471_v23 = vpack.c.bf16 %v696_v21, %v695_v14 }
  0xe4   : > { %1499 = vst [vmem:[%s1832_s10 + $0x88] sm:$0xff] %v1436_v22  }
  0xe5   : > { %1506 = vst [vmem:[%s1832_s10 + $0xc0] sm:$0xff] %v1471_v23   ;;  %v598_v26 = vpop.f32.mrf.mxu2  ;;  %v633_v27 = vpop.f32.mrf.mxu3 }
  0xe6   : > { %v530_v28 = vpop.f32.mrf.mxu0  ;;  %v565_v29 = vpop.f32.mrf.mxu1  ;;  %v634_v36 = vadd.f32 %v1823_v38, %v633_v27  ;;  %v599_v40 = vadd.f32 %v1823_v38, %v598_v26 }
  0xe7   : > { %v531_v30 = vadd.f32 %v1823_v38, %v530_v28  ;;  %v566_v31 = vadd.f32 %v1823_v38, %v565_v29 }
  0xe8   : > { %v697_v43 = vmax.f32 %v634_v36, 0.0  ;;  %v683_v48 = vmax.f32 %v599_v40, 0.0 }
  0xe9   : > { %v656_v34 = vmax.f32 %v531_v30, 0.0  ;;  %v670_v35 = vmax.f32 %v566_v31, 0.0 }
  0xeb   : > { %v1371_v37 = vpack.c.bf16 %v656_v34, %v655_v32  ;;  %v1406_v39 = vpack.c.bf16 %v670_v35, %v669_v33 }
  0xed   : > { %1486 = vst [vmem:[%s1832_s10 + $0x20] sm:$0xff] %v1371_v37   ;;  %v600_v41 = vpop.f32.mrf.mxu2  ;;  %v635_v42 = vpop.f32.mrf.mxu3 }
  0xee   : > { %1493 = vst [vmem:[%s1832_s10 + $0x58] sm:$0xff] %v1406_v39   ;;  %v601_v44 = vadd.f32 %v1823_v38, %v600_v41  ;;  %v636_v45 = vadd.f32 %v1823_v38, %v635_v42  ;;  %v533_v46 = vpop.f32.mrf.mxu0  ;;  %v568_v47 = vpop.f32.mrf.mxu1 }
  0xef   : > { %v534_v53 = vadd.f32 %v1823_v38, %v533_v46  ;;  %v569_v54 = vadd.f32 %v1823_v38, %v568_v47 }
  0xf0   : > { %v684_v49 = vmax.f32 %v601_v44, 0.0  ;;  %v698_v50 = vmax.f32 %v636_v45, 0.0 }
  0xf1   : > { %v657_v61 = vmax.f32 %v534_v53, 0.0  ;;  %v671_v62 = vmax.f32 %v569_v54, 0.0 }
  0xf2   : > { %v1441_v51 = vpack.c.bf16 %v684_v49, %v683_v48  ;;  %v1476_v52 = vpack.c.bf16 %v698_v50, %v697_v43 }
  0xf4   : > { %1500 = vst [vmem:[%s1832_s10 + $0x90] sm:$0xff] %v1441_v51  }
  0xf5   : > { %1507 = vst [vmem:[%s1832_s10 + $0xc8] sm:$0xff] %v1476_v52   ;;  %v603_v55 = vpop.f32.mrf.mxu2  ;;  %v638_v56 = vpop.f32.mrf.mxu3 }
  0xf6   : > { %v535_v57 = vpop.f32.mrf.mxu0  ;;  %v570_v58 = vpop.f32.mrf.mxu1  ;;  %v639_v1 = vadd.f32 %v1823_v38, %v638_v56  ;;  %v604_v4 = vadd.f32 %v1823_v38, %v603_v55 }
  0xf7   : > { %v536_v59 = vadd.f32 %v1823_v38, %v535_v57  ;;  %v571_v60 = vadd.f32 %v1823_v38, %v570_v58 }
  0xf8   : > { %v699_v7 = vmax.f32 %v639_v1, 0.0  ;;  %v685_v12 = vmax.f32 %v604_v4, 0.0 }
  0xf9   : > { %v658_v63 = vmax.f32 %v536_v59, 0.0  ;;  %v672_v0 = vmax.f32 %v571_v60, 0.0 }
  0xfb   : > { %v1376_v2 = vpack.c.bf16 %v658_v63, %v657_v61  ;;  %v1411_v3 = vpack.c.bf16 %v672_v0, %v671_v62 }
  0xfd   : > { %1487 = vst [vmem:[%s1832_s10 + $0x28] sm:$0xff] %v1376_v2   ;;  %v605_v5 = vpop.f32.mrf.mxu2  ;;  %v640_v6 = vpop.f32.mrf.mxu3 }
  0xfe   : > { %1494 = vst [vmem:[%s1832_s10 + $0x60] sm:$0xff] %v1411_v3   ;;  %v606_v8 = vadd.f32 %v1823_v38, %v605_v5  ;;  %v641_v9 = vadd.f32 %v1823_v38, %v640_v6  ;;  %v538_v10 = vpop.f32.mrf.mxu0  ;;  %v573_v11 = vpop.f32.mrf.mxu1 }
  0xff   : > { %v539_v17 = vadd.f32 %v1823_v38, %v538_v10  ;;  %v574_v18 = vadd.f32 %v1823_v38, %v573_v11 }
 0x100   : > { %v686_v13 = vmax.f32 %v606_v8, 0.0  ;;  %v700_v14 = vmax.f32 %v641_v9, 0.0 }
 0x101   : > { %v659_v27 = vmax.f32 %v539_v17, 0.0  ;;  %v673_v28 = vmax.f32 %v574_v18, 0.0 }
 0x102   : > { %v1446_v15 = vpack.c.bf16 %v686_v13, %v685_v12  ;;  %v1481_v16 = vpack.c.bf16 %v700_v14, %v699_v7 }
 0x104   : > { %1501 = vst [vmem:[%s1832_s10 + $0x98] sm:$0xff] %v1446_v15  }
 0x105   : > { %1508 = vst [vmem:[%s1832_s10 + $0xd0] sm:$0xff] %v1481_v16   ;;  %v608_v19 = vpop.f32.mrf.mxu2  ;;  %v643_v20 = vpop.f32.mrf.mxu3 }
 0x106   : > { %v644_v21 = vadd.f32 %v1823_v38, %v643_v20  ;;  %v540_v22 = vpop.f32.mrf.mxu0  ;;  %v575_v23 = vpop.f32.mrf.mxu1  ;;  %v609_v34 = vadd.f32 %v1823_v38, %v608_v19 }
 0x107   : > { %v541_v24 = vadd.f32 %v1823_v38, %v540_v22  ;;  %v576_v25 = vadd.f32 %v1823_v38, %v575_v23 }
 0x108   : > { %v701_v26 = vmax.f32 %v644_v21, 0.0  ;;  %v687_v39 = vmax.f32 %v609_v34, 0.0 }
 0x109   : > { %v660_v29 = vmax.f32 %v541_v24, 0.0  ;;  %v674_v30 = vmax.f32 %v576_v25, 0.0 }
 0x10a   : > { %v756_v31 = vpack.c.bf16 %v701_v26, %v701_v26 }
 0x10b   : > { %v1381_v32 = vpack.c.bf16 %v660_v29, %v659_v27  ;;  %v1416_v33 = vpack.c.bf16 %v674_v30, %v673_v28 }
 0x10c   : > { %811 = vst [vmem:[%s1832_s10 + $0xd8] sm:$0xf] %v756_v31 }
 0x10d   : > { %1488 = vst [vmem:[%s1832_s10 + $0x30] sm:$0xff] %v1381_v32   ;;  %v610_v35 = vpop.f32.mrf.mxu2  ;;  %v645_v36 = vpop.f32.mrf.mxu3 }
 0x10e   : > { %1495 = vst [vmem:[%s1832_s10 + $0x68] sm:$0xff] %v1416_v33   ;;  %v611_v37 = vadd.f32 %v1823_v38, %v610_v35 }
 0x110   : > { %v688_v40 = vmax.f32 %v611_v37, 0.0  ;;  %818 = sbr.rel (!%p1741_p4) target bundleno = 341 (0x155), region = 36 }
 0x112   : > { %v1451_v41 = vpack.c.bf16 %v688_v40, %v687_v39 }
 0x114   : > { %1502 = vst [vmem:[%s1832_s10 + $0xa0] sm:$0xff] %v1451_v41  }
 0x115   : > { %s2067_s11 = smov (!%p821_p8, %s820_s11), 55 }
 0x116   : > { %s1301_s21 = sshll.u32 %s2067_s11, 2 }
 0x117   : > { %p1304_p9 = scmp.eq.s32.totalorder %s1301_s21, 0 }
 0x118   : > { %s1924_s22 = sshrl.u32 (!%p1304_p9), %s2067_s11, 5 }
 0x119   : > { %829 = sbr.rel (%p1304_p9) target bundleno = 341 (0x155), region = 40  ;;  %p1305_p10 = scmp.le.s32.totalorder (!%p1304_p9), %s1924_s22, 0 }
 0x11e   : > { %1108 = sbr.rel (%p1305_p10) target bundleno = 324 (0x144), region = 112  ;;  %s2058_s15 = smov (!%p1305_p10), %s1918_s18 }
 0x11f   : > { %s2059_s20 = smov (!%p1305_p10), %s1832_s10  ;;  %s1933_s23 = smov (!%p1305_p10), 0  }
 0x120   : > { %s1935_s24 = smov (!%p1305_p10), 0  }
 0x123 LB: >> { %v846_v38 = vld [vmem:[%s1670_s20] sm:$0xf]  ;;  %v848_v42 = vld [vmem:[%s1670_s20 + $0x4] sm:$0xf]  ;;  %v850_v43 = vld [vmem:[%s1670_s20 + $0x8] sm:$0xf]  ;;  %s1678_s24 = sphi %s1935_s24, %s840_s24   ;;  %s1674_s23 = sphi %s1933_s23, %s2062_s23   ;;  %s1670_s20 = sphi %s2059_s20, %s2061_s20   ;;  %s1666_s15 = sphi %s2058_s15, %s2060_s15  }
 0x124   : >> { %847 = vst [vmem:[%s1666_s15] sm:$0xf] %v846_v38  ;;  %v852_v44 = vld [vmem:[%s1670_s20 + $0xc] sm:$0xf]  ;;  %v854_v45 = vld [vmem:[%s1670_s20 + $0x10] sm:$0xf]  ;;  %s910_s25 = sadd.s32 1, %s1674_s23 }
 0x125   : >> { %849 = vst [vmem:[%s1666_s15 + $0x4] sm:$0xf] %v848_v42  ;;  %v856_v46 = vld [vmem:[%s1670_s20 + $0x14] sm:$0xf]  ;;  %v858_v47 = vld [vmem:[%s1670_s20 + $0x18] sm:$0xf]  ;;  %p911_p11 = scmp.ge.s32.totalorder %s910_s25, %s1924_s22 }
 0x126   : >> { %851 = vst [vmem:[%s1666_s15 + $0x8] sm:$0xf] %v850_v43  ;;  %v860_v48 = vld [vmem:[%s1670_s20 + $0x1c] sm:$0xf]  ;;  %v862_v49 = vld [vmem:[%s1670_s20 + $0x20] sm:$0xf] }
 0x127   : >> { %853 = vst [vmem:[%s1666_s15 + $0xc] sm:$0xf] %v852_v44  ;;  %v864_v50 = vld [vmem:[%s1670_s20 + $0x24] sm:$0xf]  ;;  %v866_v51 = vld [vmem:[%s1670_s20 + $0x28] sm:$0xf] }
 0x128   : >> { %855 = vst [vmem:[%s1666_s15 + $0x10] sm:$0xf] %v854_v45  ;;  %v868_v52 = vld [vmem:[%s1670_s20 + $0x2c] sm:$0xf]  ;;  %v870_v53 = vld [vmem:[%s1670_s20 + $0x30] sm:$0xf] }
 0x129   : >> { %857 = vst [vmem:[%s1666_s15 + $0x14] sm:$0xf] %v856_v46  ;;  %v872_v54 = vld [vmem:[%s1670_s20 + $0x34] sm:$0xf]  ;;  %v874_v55 = vld [vmem:[%s1670_s20 + $0x38] sm:$0xf] }
 0x12a   : >> { %859 = vst [vmem:[%s1666_s15 + $0x18] sm:$0xf] %v858_v47  ;;  %v876_v56 = vld [vmem:[%s1670_s20 + $0x3c] sm:$0xf]  ;;  %v878_v57 = vld [vmem:[%s1670_s20 + $0x40] sm:$0xf] }
 0x12b   : >> { %861 = vst [vmem:[%s1666_s15 + $0x1c] sm:$0xf] %v860_v48  ;;  %v880_v58 = vld [vmem:[%s1670_s20 + $0x44] sm:$0xf]  ;;  %s2069_s25 = smov (%p911_p11, %s910_s25), 0  ;;  %s840_s24 = sadd.s32 1, %s1678_s24  }
 0x12c   : >> { %863 = vst [vmem:[%s1666_s15 + $0x20] sm:$0xf] %v862_v49  ;;  %v882_v59 = vld [vmem:[%s1670_s20 + $0x48] sm:$0xf]  ;;  %v884_v60 = vld [vmem:[%s1670_s20 + $0x4c] sm:$0xf]  ;;  %p839_p12 = scmp.ge.s32.totalorder %s840_s24, %s1924_s22  ;;  %s2062_s23 = smov %s2069_s25 }
 0x12d   : >> { %865 = vst [vmem:[%s1666_s15 + $0x24] sm:$0xf] %v864_v50  ;;  %s1306_s26 = sshll.u32 %s2069_s25, 7  ;;  %v886_v61 = vld [vmem:[%s1670_s20 + $0x50] sm:$0xf] }
 0x12e   : >> { %867 = vst [vmem:[%s1666_s15 + $0x28] sm:$0xf] %v866_v51  ;;  %s1994_s27 = scalar_lea.vmem %s1832_s10, %s1306_s26 [#allocation2]   ;;  %s916_s28 = scalar_lea.vmem %s1918_s18, %s1306_s26   ;;  %v888_v62 = vld [vmem:[%s1670_s20 + $0x54] sm:$0xf]  ;;  %v890_v63 = vld [vmem:[%s1670_s20 + $0x58] sm:$0xf] }
 0x12f   : >> { %869 = vst [vmem:[%s1666_s15 + $0x2c] sm:$0xf] %v868_v52  ;;  %v892_v0 = vld [vmem:[%s1670_s20 + $0x5c] sm:$0xf]  ;;  %v894_v1 = vld [vmem:[%s1670_s20 + $0x60] sm:$0xf] }
 0x130   : >> { %871 = vst [vmem:[%s1666_s15 + $0x30] sm:$0xf] %v870_v53  ;;  %v896_v2 = vld [vmem:[%s1670_s20 + $0x64] sm:$0xf]  ;;  %v898_v3 = vld [vmem:[%s1670_s20 + $0x68] sm:$0xf] }
 0x131   : >> { %873 = vst [vmem:[%s1666_s15 + $0x34] sm:$0xf] %v872_v54  ;;  %v900_v4 = vld [vmem:[%s1670_s20 + $0x6c] sm:$0xf]  ;;  %v902_v5 = vld [vmem:[%s1670_s20 + $0x70] sm:$0xf] }
 0x132   : >> { %875 = vst [vmem:[%s1666_s15 + $0x38] sm:$0xf] %v874_v55  ;;  %v904_v6 = vld [vmem:[%s1670_s20 + $0x74] sm:$0xf]  ;;  %v906_v7 = vld [vmem:[%s1670_s20 + $0x78] sm:$0xf] }
 0x133   : >> { %877 = vst [vmem:[%s1666_s15 + $0x3c] sm:$0xf] %v876_v56  ;;  %v908_v8 = vld [vmem:[%s1670_s20 + $0x7c] sm:$0xf]  ;;  %s2061_s20 = smov %s1994_s27 }
 0x134   : >> { %879 = vst [vmem:[%s1666_s15 + $0x40] sm:$0xf] %v878_v57 }
 0x135   : >> { %881 = vst [vmem:[%s1666_s15 + $0x44] sm:$0xf] %v880_v58 }
 0x136   : >> { %883 = vst [vmem:[%s1666_s15 + $0x48] sm:$0xf] %v882_v59 }
 0x137   : >> { %885 = vst [vmem:[%s1666_s15 + $0x4c] sm:$0xf] %v884_v60 }
 0x138   : >> { %887 = vst [vmem:[%s1666_s15 + $0x50] sm:$0xf] %v886_v61 }
 0x139   : >> { %889 = vst [vmem:[%s1666_s15 + $0x54] sm:$0xf] %v888_v62 }
 0x13a   : >> { %891 = vst [vmem:[%s1666_s15 + $0x58] sm:$0xf] %v890_v63 }
 0x13b   : >> { %893 = vst [vmem:[%s1666_s15 + $0x5c] sm:$0xf] %v892_v0 }
 0x13c   : >> { %895 = vst [vmem:[%s1666_s15 + $0x60] sm:$0xf] %v894_v1 }
 0x13d   : >> { %897 = vst [vmem:[%s1666_s15 + $0x64] sm:$0xf] %v896_v2 }
 0x13e   : >> { %899 = vst [vmem:[%s1666_s15 + $0x68] sm:$0xf] %v898_v3 }
 0x13f   : >> { %901 = vst [vmem:[%s1666_s15 + $0x6c] sm:$0xf] %v900_v4  ;;  %842 = sbr.rel (!%p839_p12) target bundleno = 291 (0x123), region = 118 }
 0x140   : >> { %903 = vst [vmem:[%s1666_s15 + $0x70] sm:$0xf] %v902_v5 }
 0x141   : >> { %905 = vst [vmem:[%s1666_s15 + $0x74] sm:$0xf] %v904_v6 }
 0x142   : >> { %907 = vst [vmem:[%s1666_s15 + $0x78] sm:$0xf] %v906_v7 }
 0x143   : >> { %909 = vst [vmem:[%s1666_s15 + $0x7c] sm:$0xf] %v908_v8  ;;  %s2060_s15 = smov %s916_s28 }
 0x144 PF: > { %s2035_s29 = sand.u32 31, %s2067_s11   ;;  %s1346_s30 = sshll.u32 %s1924_s22, 7 }
 0x145   : > { %s921_s4 = scalar_lea.vmem %s1832_s10, %s1346_s30 [#allocation2]   ;;  %s923_s5 = scalar_lea.vmem %s1918_s18, %s1346_s30  }
 0x146   : > { %p1311_p13 = scmp.le.s32.totalorder %s2035_s29, 0 }
 0x147   : > { %s1680_s6 = smov (!%p1311_p13), %s923_s5   ;;  %s1684_s7 = smov (!%p1311_p13), %s921_s4  }
 0x148   : > { %1122 = sbr.rel (%p1311_p13) target bundleno = 341 (0x155), region = 123  ;;  %s1688_s8 = smov (!%p1311_p13), 0  }
 0x149   : > { %s1692_s9 = smov (!%p1311_p13), 0  }
 0x14d LB: >> { %v933_v9 = vld [vmem:[%s1686_s7] sm:$0xf]  ;;  %s935_s11 = sadd.s32 1, %s1690_s8  ;;  %s927_s9 = sadd.s32 1, %s1694_s9   ;;  %s1694_s9 = sphi %s1692_s9, %s927_s9   ;;  %s1690_s8 = sphi %s1688_s8, %s1689_s8   ;;  %s1686_s7 = sphi %s1684_s7, %s940_s7   ;;  %s1682_s6 = sphi %s1680_s6, %s941_s6  }
 0x14e   : >> { %934 = vst [vmem:[%s1682_s6] sm:$0xf] %v933_v9  ;;  %p936_p0 = scmp.ge.s32.totalorder %s935_s11, %s2035_s29  ;;  %p926_p1 = scmp.ge.s32.totalorder %s927_s9, %s2035_s29 }
 0x150   : >> { %s2071_s11 = smov (%p936_p0, %s935_s11), 0  ;;  %929 = sbr.rel (!%p926_p1) target bundleno = 333 (0x14d), region = 129 }
 0x151   : >> { %s1312_s10 = sshll.u32 %s2071_s11, 2  ;;  %s1689_s8 = smov %s2071_s11  }
 0x152   : >> { %s940_s7 = scalar_lea.vmem %s921_s4, %s1312_s10 [#allocation2]   ;;  %s941_s6 = scalar_lea.vmem %s923_s5, %s1312_s10  }
 0x155 PF: > { %p10_p2 = scmp.ge.s32.totalorder %s1731_s16, 7   ;;  %s2063_s12 = smov %s1658_s13 }
 0x156   : > { %s2064_s13 = smov %s1739_s19  ;;  %s2065_s14 = smov %s1731_s16 }
 0x157   :  { %12 = sbr.rel (!%p10_p2) target bundleno = 2 (0x2), region = 140 }

// kernel: resnet_forward.20
= control target key start
LH: loop header
LB: loop body
LE: loop exit
PB: predicated region body
PF: predicated region fallthrough
CT: control target
= control target key end

     0   :  { %s2581_s21 = smov 0   ;;  %s2583_s22 = smov 0   ;;  %s3022_s0 = inlined_call_operand.vmem [shape: bf16[2178,128], index: 0, kind: input, shape index: {}]   ;;  %s3023_s1 = inlined_call_operand.vmem [shape: bf16[128,128], index: 1, kind: input, shape index: {}]   ;;  %s3024_s2 = inlined_call_operand.vmem [shape: f32[1,128], index: 2, kind: input, shape index: {}]   ;;  %s3025_s3 = inlined_call_operand.vmem [shape: bf16[2178,128], index: 3, kind: input, shape index: {}]   ;;  %s3026_s4 = inlined_call_operand.vmem [shape: bf16[128,128], index: 4, kind: input, shape index: {}]   ;;  %s3027_s5 = inlined_call_operand.vmem [shape: f32[1,128], index: 5, kind: input, shape index: {}]   ;;  %s3028_s6 = inlined_call_operand.vmem [shape: bf16[2178,128], index: 6, kind: output, shape index: {}]  }
   0x1   :  { %s2585_s23 = smov 0  }
   0x2 LB: > { %s2594_s24 = sadd.s32 4294967295, %s2512_s23   ;;  %s2596_s25 = sadd.s32 1, %s2512_s23   ;;  %s2512_s23 = sphi %s2585_s23, %s3037_s23   ;;  %s2508_s22 = sphi %s2583_s22, %s3036_s22   ;;  %s2504_s21 = sphi %s2581_s21, %s3035_s21  }
   0x3   : > { %s156_s26 = ssub.s32 %s2512_s23, %s2596_s25  ;;  %s159_s27 = sadd.s32 1, %s2508_s22 }
   0x4   : > { %p157_p0 = scmp.eq.s32.totalorder %s156_s26, 0  ;;  %p169_p1 = scmp.ne.s32.totalorder %s2508_s22, %s2504_s21 }
   0x5   : > { %p170_p2 = scmp.eq.s32.totalorder %s2594_s24, 4  ;;  %p1819_p3 = scmp.ge.s32.totalorder %s2512_s23, 1 }
   0x6   : > { %s2604_s28 = scalar_select %p157_p0, %s2508_s22, %s159_s27  }
   0x7   : > { %p2606_p4 = por %p170_p2, %p169_p1  ;;  %p240_p5 = scmp.lt.s32.totalorder %s2512_s23, 6 }
   0x9   : > { %p241_p6 = pnand %p1819_p3, %p240_p5 }
   0xa   : > { %s2635_s26 = smul.u32 (!%p241_p6), 55, %s2594_s24  ;;  %s279_s16 = sand.u32 (!%p241_p6), 1, %s2504_s21  }
   0xb   : > { %244 = sbr.rel (%p241_p6) target bundleno = 465 (0x1d1), region = 44 }
   0xc   : > { %p287_p7 = scmp.lt.s32.totalorder (!%p241_p6), %s2635_s26, 272  ;;  %s2367_s17 = smul.u32 (!%p241_p6), 220, %s279_s16 }
   0xe   : > { %s2731_s21 = scalar_lea.vmem (!%p241_p6), [#allocation2], %s2367_s17  }
  0x10   : > { %v2151_v0 = vld [vmem:[%s3023_s1 + $0x38] sm:$0xff]  ;;  %v2150_v2 = vld [vmem:[%s3023_s1 + $0x30] sm:$0xff]  ;;  %v2149_v4 = vld [vmem:[%s3023_s1 + $0x28] sm:$0xff]  ;;  %s288_s13 = scalar_select %p287_p7, %s2635_s26, 272 }
  0x11   : > { %v2186_v1 = vld [vmem:[%s3026_s4 + $0x38] sm:$0xff]  ;;  %604 = vmatpush.bf16.msra.mxu0 %v2151_v0  ;;  %2351 = vmatpush.bf16.msra.mxu2 %v2151_v0  ;;  %v2185_v3 = vld [vmem:[%s3026_s4 + $0x30] sm:$0xff]  ;;  %v2184_v5 = vld [vmem:[%s3026_s4 + $0x28] sm:$0xff]  ;;  %s2187_s19 = smul.u32 (%p2606_p4), 220, %s2594_s24 }
  0x12   : > { %1037 = vmatpush.bf16.msra.mxu1 %v2186_v1  ;;  %2359 = vmatpush.bf16.msra.mxu3 %v2186_v1  ;;  %v2148_v6 = vld [vmem:[%s3023_s1 + $0x20] sm:$0xff]  ;;  %v2147_v8 = vld [vmem:[%s3023_s1 + $0x18] sm:$0xff]  ;;  %v2146_v10 = vld [vmem:[%s3023_s1 + $0x10] sm:$0xff]  ;;  %s1820_s18 = sshll.u32 %s288_s13, 2 }
  0x13   : > { %v2183_v7 = vld [vmem:[%s3026_s4 + $0x20] sm:$0xff]  ;;  %v2182_v9 = vld [vmem:[%s3026_s4 + $0x18] sm:$0xff]  ;;  %v2181_v11 = vld [vmem:[%s3026_s4 + $0x10] sm:$0xff]  ;;  %s2663_s30 = scalar_lea.vmem %s3022_s0, %s1820_s18  ;;  %s2671_s11 = scalar_lea.vmem %s3025_s3, %s1820_s18 }
  0x14   : > { %v2145_v12 = vld [vmem:[%s3023_s1 + $0x8] sm:$0xff]  ;;  %v2144_v14 = vld [vmem:[%s3023_s1] sm:$0xff]  ;;  %v2131_v17 = vld [vmem:[%s2663_s30 + $0x70] sm:$0xff]  ;;  %s1472_s18 = ssub.s32 (%p2606_p4), 273, %s2635_s26  ;;  %s2887_s27 = scalar_lea.vmem (%p2606_p4), %s3028_s6, %s2187_s19  }
  0x15   : > { %605 = vmatpush.bf16.msra.mxu0 %v2150_v2  ;;  %2352 = vmatpush.bf16.msra.mxu2 %v2150_v2  ;;  %v2180_v13 = vld [vmem:[%s3026_s4 + $0x8] sm:$0xff]  ;;  %v2179_v15 = vld [vmem:[%s3026_s4] sm:$0xff]  ;;  %v2166_v19 = vld [vmem:[%s2671_s11 + $0x70] sm:$0xff]  ;;  %p1473_p8 = scmp.lt.s32.totalorder (%p2606_p4), %s1472_s18, 55 }
  0x16   : > { %1038 = vmatpush.bf16.msra.mxu1 %v2185_v3  ;;  %2360 = vmatpush.bf16.msra.mxu3 %v2185_v3  ;;  %v2117_v16 = vld [vmem:[%s2663_s30] sm:$0xff]  ;;  %v2118_v20 = vld [vmem:[%s2663_s30 + $0x8] sm:$0xff]  ;;  %v2132_v21 = vld [vmem:[%s2663_s30 + $0x78] sm:$0xff] }
  0x17   : > { %v2152_v18 = vld [vmem:[%s2671_s11] sm:$0xff]  ;;  %v2153_v22 = vld [vmem:[%s2671_s11 + $0x8] sm:$0xff]  ;;  %v2167_v23 = vld [vmem:[%s2671_s11 + $0x78] sm:$0xff] }
  0x18   : > { %v2119_v24 = vld [vmem:[%s2663_s30 + $0x10] sm:$0xff]  ;;  %v2133_v25 = vld [vmem:[%s2663_s30 + $0x80] sm:$0xff]  ;;  %v2120_v28 = vld [vmem:[%s2663_s30 + $0x18] sm:$0xff] }
  0x19   : > { %606 = vmatpush.bf16.msra.mxu0 %v2149_v4  ;;  %2353 = vmatpush.bf16.msra.mxu2 %v2149_v4  ;;  %v2154_v26 = vld [vmem:[%s2671_s11 + $0x10] sm:$0xff]  ;;  %v2168_v27 = vld [vmem:[%s2671_s11 + $0x80] sm:$0xff]  ;;  %v2134_v29 = vld [vmem:[%s2663_s30 + $0x88] sm:$0xff] }
  0x1a   : > { %1039 = vmatpush.bf16.msra.mxu1 %v2184_v5  ;;  %2361 = vmatpush.bf16.msra.mxu3 %v2184_v5  ;;  %v2155_v30 = vld [vmem:[%s2671_s11 + $0x18] sm:$0xff]  ;;  %v2169_v31 = vld [vmem:[%s2671_s11 + $0x88] sm:$0xff]  ;;  %v2121_v32 = vld [vmem:[%s2663_s30 + $0x20] sm:$0xff] }
  0x1b   : > { %v2135_v33 = vld [vmem:[%s2663_s30 + $0x90] sm:$0xff]  ;;  %v2156_v34 = vld [vmem:[%s2671_s11 + $0x20] sm:$0xff]  ;;  %v2122_v36 = vld [vmem:[%s2663_s30 + $0x28] sm:$0xff] }
  0x1c   : > { %v2170_v35 = vld [vmem:[%s2671_s11 + $0x90] sm:$0xff]  ;;  %v2136_v37 = vld [vmem:[%s2663_s30 + $0x98] sm:$0xff]  ;;  %v2157_v38 = vld [vmem:[%s2671_s11 + $0x28] sm:$0xff] }
  0x1d   : > { %607 = vmatpush.bf16.msra.mxu0 %v2148_v6  ;;  %2354 = vmatpush.bf16.msra.mxu2 %v2148_v6  ;;  %v2171_v39 = vld [vmem:[%s2671_s11 + $0x98] sm:$0xff]  ;;  %v2123_v40 = vld [vmem:[%s2663_s30 + $0x30] sm:$0xff]  ;;  %v2137_v41 = vld [vmem:[%s2663_s30 + $0xa0] sm:$0xff] }
  0x1e   : > { %1040 = vmatpush.bf16.msra.mxu1 %v2183_v7  ;;  %2362 = vmatpush.bf16.msra.mxu3 %v2183_v7  ;;  %v2158_v42 = vld [vmem:[%s2671_s11 + $0x30] sm:$0xff]  ;;  %v2172_v43 = vld [vmem:[%s2671_s11 + $0xa0] sm:$0xff]  ;;  %v2124_v44 = vld [vmem:[%s2663_s30 + $0x38] sm:$0xff] }
  0x1f   : > { %v2138_v45 = vld [vmem:[%s2663_s30 + $0xa8] sm:$0xff]  ;;  %v2159_v46 = vld [vmem:[%s2671_s11 + $0x38] sm:$0xff]  ;;  %v2708_v48 = vld [vmem:[%s3024_s2] ss:$0 sm:$0xff] }
  0x20   : > { %v2173_v47 = vld [vmem:[%s2671_s11 + $0xa8] sm:$0xff]  ;;  %v2125_v49 = vld [vmem:[%s2663_s30 + $0x40] sm:$0xff]  ;;  %v2139_v50 = vld [vmem:[%s2663_s30 + $0xb0] sm:$0xff] }
  0x21   : > { %608 = vmatpush.bf16.msra.mxu0 %v2147_v8  ;;  %2355 = vmatpush.bf16.msra.mxu2 %v2147_v8  ;;  %v2160_v52 = vld [vmem:[%s2671_s11 + $0x40] sm:$0xff]  ;;  %v2174_v53 = vld [vmem:[%s2671_s11 + $0xb0] sm:$0xff] }
  0x22   : > { %1041 = vmatpush.bf16.msra.mxu1 %v2182_v9  ;;  %2363 = vmatpush.bf16.msra.mxu3 %v2182_v9  ;;  %v2718_v58 = vld [vmem:[%s3027_s5] ss:$0 sm:$0xff]  ;;  %v2126_v9 = vld [vmem:[%s2663_s30 + $0x48] sm:$0xff] }
  0x25   : > { %609 = vmatpush.bf16.msra.mxu0 %v2146_v10  ;;  %2356 = vmatpush.bf16.msra.mxu2 %v2146_v10  ;;  %v2140_v10 = vld [vmem:[%s2663_s30 + $0xb8] sm:$0xff] }
  0x26   : > { %1042 = vmatpush.bf16.msra.mxu1 %v2181_v11  ;;  %2364 = vmatpush.bf16.msra.mxu3 %v2181_v11 }
  0x29   : > { %610 = vmatpush.bf16.msra.mxu0 %v2145_v12  ;;  %2357 = vmatpush.bf16.msra.mxu2 %v2145_v12  ;;  %v2161_v12 = vld [vmem:[%s2671_s11 + $0x48] sm:$0xff] }
  0x2a   : > { %1043 = vmatpush.bf16.msra.mxu1 %v2180_v13  ;;  %2365 = vmatpush.bf16.msra.mxu3 %v2180_v13  ;;  %v2175_v13 = vld [vmem:[%s2671_s11 + $0xb8] sm:$0xff] }
  0x2d   : > { %611 = vmatpush.bf16.msra.mxu0 %v2144_v14  ;;  %2358 = vmatpush.bf16.msra.mxu2 %v2144_v14 }
  0x2e   : > { %1044 = vmatpush.bf16.msra.mxu1 %v2179_v15  ;;  %2366 = vmatpush.bf16.msra.mxu3 %v2179_v15 }
  0x30   : > { %612 = vmatmul.bf16.vlgmr.msra.gmra.mxu0 %v2117_v16  ;;  %682 = vmatmul.bf16.vlgmr.msra.gmra.mxu2 %v2131_v17 }
  0x31   : > { %1045 = vmatmul.bf16.vlgmr.msra.gmra.mxu1 %v2152_v18  ;;  %1115 = vmatmul.bf16.vlgmr.msra.gmra.mxu3 %v2166_v19 }
  0x40   : > { %617 = vmatmul.bf16.gmra.mxu0 %v2118_v20  ;;  %687 = vmatmul.bf16.gmra.mxu2 %v2132_v21 }
  0x41   : > { %1050 = vmatmul.bf16.gmra.mxu1 %v2153_v22  ;;  %1120 = vmatmul.bf16.gmra.mxu3 %v2167_v23 }
  0x50   : > { %622 = vmatmul.bf16.gmra.mxu0 %v2119_v24  ;;  %692 = vmatmul.bf16.gmra.mxu2 %v2133_v25 }
  0x51   : > { %1055 = vmatmul.bf16.gmra.mxu1 %v2154_v26  ;;  %1125 = vmatmul.bf16.gmra.mxu3 %v2168_v27 }
  0x60   : > { %627 = vmatmul.bf16.gmra.mxu0 %v2120_v28  ;;  %697 = vmatmul.bf16.gmra.mxu2 %v2134_v29 }
  0x61   : > { %1060 = vmatmul.bf16.gmra.mxu1 %v2155_v30  ;;  %1130 = vmatmul.bf16.gmra.mxu3 %v2169_v31 }
  0x70   : > { %632 = vmatmul.bf16.gmra.mxu0 %v2121_v32  ;;  %702 = vmatmul.bf16.gmra.mxu2 %v2135_v33 }
  0x71   : > { %1065 = vmatmul.bf16.gmra.mxu1 %v2156_v34  ;;  %1135 = vmatmul.bf16.gmra.mxu3 %v2170_v35 }
  0x80   : > { %637 = vmatmul.bf16.gmra.mxu0 %v2122_v36  ;;  %707 = vmatmul.bf16.gmra.mxu2 %v2136_v37 }
  0x81   : > { %1070 = vmatmul.bf16.gmra.mxu1 %v2157_v38  ;;  %1140 = vmatmul.bf16.gmra.mxu3 %v2171_v39  ;;  %v2127_v39 = vld [vmem:[%s2663_s30 + $0x50] sm:$0xff] }
  0x90   : > { %642 = vmatmul.bf16.gmra.mxu0 %v2123_v40  ;;  %712 = vmatmul.bf16.gmra.mxu2 %v2137_v41  ;;  %v2141_v40 = vld [vmem:[%s2663_s30 + $0xc0] sm:$0xff] }
  0x91   : > { %1075 = vmatmul.bf16.gmra.mxu1 %v2158_v42  ;;  %1145 = vmatmul.bf16.gmra.mxu3 %v2172_v43  ;;  %v2162_v42 = vld [vmem:[%s2671_s11 + $0x50] sm:$0xff]  ;;  %v2176_v43 = vld [vmem:[%s2671_s11 + $0xc0] sm:$0xff] }
  0xa0   : > { %647 = vmatmul.bf16.gmra.mxu0 %v2124_v44  ;;  %717 = vmatmul.bf16.gmra.mxu2 %v2138_v45 }
  0xa1   : > { %1080 = vmatmul.bf16.gmra.mxu1 %v2159_v46  ;;  %1150 = vmatmul.bf16.gmra.mxu3 %v2173_v47 }
  0xad   : > { %v613_v51 = vpop.f32.mrf.mxu0 }
  0xae   : > { %v1046_v54 = vpop.f32.mrf.mxu1  ;;  %v614_v55 = vadd.f32 %v2708_v48, %v613_v51 }
  0xb0   : > { %652 = vmatmul.bf16.gmra.mxu0 %v2125_v49  ;;  %722 = vmatmul.bf16.gmra.mxu2 %v2139_v50  ;;  %v1185_v57 = vadd.f32 %v1046_v54, %v614_v55 }
  0xb1   : > { %1085 = vmatmul.bf16.gmra.mxu1 %v2160_v52  ;;  %1155 = vmatmul.bf16.gmra.mxu3 %v2174_v53 }
  0xb2   : > { %v1244_v0 = vadd.f32 %v2718_v58, %v1185_v57 }
  0xb3   : > { %v683_v56 = vpop.f32.mrf.mxu2 }
  0xb4   : > { %v1116_v59 = vpop.f32.mrf.mxu3  ;;  %v684_v61 = vadd.f32 %v2708_v48, %v683_v56  ;;  %v1299_v5 = vmax.f32 %v1244_v0, 0.0 }
  0xb5   : > { %v615_v60 = vpop.f32.mrf.mxu0 }
  0xb6   : > { %v616_v62 = vadd.f32 %v2708_v48, %v615_v60  ;;  %v1048_v63 = vpop.f32.mrf.mxu1  ;;  %v1213_v2 = vadd.f32 %v1116_v59, %v684_v61 }
  0xb8   : > { %v1186_v1 = vadd.f32 %v1048_v63, %v616_v62  ;;  %v1272_v14 = vadd.f32 %v2718_v58, %v1213_v2 }
  0xba   : > { %v1245_v3 = vadd.f32 %v2718_v58, %v1186_v1  ;;  %v1327_v20 = vmax.f32 %v1272_v14, 0.0 }
  0xbb   : > { %v685_v4 = vpop.f32.mrf.mxu2 }
  0xbc   : > { %v1300_v6 = vmax.f32 %v1245_v3, 0.0  ;;  %v686_v7 = vadd.f32 %v2708_v48, %v685_v4  ;;  %v1118_v8 = vpop.f32.mrf.mxu3 }
  0xbd   : > { %v618_v11 = vpop.f32.mrf.mxu0 }
  0xbe   : > { %v2193_v15 = vpack.c.bf16 %v1300_v6, %v1299_v5  ;;  %v1214_v16 = vadd.f32 %v1118_v8, %v686_v7  ;;  %v1051_v17 = vpop.f32.mrf.mxu1  ;;  %v619_v19 = vadd.f32 %v2708_v48, %v618_v11  ;;  %v2128_v7 = vld [vmem:[%s2663_s30 + $0x58] sm:$0xff]  ;;  %v2142_v8 = vld [vmem:[%s2663_s30 + $0xc8] sm:$0xff] }
  0xbf   : > { %v2177_v11 = vld [vmem:[%s2671_s11 + $0xc8] sm:$0xff] }
  0xc0   : > { %2194 = vst [vmem:[%s2731_s21] sm:$0xff] %v2193_v15   ;;  %v1273_v18 = vadd.f32 %v2718_v58, %v1214_v16  ;;  %657 = vmatmul.bf16.gmra.mxu0 %v2126_v9  ;;  %727 = vmatmul.bf16.gmra.mxu2 %v2140_v10  ;;  %v1187_v24 = vadd.f32 %v1051_v17, %v619_v19  ;;  %v2163_v10 = vld [vmem:[%s2671_s11 + $0x58] sm:$0xff] }
  0xc1   : > { %1090 = vmatmul.bf16.gmra.mxu1 %v2161_v12  ;;  %1160 = vmatmul.bf16.gmra.mxu3 %v2175_v13 }
  0xc2   : > { %v1328_v21 = vmax.f32 %v1273_v18, 0.0  ;;  %v1246_v30 = vadd.f32 %v2718_v58, %v1187_v24 }
  0xc3   : > { %v688_v22 = vpop.f32.mrf.mxu2 }
  0xc4   : > { %v2263_v23 = vpack.c.bf16 %v1328_v21, %v1327_v20  ;;  %v1121_v25 = vpop.f32.mrf.mxu3  ;;  %v689_v27 = vadd.f32 %v2708_v48, %v688_v22  ;;  %v1301_v35 = vmax.f32 %v1246_v30, 0.0 }
  0xc5   : > { %v620_v26 = vpop.f32.mrf.mxu0 }
  0xc6   : > { %2338 = vst [vmem:[%s2731_s21 + $0x70] sm:$0xff] %v2263_v23   ;;  %v621_v28 = vadd.f32 %v2708_v48, %v620_v26  ;;  %v1053_v29 = vpop.f32.mrf.mxu1  ;;  %v1215_v32 = vadd.f32 %v1121_v25, %v689_v27 }
  0xc8   : > { %v1188_v31 = vadd.f32 %v1053_v29, %v621_v28  ;;  %v1274_v44 = vadd.f32 %v2718_v58, %v1215_v32 }
  0xca   : > { %v1247_v33 = vadd.f32 %v2718_v58, %v1188_v31  ;;  %v1329_v51 = vmax.f32 %v1274_v44, 0.0 }
  0xcb   : > { %v690_v34 = vpop.f32.mrf.mxu2 }
  0xcc   : > { %v1302_v36 = vmax.f32 %v1247_v33, 0.0  ;;  %v691_v37 = vadd.f32 %v2708_v48, %v690_v34  ;;  %v1123_v38 = vpop.f32.mrf.mxu3 }
  0xcd   : > { %v623_v41 = vpop.f32.mrf.mxu0 }
  0xce   : > { %v2198_v45 = vpack.c.bf16 %v1302_v36, %v1301_v35  ;;  %v1216_v46 = vadd.f32 %v1123_v38, %v691_v37  ;;  %v1056_v47 = vpop.f32.mrf.mxu1  ;;  %v624_v50 = vadd.f32 %v2708_v48, %v623_v41  ;;  %v2129_v37 = vld [vmem:[%s2663_s30 + $0x60] sm:$0xff]  ;;  %v2143_v38 = vld [vmem:[%s2663_s30 + $0xd0] sm:$0xff] }
  0xcf   : > { %v2178_v41 = vld [vmem:[%s2671_s11 + $0xd0] sm:$0xff] }
  0xd0   : > { %2325 = vst [vmem:[%s2731_s21 + $0x8] sm:$0xff] %v2198_v45   ;;  %v1275_v49 = vadd.f32 %v2718_v58, %v1216_v46  ;;  %662 = vmatmul.bf16.gmra.mxu0 %v2127_v39  ;;  %732 = vmatmul.bf16.gmra.mxu2 %v2141_v40  ;;  %v1189_v55 = vadd.f32 %v1056_v47, %v624_v50  ;;  %v2164_v40 = vld [vmem:[%s2671_s11 + $0x60] sm:$0xff] }
  0xd1   : > { %1095 = vmatmul.bf16.gmra.mxu1 %v2162_v42  ;;  %1165 = vmatmul.bf16.gmra.mxu3 %v2176_v43 }
  0xd2   : > { %v1330_v52 = vmax.f32 %v1275_v49, 0.0  ;;  %v1248_v62 = vadd.f32 %v2718_v58, %v1189_v55 }
  0xd3   : > { %v693_v53 = vpop.f32.mrf.mxu2 }
  0xd4   : > { %v2268_v54 = vpack.c.bf16 %v1330_v52, %v1329_v51  ;;  %v1126_v56 = vpop.f32.mrf.mxu3  ;;  %v694_v59 = vadd.f32 %v2708_v48, %v693_v53  ;;  %v1303_v3 = vmax.f32 %v1248_v62, 0.0 }
  0xd5   : > { %v625_v57 = vpop.f32.mrf.mxu0 }
  0xd6   : > { %2339 = vst [vmem:[%s2731_s21 + $0x78] sm:$0xff] %v2268_v54   ;;  %v626_v60 = vadd.f32 %v2708_v48, %v625_v57  ;;  %v1058_v61 = vpop.f32.mrf.mxu1  ;;  %v1217_v0 = vadd.f32 %v1126_v56, %v694_v59  ;;  %v369_v56 = vld [vmem:[%s2663_s30 + $0xd8] sm:$0xf] }
  0xd8   : > { %v1190_v63 = vadd.f32 %v1058_v61, %v626_v60  ;;  %v1276_v12 = vadd.f32 %v2718_v58, %v1217_v0  ;;  %v806_v61 = vld [vmem:[%s2671_s11 + $0xd8] sm:$0xf]  ;;  %v499_v0 = vunpack.c.l.b16 %v369_v56 }
  0xda   : > { %v1249_v1 = vadd.f32 %v2718_v58, %v1190_v63  ;;  %v1331_v18 = vmax.f32 %v1276_v12, 0.0  ;;  %v2165_v12 = vld [vmem:[%s2671_s11 + $0x68] sm:$0xff] }
  0xdb   : > { %v695_v2 = vpop.f32.mrf.mxu2 }
  0xdc   : > { %v1304_v4 = vmax.f32 %v1249_v1, 0.0  ;;  %v696_v5 = vadd.f32 %v2708_v48, %v695_v2  ;;  %v1128_v6 = vpop.f32.mrf.mxu3  ;;  %v932_v1 = vunpack.c.l.b16 %v806_v61 }
  0xdd   : > { %v628_v9 = vpop.f32.mrf.mxu0 }
  0xde   : > { %v2203_v13 = vpack.c.bf16 %v1304_v4, %v1303_v3  ;;  %v1218_v14 = vadd.f32 %v1128_v6, %v696_v5  ;;  %v1061_v15 = vpop.f32.mrf.mxu1  ;;  %v629_v17 = vadd.f32 %v2708_v48, %v628_v9  ;;  %v2130_v9 = vld [vmem:[%s2663_s30 + $0x68] sm:$0xff] }
  0xe0   : > { %2326 = vst [vmem:[%s2731_s21 + $0x10] sm:$0xff] %v2203_v13   ;;  %v1277_v16 = vadd.f32 %v2718_v58, %v1218_v14  ;;  %667 = vmatmul.bf16.gmra.mxu0 %v2128_v7  ;;  %737 = vmatmul.bf16.gmra.mxu2 %v2142_v8  ;;  %v1191_v22 = vadd.f32 %v1061_v15, %v629_v17 }
  0xe1   : > { %1100 = vmatmul.bf16.gmra.mxu1 %v2163_v10  ;;  %1170 = vmatmul.bf16.gmra.mxu3 %v2177_v11  ;;  %v527_v10 = vpack.c.b16 %v499_v0, %v499_v0  ;;  %v960_v13 = vpack.c.b16 %v932_v1, %v932_v1 }
  0xe2   : > { %v1332_v19 = vmax.f32 %v1277_v16, 0.0  ;;  %v1250_v28 = vadd.f32 %v2718_v58, %v1191_v22 }
  0xe3   : > { %v698_v20 = vpop.f32.mrf.mxu2 }
  0xe4   : > { %v2273_v21 = vpack.c.bf16 %v1332_v19, %v1331_v18  ;;  %v1131_v23 = vpop.f32.mrf.mxu3  ;;  %v699_v25 = vadd.f32 %v2708_v48, %v698_v20  ;;  %v1305_v33 = vmax.f32 %v1250_v28, 0.0 }
  0xe5   : > { %v630_v24 = vpop.f32.mrf.mxu0 }
  0xe6   : > { %2340 = vst [vmem:[%s2731_s21 + $0x80] sm:$0xff] %v2273_v21   ;;  %v631_v26 = vadd.f32 %v2708_v48, %v630_v24  ;;  %v1063_v27 = vpop.f32.mrf.mxu1  ;;  %v1219_v30 = vadd.f32 %v1131_v23, %v699_v25 }
  0xe8   : > { %v1192_v29 = vadd.f32 %v1063_v27, %v631_v26  ;;  %v1278_v42 = vadd.f32 %v2718_v58, %v1219_v30 }
  0xea   : > { %v1251_v31 = vadd.f32 %v2718_v58, %v1192_v29  ;;  %v1333_v49 = vmax.f32 %v1278_v42, 0.0 }
  0xeb   : > { %v700_v32 = vpop.f32.mrf.mxu2 }
  0xec   : > { %v1306_v34 = vmax.f32 %v1251_v31, 0.0  ;;  %v701_v35 = vadd.f32 %v2708_v48, %v700_v32  ;;  %v1133_v36 = vpop.f32.mrf.mxu3 }
  0xed   : > { %v633_v39 = vpop.f32.mrf.mxu0 }
  0xee   : > { %v2208_v43 = vpack.c.bf16 %v1306_v34, %v1305_v33  ;;  %v1220_v44 = vadd.f32 %v1133_v36, %v701_v35  ;;  %v1066_v45 = vpop.f32.mrf.mxu1  ;;  %v634_v47 = vadd.f32 %v2708_v48, %v633_v39 }
  0xf0   : > { %2327 = vst [vmem:[%s2731_s21 + $0x18] sm:$0xff] %v2208_v43   ;;  %v1279_v46 = vadd.f32 %v2718_v58, %v1220_v44  ;;  %672 = vmatmul.bf16.gmra.mxu0 %v2129_v37  ;;  %742 = vmatmul.bf16.gmra.mxu2 %v2143_v38  ;;  %v1193_v53 = vadd.f32 %v1066_v45, %v634_v47 }
  0xf1   : > { %1105 = vmatmul.bf16.gmra.mxu1 %v2164_v40  ;;  %1175 = vmatmul.bf16.gmra.mxu3 %v2178_v41 }
  0xf2   : > { %v1334_v50 = vmax.f32 %v1279_v46, 0.0  ;;  %v1252_v62 = vadd.f32 %v2718_v58, %v1193_v53 }
  0xf3   : > { %v703_v51 = vpop.f32.mrf.mxu2 }
  0xf4   : > { %v2278_v52 = vpack.c.bf16 %v1334_v50, %v1333_v49  ;;  %v1136_v54 = vpop.f32.mrf.mxu3  ;;  %v704_v57 = vadd.f32 %v2708_v48, %v703_v51  ;;  %v1307_v5 = vmax.f32 %v1252_v62, 0.0 }
  0xf5   : > { %v635_v55 = vpop.f32.mrf.mxu0 }
  0xf6   : > { %2341 = vst [vmem:[%s2731_s21 + $0x88] sm:$0xff] %v2278_v52   ;;  %v636_v59 = vadd.f32 %v2708_v48, %v635_v55  ;;  %v1068_v60 = vpop.f32.mrf.mxu1  ;;  %v1221_v2 = vadd.f32 %v1136_v54, %v704_v57 }
  0xf8   : > { %v1194_v63 = vadd.f32 %v1068_v60, %v636_v59  ;;  %v1280_v14 = vadd.f32 %v2718_v58, %v1221_v2 }
  0xfa   : > { %v1253_v3 = vadd.f32 %v2718_v58, %v1194_v63  ;;  %v1335_v20 = vmax.f32 %v1280_v14, 0.0 }
  0xfb   : > { %v705_v4 = vpop.f32.mrf.mxu2 }
  0xfc   : > { %v1308_v6 = vmax.f32 %v1253_v3, 0.0  ;;  %v706_v7 = vadd.f32 %v2708_v48, %v705_v4  ;;  %v1138_v8 = vpop.f32.mrf.mxu3 }
  0xfd   : > { %v638_v11 = vpop.f32.mrf.mxu0 }
  0xfe   : > { %v2213_v15 = vpack.c.bf16 %v1308_v6, %v1307_v5  ;;  %v1222_v16 = vadd.f32 %v1138_v8, %v706_v7  ;;  %v1071_v17 = vpop.f32.mrf.mxu1  ;;  %v639_v19 = vadd.f32 %v2708_v48, %v638_v11 }
 0x100   : > { %2328 = vst [vmem:[%s2731_s21 + $0x20] sm:$0xff] %v2213_v15   ;;  %v1281_v18 = vadd.f32 %v2718_v58, %v1222_v16  ;;  %677 = vmatmul.bf16.gmra.mxu0 %v2130_v9  ;;  %747 = vmatmul.bf16.gmra.mxu2 %v527_v10  ;;  %v1195_v24 = vadd.f32 %v1071_v17, %v639_v19 }
 0x101   : > { %1110 = vmatmul.bf16.gmra.mxu1 %v2165_v12  ;;  %1180 = vmatmul.bf16.gmra.mxu3 %v960_v13 }
 0x102   : > { %v1336_v21 = vmax.f32 %v1281_v18, 0.0  ;;  %v1254_v30 = vadd.f32 %v2718_v58, %v1195_v24 }
 0x103   : > { %v708_v22 = vpop.f32.mrf.mxu2 }
 0x104   : > { %v2283_v23 = vpack.c.bf16 %v1336_v21, %v1335_v20  ;;  %v1141_v25 = vpop.f32.mrf.mxu3  ;;  %v709_v27 = vadd.f32 %v2708_v48, %v708_v22  ;;  %v1309_v35 = vmax.f32 %v1254_v30, 0.0 }
 0x105   : > { %v640_v26 = vpop.f32.mrf.mxu0 }
 0x106   : > { %2342 = vst [vmem:[%s2731_s21 + $0x90] sm:$0xff] %v2283_v23   ;;  %v641_v28 = vadd.f32 %v2708_v48, %v640_v26  ;;  %v1073_v29 = vpop.f32.mrf.mxu1  ;;  %v1223_v32 = vadd.f32 %v1141_v25, %v709_v27 }
 0x108   : > { %v1196_v31 = vadd.f32 %v1073_v29, %v641_v28  ;;  %v1282_v40 = vadd.f32 %v2718_v58, %v1223_v32 }
 0x10a   : > { %v1255_v33 = vadd.f32 %v2718_v58, %v1196_v31  ;;  %v1337_v46 = vmax.f32 %v1282_v40, 0.0 }
 0x10b   : > { %v710_v34 = vpop.f32.mrf.mxu2 }
 0x10c   : > { %v1310_v36 = vmax.f32 %v1255_v33, 0.0  ;;  %v711_v37 = vadd.f32 %v2708_v48, %v710_v34  ;;  %v1143_v38 = vpop.f32.mrf.mxu3 }
 0x10d   : > { %v643_v39 = vpop.f32.mrf.mxu0 }
 0x10e   : > { %v2218_v41 = vpack.c.bf16 %v1310_v36, %v1309_v35  ;;  %v1224_v42 = vadd.f32 %v1143_v38, %v711_v37  ;;  %v1076_v43 = vpop.f32.mrf.mxu1  ;;  %v644_v45 = vadd.f32 %v2708_v48, %v643_v39 }
 0x110   : > { %2329 = vst [vmem:[%s2731_s21 + $0x28] sm:$0xff] %v2218_v41   ;;  %v1283_v44 = vadd.f32 %v2718_v58, %v1224_v42  ;;  %v1197_v51 = vadd.f32 %v1076_v43, %v644_v45 }
 0x112   : > { %v1338_v47 = vmax.f32 %v1283_v44, 0.0  ;;  %v1256_v57 = vadd.f32 %v2718_v58, %v1197_v51 }
 0x113   : > { %v713_v49 = vpop.f32.mrf.mxu2 }
 0x114   : > { %v2288_v50 = vpack.c.bf16 %v1338_v47, %v1337_v46  ;;  %v1146_v52 = vpop.f32.mrf.mxu3  ;;  %v714_v54 = vadd.f32 %v2708_v48, %v713_v49  ;;  %v1311_v63 = vmax.f32 %v1256_v57, 0.0 }
 0x115   : > { %v645_v53 = vpop.f32.mrf.mxu0 }
 0x116   : > { %2343 = vst [vmem:[%s2731_s21 + $0x98] sm:$0xff] %v2288_v50   ;;  %v646_v55 = vadd.f32 %v2708_v48, %v645_v53  ;;  %v1078_v56 = vpop.f32.mrf.mxu1  ;;  %v1225_v60 = vadd.f32 %v1146_v52, %v714_v54 }
 0x118   : > { %v1198_v59 = vadd.f32 %v1078_v56, %v646_v55  ;;  %v1284_v4 = vadd.f32 %v2718_v58, %v1225_v60 }
 0x11a   : > { %v1257_v61 = vadd.f32 %v2718_v58, %v1198_v59  ;;  %v1339_v10 = vmax.f32 %v1284_v4, 0.0 }
 0x11b   : > { %v715_v62 = vpop.f32.mrf.mxu2 }
 0x11c   : > { %v1312_v0 = vmax.f32 %v1257_v61, 0.0  ;;  %v716_v1 = vadd.f32 %v2708_v48, %v715_v62  ;;  %v1148_v2 = vpop.f32.mrf.mxu3 }
 0x11d   : > { %v648_v3 = vpop.f32.mrf.mxu0 }
 0x11e   : > { %v2223_v5 = vpack.c.bf16 %v1312_v0, %v1311_v63  ;;  %v1226_v6 = vadd.f32 %v1148_v2, %v716_v1  ;;  %v1081_v7 = vpop.f32.mrf.mxu1  ;;  %v649_v9 = vadd.f32 %v2708_v48, %v648_v3 }
 0x120   : > { %2330 = vst [vmem:[%s2731_s21 + $0x30] sm:$0xff] %v2223_v5   ;;  %v1285_v8 = vadd.f32 %v2718_v58, %v1226_v6  ;;  %v1199_v14 = vadd.f32 %v1081_v7, %v649_v9 }
 0x122   : > { %v1340_v11 = vmax.f32 %v1285_v8, 0.0  ;;  %v1258_v20 = vadd.f32 %v2718_v58, %v1199_v14 }
 0x123   : > { %v718_v12 = vpop.f32.mrf.mxu2 }
 0x124   : > { %v2293_v13 = vpack.c.bf16 %v1340_v11, %v1339_v10  ;;  %v1151_v15 = vpop.f32.mrf.mxu3  ;;  %v719_v17 = vadd.f32 %v2708_v48, %v718_v12  ;;  %v1313_v25 = vmax.f32 %v1258_v20, 0.0 }
 0x125   : > { %v650_v16 = vpop.f32.mrf.mxu0 }
 0x126   : > { %2344 = vst [vmem:[%s2731_s21 + $0xa0] sm:$0xff] %v2293_v13   ;;  %v651_v18 = vadd.f32 %v2708_v48, %v650_v16  ;;  %v1083_v19 = vpop.f32.mrf.mxu1  ;;  %v1227_v22 = vadd.f32 %v1151_v15, %v719_v17 }
 0x128   : > { %v1200_v21 = vadd.f32 %v1083_v19, %v651_v18  ;;  %v1286_v30 = vadd.f32 %v2718_v58, %v1227_v22 }
 0x12a   : > { %v1259_v23 = vadd.f32 %v2718_v58, %v1200_v21  ;;  %v1341_v36 = vmax.f32 %v1286_v30, 0.0 }
 0x12b   : > { %v720_v24 = vpop.f32.mrf.mxu2 }
 0x12c   : > { %v1314_v26 = vmax.f32 %v1259_v23, 0.0  ;;  %v721_v27 = vadd.f32 %v2708_v48, %v720_v24  ;;  %v1153_v28 = vpop.f32.mrf.mxu3 }
 0x12d   : > { %v653_v29 = vpop.f32.mrf.mxu0 }
 0x12e   : > { %v2228_v31 = vpack.c.bf16 %v1314_v26, %v1313_v25  ;;  %v1228_v32 = vadd.f32 %v1153_v28, %v721_v27  ;;  %v1086_v33 = vpop.f32.mrf.mxu1  ;;  %v654_v35 = vadd.f32 %v2708_v48, %v653_v29 }
 0x130   : > { %2331 = vst [vmem:[%s2731_s21 + $0x38] sm:$0xff] %v2228_v31   ;;  %v1287_v34 = vadd.f32 %v2718_v58, %v1228_v32  ;;  %v1201_v40 = vadd.f32 %v1086_v33, %v654_v35 }
 0x132   : > { %v1342_v37 = vmax.f32 %v1287_v34, 0.0  ;;  %v1260_v46 = vadd.f32 %v2718_v58, %v1201_v40 }
 0x133   : > { %v723_v38 = vpop.f32.mrf.mxu2 }
 0x134   : > { %v2298_v39 = vpack.c.bf16 %v1342_v37, %v1341_v36  ;;  %v1156_v41 = vpop.f32.mrf.mxu3  ;;  %v724_v43 = vadd.f32 %v2708_v48, %v723_v38  ;;  %v1315_v52 = vmax.f32 %v1260_v46, 0.0 }
 0x135   : > { %v655_v42 = vpop.f32.mrf.mxu0 }
 0x136   : > { %2345 = vst [vmem:[%s2731_s21 + $0xa8] sm:$0xff] %v2298_v39   ;;  %v656_v44 = vadd.f32 %v2708_v48, %v655_v42  ;;  %v1088_v45 = vpop.f32.mrf.mxu1  ;;  %v1229_v49 = vadd.f32 %v1156_v41, %v724_v43 }
 0x138   : > { %v1202_v47 = vadd.f32 %v1088_v45, %v656_v44  ;;  %v1288_v57 = vadd.f32 %v2718_v58, %v1229_v49 }
 0x13a   : > { %v1261_v50 = vadd.f32 %v2718_v58, %v1202_v47  ;;  %v1343_v0 = vmax.f32 %v1288_v57, 0.0 }
 0x13b   : > { %v725_v51 = vpop.f32.mrf.mxu2 }
 0x13c   : > { %v1316_v53 = vmax.f32 %v1261_v50, 0.0  ;;  %v726_v54 = vadd.f32 %v2708_v48, %v725_v51  ;;  %v1158_v55 = vpop.f32.mrf.mxu3 }
 0x13d   : > { %v658_v56 = vpop.f32.mrf.mxu0 }
 0x13e   : > { %v2233_v59 = vpack.c.bf16 %v1316_v53, %v1315_v52  ;;  %v1230_v60 = vadd.f32 %v1158_v55, %v726_v54  ;;  %v1091_v61 = vpop.f32.mrf.mxu1  ;;  %v659_v63 = vadd.f32 %v2708_v48, %v658_v56 }
 0x140   : > { %2332 = vst [vmem:[%s2731_s21 + $0x40] sm:$0xff] %v2233_v59   ;;  %v1289_v62 = vadd.f32 %v2718_v58, %v1230_v60  ;;  %v1203_v4 = vadd.f32 %v1091_v61, %v659_v63 }
 0x142   : > { %v1344_v1 = vmax.f32 %v1289_v62, 0.0  ;;  %v1262_v10 = vadd.f32 %v2718_v58, %v1203_v4 }
 0x143   : > { %v728_v2 = vpop.f32.mrf.mxu2 }
 0x144   : > { %v2303_v3 = vpack.c.bf16 %v1344_v1, %v1343_v0  ;;  %v1161_v5 = vpop.f32.mrf.mxu3  ;;  %v729_v7 = vadd.f32 %v2708_v48, %v728_v2  ;;  %v1317_v15 = vmax.f32 %v1262_v10, 0.0 }
 0x145   : > { %v660_v6 = vpop.f32.mrf.mxu0 }
 0x146   : > { %2346 = vst [vmem:[%s2731_s21 + $0xb0] sm:$0xff] %v2303_v3   ;;  %v661_v8 = vadd.f32 %v2708_v48, %v660_v6  ;;  %v1093_v9 = vpop.f32.mrf.mxu1  ;;  %v1231_v12 = vadd.f32 %v1161_v5, %v729_v7 }
 0x148   : > { %v1204_v11 = vadd.f32 %v1093_v9, %v661_v8  ;;  %v1290_v20 = vadd.f32 %v2718_v58, %v1231_v12 }
 0x14a   : > { %v1263_v13 = vadd.f32 %v2718_v58, %v1204_v11  ;;  %v1345_v26 = vmax.f32 %v1290_v20, 0.0 }
 0x14b   : > { %v730_v14 = vpop.f32.mrf.mxu2 }
 0x14c   : > { %v1318_v16 = vmax.f32 %v1263_v13, 0.0  ;;  %v731_v17 = vadd.f32 %v2708_v48, %v730_v14  ;;  %v1163_v18 = vpop.f32.mrf.mxu3 }
 0x14d   : > { %v663_v19 = vpop.f32.mrf.mxu0 }
 0x14e   : > { %v2238_v21 = vpack.c.bf16 %v1318_v16, %v1317_v15  ;;  %v1232_v22 = vadd.f32 %v1163_v18, %v731_v17  ;;  %v1096_v23 = vpop.f32.mrf.mxu1  ;;  %v664_v25 = vadd.f32 %v2708_v48, %v663_v19 }
 0x150   : > { %2333 = vst [vmem:[%s2731_s21 + $0x48] sm:$0xff] %v2238_v21   ;;  %v1291_v24 = vadd.f32 %v2718_v58, %v1232_v22  ;;  %v1205_v30 = vadd.f32 %v1096_v23, %v664_v25 }
 0x152   : > { %v1346_v27 = vmax.f32 %v1291_v24, 0.0  ;;  %v1264_v36 = vadd.f32 %v2718_v58, %v1205_v30 }
 0x153   : > { %v733_v28 = vpop.f32.mrf.mxu2 }
 0x154   : > { %v2308_v29 = vpack.c.bf16 %v1346_v27, %v1345_v26  ;;  %v1166_v31 = vpop.f32.mrf.mxu3  ;;  %v734_v33 = vadd.f32 %v2708_v48, %v733_v28  ;;  %v1319_v41 = vmax.f32 %v1264_v36, 0.0 }
 0x155   : > { %v665_v32 = vpop.f32.mrf.mxu0 }
 0x156   : > { %2347 = vst [vmem:[%s2731_s21 + $0xb8] sm:$0xff] %v2308_v29   ;;  %v666_v34 = vadd.f32 %v2708_v48, %v665_v32  ;;  %v1098_v35 = vpop.f32.mrf.mxu1  ;;  %v1233_v38 = vadd.f32 %v1166_v31, %v734_v33 }
 0x158   : > { %v1206_v37 = vadd.f32 %v1098_v35, %v666_v34  ;;  %v1292_v46 = vadd.f32 %v2718_v58, %v1233_v38 }
 0x15a   : > { %v1265_v39 = vadd.f32 %v2718_v58, %v1206_v37  ;;  %v1347_v53 = vmax.f32 %v1292_v46, 0.0 }
 0x15b   : > { %v735_v40 = vpop.f32.mrf.mxu2 }
 0x15c   : > { %v1320_v42 = vmax.f32 %v1265_v39, 0.0  ;;  %v736_v43 = vadd.f32 %v2708_v48, %v735_v40  ;;  %v1168_v44 = vpop.f32.mrf.mxu3 }
 0x15d   : > { %v668_v45 = vpop.f32.mrf.mxu0 }
 0x15e   : > { %v2243_v47 = vpack.c.bf16 %v1320_v42, %v1319_v41  ;;  %v1234_v49 = vadd.f32 %v1168_v44, %v736_v43  ;;  %v1101_v50 = vpop.f32.mrf.mxu1  ;;  %v669_v52 = vadd.f32 %v2708_v48, %v668_v45 }
 0x160   : > { %2334 = vst [vmem:[%s2731_s21 + $0x50] sm:$0xff] %v2243_v47   ;;  %v1293_v51 = vadd.f32 %v2718_v58, %v1234_v49  ;;  %v1207_v57 = vadd.f32 %v1101_v50, %v669_v52 }
 0x162   : > { %v1348_v54 = vmax.f32 %v1293_v51, 0.0  ;;  %v1266_v0 = vadd.f32 %v2718_v58, %v1207_v57 }
 0x163   : > { %v738_v55 = vpop.f32.mrf.mxu2 }
 0x164   : > { %v2313_v56 = vpack.c.bf16 %v1348_v54, %v1347_v53  ;;  %v1171_v59 = vpop.f32.mrf.mxu3  ;;  %v739_v61 = vadd.f32 %v2708_v48, %v738_v55  ;;  %v1321_v5 = vmax.f32 %v1266_v0, 0.0 }
 0x165   : > { %v670_v60 = vpop.f32.mrf.mxu0 }
 0x166   : > { %2348 = vst [vmem:[%s2731_s21 + $0xc0] sm:$0xff] %v2313_v56   ;;  %v671_v62 = vadd.f32 %v2708_v48, %v670_v60  ;;  %v1103_v63 = vpop.f32.mrf.mxu1  ;;  %v1235_v2 = vadd.f32 %v1171_v59, %v739_v61 }
 0x168   : > { %v1208_v1 = vadd.f32 %v1103_v63, %v671_v62  ;;  %v1294_v10 = vadd.f32 %v2718_v58, %v1235_v2 }
 0x16a   : > { %v1267_v3 = vadd.f32 %v2718_v58, %v1208_v1  ;;  %v1349_v16 = vmax.f32 %v1294_v10, 0.0 }
 0x16b   : > { %v740_v4 = vpop.f32.mrf.mxu2 }
 0x16c   : > { %v1322_v6 = vmax.f32 %v1267_v3, 0.0  ;;  %v741_v7 = vadd.f32 %v2708_v48, %v740_v4  ;;  %v1173_v8 = vpop.f32.mrf.mxu3 }
 0x16d   : > { %v673_v9 = vpop.f32.mrf.mxu0 }
 0x16e   : > { %v2248_v11 = vpack.c.bf16 %v1322_v6, %v1321_v5  ;;  %v1236_v12 = vadd.f32 %v1173_v8, %v741_v7  ;;  %v1106_v13 = vpop.f32.mrf.mxu1  ;;  %v674_v15 = vadd.f32 %v2708_v48, %v673_v9 }
 0x170   : > { %2335 = vst [vmem:[%s2731_s21 + $0x58] sm:$0xff] %v2248_v11   ;;  %v1295_v14 = vadd.f32 %v2718_v58, %v1236_v12  ;;  %v1209_v20 = vadd.f32 %v1106_v13, %v674_v15 }
 0x172   : > { %v1350_v17 = vmax.f32 %v1295_v14, 0.0  ;;  %v1268_v26 = vadd.f32 %v2718_v58, %v1209_v20 }
 0x173   : > { %v743_v18 = vpop.f32.mrf.mxu2 }
 0x174   : > { %v2318_v19 = vpack.c.bf16 %v1350_v17, %v1349_v16  ;;  %v1176_v21 = vpop.f32.mrf.mxu3  ;;  %v744_v23 = vadd.f32 %v2708_v48, %v743_v18  ;;  %v1323_v31 = vmax.f32 %v1268_v26, 0.0 }
 0x175   : > { %v675_v22 = vpop.f32.mrf.mxu0 }
 0x176   : > { %2349 = vst [vmem:[%s2731_s21 + $0xc8] sm:$0xff] %v2318_v19   ;;  %v676_v24 = vadd.f32 %v2708_v48, %v675_v22  ;;  %v1108_v25 = vpop.f32.mrf.mxu1  ;;  %v1237_v28 = vadd.f32 %v1176_v21, %v744_v23 }
 0x178   : > { %v1210_v27 = vadd.f32 %v1108_v25, %v676_v24  ;;  %v1296_v36 = vadd.f32 %v2718_v58, %v1237_v28 }
 0x17a   : > { %v1269_v29 = vadd.f32 %v2718_v58, %v1210_v27  ;;  %v1351_v42 = vmax.f32 %v1296_v36, 0.0 }
 0x17b   : > { %v745_v30 = vpop.f32.mrf.mxu2 }
 0x17c   : > { %v1324_v32 = vmax.f32 %v1269_v29, 0.0  ;;  %v746_v33 = vadd.f32 %v2708_v48, %v745_v30  ;;  %v1178_v34 = vpop.f32.mrf.mxu3 }
 0x17d   : > { %v678_v35 = vpop.f32.mrf.mxu0 }
 0x17e   : > { %v2253_v37 = vpack.c.bf16 %v1324_v32, %v1323_v31  ;;  %v1238_v38 = vadd.f32 %v1178_v34, %v746_v33  ;;  %v1111_v39 = vpop.f32.mrf.mxu1  ;;  %v679_v41 = vadd.f32 %v2708_v48, %v678_v35 }
 0x180   : > { %2336 = vst [vmem:[%s2731_s21 + $0x60] sm:$0xff] %v2253_v37   ;;  %v1297_v40 = vadd.f32 %v2718_v58, %v1238_v38  ;;  %v1211_v46 = vadd.f32 %v1111_v39, %v679_v41 }
 0x182   : > { %v1352_v43 = vmax.f32 %v1297_v40, 0.0  ;;  %v1270_v54 = vadd.f32 %v2718_v58, %v1211_v46 }
 0x183   : > { %v748_v44 = vpop.f32.mrf.mxu2 }
 0x184   : > { %v2323_v45 = vpack.c.bf16 %v1352_v43, %v1351_v42  ;;  %v749_v47 = vadd.f32 %v2708_v48, %v748_v44  ;;  %v1181_v49 = vpop.f32.mrf.mxu3  ;;  %v1325_v61 = vmax.f32 %v1270_v54, 0.0 }
 0x185   : > { %v680_v50 = vpop.f32.mrf.mxu0 }
 0x186   : > { %2350 = vst [vmem:[%s2731_s21 + $0xd0] sm:$0xff] %v2323_v45   ;;  %v1239_v51 = vadd.f32 %v1181_v49, %v749_v47  ;;  %v681_v52 = vadd.f32 %v2708_v48, %v680_v50  ;;  %v1113_v53 = vpop.f32.mrf.mxu1 }
 0x188   : > { %v1298_v55 = vadd.f32 %v2718_v58, %v1239_v51  ;;  %v1212_v56 = vadd.f32 %v1113_v53, %v681_v52 }
 0x18a   : > { %v1353_v57 = vmax.f32 %v1298_v55, 0.0  ;;  %v1271_v59 = vadd.f32 %v2718_v58, %v1212_v56 }
 0x18b   : > { %v750_v60 = vpop.f32.mrf.mxu2 }
 0x18c   : > { %v1408_v62 = vpack.c.bf16 %v1353_v57, %v1353_v57  ;;  %v1326_v63 = vmax.f32 %v1271_v59, 0.0  ;;  %v1183_v0 = vpop.f32.mrf.mxu3  ;;  %1470 = sbr.rel (!%p2606_p4) target bundleno = 465 (0x1d1), region = 48 }
 0x18e   : > { %1463 = vst [vmem:[%s2731_s21 + $0xd8] sm:$0xf] %v1408_v62  ;;  %v2258_v1 = vpack.c.bf16 %v1326_v63, %v1325_v61 }
 0x190   : > { %2337 = vst [vmem:[%s2731_s21 + $0x68] sm:$0xff] %v2258_v1  }
 0x191   : > { %s3039_s18 = smov (!%p1473_p8, %s1472_s18), 55 }
 0x192   : > { %s2102_s30 = sshll.u32 %s3039_s18, 2 }
 0x193   : > { %p2105_p9 = scmp.eq.s32.totalorder %s2102_s30, 0 }
 0x194   : > { %s2893_s7 = sshrl.u32 (!%p2105_p9), %s3039_s18, 5 }
 0x195   : > { %1481 = sbr.rel (%p2105_p9) target bundleno = 465 (0x1d1), region = 52  ;;  %p2106_p10 = scmp.le.s32.totalorder (!%p2105_p9), %s2893_s7, 0 }
 0x19a   : > { %1766 = sbr.rel (%p2106_p10) target bundleno = 448 (0x1c0), region = 127  ;;  %s3030_s24 = smov (!%p2106_p10), %s2887_s27 }
 0x19b   : > { %s3031_s29 = smov (!%p2106_p10), %s2731_s21  ;;  %s2902_s26 = smov (!%p2106_p10), 0  }
 0x19c   : > { %s2904_s8 = smov (!%p2106_p10), 0  }
 0x19f LB: >> { %v1498_v48 = vld [vmem:[%s2520_s29] sm:$0xf]  ;;  %v1500_v58 = vld [vmem:[%s2520_s29 + $0x4] sm:$0xf]  ;;  %v1502_v2 = vld [vmem:[%s2520_s29 + $0x8] sm:$0xf]  ;;  %s2528_s8 = sphi %s2904_s8, %s1492_s8   ;;  %s2524_s26 = sphi %s2902_s26, %s3034_s26   ;;  %s2520_s29 = sphi %s3031_s29, %s3033_s29   ;;  %s2516_s24 = sphi %s3030_s24, %s3032_s24  }
 0x1a0   : >> { %1499 = vst [vmem:[%s2516_s24] sm:$0xf] %v1498_v48  ;;  %v1504_v3 = vld [vmem:[%s2520_s29 + $0xc] sm:$0xf]  ;;  %v1506_v4 = vld [vmem:[%s2520_s29 + $0x10] sm:$0xf]  ;;  %s1562_s9 = sadd.s32 1, %s2524_s26 }
 0x1a1   : >> { %1501 = vst [vmem:[%s2516_s24 + $0x4] sm:$0xf] %v1500_v58  ;;  %v1508_v5 = vld [vmem:[%s2520_s29 + $0x14] sm:$0xf]  ;;  %v1510_v6 = vld [vmem:[%s2520_s29 + $0x18] sm:$0xf]  ;;  %p1563_p11 = scmp.ge.s32.totalorder %s1562_s9, %s2893_s7 }
 0x1a2   : >> { %1503 = vst [vmem:[%s2516_s24 + $0x8] sm:$0xf] %v1502_v2  ;;  %v1512_v7 = vld [vmem:[%s2520_s29 + $0x1c] sm:$0xf]  ;;  %v1514_v8 = vld [vmem:[%s2520_s29 + $0x20] sm:$0xf] }
 0x1a3   : >> { %1505 = vst [vmem:[%s2516_s24 + $0xc] sm:$0xf] %v1504_v3  ;;  %v1516_v9 = vld [vmem:[%s2520_s29 + $0x24] sm:$0xf]  ;;  %v1518_v10 = vld [vmem:[%s2520_s29 + $0x28] sm:$0xf] }
 0x1a4   : >> { %1507 = vst [vmem:[%s2516_s24 + $0x10] sm:$0xf] %v1506_v4  ;;  %v1520_v11 = vld [vmem:[%s2520_s29 + $0x2c] sm:$0xf]  ;;  %v1522_v12 = vld [vmem:[%s2520_s29 + $0x30] sm:$0xf] }
 0x1a5   : >> { %1509 = vst [vmem:[%s2516_s24 + $0x14] sm:$0xf] %v1508_v5  ;;  %v1524_v13 = vld [vmem:[%s2520_s29 + $0x34] sm:$0xf]  ;;  %v1526_v14 = vld [vmem:[%s2520_s29 + $0x38] sm:$0xf] }
 0x1a6   : >> { %1511 = vst [vmem:[%s2516_s24 + $0x18] sm:$0xf] %v1510_v6  ;;  %v1528_v15 = vld [vmem:[%s2520_s29 + $0x3c] sm:$0xf]  ;;  %v1530_v16 = vld [vmem:[%s2520_s29 + $0x40] sm:$0xf] }
 0x1a7   : >> { %1513 = vst [vmem:[%s2516_s24 + $0x1c] sm:$0xf] %v1512_v7  ;;  %v1532_v17 = vld [vmem:[%s2520_s29 + $0x44] sm:$0xf]  ;;  %s3041_s9 = smov (%p1563_p11, %s1562_s9), 0  ;;  %s1492_s8 = sadd.s32 1, %s2528_s8  }
 0x1a8   : >> { %1515 = vst [vmem:[%s2516_s24 + $0x20] sm:$0xf] %v1514_v8  ;;  %v1534_v18 = vld [vmem:[%s2520_s29 + $0x48] sm:$0xf]  ;;  %v1536_v19 = vld [vmem:[%s2520_s29 + $0x4c] sm:$0xf]  ;;  %p1491_p12 = scmp.ge.s32.totalorder %s1492_s8, %s2893_s7  ;;  %s3034_s26 = smov %s3041_s9 }
 0x1a9   : >> { %1517 = vst [vmem:[%s2516_s24 + $0x24] sm:$0xf] %v1516_v9  ;;  %s2107_s10 = sshll.u32 %s3041_s9, 7  ;;  %v1538_v20 = vld [vmem:[%s2520_s29 + $0x50] sm:$0xf] }
 0x1aa   : >> { %1519 = vst [vmem:[%s2516_s24 + $0x28] sm:$0xf] %v1518_v10  ;;  %s2963_s11 = scalar_lea.vmem %s2731_s21, %s2107_s10 [#allocation2]   ;;  %s1568_s12 = scalar_lea.vmem %s2887_s27, %s2107_s10   ;;  %v1540_v21 = vld [vmem:[%s2520_s29 + $0x54] sm:$0xf]  ;;  %v1542_v22 = vld [vmem:[%s2520_s29 + $0x58] sm:$0xf] }
 0x1ab   : >> { %1521 = vst [vmem:[%s2516_s24 + $0x2c] sm:$0xf] %v1520_v11  ;;  %v1544_v23 = vld [vmem:[%s2520_s29 + $0x5c] sm:$0xf]  ;;  %v1546_v24 = vld [vmem:[%s2520_s29 + $0x60] sm:$0xf] }
 0x1ac   : >> { %1523 = vst [vmem:[%s2516_s24 + $0x30] sm:$0xf] %v1522_v12  ;;  %v1548_v25 = vld [vmem:[%s2520_s29 + $0x64] sm:$0xf]  ;;  %v1550_v26 = vld [vmem:[%s2520_s29 + $0x68] sm:$0xf] }
 0x1ad   : >> { %1525 = vst [vmem:[%s2516_s24 + $0x34] sm:$0xf] %v1524_v13  ;;  %v1552_v27 = vld [vmem:[%s2520_s29 + $0x6c] sm:$0xf]  ;;  %v1554_v28 = vld [vmem:[%s2520_s29 + $0x70] sm:$0xf] }
 0x1ae   : >> { %1527 = vst [vmem:[%s2516_s24 + $0x38] sm:$0xf] %v1526_v14  ;;  %v1556_v29 = vld [vmem:[%s2520_s29 + $0x74] sm:$0xf]  ;;  %v1558_v30 = vld [vmem:[%s2520_s29 + $0x78] sm:$0xf] }
 0x1af   : >> { %1529 = vst [vmem:[%s2516_s24 + $0x3c] sm:$0xf] %v1528_v15  ;;  %v1560_v31 = vld [vmem:[%s2520_s29 + $0x7c] sm:$0xf]  ;;  %s3033_s29 = smov %s2963_s11 }
 0x1b0   : >> { %1531 = vst [vmem:[%s2516_s24 + $0x40] sm:$0xf] %v1530_v16 }
 0x1b1   : >> { %1533 = vst [vmem:[%s2516_s24 + $0x44] sm:$0xf] %v1532_v17 }
 0x1b2   : >> { %1535 = vst [vmem:[%s2516_s24 + $0x48] sm:$0xf] %v1534_v18 }
 0x1b3   : >> { %1537 = vst [vmem:[%s2516_s24 + $0x4c] sm:$0xf] %v1536_v19 }
 0x1b4   : >> { %1539 = vst [vmem:[%s2516_s24 + $0x50] sm:$0xf] %v1538_v20 }
 0x1b5   : >> { %1541 = vst [vmem:[%s2516_s24 + $0x54] sm:$0xf] %v1540_v21 }
 0x1b6   : >> { %1543 = vst [vmem:[%s2516_s24 + $0x58] sm:$0xf] %v1542_v22 }
 0x1b7   : >> { %1545 = vst [vmem:[%s2516_s24 + $0x5c] sm:$0xf] %v1544_v23 }
 0x1b8   : >> { %1547 = vst [vmem:[%s2516_s24 + $0x60] sm:$0xf] %v1546_v24 }
 0x1b9   : >> { %1549 = vst [vmem:[%s2516_s24 + $0x64] sm:$0xf] %v1548_v25 }
 0x1ba   : >> { %1551 = vst [vmem:[%s2516_s24 + $0x68] sm:$0xf] %v1550_v26 }
 0x1bb   : >> { %1553 = vst [vmem:[%s2516_s24 + $0x6c] sm:$0xf] %v1552_v27  ;;  %1494 = sbr.rel (!%p1491_p12) target bundleno = 415 (0x19f), region = 133 }
 0x1bc   : >> { %1555 = vst [vmem:[%s2516_s24 + $0x70] sm:$0xf] %v1554_v28 }
 0x1bd   : >> { %1557 = vst [vmem:[%s2516_s24 + $0x74] sm:$0xf] %v1556_v29 }
 0x1be   : >> { %1559 = vst [vmem:[%s2516_s24 + $0x78] sm:$0xf] %v1558_v30 }
 0x1bf   : >> { %1561 = vst [vmem:[%s2516_s24 + $0x7c] sm:$0xf] %v1560_v31  ;;  %s3032_s24 = smov %s1568_s12 }
 0x1c0 PF: > { %s3004_s13 = sand.u32 31, %s3039_s18   ;;  %s2188_s14 = sshll.u32 %s2893_s7, 7 }
 0x1c1   : > { %s1573_s15 = scalar_lea.vmem %s2731_s21, %s2188_s14 [#allocation2]   ;;  %s1575_s16 = scalar_lea.vmem %s2887_s27, %s2188_s14  }
 0x1c2   : > { %p2112_p13 = scmp.le.s32.totalorder %s3004_s13, 0 }
 0x1c3   : > { %s2530_s17 = smov (!%p2112_p13), %s1575_s16   ;;  %s2534_s19 = smov (!%p2112_p13), %s1573_s15  }
 0x1c4   : > { %1780 = sbr.rel (%p2112_p13) target bundleno = 465 (0x1d1), region = 138  ;;  %s2538_s20 = smov (!%p2112_p13), 0  }
 0x1c5   : > { %s2542_s23 = smov (!%p2112_p13), 0  }
 0x1c9 LB: >> { %v1585_v32 = vld [vmem:[%s2536_s19] sm:$0xf]  ;;  %s1587_s18 = sadd.s32 1, %s2540_s20  ;;  %s1579_s23 = sadd.s32 1, %s2544_s23   ;;  %s2544_s23 = sphi %s2542_s23, %s1579_s23   ;;  %s2540_s20 = sphi %s2538_s20, %s2539_s20   ;;  %s2536_s19 = sphi %s2534_s19, %s1592_s19   ;;  %s2532_s17 = sphi %s2530_s17, %s1593_s17  }
 0x1ca   : >> { %1586 = vst [vmem:[%s2532_s17] sm:$0xf] %v1585_v32  ;;  %p1588_p0 = scmp.ge.s32.totalorder %s1587_s18, %s3004_s13  ;;  %p1578_p1 = scmp.ge.s32.totalorder %s1579_s23, %s3004_s13 }
 0x1cc   : >> { %s3043_s18 = smov (%p1588_p0, %s1587_s18), 0  ;;  %1581 = sbr.rel (!%p1578_p1) target bundleno = 457 (0x1c9), region = 144 }
 0x1cd   : >> { %s2113_s21 = sshll.u32 %s3043_s18, 2  ;;  %s2539_s20 = smov %s3043_s18  }
 0x1ce   : >> { %s1592_s19 = scalar_lea.vmem %s1573_s15, %s2113_s21 [#allocation2]   ;;  %s1593_s17 = scalar_lea.vmem %s1575_s16, %s2113_s21  }
 0x1d1 PF: > { %p13_p2 = scmp.ge.s32.totalorder %s2596_s25, 7   ;;  %s3035_s21 = smov %s2508_s22 }
 0x1d2   : > { %s3036_s22 = smov %s2604_s28  ;;  %s3037_s23 = smov %s2596_s25 }
 0x1d3   :  { %15 = sbr.rel (!%p13_p2) target bundleno = 2 (0x2), region = 155 }

// kernel: resnet_forward.23
= control target key start
LH: loop header
LB: loop body
LE: loop exit
PB: predicated region body
PF: predicated region fallthrough
CT: control target
= control target key end

     0   :  { %s2101_s15 = smov 0   ;;  %s2103_s16 = smov 0   ;;  %s2465_s0 = inlined_call_operand.vmem [shape: bf16[2178,128], index: 0, kind: input, shape index: {}]   ;;  %s2466_s1 = inlined_call_operand.vmem [shape: bf16[128,128], index: 1, kind: input, shape index: {}]   ;;  %s2467_s2 = inlined_call_operand.vmem [shape: f32[1,128], index: 2, kind: input, shape index: {}]   ;;  %s2468_s3 = inlined_call_operand.vmem [shape: bf16[2178,128], index: 3, kind: input, shape index: {}]   ;;  %s2469_s4 = inlined_call_operand.vmem [shape: bf16[2178,128], index: 4, kind: output, shape index: {}]  }
   0x1   :  { %s2105_s17 = smov 0  }
   0x2 LB: > { %s2114_s18 = sadd.s32 4294967295, %s2042_s17   ;;  %s2116_s19 = sadd.s32 1, %s2042_s17   ;;  %s2042_s17 = sphi %s2105_s17, %s2478_s17   ;;  %s2038_s16 = sphi %s2103_s16, %s2477_s16   ;;  %s2034_s15 = sphi %s2101_s15, %s2476_s15  }
   0x3   : > { %s112_s20 = ssub.s32 %s2042_s17, %s2116_s19  ;;  %s115_s21 = sadd.s32 1, %s2038_s16 }
   0x4   : > { %p113_p0 = scmp.eq.s32.totalorder %s112_s20, 0  ;;  %p125_p1 = scmp.ne.s32.totalorder %s2038_s16, %s2034_s15 }
   0x5   : > { %p126_p2 = scmp.eq.s32.totalorder %s2114_s18, 4  ;;  %p1383_p3 = scmp.ge.s32.totalorder %s2042_s17, 1 }
   0x6   : > { %s2124_s22 = scalar_select %p113_p0, %s2038_s16, %s115_s21  }
   0x7   : > { %p2126_p4 = por %p126_p2, %p125_p1  ;;  %p190_p5 = scmp.lt.s32.totalorder %s2042_s17, 6 }
   0x9   : > { %p191_p6 = pnand %p1383_p3, %p190_p5 }
   0xa   : > { %s2143_s6 = smul.u32 (!%p191_p6), 55, %s2114_s18  ;;  %s225_s5 = sand.u32 (!%p191_p6), 1, %s2034_s15  }
   0xb   : > { %194 = sbr.rel (%p191_p6) target bundleno = 358 (0x166), region = 36 }
   0xc   : > { %p233_p7 = scmp.lt.s32.totalorder (!%p191_p6), %s2143_s6, 272  ;;  %s1898_s7 = smul.u32 (!%p191_p6), 220, %s225_s5 }
   0xe   : > { %s2222_s15 = scalar_lea.vmem (!%p191_p6), [#allocation2], %s1898_s7  }
  0x10   : > { %v1575_v0 = vld [vmem:[%s2466_s1 + $0x38] sm:$0xff]  ;;  %v1574_v1 = vld [vmem:[%s2466_s1 + $0x30] sm:$0xff]  ;;  %v1573_v2 = vld [vmem:[%s2466_s1 + $0x28] sm:$0xff]  ;;  %s2153_s11 = scalar_select %p233_p7, %s2143_s6, 272 }
  0x11   : > { %550 = vmatpush.bf16.msra.mxu0 %v1575_v0  ;;  %1874 = vmatpush.bf16.msra.mxu1 %v1575_v0  ;;  %v1572_v3 = vld [vmem:[%s2466_s1 + $0x20] sm:$0xff]  ;;  %v1571_v4 = vld [vmem:[%s2466_s1 + $0x18] sm:$0xff]  ;;  %v1570_v5 = vld [vmem:[%s2466_s1 + $0x10] sm:$0xff]  ;;  %s1036_s8 = ssub.s32 (%p2126_p4), 273, %s2143_s6  ;;  %s1576_s9 = smul.u32 (%p2126_p4), 220, %s2114_s18 }
  0x12   : > { %1875 = vmatpush.bf16.msra.mxu2 %v1575_v0  ;;  %1876 = vmatpush.bf16.msra.mxu3 %v1575_v0  ;;  %v1569_v6 = vld [vmem:[%s2466_s1 + $0x8] sm:$0xff]  ;;  %s1384_s14 = sshll.u32 %s2153_s11, 2  ;;  %v1568_v7 = vld [vmem:[%s2466_s1] sm:$0xff]  ;;  %p1037_p8 = scmp.lt.s32.totalorder (%p2126_p4), %s1036_s8, 55 }
  0x13   : > { %s2167_s25 = scalar_lea.vmem %s2465_s0, %s1384_s14  ;;  %s2202_s28 = scalar_lea.vmem %s2468_s3, %s1384_s14  ;;  %v2207_v40 = vld [vmem:[%s2467_s2] ss:$0 sm:$0xff] }
  0x14   : > { %v1541_v8 = vld [vmem:[%s2167_s25] sm:$0xff]  ;;  %v1548_v9 = vld [vmem:[%s2167_s25 + $0x38] sm:$0xff]  ;;  %v1555_v10 = vld [vmem:[%s2167_s25 + $0x70] sm:$0xff]  ;;  %s2330_s12 = scalar_lea.vmem (%p2126_p4), %s2469_s4, %s1576_s9  }
  0x15   : > { %551 = vmatpush.bf16.msra.mxu0 %v1574_v1  ;;  %1877 = vmatpush.bf16.msra.mxu1 %v1574_v1  ;;  %v1562_v11 = vld [vmem:[%s2167_s25 + $0xa8] sm:$0xff]  ;;  %v1549_v13 = vld [vmem:[%s2167_s25 + $0x40] sm:$0xff]  ;;  %v1556_v14 = vld [vmem:[%s2167_s25 + $0x78] sm:$0xff] }
  0x16   : > { %1878 = vmatpush.bf16.msra.mxu2 %v1574_v1  ;;  %1879 = vmatpush.bf16.msra.mxu3 %v1574_v1  ;;  %v1542_v12 = vld [vmem:[%s2167_s25 + $0x8] sm:$0xff]  ;;  %v1563_v15 = vld [vmem:[%s2167_s25 + $0xb0] sm:$0xff]  ;;  %v1557_v18 = vld [vmem:[%s2167_s25 + $0x80] sm:$0xff] }
  0x17   : > { %v1543_v16 = vld [vmem:[%s2167_s25 + $0x10] sm:$0xff]  ;;  %v1550_v17 = vld [vmem:[%s2167_s25 + $0x48] sm:$0xff]  ;;  %v1564_v19 = vld [vmem:[%s2167_s25 + $0xb8] sm:$0xff] }
  0x18   : > { %v1544_v20 = vld [vmem:[%s2167_s25 + $0x18] sm:$0xff]  ;;  %v1551_v21 = vld [vmem:[%s2167_s25 + $0x50] sm:$0xff]  ;;  %v1558_v22 = vld [vmem:[%s2167_s25 + $0x88] sm:$0xff] }
  0x19   : > { %552 = vmatpush.bf16.msra.mxu0 %v1573_v2  ;;  %1880 = vmatpush.bf16.msra.mxu1 %v1573_v2  ;;  %v1565_v23 = vld [vmem:[%s2167_s25 + $0xc0] sm:$0xff]  ;;  %v1552_v25 = vld [vmem:[%s2167_s25 + $0x58] sm:$0xff]  ;;  %v1559_v26 = vld [vmem:[%s2167_s25 + $0x90] sm:$0xff] }
  0x1a   : > { %1881 = vmatpush.bf16.msra.mxu2 %v1573_v2  ;;  %1882 = vmatpush.bf16.msra.mxu3 %v1573_v2  ;;  %v1545_v24 = vld [vmem:[%s2167_s25 + $0x20] sm:$0xff]  ;;  %v1566_v27 = vld [vmem:[%s2167_s25 + $0xc8] sm:$0xff]  ;;  %v1560_v30 = vld [vmem:[%s2167_s25 + $0x98] sm:$0xff] }
  0x1b   : > { %v1546_v28 = vld [vmem:[%s2167_s25 + $0x28] sm:$0xff]  ;;  %v1553_v29 = vld [vmem:[%s2167_s25 + $0x60] sm:$0xff]  ;;  %v1567_v31 = vld [vmem:[%s2167_s25 + $0xd0] sm:$0xff] }
  0x1c   : > { %v315_v32 = vld [vmem:[%s2167_s25 + $0xd8] sm:$0xf]  ;;  %v1547_v34 = vld [vmem:[%s2167_s25 + $0x30] sm:$0xff]  ;;  %v1554_v35 = vld [vmem:[%s2167_s25 + $0x68] sm:$0xff] }
  0x1d   : > { %553 = vmatpush.bf16.msra.mxu0 %v1572_v3  ;;  %1883 = vmatpush.bf16.msra.mxu1 %v1572_v3  ;;  %v445_v33 = vunpack.c.l.b16 %v315_v32  ;;  %v1561_v36 = vld [vmem:[%s2167_s25 + $0xa0] sm:$0xff]  ;;  %v1828_v42 = vld [vmem:[%s2202_s28 + $0x38] sm:$0xff]   ;;  %v1842_v49 = vld [vmem:[%s2202_s28 + $0xa8] sm:$0xff]  }
  0x1e   : > { %1884 = vmatpush.bf16.msra.mxu2 %v1572_v3  ;;  %1885 = vmatpush.bf16.msra.mxu3 %v1572_v3  ;;  %v1580_v41 = vld [vmem:[%s2202_s28] sm:$0xff]   ;;  %v1609_v46 = vunpack.c.l.bf16 %v1828_v42  ;;  %v1610_v51 = vunpack.c.h.bf16 %v1828_v42  ;;  %v1835_v56 = vld [vmem:[%s2202_s28 + $0x70] sm:$0xff]   ;;  %v1665_v60 = vunpack.c.l.bf16 %v1842_v49 }
  0x1f   : > { %v473_v37 = vpack.c.b16 %v445_v33, %v445_v33  ;;  %v1581_v44 = vunpack.c.l.bf16 %v1580_v41  ;;  %v1582_v50 = vunpack.c.h.bf16 %v1580_v41  ;;  %v1637_v0 = vunpack.c.l.bf16 %v1835_v56  ;;  %v1843_v33 = vld [vmem:[%s2202_s28 + $0xb0] sm:$0xff]   ;;  %v1836_v41 = vld [vmem:[%s2202_s28 + $0x78] sm:$0xff]  }
  0x21   : > { %554 = vmatpush.bf16.msra.mxu0 %v1571_v4  ;;  %1886 = vmatpush.bf16.msra.mxu1 %v1571_v4 }
  0x22   : > { %1887 = vmatpush.bf16.msra.mxu2 %v1571_v4  ;;  %1888 = vmatpush.bf16.msra.mxu3 %v1571_v4 }
  0x25   : > { %555 = vmatpush.bf16.msra.mxu0 %v1570_v5  ;;  %1889 = vmatpush.bf16.msra.mxu1 %v1570_v5 }
  0x26   : > { %1890 = vmatpush.bf16.msra.mxu2 %v1570_v5  ;;  %1891 = vmatpush.bf16.msra.mxu3 %v1570_v5 }
  0x29   : > { %556 = vmatpush.bf16.msra.mxu0 %v1569_v6  ;;  %1892 = vmatpush.bf16.msra.mxu1 %v1569_v6 }
  0x2a   : > { %1893 = vmatpush.bf16.msra.mxu2 %v1569_v6  ;;  %1894 = vmatpush.bf16.msra.mxu3 %v1569_v6  ;;  %v1638_v6 = vunpack.c.h.bf16 %v1835_v56  ;;  %v1670_v56 = vunpack.c.h.bf16 %v1843_v33 }
  0x2d   : > { %557 = vmatpush.bf16.msra.mxu0 %v1568_v7  ;;  %1895 = vmatpush.bf16.msra.mxu1 %v1568_v7 }
  0x2e   : > { %1896 = vmatpush.bf16.msra.mxu2 %v1568_v7  ;;  %1897 = vmatpush.bf16.msra.mxu3 %v1568_v7  ;;  %v1666_v7 = vunpack.c.h.bf16 %v1842_v49  ;;  %v1641_v49 = vunpack.c.l.bf16 %v1836_v41 }
  0x30   : > { %558 = vmatmul.bf16.vlgmr.msra.gmra.mxu0 %v1541_v8  ;;  %593 = vmatmul.bf16.vlgmr.msra.gmra.mxu1 %v1548_v9 }
  0x31   : > { %628 = vmatmul.bf16.vlgmr.msra.gmra.mxu2 %v1555_v10  ;;  %663 = vmatmul.bf16.vlgmr.msra.gmra.mxu3 %v1562_v11 }
  0x40   : > { %563 = vmatmul.bf16.gmra.mxu0 %v1542_v12  ;;  %598 = vmatmul.bf16.gmra.mxu1 %v1549_v13 }
  0x41   : > { %633 = vmatmul.bf16.gmra.mxu2 %v1556_v14  ;;  %668 = vmatmul.bf16.gmra.mxu3 %v1563_v15 }
  0x50   : > { %568 = vmatmul.bf16.gmra.mxu0 %v1543_v16  ;;  %603 = vmatmul.bf16.gmra.mxu1 %v1550_v17 }
  0x51   : > { %638 = vmatmul.bf16.gmra.mxu2 %v1557_v18  ;;  %673 = vmatmul.bf16.gmra.mxu3 %v1564_v19 }
  0x60   : > { %573 = vmatmul.bf16.gmra.mxu0 %v1544_v20  ;;  %608 = vmatmul.bf16.gmra.mxu1 %v1551_v21  ;;  %v1822_v20 = vld [vmem:[%s2202_s28 + $0x8] sm:$0xff]   ;;  %v1829_v21 = vld [vmem:[%s2202_s28 + $0x40] sm:$0xff]  }
  0x61   : > { %643 = vmatmul.bf16.gmra.mxu2 %v1558_v22  ;;  %678 = vmatmul.bf16.gmra.mxu3 %v1565_v23 }
  0x70   : > { %578 = vmatmul.bf16.gmra.mxu0 %v1545_v24  ;;  %613 = vmatmul.bf16.gmra.mxu1 %v1552_v25 }
  0x71   : > { %648 = vmatmul.bf16.gmra.mxu2 %v1559_v26  ;;  %683 = vmatmul.bf16.gmra.mxu3 %v1566_v27  ;;  %v1585_v26 = vunpack.c.l.bf16 %v1822_v20 }
  0x80   : > { %583 = vmatmul.bf16.gmra.mxu0 %v1546_v28  ;;  %618 = vmatmul.bf16.gmra.mxu1 %v1553_v29  ;;  %v1613_v28 = vunpack.c.l.bf16 %v1829_v21 }
  0x81   : > { %653 = vmatmul.bf16.gmra.mxu2 %v1560_v30  ;;  %688 = vmatmul.bf16.gmra.mxu3 %v1567_v31 }
  0x90   : > { %588 = vmatmul.bf16.gmra.mxu0 %v1547_v34  ;;  %623 = vmatmul.bf16.gmra.mxu1 %v1554_v35  ;;  %v1586_v34 = vunpack.c.h.bf16 %v1822_v20  ;;  %v1614_v35 = vunpack.c.h.bf16 %v1829_v21 }
  0x91   : > { %658 = vmatmul.bf16.gmra.mxu2 %v1561_v36  ;;  %693 = vmatmul.bf16.gmra.mxu3 %v473_v37 }
  0xad   : > { %v559_v38 = vpop.f32.mrf.mxu0  ;;  %v594_v39 = vpop.f32.mrf.mxu1 }
  0xae   : > { %v560_v43 = vadd.f32 %v2207_v40, %v559_v38  ;;  %v595_v45 = vadd.f32 %v2207_v40, %v594_v39 }
  0xb0   : > { %v808_v54 = vadd.f32 %v1581_v44, %v560_v43  ;;  %v822_v55 = vadd.f32 %v1609_v46, %v595_v45  ;;  %v1669_v45 = vunpack.c.l.bf16 %v1843_v33 }
  0xb2   : > { %v863_v1 = vmax.f32 %v808_v54, 0.0  ;;  %v877_v2 = vmax.f32 %v822_v55, 0.0  ;;  %v1642_v55 = vunpack.c.h.bf16 %v1836_v41 }
  0xb4   : > { %v629_v47 = vpop.f32.mrf.mxu2  ;;  %v664_v48 = vpop.f32.mrf.mxu3 }
  0xb5   : > { %v561_v52 = vpop.f32.mrf.mxu0  ;;  %v596_v53 = vpop.f32.mrf.mxu1  ;;  %v665_v59 = vadd.f32 %v2207_v40, %v664_v48  ;;  %v630_v63 = vadd.f32 %v2207_v40, %v629_v47 }
  0xb6   : > { %v562_v57 = vadd.f32 %v2207_v40, %v561_v52  ;;  %v597_v58 = vadd.f32 %v2207_v40, %v596_v53 }
  0xb7   : > { %v850_v5 = vadd.f32 %v1665_v60, %v665_v59  ;;  %v836_v12 = vadd.f32 %v1637_v0, %v630_v63 }
  0xb8   : > { %v809_v61 = vadd.f32 %v1582_v50, %v562_v57  ;;  %v823_v62 = vadd.f32 %v1610_v51, %v597_v58 }
  0xb9   : > { %v905_v17 = vmax.f32 %v850_v5, 0.0  ;;  %v891_v22 = vmax.f32 %v836_v12, 0.0  ;;  %v1823_v5 = vld [vmem:[%s2202_s28 + $0x10] sm:$0xff]  }
  0xba   : > { %v864_v3 = vmax.f32 %v809_v61, 0.0  ;;  %v878_v4 = vmax.f32 %v823_v62, 0.0 }
  0xbc   : > { %v1690_v8 = vpack.c.bf16 %v864_v3, %v863_v1  ;;  %v1725_v9 = vpack.c.bf16 %v878_v4, %v877_v2  ;;  %v631_v10 = vpop.f32.mrf.mxu2  ;;  %v666_v11 = vpop.f32.mrf.mxu3 }
  0xbd   : > { %v632_v13 = vadd.f32 %v2207_v40, %v631_v10  ;;  %v667_v14 = vadd.f32 %v2207_v40, %v666_v11  ;;  %v564_v15 = vpop.f32.mrf.mxu0  ;;  %v599_v16 = vpop.f32.mrf.mxu1  ;;  %v1589_v11 = vunpack.c.l.bf16 %v1823_v5 }
  0xbe   : > { %1691 = vst [vmem:[%s2222_s15] sm:$0xff] %v1690_v8   ;;  %v565_v25 = vadd.f32 %v2207_v40, %v564_v15  ;;  %v600_v27 = vadd.f32 %v2207_v40, %v599_v16 }
  0xbf   : > { %1854 = vst [vmem:[%s2222_s15 + $0x38] sm:$0xff] %v1725_v9   ;;  %v837_v18 = vadd.f32 %v1638_v6, %v632_v13  ;;  %v851_v19 = vadd.f32 %v1666_v7, %v667_v14  ;;  %v1830_v6 = vld [vmem:[%s2202_s28 + $0x48] sm:$0xff]  }
  0xc0   : > { %v810_v38 = vadd.f32 %v1585_v26, %v565_v25  ;;  %v824_v39 = vadd.f32 %v1613_v28, %v600_v27  ;;  %v1617_v13 = vunpack.c.l.bf16 %v1830_v6  ;;  %v1618_v20 = vunpack.c.h.bf16 %v1830_v6  ;;  %v1837_v25 = vld [vmem:[%s2202_s28 + $0x80] sm:$0xff]  }
  0xc1   : > { %v892_v23 = vmax.f32 %v837_v18, 0.0  ;;  %v906_v24 = vmax.f32 %v851_v19, 0.0  ;;  %v1844_v18 = vld [vmem:[%s2202_s28 + $0xb8] sm:$0xff]   ;;  %v1590_v19 = vunpack.c.h.bf16 %v1823_v5  ;;  %v1645_v33 = vunpack.c.l.bf16 %v1837_v25 }
  0xc2   : > { %v865_v50 = vmax.f32 %v810_v38, 0.0  ;;  %v879_v51 = vmax.f32 %v824_v39, 0.0  ;;  %v1646_v39 = vunpack.c.h.bf16 %v1837_v25  ;;  %v1674_v41 = vunpack.c.h.bf16 %v1844_v18 }
  0xc3   : > { %v1760_v29 = vpack.c.bf16 %v892_v23, %v891_v22  ;;  %v1795_v30 = vpack.c.bf16 %v906_v24, %v905_v17 }
  0xc4   : > { %v634_v31 = vpop.f32.mrf.mxu2  ;;  %v669_v32 = vpop.f32.mrf.mxu3 }
  0xc5   : > { %1861 = vst [vmem:[%s2222_s15 + $0x70] sm:$0xff] %v1760_v29   ;;  %v566_v36 = vpop.f32.mrf.mxu0  ;;  %v601_v37 = vpop.f32.mrf.mxu1  ;;  %v670_v44 = vadd.f32 %v2207_v40, %v669_v32  ;;  %v635_v48 = vadd.f32 %v2207_v40, %v634_v31  ;;  %v1673_v29 = vunpack.c.l.bf16 %v1844_v18 }
  0xc6   : > { %1868 = vst [vmem:[%s2222_s15 + $0xa8] sm:$0xff] %v1795_v30   ;;  %v567_v42 = vadd.f32 %v2207_v40, %v566_v36  ;;  %v602_v43 = vadd.f32 %v2207_v40, %v601_v37 }
  0xc7   : > { %v852_v54 = vadd.f32 %v1669_v45, %v670_v44  ;;  %v838_v61 = vadd.f32 %v1641_v49, %v635_v48 }
  0xc8   : > { %v811_v46 = vadd.f32 %v1586_v34, %v567_v42  ;;  %v825_v47 = vadd.f32 %v1614_v35, %v602_v43 }
  0xc9   : > { %v907_v2 = vmax.f32 %v852_v54, 0.0  ;;  %v893_v7 = vmax.f32 %v838_v61, 0.0  ;;  %v1824_v54 = vld [vmem:[%s2202_s28 + $0x18] sm:$0xff]  }
  0xca   : > { %v866_v52 = vmax.f32 %v811_v46, 0.0  ;;  %v880_v53 = vmax.f32 %v825_v47, 0.0 }
  0xcc   : > { %v1695_v57 = vpack.c.bf16 %v866_v52, %v865_v50  ;;  %v1730_v58 = vpack.c.bf16 %v880_v53, %v879_v51  ;;  %v636_v59 = vpop.f32.mrf.mxu2  ;;  %v671_v60 = vpop.f32.mrf.mxu3 }
  0xcd   : > { %v637_v62 = vadd.f32 %v2207_v40, %v636_v59  ;;  %v672_v63 = vadd.f32 %v2207_v40, %v671_v60  ;;  %v569_v0 = vpop.f32.mrf.mxu0  ;;  %v604_v1 = vpop.f32.mrf.mxu1  ;;  %v1593_v60 = vunpack.c.l.bf16 %v1824_v54 }
  0xce   : > { %1848 = vst [vmem:[%s2222_s15 + $0x8] sm:$0xff] %v1695_v57   ;;  %v570_v10 = vadd.f32 %v2207_v40, %v569_v0  ;;  %v605_v12 = vadd.f32 %v2207_v40, %v604_v1 }
  0xcf   : > { %1855 = vst [vmem:[%s2222_s15 + $0x40] sm:$0xff] %v1730_v58   ;;  %v839_v3 = vadd.f32 %v1642_v55, %v637_v62  ;;  %v853_v4 = vadd.f32 %v1670_v56, %v672_v63  ;;  %v1831_v55 = vld [vmem:[%s2202_s28 + $0x50] sm:$0xff]  }
  0xd0   : > { %v812_v23 = vadd.f32 %v1589_v11, %v570_v10  ;;  %v826_v24 = vadd.f32 %v1617_v13, %v605_v12  ;;  %v1621_v62 = vunpack.c.l.bf16 %v1831_v55  ;;  %v1622_v5 = vunpack.c.h.bf16 %v1831_v55  ;;  %v1838_v10 = vld [vmem:[%s2202_s28 + $0x88] sm:$0xff]  }
  0xd1   : > { %v894_v8 = vmax.f32 %v839_v3, 0.0  ;;  %v908_v9 = vmax.f32 %v853_v4, 0.0  ;;  %v1845_v3 = vld [vmem:[%s2202_s28 + $0xc0] sm:$0xff]   ;;  %v1594_v4 = vunpack.c.h.bf16 %v1824_v54  ;;  %v1649_v18 = vunpack.c.l.bf16 %v1838_v10 }
  0xd2   : > { %v867_v34 = vmax.f32 %v812_v23, 0.0  ;;  %v881_v35 = vmax.f32 %v826_v24, 0.0  ;;  %v1650_v24 = vunpack.c.h.bf16 %v1838_v10  ;;  %v1678_v25 = vunpack.c.h.bf16 %v1845_v3 }
  0xd3   : > { %v1765_v14 = vpack.c.bf16 %v894_v8, %v893_v7  ;;  %v1800_v15 = vpack.c.bf16 %v908_v9, %v907_v2 }
  0xd4   : > { %v639_v16 = vpop.f32.mrf.mxu2  ;;  %v674_v17 = vpop.f32.mrf.mxu3 }
  0xd5   : > { %1862 = vst [vmem:[%s2222_s15 + $0x78] sm:$0xff] %v1765_v14   ;;  %v571_v21 = vpop.f32.mrf.mxu0  ;;  %v606_v22 = vpop.f32.mrf.mxu1  ;;  %v675_v28 = vadd.f32 %v2207_v40, %v674_v17  ;;  %v640_v32 = vadd.f32 %v2207_v40, %v639_v16  ;;  %v1677_v14 = vunpack.c.l.bf16 %v1845_v3 }
  0xd6   : > { %1869 = vst [vmem:[%s2222_s15 + $0xb0] sm:$0xff] %v1800_v15   ;;  %v572_v26 = vadd.f32 %v2207_v40, %v571_v21  ;;  %v607_v27 = vadd.f32 %v2207_v40, %v606_v22 }
  0xd7   : > { %v854_v38 = vadd.f32 %v1673_v29, %v675_v28  ;;  %v840_v46 = vadd.f32 %v1645_v33, %v640_v32 }
  0xd8   : > { %v813_v30 = vadd.f32 %v1590_v19, %v572_v26  ;;  %v827_v31 = vadd.f32 %v1618_v20, %v607_v27 }
  0xd9   : > { %v909_v51 = vmax.f32 %v854_v38, 0.0  ;;  %v895_v56 = vmax.f32 %v840_v46, 0.0  ;;  %v1825_v38 = vld [vmem:[%s2202_s28 + $0x20] sm:$0xff]  }
  0xda   : > { %v868_v36 = vmax.f32 %v813_v30, 0.0  ;;  %v882_v37 = vmax.f32 %v827_v31, 0.0 }
  0xdc   : > { %v1700_v42 = vpack.c.bf16 %v868_v36, %v867_v34  ;;  %v1735_v43 = vpack.c.bf16 %v882_v37, %v881_v35  ;;  %v641_v44 = vpop.f32.mrf.mxu2  ;;  %v676_v45 = vpop.f32.mrf.mxu3 }
  0xdd   : > { %v642_v47 = vadd.f32 %v2207_v40, %v641_v44  ;;  %v677_v48 = vadd.f32 %v2207_v40, %v676_v45  ;;  %v574_v49 = vpop.f32.mrf.mxu0  ;;  %v609_v50 = vpop.f32.mrf.mxu1  ;;  %v1597_v45 = vunpack.c.l.bf16 %v1825_v38 }
  0xde   : > { %1849 = vst [vmem:[%s2222_s15 + $0x10] sm:$0xff] %v1700_v42   ;;  %v575_v59 = vadd.f32 %v2207_v40, %v574_v49  ;;  %v610_v61 = vadd.f32 %v2207_v40, %v609_v50 }
  0xdf   : > { %1856 = vst [vmem:[%s2222_s15 + $0x48] sm:$0xff] %v1735_v43   ;;  %v841_v52 = vadd.f32 %v1646_v39, %v642_v47  ;;  %v855_v53 = vadd.f32 %v1674_v41, %v677_v48  ;;  %v1832_v39 = vld [vmem:[%s2202_s28 + $0x58] sm:$0xff]  }
  0xe0   : > { %v814_v8 = vadd.f32 %v1593_v60, %v575_v59  ;;  %v828_v9 = vadd.f32 %v1621_v62, %v610_v61  ;;  %v1625_v47 = vunpack.c.l.bf16 %v1832_v39  ;;  %v1626_v54 = vunpack.c.h.bf16 %v1832_v39  ;;  %v1839_v59 = vld [vmem:[%s2202_s28 + $0x90] sm:$0xff]  }
  0xe1   : > { %v896_v57 = vmax.f32 %v841_v52, 0.0  ;;  %v910_v58 = vmax.f32 %v855_v53, 0.0  ;;  %v1846_v52 = vld [vmem:[%s2202_s28 + $0xc8] sm:$0xff]   ;;  %v1598_v53 = vunpack.c.h.bf16 %v1825_v38  ;;  %v1653_v3 = vunpack.c.l.bf16 %v1839_v59 }
  0xe2   : > { %v869_v19 = vmax.f32 %v814_v8, 0.0  ;;  %v883_v20 = vmax.f32 %v828_v9, 0.0  ;;  %v1654_v9 = vunpack.c.h.bf16 %v1839_v59  ;;  %v1682_v10 = vunpack.c.h.bf16 %v1846_v52 }
  0xe3   : > { %v1770_v63 = vpack.c.bf16 %v896_v57, %v895_v56  ;;  %v1805_v0 = vpack.c.bf16 %v910_v58, %v909_v51 }
  0xe4   : > { %v644_v1 = vpop.f32.mrf.mxu2  ;;  %v679_v2 = vpop.f32.mrf.mxu3 }
  0xe5   : > { %1863 = vst [vmem:[%s2222_s15 + $0x80] sm:$0xff] %v1770_v63   ;;  %v576_v6 = vpop.f32.mrf.mxu0  ;;  %v611_v7 = vpop.f32.mrf.mxu1  ;;  %v680_v13 = vadd.f32 %v2207_v40, %v679_v2  ;;  %v645_v17 = vadd.f32 %v2207_v40, %v644_v1  ;;  %v1681_v63 = vunpack.c.l.bf16 %v1846_v52 }
  0xe6   : > { %1870 = vst [vmem:[%s2222_s15 + $0xb8] sm:$0xff] %v1805_v0   ;;  %v577_v11 = vadd.f32 %v2207_v40, %v576_v6  ;;  %v612_v12 = vadd.f32 %v2207_v40, %v611_v7 }
  0xe7   : > { %v856_v23 = vadd.f32 %v1677_v14, %v680_v13  ;;  %v842_v30 = vadd.f32 %v1649_v18, %v645_v17 }
  0xe8   : > { %v815_v15 = vadd.f32 %v1594_v4, %v577_v11  ;;  %v829_v16 = vadd.f32 %v1622_v5, %v612_v12 }
  0xe9   : > { %v911_v35 = vmax.f32 %v856_v23, 0.0  ;;  %v897_v41 = vmax.f32 %v842_v30, 0.0  ;;  %v1826_v23 = vld [vmem:[%s2202_s28 + $0x28] sm:$0xff]  }
  0xea   : > { %v870_v21 = vmax.f32 %v815_v15, 0.0  ;;  %v884_v22 = vmax.f32 %v829_v16, 0.0 }
  0xec   : > { %v1705_v26 = vpack.c.bf16 %v870_v21, %v869_v19  ;;  %v1740_v27 = vpack.c.bf16 %v884_v22, %v883_v20  ;;  %v646_v28 = vpop.f32.mrf.mxu2  ;;  %v681_v29 = vpop.f32.mrf.mxu3 }
  0xed   : > { %v647_v31 = vadd.f32 %v2207_v40, %v646_v28  ;;  %v682_v32 = vadd.f32 %v2207_v40, %v681_v29  ;;  %v579_v33 = vpop.f32.mrf.mxu0  ;;  %v614_v34 = vpop.f32.mrf.mxu1  ;;  %v1601_v29 = vunpack.c.l.bf16 %v1826_v23 }
  0xee   : > { %1850 = vst [vmem:[%s2222_s15 + $0x18] sm:$0xff] %v1705_v26   ;;  %v580_v44 = vadd.f32 %v2207_v40, %v579_v33  ;;  %v615_v46 = vadd.f32 %v2207_v40, %v614_v34 }
  0xef   : > { %1857 = vst [vmem:[%s2222_s15 + $0x50] sm:$0xff] %v1740_v27   ;;  %v843_v36 = vadd.f32 %v1650_v24, %v647_v31  ;;  %v857_v37 = vadd.f32 %v1678_v25, %v682_v32  ;;  %v1833_v24 = vld [vmem:[%s2202_s28 + $0x60] sm:$0xff]  }
  0xf0   : > { %v816_v57 = vadd.f32 %v1597_v45, %v580_v44  ;;  %v830_v58 = vadd.f32 %v1625_v47, %v615_v46  ;;  %v1629_v31 = vunpack.c.l.bf16 %v1833_v24  ;;  %v1630_v38 = vunpack.c.h.bf16 %v1833_v24  ;;  %v1840_v44 = vld [vmem:[%s2202_s28 + $0x98] sm:$0xff]  }
  0xf1   : > { %v898_v42 = vmax.f32 %v843_v36, 0.0  ;;  %v912_v43 = vmax.f32 %v857_v37, 0.0  ;;  %v1847_v36 = vld [vmem:[%s2202_s28 + $0xd0] sm:$0xff]   ;;  %v1602_v37 = vunpack.c.h.bf16 %v1826_v23  ;;  %v1657_v52 = vunpack.c.l.bf16 %v1840_v44 }
  0xf2   : > { %v871_v4 = vmax.f32 %v816_v57, 0.0  ;;  %v885_v5 = vmax.f32 %v830_v58, 0.0  ;;  %v1658_v58 = vunpack.c.h.bf16 %v1840_v44  ;;  %v1686_v59 = vunpack.c.h.bf16 %v1847_v36 }
  0xf3   : > { %v1775_v48 = vpack.c.bf16 %v898_v42, %v897_v41  ;;  %v1810_v49 = vpack.c.bf16 %v912_v43, %v911_v35 }
  0xf4   : > { %v649_v50 = vpop.f32.mrf.mxu2  ;;  %v684_v51 = vpop.f32.mrf.mxu3 }
  0xf5   : > { %1864 = vst [vmem:[%s2222_s15 + $0x88] sm:$0xff] %v1775_v48   ;;  %v581_v55 = vpop.f32.mrf.mxu0  ;;  %v616_v56 = vpop.f32.mrf.mxu1  ;;  %v685_v62 = vadd.f32 %v2207_v40, %v684_v51  ;;  %v650_v2 = vadd.f32 %v2207_v40, %v649_v50  ;;  %v1685_v48 = vunpack.c.l.bf16 %v1847_v36 }
  0xf6   : > { %1871 = vst [vmem:[%s2222_s15 + $0xc0] sm:$0xff] %v1810_v49   ;;  %v582_v60 = vadd.f32 %v2207_v40, %v581_v55  ;;  %v617_v61 = vadd.f32 %v2207_v40, %v616_v56 }
  0xf7   : > { %v858_v8 = vadd.f32 %v1681_v63, %v685_v62  ;;  %v844_v15 = vadd.f32 %v1653_v3, %v650_v2 }
  0xf8   : > { %v817_v0 = vadd.f32 %v1598_v53, %v582_v60  ;;  %v831_v1 = vadd.f32 %v1626_v54, %v617_v61 }
  0xf9   : > { %v913_v20 = vmax.f32 %v858_v8, 0.0  ;;  %v899_v25 = vmax.f32 %v844_v15, 0.0  ;;  %v1827_v8 = vld [vmem:[%s2202_s28 + $0x30] sm:$0xff]  }
  0xfa   : > { %v872_v6 = vmax.f32 %v817_v0, 0.0  ;;  %v886_v7 = vmax.f32 %v831_v1, 0.0  ;;  %v1605_v15 = vunpack.c.l.bf16 %v1827_v8  ;;  %v1606_v23 = vunpack.c.h.bf16 %v1827_v8 }
  0xfc   : > { %v1710_v11 = vpack.c.bf16 %v872_v6, %v871_v4  ;;  %v1745_v12 = vpack.c.bf16 %v886_v7, %v885_v5  ;;  %v651_v13 = vpop.f32.mrf.mxu2  ;;  %v686_v14 = vpop.f32.mrf.mxu3 }
  0xfd   : > { %v652_v16 = vadd.f32 %v2207_v40, %v651_v13  ;;  %v687_v17 = vadd.f32 %v2207_v40, %v686_v14  ;;  %v584_v18 = vpop.f32.mrf.mxu0  ;;  %v619_v19 = vpop.f32.mrf.mxu1 }
  0xfe   : > { %1851 = vst [vmem:[%s2222_s15 + $0x20] sm:$0xff] %v1710_v11   ;;  %v585_v28 = vadd.f32 %v2207_v40, %v584_v18  ;;  %v620_v30 = vadd.f32 %v2207_v40, %v619_v19 }
  0xff   : > { %1858 = vst [vmem:[%s2222_s15 + $0x58] sm:$0xff] %v1745_v12   ;;  %v845_v21 = vadd.f32 %v1654_v9, %v652_v16  ;;  %v859_v22 = vadd.f32 %v1682_v10, %v687_v17  ;;  %v1834_v9 = vld [vmem:[%s2202_s28 + $0x68] sm:$0xff]   ;;  %v752_v10 = vld [vmem:[%s2202_s28 + $0xd8] sm:$0xf] }
 0x100   : > { %v818_v42 = vadd.f32 %v1601_v29, %v585_v28  ;;  %v832_v43 = vadd.f32 %v1629_v31, %v620_v30  ;;  %v1633_v17 = vunpack.c.l.bf16 %v1834_v9  ;;  %v1634_v24 = vunpack.c.h.bf16 %v1834_v9  ;;  %v1841_v30 = vld [vmem:[%s2202_s28 + $0xa0] sm:$0xff]  }
 0x101   : > { %v900_v26 = vmax.f32 %v845_v21, 0.0  ;;  %v914_v27 = vmax.f32 %v859_v22, 0.0 }
 0x102   : > { %v873_v53 = vmax.f32 %v818_v42, 0.0  ;;  %v887_v54 = vmax.f32 %v832_v43, 0.0 }
 0x103   : > { %v1780_v32 = vpack.c.bf16 %v900_v26, %v899_v25  ;;  %v1815_v33 = vpack.c.bf16 %v914_v27, %v913_v20  ;;  %v807_v20 = vunpack.c.l.bf16 %v752_v10 }
 0x104   : > { %v654_v34 = vpop.f32.mrf.mxu2  ;;  %v689_v35 = vpop.f32.mrf.mxu3 }
 0x105   : > { %1865 = vst [vmem:[%s2222_s15 + $0x90] sm:$0xff] %v1780_v32   ;;  %v586_v39 = vpop.f32.mrf.mxu0  ;;  %v621_v41 = vpop.f32.mrf.mxu1  ;;  %v690_v47 = vadd.f32 %v2207_v40, %v689_v35  ;;  %v655_v51 = vadd.f32 %v2207_v40, %v654_v34 }
 0x106   : > { %1872 = vst [vmem:[%s2222_s15 + $0xc8] sm:$0xff] %v1815_v33   ;;  %v587_v45 = vadd.f32 %v2207_v40, %v586_v39  ;;  %v622_v46 = vadd.f32 %v2207_v40, %v621_v41 }
 0x107   : > { %v860_v57 = vadd.f32 %v1685_v48, %v690_v47  ;;  %v846_v0 = vadd.f32 %v1657_v52, %v655_v51 }
 0x108   : > { %v819_v49 = vadd.f32 %v1602_v37, %v587_v45  ;;  %v833_v50 = vadd.f32 %v1630_v38, %v622_v46  ;;  %v1661_v37 = vunpack.c.l.bf16 %v1841_v30  ;;  %v1662_v45 = vunpack.c.h.bf16 %v1841_v30 }
 0x109   : > { %v915_v5 = vmax.f32 %v860_v57, 0.0  ;;  %v901_v11 = vmax.f32 %v846_v0, 0.0 }
 0x10a   : > { %v874_v55 = vmax.f32 %v819_v49, 0.0  ;;  %v888_v56 = vmax.f32 %v833_v50, 0.0 }
 0x10c   : > { %v1715_v60 = vpack.c.bf16 %v874_v55, %v873_v53  ;;  %v1750_v61 = vpack.c.bf16 %v888_v56, %v887_v54  ;;  %v656_v62 = vpop.f32.mrf.mxu2  ;;  %v691_v63 = vpop.f32.mrf.mxu3 }
 0x10d   : > { %v657_v1 = vadd.f32 %v2207_v40, %v656_v62  ;;  %v692_v2 = vadd.f32 %v2207_v40, %v691_v63  ;;  %v589_v3 = vpop.f32.mrf.mxu0  ;;  %v624_v4 = vpop.f32.mrf.mxu1 }
 0x10e   : > { %1852 = vst [vmem:[%s2222_s15 + $0x28] sm:$0xff] %v1715_v60   ;;  %v590_v14 = vadd.f32 %v2207_v40, %v589_v3  ;;  %v625_v16 = vadd.f32 %v2207_v40, %v624_v4 }
 0x10f   : > { %1859 = vst [vmem:[%s2222_s15 + $0x60] sm:$0xff] %v1750_v61   ;;  %v847_v6 = vadd.f32 %v1658_v58, %v657_v1  ;;  %v861_v7 = vadd.f32 %v1686_v59, %v692_v2 }
 0x110   : > { %v820_v28 = vadd.f32 %v1605_v15, %v590_v14  ;;  %v834_v29 = vadd.f32 %v1633_v17, %v625_v16 }
 0x111   : > { %v902_v12 = vmax.f32 %v847_v6, 0.0  ;;  %v916_v13 = vmax.f32 %v861_v7, 0.0 }
 0x112   : > { %v875_v39 = vmax.f32 %v820_v28, 0.0  ;;  %v889_v41 = vmax.f32 %v834_v29, 0.0 }
 0x113   : > { %v1785_v18 = vpack.c.bf16 %v902_v12, %v901_v11  ;;  %v1820_v19 = vpack.c.bf16 %v916_v13, %v915_v5 }
 0x114   : > { %v659_v21 = vpop.f32.mrf.mxu2  ;;  %v694_v22 = vpop.f32.mrf.mxu3 }
 0x115   : > { %1866 = vst [vmem:[%s2222_s15 + $0x98] sm:$0xff] %v1785_v18   ;;  %v695_v25 = vadd.f32 %v2207_v40, %v694_v22  ;;  %v591_v26 = vpop.f32.mrf.mxu0  ;;  %v626_v27 = vpop.f32.mrf.mxu1  ;;  %v660_v36 = vadd.f32 %v2207_v40, %v659_v21 }
 0x116   : > { %1873 = vst [vmem:[%s2222_s15 + $0xd0] sm:$0xff] %v1820_v19   ;;  %v592_v31 = vadd.f32 %v2207_v40, %v591_v26  ;;  %v627_v32 = vadd.f32 %v2207_v40, %v626_v27 }
 0x117   : > { %v862_v33 = vadd.f32 %v807_v20, %v695_v25  ;;  %v848_v50 = vadd.f32 %v1661_v37, %v660_v36 }
 0x118   : > { %v821_v34 = vadd.f32 %v1606_v23, %v592_v31  ;;  %v835_v35 = vadd.f32 %v1634_v24, %v627_v32 }
 0x119   : > { %v917_v38 = vmax.f32 %v862_v33, 0.0  ;;  %v903_v53 = vmax.f32 %v848_v50, 0.0 }
 0x11a   : > { %v876_v42 = vmax.f32 %v821_v34, 0.0  ;;  %v890_v43 = vmax.f32 %v835_v35, 0.0 }
 0x11b   : > { %v972_v44 = vpack.c.bf16 %v917_v38, %v917_v38 }
 0x11c   : > { %v1720_v46 = vpack.c.bf16 %v876_v42, %v875_v39  ;;  %v1755_v47 = vpack.c.bf16 %v890_v43, %v889_v41  ;;  %v661_v48 = vpop.f32.mrf.mxu2  ;;  %v696_v49 = vpop.f32.mrf.mxu3 }
 0x11d   : > { %1027 = vst [vmem:[%s2222_s15 + $0xd8] sm:$0xf] %v972_v44  ;;  %v662_v51 = vadd.f32 %v2207_v40, %v661_v48 }
 0x11e   : > { %1853 = vst [vmem:[%s2222_s15 + $0x30] sm:$0xff] %v1720_v46  }
 0x11f   : > { %1860 = vst [vmem:[%s2222_s15 + $0x68] sm:$0xff] %v1755_v47   ;;  %v849_v52 = vadd.f32 %v1662_v45, %v662_v51 }
 0x121   : > { %v904_v54 = vmax.f32 %v849_v52, 0.0  ;;  %1034 = sbr.rel (!%p2126_p4) target bundleno = 358 (0x166), region = 40 }
 0x123   : > { %v1790_v55 = vpack.c.bf16 %v904_v54, %v903_v53 }
 0x125   : > { %1867 = vst [vmem:[%s2222_s15 + $0xa0] sm:$0xff] %v1790_v55  }
 0x126   : > { %s2480_s8 = smov (!%p1037_p8, %s1036_s8), 55 }
 0x127   : > { %s1526_s13 = sshll.u32 %s2480_s8, 2 }
 0x128   : > { %p1529_p9 = scmp.eq.s32.totalorder %s1526_s13, 0 }
 0x129   : > { %s2336_s14 = sshrl.u32 (!%p1529_p9), %s2480_s8, 5 }
 0x12a   : > { %1045 = sbr.rel (%p1529_p9) target bundleno = 358 (0x166), region = 44  ;;  %p1530_p10 = scmp.le.s32.totalorder (!%p1529_p9), %s2336_s14, 0 }
 0x12f   : > { %1330 = sbr.rel (%p1530_p10) target bundleno = 341 (0x155), region = 119  ;;  %s2471_s18 = smov (!%p1530_p10), %s2330_s12 }
 0x130   : > { %s2472_s23 = smov (!%p1530_p10), %s2222_s15  ;;  %s2345_s6 = smov (!%p1530_p10), 0  }
 0x131   : > { %s2347_s17 = smov (!%p1530_p10), 0  }
 0x134 LB: >> { %v1062_v40 = vld [vmem:[%s2050_s23] sm:$0xf]  ;;  %v1064_v56 = vld [vmem:[%s2050_s23 + $0x4] sm:$0xf]  ;;  %v1066_v57 = vld [vmem:[%s2050_s23 + $0x8] sm:$0xf]  ;;  %s2058_s17 = sphi %s2347_s17, %s1056_s17   ;;  %s2054_s6 = sphi %s2345_s6, %s2475_s6   ;;  %s2050_s23 = sphi %s2472_s23, %s2474_s23   ;;  %s2046_s18 = sphi %s2471_s18, %s2473_s18  }
 0x135   : >> { %1063 = vst [vmem:[%s2046_s18] sm:$0xf] %v1062_v40  ;;  %v1068_v58 = vld [vmem:[%s2050_s23 + $0xc] sm:$0xf]  ;;  %v1070_v59 = vld [vmem:[%s2050_s23 + $0x10] sm:$0xf]  ;;  %s1126_s20 = sadd.s32 1, %s2054_s6 }
 0x136   : >> { %1065 = vst [vmem:[%s2046_s18 + $0x4] sm:$0xf] %v1064_v56  ;;  %v1072_v60 = vld [vmem:[%s2050_s23 + $0x14] sm:$0xf]  ;;  %v1074_v61 = vld [vmem:[%s2050_s23 + $0x18] sm:$0xf]  ;;  %p1127_p11 = scmp.ge.s32.totalorder %s1126_s20, %s2336_s14 }
 0x137   : >> { %1067 = vst [vmem:[%s2046_s18 + $0x8] sm:$0xf] %v1066_v57  ;;  %v1076_v62 = vld [vmem:[%s2050_s23 + $0x1c] sm:$0xf]  ;;  %v1078_v63 = vld [vmem:[%s2050_s23 + $0x20] sm:$0xf] }
 0x138   : >> { %1069 = vst [vmem:[%s2046_s18 + $0xc] sm:$0xf] %v1068_v58  ;;  %v1080_v0 = vld [vmem:[%s2050_s23 + $0x24] sm:$0xf]  ;;  %v1082_v1 = vld [vmem:[%s2050_s23 + $0x28] sm:$0xf] }
 0x139   : >> { %1071 = vst [vmem:[%s2046_s18 + $0x10] sm:$0xf] %v1070_v59  ;;  %v1084_v2 = vld [vmem:[%s2050_s23 + $0x2c] sm:$0xf]  ;;  %v1086_v3 = vld [vmem:[%s2050_s23 + $0x30] sm:$0xf] }
 0x13a   : >> { %1073 = vst [vmem:[%s2046_s18 + $0x14] sm:$0xf] %v1072_v60  ;;  %v1088_v4 = vld [vmem:[%s2050_s23 + $0x34] sm:$0xf]  ;;  %v1090_v5 = vld [vmem:[%s2050_s23 + $0x38] sm:$0xf] }
 0x13b   : >> { %1075 = vst [vmem:[%s2046_s18 + $0x18] sm:$0xf] %v1074_v61  ;;  %v1092_v6 = vld [vmem:[%s2050_s23 + $0x3c] sm:$0xf]  ;;  %v1094_v7 = vld [vmem:[%s2050_s23 + $0x40] sm:$0xf] }
 0x13c   : >> { %1077 = vst [vmem:[%s2046_s18 + $0x1c] sm:$0xf] %v1076_v62  ;;  %v1096_v8 = vld [vmem:[%s2050_s23 + $0x44] sm:$0xf]  ;;  %s2482_s20 = smov (%p1127_p11, %s1126_s20), 0  ;;  %s1056_s17 = sadd.s32 1, %s2058_s17  }
 0x13d   : >> { %1079 = vst [vmem:[%s2046_s18 + $0x20] sm:$0xf] %v1078_v63  ;;  %v1098_v9 = vld [vmem:[%s2050_s23 + $0x48] sm:$0xf]  ;;  %v1100_v10 = vld [vmem:[%s2050_s23 + $0x4c] sm:$0xf]  ;;  %p1055_p12 = scmp.ge.s32.totalorder %s1056_s17, %s2336_s14  ;;  %s2475_s6 = smov %s2482_s20 }
 0x13e   : >> { %1081 = vst [vmem:[%s2046_s18 + $0x24] sm:$0xf] %v1080_v0  ;;  %s1531_s21 = sshll.u32 %s2482_s20, 7  ;;  %v1102_v11 = vld [vmem:[%s2050_s23 + $0x50] sm:$0xf] }
 0x13f   : >> { %1083 = vst [vmem:[%s2046_s18 + $0x28] sm:$0xf] %v1082_v1  ;;  %s2406_s24 = scalar_lea.vmem %s2222_s15, %s1531_s21 [#allocation2]   ;;  %s1132_s25 = scalar_lea.vmem %s2330_s12, %s1531_s21   ;;  %v1104_v12 = vld [vmem:[%s2050_s23 + $0x54] sm:$0xf]  ;;  %v1106_v13 = vld [vmem:[%s2050_s23 + $0x58] sm:$0xf] }
 0x140   : >> { %1085 = vst [vmem:[%s2046_s18 + $0x2c] sm:$0xf] %v1084_v2  ;;  %v1108_v14 = vld [vmem:[%s2050_s23 + $0x5c] sm:$0xf]  ;;  %v1110_v15 = vld [vmem:[%s2050_s23 + $0x60] sm:$0xf] }
 0x141   : >> { %1087 = vst [vmem:[%s2046_s18 + $0x30] sm:$0xf] %v1086_v3  ;;  %v1112_v16 = vld [vmem:[%s2050_s23 + $0x64] sm:$0xf]  ;;  %v1114_v17 = vld [vmem:[%s2050_s23 + $0x68] sm:$0xf] }
 0x142   : >> { %1089 = vst [vmem:[%s2046_s18 + $0x34] sm:$0xf] %v1088_v4  ;;  %v1116_v18 = vld [vmem:[%s2050_s23 + $0x6c] sm:$0xf]  ;;  %v1118_v19 = vld [vmem:[%s2050_s23 + $0x70] sm:$0xf] }
 0x143   : >> { %1091 = vst [vmem:[%s2046_s18 + $0x38] sm:$0xf] %v1090_v5  ;;  %v1120_v20 = vld [vmem:[%s2050_s23 + $0x74] sm:$0xf]  ;;  %v1122_v21 = vld [vmem:[%s2050_s23 + $0x78] sm:$0xf] }
 0x144   : >> { %1093 = vst [vmem:[%s2046_s18 + $0x3c] sm:$0xf] %v1092_v6  ;;  %v1124_v22 = vld [vmem:[%s2050_s23 + $0x7c] sm:$0xf]  ;;  %s2474_s23 = smov %s2406_s24 }
 0x145   : >> { %1095 = vst [vmem:[%s2046_s18 + $0x40] sm:$0xf] %v1094_v7 }
 0x146   : >> { %1097 = vst [vmem:[%s2046_s18 + $0x44] sm:$0xf] %v1096_v8 }
 0x147   : >> { %1099 = vst [vmem:[%s2046_s18 + $0x48] sm:$0xf] %v1098_v9 }
 0x148   : >> { %1101 = vst [vmem:[%s2046_s18 + $0x4c] sm:$0xf] %v1100_v10 }
 0x149   : >> { %1103 = vst [vmem:[%s2046_s18 + $0x50] sm:$0xf] %v1102_v11 }
 0x14a   : >> { %1105 = vst [vmem:[%s2046_s18 + $0x54] sm:$0xf] %v1104_v12 }
 0x14b   : >> { %1107 = vst [vmem:[%s2046_s18 + $0x58] sm:$0xf] %v1106_v13 }
 0x14c   : >> { %1109 = vst [vmem:[%s2046_s18 + $0x5c] sm:$0xf] %v1108_v14 }
 0x14d   : >> { %1111 = vst [vmem:[%s2046_s18 + $0x60] sm:$0xf] %v1110_v15 }
 0x14e   : >> { %1113 = vst [vmem:[%s2046_s18 + $0x64] sm:$0xf] %v1112_v16 }
 0x14f   : >> { %1115 = vst [vmem:[%s2046_s18 + $0x68] sm:$0xf] %v1114_v17 }
 0x150   : >> { %1117 = vst [vmem:[%s2046_s18 + $0x6c] sm:$0xf] %v1116_v18  ;;  %1058 = sbr.rel (!%p1055_p12) target bundleno = 308 (0x134), region = 125 }
 0x151   : >> { %1119 = vst [vmem:[%s2046_s18 + $0x70] sm:$0xf] %v1118_v19 }
 0x152   : >> { %1121 = vst [vmem:[%s2046_s18 + $0x74] sm:$0xf] %v1120_v20 }
 0x153   : >> { %1123 = vst [vmem:[%s2046_s18 + $0x78] sm:$0xf] %v1122_v21 }
 0x154   : >> { %1125 = vst [vmem:[%s2046_s18 + $0x7c] sm:$0xf] %v1124_v22  ;;  %s2473_s18 = smov %s1132_s25 }
 0x155 PF: > { %s2447_s26 = sand.u32 31, %s2480_s8   ;;  %s1577_s27 = sshll.u32 %s2336_s14, 7 }
 0x156   : > { %s1137_s28 = scalar_lea.vmem %s2222_s15, %s1577_s27 [#allocation2]   ;;  %s1139_s29 = scalar_lea.vmem %s2330_s12, %s1577_s27  }
 0x157   : > { %p1536_p13 = scmp.le.s32.totalorder %s2447_s26, 0 }
 0x158   : > { %s2060_s30 = smov (!%p1536_p13), %s1139_s29   ;;  %s2064_s5 = smov (!%p1536_p13), %s1137_s28  }
 0x159   : > { %1344 = sbr.rel (%p1536_p13) target bundleno = 358 (0x166), region = 130  ;;  %s2068_s7 = smov (!%p1536_p13), 0  }
 0x15a   : > { %s2072_s9 = smov (!%p1536_p13), 0  }
 0x15e LB: >> { %v1149_v23 = vld [vmem:[%s2066_s5] sm:$0xf]  ;;  %s1151_s8 = sadd.s32 1, %s2070_s7  ;;  %s1143_s9 = sadd.s32 1, %s2074_s9   ;;  %s2074_s9 = sphi %s2072_s9, %s1143_s9   ;;  %s2070_s7 = sphi %s2068_s7, %s2069_s7   ;;  %s2066_s5 = sphi %s2064_s5, %s1156_s5   ;;  %s2062_s30 = sphi %s2060_s30, %s1157_s30  }
 0x15f   : >> { %1150 = vst [vmem:[%s2062_s30] sm:$0xf] %v1149_v23  ;;  %p1152_p0 = scmp.ge.s32.totalorder %s1151_s8, %s2447_s26  ;;  %p1142_p1 = scmp.ge.s32.totalorder %s1143_s9, %s2447_s26 }
 0x161   : >> { %s2484_s8 = smov (%p1152_p0, %s1151_s8), 0  ;;  %1145 = sbr.rel (!%p1142_p1) target bundleno = 350 (0x15e), region = 136 }
 0x162   : >> { %s1537_s15 = sshll.u32 %s2484_s8, 2  ;;  %s2069_s7 = smov %s2484_s8  }
 0x163   : >> { %s1156_s5 = scalar_lea.vmem %s1137_s28, %s1537_s15 [#allocation2]   ;;  %s1157_s30 = scalar_lea.vmem %s1139_s29, %s1537_s15  }
 0x166 PF: > { %p11_p2 = scmp.ge.s32.totalorder %s2116_s19, 7   ;;  %s2476_s15 = smov %s2038_s16 }
 0x167   : > { %s2477_s16 = smov %s2124_s22  ;;  %s2478_s17 = smov %s2116_s19 }
 0x168   :  { %13 = sbr.rel (!%p11_p2) target bundleno = 2 (0x2), region = 147 }

// kernel: resnet_forward.25
= control target key start
LH: loop header
LB: loop body
LE: loop exit
PB: predicated region body
PF: predicated region fallthrough
CT: control target
= control target key end

     0   :  { %s1419_s12 = smov 0   ;;  %s1421_s13 = smov 0   ;;  %s1711_s0 = inlined_call_operand.vmem [shape: bf16[578,36], index: 0, kind: input, shape index: {}]   ;;  %s1712_s1 = inlined_call_operand.vmem [shape: bf16[36,128], index: 1, kind: input, shape index: {}]   ;;  %s1713_s2 = inlined_call_operand.vmem [shape: f32[1,128], index: 2, kind: input, shape index: {}]   ;;  %s1714_s3 = inlined_call_operand.vmem [shape: bf16[578,128], index: 3, kind: output, shape index: {}]  }
   0x1   :  { %s1423_s14 = smov 0  }
   0x2 LB: > { %s1432_s15 = sadd.s32 4294967295, %s1365_s14   ;;  %s1434_s16 = sadd.s32 1, %s1365_s14   ;;  %s1365_s14 = sphi %s1423_s14, %s1723_s14   ;;  %s1361_s13 = sphi %s1421_s13, %s1722_s13   ;;  %s1357_s12 = sphi %s1419_s12, %s1721_s12  }
   0x3   : > { %s85_s17 = ssub.s32 %s1365_s14, %s1434_s16  ;;  %s88_s18 = sadd.s32 1, %s1361_s13 }
   0x4   : > { %p86_p0 = scmp.eq.s32.totalorder %s85_s17, 0  ;;  %p98_p1 = scmp.ne.s32.totalorder %s1361_s13, %s1357_s12 }
   0x5   : > { %p99_p2 = scmp.eq.s32.totalorder %s1432_s15, 1  ;;  %p966_p3 = scmp.ge.s32.totalorder %s1365_s14, 1 }
   0x6   : > { %s1442_s19 = scalar_select %p86_p0, %s1361_s13, %s88_s18  }
   0x7   : > { %p1444_p4 = por %p99_p2, %p98_p1  ;;  %p146_p5 = scmp.lt.s32.totalorder %s1365_s14, 3 }
   0x9   : > { %p147_p6 = pnand %p966_p3, %p146_p5 }
   0xa   : > { %s1452_s23 = smul.u32 (!%p147_p6), 37, %s1432_s15  ;;  %s170_s8 = sand.u32 (!%p147_p6), 1, %s1357_s12  }
   0xb   : > { %150 = sbr.rel (%p147_p6) target bundleno = 309 (0x135), region = 32 }
   0xc   : > { %p178_p7 = scmp.lt.s32.totalorder (!%p147_p6), %s1452_s23, 72  ;;  %s1221_s9 = smul.u32 (!%p147_p6), 148, %s170_s8 }
   0xe   : > { %s1517_s10 = scalar_lea.vmem (!%p147_p6), [#allocation2], %s1221_s9  }
  0x10   : > { %v234_v0 = vld [vmem:[%s1712_s1 + $0x10] sm:$0x3]  ;;  %vm405_vm0 = vcmask 1041408   ;;  %s179_s24 = scalar_select %p178_p7, %s1452_s23, 72  ;;  %v1101_v4 = vld [vmem:[%s1712_s1 + $0x8] sm:$0xff]  ;;  %v1100_v5 = vld [vmem:[%s1712_s1] sm:$0xff] }
  0x11   : > { %v341_v1 = vunpack.c.l.b16 %v234_v0  ;;  %vm347_vm1 = vcmask 293888   ;;  %v1508_v29 = vld [vmem:[%s1713_s2] ss:$0 sm:$0xff]  ;;  %s631_s11 = ssub.s32 (%p1444_p4), 73, %s1452_s23  ;;  %s1102_s12 = smul.u32 (%p1444_p4), 148, %s1432_s15 }
  0x12   : > { %s967_s27 = sshll.u32 %s179_s24, 2  ;;  %p632_p8 = scmp.lt.s32.totalorder (%p1444_p4), %s631_s11, 37 }
  0x13   : > { %v344_v2 = vpack.c.b16 %v341_v1, %v341_v1  ;;  %s1465_s5 = scalar_lea.vmem %s1711_s0, %s967_s27  ;;  %s1576_s18 = scalar_lea.vmem (%p1444_p4), %s1714_s3, %s1102_s12  }
  0x14   : > { %v1082_v6 = vld [vmem:[%s1465_s5] sm:$0xff]  ;;  %v1087_v7 = vld [vmem:[%s1465_s5 + $0x28] sm:$0xff]  ;;  %v1092_v8 = vld [vmem:[%s1465_s5 + $0x50] sm:$0xff] }
  0x15   : > { %v407_v3 = vsel %vm405_vm0, %v344_v2, 0  ;;  %v1097_v9 = vld [vmem:[%s1465_s5 + $0x78] sm:$0xff]  ;;  %v1083_v10 = vld [vmem:[%s1465_s5 + $0x8] sm:$0xff]  ;;  %v1088_v11 = vld [vmem:[%s1465_s5 + $0x30] sm:$0xff] }
  0x16   : > { %414 = vmatpush.bf16.msra.mxu0 %v407_v3  ;;  %1212 = vmatpush.bf16.msra.mxu1 %v407_v3  ;;  %v1093_v12 = vld [vmem:[%s1465_s5 + $0x58] sm:$0xff]  ;;  %v1098_v13 = vld [vmem:[%s1465_s5 + $0x80] sm:$0xff]  ;;  %v1084_v14 = vld [vmem:[%s1465_s5 + $0x10] sm:$0xff] }
  0x17   : > { %1213 = vmatpush.bf16.msra.mxu2 %v407_v3  ;;  %1214 = vmatpush.bf16.msra.mxu3 %v407_v3  ;;  %v1089_v15 = vld [vmem:[%s1465_s5 + $0x38] sm:$0xff]  ;;  %v1094_v16 = vld [vmem:[%s1465_s5 + $0x60] sm:$0xff]  ;;  %v1099_v17 = vld [vmem:[%s1465_s5 + $0x88] sm:$0xff] }
  0x18   : > { %v229_v18 = vld [vmem:[%s1465_s5 + $0x90] sm:$0xf]  ;;  %v1085_v20 = vld [vmem:[%s1465_s5 + $0x18] sm:$0xff]  ;;  %v1090_v21 = vld [vmem:[%s1465_s5 + $0x40] sm:$0xff] }
  0x19   : > { %v312_v19 = vunpack.c.l.b16 %v229_v18  ;;  %v1095_v22 = vld [vmem:[%s1465_s5 + $0x68] sm:$0xff]  ;;  %v1086_v24 = vld [vmem:[%s1465_s5 + $0x20] sm:$0xff]  ;;  %v1096_v26 = vld [vmem:[%s1465_s5 + $0x70] sm:$0xff] }
  0x1a   : > { %415 = vmatpush.bf16.msra.mxu0 %v1101_v4  ;;  %1215 = vmatpush.bf16.msra.mxu1 %v1101_v4  ;;  %v1091_v25 = vld [vmem:[%s1465_s5 + $0x48] sm:$0xff] }
  0x1b   : > { %1216 = vmatpush.bf16.msra.mxu2 %v1101_v4  ;;  %1217 = vmatpush.bf16.msra.mxu3 %v1101_v4  ;;  %v331_v23 = vpack.c.b16 %v312_v19, %v312_v19 }
  0x1e   : > { %416 = vmatpush.bf16.msra.mxu0 %v1100_v5  ;;  %1218 = vmatpush.bf16.msra.mxu1 %v1100_v5 }
  0x1f   : > { %1219 = vmatpush.bf16.msra.mxu2 %v1100_v5  ;;  %1220 = vmatpush.bf16.msra.mxu3 %v1100_v5 }
  0x21   : > { %1048 = vmatmul.msk.bf16.vlgmr.msra.gmra.mxu0 %vm347_vm1, %v1082_v6  ;;  %1053 = vmatmul.msk.bf16.vlgmr.msra.gmra.mxu1 %vm347_vm1, %v1087_v7 }
  0x22   : > { %1058 = vmatmul.msk.bf16.vlgmr.msra.gmra.mxu2 %vm347_vm1, %v1092_v8  ;;  %1063 = vmatmul.msk.bf16.vlgmr.msra.gmra.mxu3 %vm347_vm1, %v1097_v9 }
  0x31   : > { %1049 = vmatmul.msk.bf16.gmra.mxu0 %vm347_vm1, %v1083_v10  ;;  %1054 = vmatmul.msk.bf16.gmra.mxu1 %vm347_vm1, %v1088_v11 }
  0x32   : > { %1059 = vmatmul.msk.bf16.gmra.mxu2 %vm347_vm1, %v1093_v12  ;;  %1064 = vmatmul.msk.bf16.gmra.mxu3 %vm347_vm1, %v1098_v13 }
  0x41   : > { %1050 = vmatmul.msk.bf16.gmra.mxu0 %vm347_vm1, %v1084_v14  ;;  %1055 = vmatmul.msk.bf16.gmra.mxu1 %vm347_vm1, %v1089_v15 }
  0x42   : > { %1060 = vmatmul.msk.bf16.gmra.mxu2 %vm347_vm1, %v1094_v16  ;;  %1065 = vmatmul.msk.bf16.gmra.mxu3 %vm347_vm1, %v1099_v17 }
  0x51   : > { %1051 = vmatmul.msk.bf16.gmra.mxu0 %vm347_vm1, %v1085_v20  ;;  %1056 = vmatmul.msk.bf16.gmra.mxu1 %vm347_vm1, %v1090_v21 }
  0x52   : > { %1061 = vmatmul.msk.bf16.gmra.mxu2 %vm347_vm1, %v1095_v22  ;;  %1066 = vmatmul.msk.bf16.gmra.mxu3 %vm347_vm1, %v331_v23 }
  0x61   : > { %1052 = vmatmul.msk.bf16.gmra.mxu0 %vm347_vm1, %v1086_v24  ;;  %1057 = vmatmul.msk.bf16.gmra.mxu1 %vm347_vm1, %v1091_v25 }
  0x62   : > { %1062 = vmatmul.msk.bf16.gmra.mxu2 %vm347_vm1, %v1096_v26 }
  0x9e   : > { %v418_v27 = vpop.f32.mrf.mxu0  ;;  %v443_v28 = vpop.f32.mrf.mxu1 }
  0x9f   : > { %v419_v30 = vadd.f32 %v1508_v29, %v418_v27  ;;  %v444_v31 = vadd.f32 %v1508_v29, %v443_v28 }
  0xa1   : > { %v512_v38 = vmax.f32 %v419_v30, 0.0  ;;  %v522_v39 = vmax.f32 %v444_v31, 0.0 }
  0xa5   : > { %v468_v32 = vpop.f32.mrf.mxu2  ;;  %v493_v33 = vpop.f32.mrf.mxu3 }
  0xa6   : > { %v420_v34 = vpop.f32.mrf.mxu0  ;;  %v445_v35 = vpop.f32.mrf.mxu1  ;;  %v494_v42 = vadd.f32 %v1508_v29, %v493_v33  ;;  %v469_v45 = vadd.f32 %v1508_v29, %v468_v32 }
  0xa7   : > { %v421_v36 = vadd.f32 %v1508_v29, %v420_v34  ;;  %v446_v37 = vadd.f32 %v1508_v29, %v445_v35 }
  0xa8   : > { %v542_v51 = vmax.f32 %v494_v42, 0.0  ;;  %v532_v53 = vmax.f32 %v469_v45, 0.0 }
  0xa9   : > { %v513_v40 = vmax.f32 %v421_v36, 0.0  ;;  %v523_v41 = vmax.f32 %v446_v37, 0.0 }
  0xab   : > { %v1108_v43 = vpack.c.bf16 %v513_v40, %v512_v38  ;;  %v1133_v44 = vpack.c.bf16 %v523_v41, %v522_v39 }
  0xad   : > { %1109 = vst [vmem:[%s1517_s10] sm:$0xff] %v1108_v43   ;;  %v470_v46 = vpop.f32.mrf.mxu2  ;;  %v495_v47 = vpop.f32.mrf.mxu3 }
  0xae   : > { %1199 = vst [vmem:[%s1517_s10 + $0x28] sm:$0xff] %v1133_v44   ;;  %v471_v48 = vadd.f32 %v1508_v29, %v470_v46  ;;  %v423_v49 = vpop.f32.mrf.mxu0  ;;  %v448_v50 = vpop.f32.mrf.mxu1  ;;  %v496_v52 = vadd.f32 %v1508_v29, %v495_v47 }
  0xaf   : > { %v424_v58 = vadd.f32 %v1508_v29, %v423_v49  ;;  %v449_v59 = vadd.f32 %v1508_v29, %v448_v50 }
  0xb0   : > { %v533_v54 = vmax.f32 %v471_v48, 0.0  ;;  %v543_v55 = vmax.f32 %v496_v52, 0.0 }
  0xb1   : > { %v514_v2 = vmax.f32 %v424_v58, 0.0  ;;  %v524_v3 = vmax.f32 %v449_v59, 0.0 }
  0xb2   : > { %v1158_v56 = vpack.c.bf16 %v533_v54, %v532_v53  ;;  %v1183_v57 = vpack.c.bf16 %v543_v55, %v542_v51 }
  0xb4   : > { %1204 = vst [vmem:[%s1517_s10 + $0x50] sm:$0xff] %v1158_v56  }
  0xb5   : > { %v473_v60 = vpop.f32.mrf.mxu2  ;;  %1209 = vst [vmem:[%s1517_s10 + $0x78] sm:$0xff] %v1183_v57   ;;  %v498_v61 = vpop.f32.mrf.mxu3 }
  0xb6   : > { %v425_v62 = vpop.f32.mrf.mxu0  ;;  %v450_v63 = vpop.f32.mrf.mxu1  ;;  %v499_v6 = vadd.f32 %v1508_v29, %v498_v61  ;;  %v474_v9 = vadd.f32 %v1508_v29, %v473_v60 }
  0xb7   : > { %v426_v0 = vadd.f32 %v1508_v29, %v425_v62  ;;  %v451_v1 = vadd.f32 %v1508_v29, %v450_v63 }
  0xb8   : > { %v544_v15 = vmax.f32 %v499_v6, 0.0  ;;  %v534_v17 = vmax.f32 %v474_v9, 0.0 }
  0xb9   : > { %v515_v4 = vmax.f32 %v426_v0, 0.0  ;;  %v525_v5 = vmax.f32 %v451_v1, 0.0 }
  0xbb   : > { %v1113_v7 = vpack.c.bf16 %v515_v4, %v514_v2  ;;  %v1138_v8 = vpack.c.bf16 %v525_v5, %v524_v3 }
  0xbd   : > { %1195 = vst [vmem:[%s1517_s10 + $0x8] sm:$0xff] %v1113_v7   ;;  %v475_v10 = vpop.f32.mrf.mxu2  ;;  %v500_v11 = vpop.f32.mrf.mxu3 }
  0xbe   : > { %1200 = vst [vmem:[%s1517_s10 + $0x30] sm:$0xff] %v1138_v8   ;;  %v476_v12 = vadd.f32 %v1508_v29, %v475_v10  ;;  %v428_v13 = vpop.f32.mrf.mxu0  ;;  %v453_v14 = vpop.f32.mrf.mxu1  ;;  %v501_v16 = vadd.f32 %v1508_v29, %v500_v11 }
  0xbf   : > { %v429_v22 = vadd.f32 %v1508_v29, %v428_v13  ;;  %v454_v23 = vadd.f32 %v1508_v29, %v453_v14 }
  0xc0   : > { %v535_v18 = vmax.f32 %v476_v12, 0.0  ;;  %v545_v19 = vmax.f32 %v501_v16, 0.0 }
  0xc1   : > { %v516_v31 = vmax.f32 %v429_v22, 0.0  ;;  %v526_v32 = vmax.f32 %v454_v23, 0.0 }
  0xc2   : > { %v1163_v20 = vpack.c.bf16 %v535_v18, %v534_v17  ;;  %v1188_v21 = vpack.c.bf16 %v545_v19, %v544_v15 }
  0xc4   : > { %1205 = vst [vmem:[%s1517_s10 + $0x58] sm:$0xff] %v1163_v20  }
  0xc5   : > { %v478_v24 = vpop.f32.mrf.mxu2  ;;  %1210 = vst [vmem:[%s1517_s10 + $0x80] sm:$0xff] %v1188_v21   ;;  %v503_v25 = vpop.f32.mrf.mxu3 }
  0xc6   : > { %v430_v26 = vpop.f32.mrf.mxu0  ;;  %v455_v27 = vpop.f32.mrf.mxu1  ;;  %v504_v35 = vadd.f32 %v1508_v29, %v503_v25  ;;  %v479_v38 = vadd.f32 %v1508_v29, %v478_v24 }
  0xc7   : > { %v431_v28 = vadd.f32 %v1508_v29, %v430_v26  ;;  %v456_v30 = vadd.f32 %v1508_v29, %v455_v27 }
  0xc8   : > { %v546_v44 = vmax.f32 %v504_v35, 0.0  ;;  %v536_v46 = vmax.f32 %v479_v38, 0.0 }
  0xc9   : > { %v517_v33 = vmax.f32 %v431_v28, 0.0  ;;  %v527_v34 = vmax.f32 %v456_v30, 0.0 }
  0xcb   : > { %v1118_v36 = vpack.c.bf16 %v517_v33, %v516_v31  ;;  %v1143_v37 = vpack.c.bf16 %v527_v34, %v526_v32 }
  0xcd   : > { %1196 = vst [vmem:[%s1517_s10 + $0x10] sm:$0xff] %v1118_v36   ;;  %v480_v39 = vpop.f32.mrf.mxu2  ;;  %v505_v40 = vpop.f32.mrf.mxu3 }
  0xce   : > { %1201 = vst [vmem:[%s1517_s10 + $0x38] sm:$0xff] %v1143_v37   ;;  %v481_v41 = vadd.f32 %v1508_v29, %v480_v39  ;;  %v433_v42 = vpop.f32.mrf.mxu0  ;;  %v458_v43 = vpop.f32.mrf.mxu1  ;;  %v506_v45 = vadd.f32 %v1508_v29, %v505_v40 }
  0xcf   : > { %v434_v51 = vadd.f32 %v1508_v29, %v433_v42  ;;  %v459_v52 = vadd.f32 %v1508_v29, %v458_v43 }
  0xd0   : > { %v537_v47 = vmax.f32 %v481_v41, 0.0  ;;  %v547_v48 = vmax.f32 %v506_v45, 0.0 }
  0xd1   : > { %v518_v61 = vmax.f32 %v434_v51, 0.0  ;;  %v528_v62 = vmax.f32 %v459_v52, 0.0 }
  0xd2   : > { %v1168_v49 = vpack.c.bf16 %v537_v47, %v536_v46  ;;  %v1193_v50 = vpack.c.bf16 %v547_v48, %v546_v44 }
  0xd4   : > { %1206 = vst [vmem:[%s1517_s10 + $0x60] sm:$0xff] %v1168_v49  }
  0xd5   : > { %v483_v53 = vpop.f32.mrf.mxu2  ;;  %1211 = vst [vmem:[%s1517_s10 + $0x88] sm:$0xff] %v1193_v50   ;;  %v508_v54 = vpop.f32.mrf.mxu3 }
  0xd6   : > { %v435_v55 = vpop.f32.mrf.mxu0  ;;  %v460_v56 = vpop.f32.mrf.mxu1  ;;  %v509_v57 = vadd.f32 %v1508_v29, %v508_v54  ;;  %v484_v4 = vadd.f32 %v1508_v29, %v483_v53 }
  0xd7   : > { %v436_v58 = vadd.f32 %v1508_v29, %v435_v55  ;;  %v461_v59 = vadd.f32 %v1508_v29, %v460_v56 }
  0xd8   : > { %v548_v60 = vmax.f32 %v509_v57, 0.0  ;;  %v538_v10 = vmax.f32 %v484_v4, 0.0 }
  0xd9   : > { %v519_v63 = vmax.f32 %v436_v58, 0.0  ;;  %v529_v0 = vmax.f32 %v461_v59, 0.0 }
  0xda   : > { %v585_v1 = vpack.c.bf16 %v548_v60, %v548_v60 }
  0xdb   : > { %v1123_v2 = vpack.c.bf16 %v519_v63, %v518_v61  ;;  %v1148_v3 = vpack.c.bf16 %v529_v0, %v528_v62 }
  0xdc   : > { %622 = vst [vmem:[%s1517_s10 + $0x90] sm:$0xf] %v585_v1 }
  0xdd   : > { %1197 = vst [vmem:[%s1517_s10 + $0x18] sm:$0xff] %v1123_v2   ;;  %v485_v5 = vpop.f32.mrf.mxu2  ;;  %v510_v6 = vpop.f32.mrf.mxu3 }
  0xde   : > { %1202 = vst [vmem:[%s1517_s10 + $0x40] sm:$0xff] %v1148_v3   ;;  %v486_v7 = vadd.f32 %v1508_v29, %v485_v5  ;;  %v438_v8 = vpop.f32.mrf.mxu0  ;;  %v463_v9 = vpop.f32.mrf.mxu1 }
  0xdf   : > { %v439_v13 = vadd.f32 %v1508_v29, %v438_v8  ;;  %v464_v14 = vadd.f32 %v1508_v29, %v463_v9 }
  0xe0   : > { %v539_v11 = vmax.f32 %v486_v7, 0.0 }
  0xe1   : > { %v520_v20 = vmax.f32 %v439_v13, 0.0  ;;  %v530_v21 = vmax.f32 %v464_v14, 0.0 }
  0xe2   : > { %v1173_v12 = vpack.c.bf16 %v539_v11, %v538_v10 }
  0xe4   : > { %1207 = vst [vmem:[%s1517_s10 + $0x68] sm:$0xff] %v1173_v12  }
  0xe5   : > { %v488_v15 = vpop.f32.mrf.mxu2 }
  0xe6   : > { %v440_v16 = vpop.f32.mrf.mxu0  ;;  %v465_v17 = vpop.f32.mrf.mxu1  ;;  %v489_v26 = vadd.f32 %v1508_v29, %v488_v15 }
  0xe7   : > { %v441_v18 = vadd.f32 %v1508_v29, %v440_v16  ;;  %v466_v19 = vadd.f32 %v1508_v29, %v465_v17 }
  0xe8   : > { %v540_v30 = vmax.f32 %v489_v26, 0.0 }
  0xe9   : > { %v521_v22 = vmax.f32 %v441_v18, 0.0  ;;  %v531_v23 = vmax.f32 %v466_v19, 0.0 }
  0xeb   : > { %v1128_v24 = vpack.c.bf16 %v521_v22, %v520_v20  ;;  %v1153_v25 = vpack.c.bf16 %v531_v23, %v530_v21 }
  0xed   : > { %1198 = vst [vmem:[%s1517_s10 + $0x20] sm:$0xff] %v1128_v24   ;;  %v490_v27 = vpop.f32.mrf.mxu2 }
  0xee   : > { %1203 = vst [vmem:[%s1517_s10 + $0x48] sm:$0xff] %v1153_v25   ;;  %v491_v28 = vadd.f32 %v1508_v29, %v490_v27 }
  0xf0   : > { %v541_v31 = vmax.f32 %v491_v28, 0.0  ;;  %629 = sbr.rel (!%p1444_p4) target bundleno = 309 (0x135), region = 36 }
  0xf2   : > { %v1178_v32 = vpack.c.bf16 %v541_v31, %v540_v30 }
  0xf4   : > { %1208 = vst [vmem:[%s1517_s10 + $0x70] sm:$0xff] %v1178_v32  }
  0xf5   : > { %s1725_s11 = smov (!%p632_p8, %s631_s11), 37 }
  0xf6   : > { %s1067_s21 = sshll.u32 %s1725_s11, 2 }
  0xf7   : > { %p1070_p9 = scmp.eq.s32.totalorder %s1067_s21, 0 }
  0xf8   : > { %s1582_s22 = sshrl.u32 (!%p1070_p9), %s1725_s11, 5 }
  0xf9   : > { %640 = sbr.rel (%p1070_p9) target bundleno = 309 (0x135), region = 40  ;;  %p1071_p10 = scmp.le.s32.totalorder (!%p1070_p9), %s1582_s22, 0 }
  0xfe   : > { %919 = sbr.rel (%p1071_p10) target bundleno = 292 (0x124), region = 112  ;;  %s1716_s15 = smov (!%p1071_p10), %s1576_s18 }
  0xff   : > { %s1717_s20 = smov (!%p1071_p10), %s1517_s10  ;;  %s1591_s23 = smov (!%p1071_p10), 0  }
 0x100   : > { %s1593_s24 = smov (!%p1071_p10), 0  }
 0x103 LB: >> { %v657_v29 = vld [vmem:[%s1373_s20] sm:$0xf]  ;;  %v659_v33 = vld [vmem:[%s1373_s20 + $0x4] sm:$0xf]  ;;  %v661_v34 = vld [vmem:[%s1373_s20 + $0x8] sm:$0xf]  ;;  %s1381_s24 = sphi %s1593_s24, %s651_s24   ;;  %s1377_s23 = sphi %s1591_s23, %s1720_s23   ;;  %s1373_s20 = sphi %s1717_s20, %s1719_s20   ;;  %s1369_s15 = sphi %s1716_s15, %s1718_s15  }
 0x104   : >> { %658 = vst [vmem:[%s1369_s15] sm:$0xf] %v657_v29  ;;  %v663_v35 = vld [vmem:[%s1373_s20 + $0xc] sm:$0xf]  ;;  %v665_v36 = vld [vmem:[%s1373_s20 + $0x10] sm:$0xf]  ;;  %s721_s25 = sadd.s32 1, %s1377_s23 }
 0x105   : >> { %660 = vst [vmem:[%s1369_s15 + $0x4] sm:$0xf] %v659_v33  ;;  %v667_v37 = vld [vmem:[%s1373_s20 + $0x14] sm:$0xf]  ;;  %v669_v38 = vld [vmem:[%s1373_s20 + $0x18] sm:$0xf]  ;;  %p722_p11 = scmp.ge.s32.totalorder %s721_s25, %s1582_s22 }
 0x106   : >> { %662 = vst [vmem:[%s1369_s15 + $0x8] sm:$0xf] %v661_v34  ;;  %v671_v39 = vld [vmem:[%s1373_s20 + $0x1c] sm:$0xf]  ;;  %v673_v40 = vld [vmem:[%s1373_s20 + $0x20] sm:$0xf] }
 0x107   : >> { %664 = vst [vmem:[%s1369_s15 + $0xc] sm:$0xf] %v663_v35  ;;  %v675_v41 = vld [vmem:[%s1373_s20 + $0x24] sm:$0xf]  ;;  %v677_v42 = vld [vmem:[%s1373_s20 + $0x28] sm:$0xf] }
 0x108   : >> { %666 = vst [vmem:[%s1369_s15 + $0x10] sm:$0xf] %v665_v36  ;;  %v679_v43 = vld [vmem:[%s1373_s20 + $0x2c] sm:$0xf]  ;;  %v681_v44 = vld [vmem:[%s1373_s20 + $0x30] sm:$0xf] }
 0x109   : >> { %668 = vst [vmem:[%s1369_s15 + $0x14] sm:$0xf] %v667_v37  ;;  %v683_v45 = vld [vmem:[%s1373_s20 + $0x34] sm:$0xf]  ;;  %v685_v46 = vld [vmem:[%s1373_s20 + $0x38] sm:$0xf] }
 0x10a   : >> { %670 = vst [vmem:[%s1369_s15 + $0x18] sm:$0xf] %v669_v38  ;;  %v687_v47 = vld [vmem:[%s1373_s20 + $0x3c] sm:$0xf]  ;;  %v689_v48 = vld [vmem:[%s1373_s20 + $0x40] sm:$0xf] }
 0x10b   : >> { %672 = vst [vmem:[%s1369_s15 + $0x1c] sm:$0xf] %v671_v39  ;;  %v691_v49 = vld [vmem:[%s1373_s20 + $0x44] sm:$0xf]  ;;  %s1727_s25 = smov (%p722_p11, %s721_s25), 0  ;;  %s651_s24 = sadd.s32 1, %s1381_s24  }
 0x10c   : >> { %674 = vst [vmem:[%s1369_s15 + $0x20] sm:$0xf] %v673_v40  ;;  %v693_v50 = vld [vmem:[%s1373_s20 + $0x48] sm:$0xf]  ;;  %v695_v51 = vld [vmem:[%s1373_s20 + $0x4c] sm:$0xf]  ;;  %p650_p12 = scmp.ge.s32.totalorder %s651_s24, %s1582_s22  ;;  %s1720_s23 = smov %s1727_s25 }
 0x10d   : >> { %676 = vst [vmem:[%s1369_s15 + $0x24] sm:$0xf] %v675_v41  ;;  %s1072_s26 = sshll.u32 %s1727_s25, 7  ;;  %v697_v52 = vld [vmem:[%s1373_s20 + $0x50] sm:$0xf] }
 0x10e   : >> { %678 = vst [vmem:[%s1369_s15 + $0x28] sm:$0xf] %v677_v42  ;;  %s1652_s27 = scalar_lea.vmem %s1517_s10, %s1072_s26 [#allocation2]   ;;  %s727_s28 = scalar_lea.vmem %s1576_s18, %s1072_s26   ;;  %v699_v53 = vld [vmem:[%s1373_s20 + $0x54] sm:$0xf]  ;;  %v701_v54 = vld [vmem:[%s1373_s20 + $0x58] sm:$0xf] }
 0x10f   : >> { %680 = vst [vmem:[%s1369_s15 + $0x2c] sm:$0xf] %v679_v43  ;;  %v703_v55 = vld [vmem:[%s1373_s20 + $0x5c] sm:$0xf]  ;;  %v705_v56 = vld [vmem:[%s1373_s20 + $0x60] sm:$0xf] }
 0x110   : >> { %682 = vst [vmem:[%s1369_s15 + $0x30] sm:$0xf] %v681_v44  ;;  %v707_v57 = vld [vmem:[%s1373_s20 + $0x64] sm:$0xf]  ;;  %v709_v58 = vld [vmem:[%s1373_s20 + $0x68] sm:$0xf] }
 0x111   : >> { %684 = vst [vmem:[%s1369_s15 + $0x34] sm:$0xf] %v683_v45  ;;  %v711_v59 = vld [vmem:[%s1373_s20 + $0x6c] sm:$0xf]  ;;  %v713_v60 = vld [vmem:[%s1373_s20 + $0x70] sm:$0xf] }
 0x112   : >> { %686 = vst [vmem:[%s1369_s15 + $0x38] sm:$0xf] %v685_v46  ;;  %v715_v61 = vld [vmem:[%s1373_s20 + $0x74] sm:$0xf]  ;;  %v717_v62 = vld [vmem:[%s1373_s20 + $0x78] sm:$0xf] }
 0x113   : >> { %688 = vst [vmem:[%s1369_s15 + $0x3c] sm:$0xf] %v687_v47  ;;  %v719_v63 = vld [vmem:[%s1373_s20 + $0x7c] sm:$0xf]  ;;  %s1719_s20 = smov %s1652_s27 }
 0x114   : >> { %690 = vst [vmem:[%s1369_s15 + $0x40] sm:$0xf] %v689_v48 }
 0x115   : >> { %692 = vst [vmem:[%s1369_s15 + $0x44] sm:$0xf] %v691_v49 }
 0x116   : >> { %694 = vst [vmem:[%s1369_s15 + $0x48] sm:$0xf] %v693_v50 }
 0x117   : >> { %696 = vst [vmem:[%s1369_s15 + $0x4c] sm:$0xf] %v695_v51 }
 0x118   : >> { %698 = vst [vmem:[%s1369_s15 + $0x50] sm:$0xf] %v697_v52 }
 0x119   : >> { %700 = vst [vmem:[%s1369_s15 + $0x54] sm:$0xf] %v699_v53 }
 0x11a   : >> { %702 = vst [vmem:[%s1369_s15 + $0x58] sm:$0xf] %v701_v54 }
 0x11b   : >> { %704 = vst [vmem:[%s1369_s15 + $0x5c] sm:$0xf] %v703_v55 }
 0x11c   : >> { %706 = vst [vmem:[%s1369_s15 + $0x60] sm:$0xf] %v705_v56 }
 0x11d   : >> { %708 = vst [vmem:[%s1369_s15 + $0x64] sm:$0xf] %v707_v57 }
 0x11e   : >> { %710 = vst [vmem:[%s1369_s15 + $0x68] sm:$0xf] %v709_v58 }
 0x11f   : >> { %712 = vst [vmem:[%s1369_s15 + $0x6c] sm:$0xf] %v711_v59  ;;  %653 = sbr.rel (!%p650_p12) target bundleno = 259 (0x103), region = 118 }
 0x120   : >> { %714 = vst [vmem:[%s1369_s15 + $0x70] sm:$0xf] %v713_v60 }
 0x121   : >> { %716 = vst [vmem:[%s1369_s15 + $0x74] sm:$0xf] %v715_v61 }
 0x122   : >> { %718 = vst [vmem:[%s1369_s15 + $0x78] sm:$0xf] %v717_v62 }
 0x123   : >> { %720 = vst [vmem:[%s1369_s15 + $0x7c] sm:$0xf] %v719_v63  ;;  %s1718_s15 = smov %s727_s28 }
 0x124 PF: > { %s1693_s29 = sand.u32 31, %s1725_s11   ;;  %s1103_s30 = sshll.u32 %s1582_s22, 7 }
 0x125   : > { %s732_s4 = scalar_lea.vmem %s1517_s10, %s1103_s30 [#allocation2]   ;;  %s734_s5 = scalar_lea.vmem %s1576_s18, %s1103_s30  }
 0x126   : > { %p1077_p13 = scmp.le.s32.totalorder %s1693_s29, 0 }
 0x127   : > { %s1383_s6 = smov (!%p1077_p13), %s734_s5   ;;  %s1387_s7 = smov (!%p1077_p13), %s732_s4  }
 0x128   : > { %933 = sbr.rel (%p1077_p13) target bundleno = 309 (0x135), region = 123  ;;  %s1391_s8 = smov (!%p1077_p13), 0  }
 0x129   : > { %s1395_s9 = smov (!%p1077_p13), 0  }
 0x12d LB: >> { %v744_v0 = vld [vmem:[%s1389_s7] sm:$0xf]  ;;  %s746_s11 = sadd.s32 1, %s1393_s8  ;;  %s738_s9 = sadd.s32 1, %s1397_s9   ;;  %s1397_s9 = sphi %s1395_s9, %s738_s9   ;;  %s1393_s8 = sphi %s1391_s8, %s1392_s8   ;;  %s1389_s7 = sphi %s1387_s7, %s751_s7   ;;  %s1385_s6 = sphi %s1383_s6, %s752_s6  }
 0x12e   : >> { %745 = vst [vmem:[%s1385_s6] sm:$0xf] %v744_v0  ;;  %p747_p0 = scmp.ge.s32.totalorder %s746_s11, %s1693_s29  ;;  %p737_p1 = scmp.ge.s32.totalorder %s738_s9, %s1693_s29 }
 0x130   : >> { %s1729_s11 = smov (%p747_p0, %s746_s11), 0  ;;  %740 = sbr.rel (!%p737_p1) target bundleno = 301 (0x12d), region = 129 }
 0x131   : >> { %s1078_s10 = sshll.u32 %s1729_s11, 2  ;;  %s1392_s8 = smov %s1729_s11  }
 0x132   : >> { %s751_s7 = scalar_lea.vmem %s732_s4, %s1078_s10 [#allocation2]   ;;  %s752_s6 = scalar_lea.vmem %s734_s5, %s1078_s10  }
 0x135 PF: > { %p10_p2 = scmp.ge.s32.totalorder %s1434_s16, 4   ;;  %s1721_s12 = smov %s1361_s13 }
 0x136   : > { %s1722_s13 = smov %s1442_s19  ;;  %s1723_s14 = smov %s1434_s16 }
 0x137   :  { %12 = sbr.rel (!%p10_p2) target bundleno = 2 (0x2), region = 140 }

// kernel: resnet_forward.26
= control target key start
LH: loop header
LB: loop body
LE: loop exit
PB: predicated region body
PF: predicated region fallthrough
CT: control target
= control target key end

     0   :  { %s2113_s21 = smov 0   ;;  %s2115_s22 = smov 0   ;;  %s2497_s0 = inlined_call_operand.vmem [shape: bf16[578,128], index: 0, kind: input, shape index: {}]   ;;  %s2498_s1 = inlined_call_operand.vmem [shape: bf16[128,128], index: 1, kind: input, shape index: {}]   ;;  %s2499_s2 = inlined_call_operand.vmem [shape: f32[1,128], index: 2, kind: input, shape index: {}]   ;;  %s2500_s3 = inlined_call_operand.vmem [shape: bf16[578,128], index: 3, kind: input, shape index: {}]   ;;  %s2501_s4 = inlined_call_operand.vmem [shape: bf16[128,128], index: 4, kind: input, shape index: {}]   ;;  %s2502_s5 = inlined_call_operand.vmem [shape: f32[1,128], index: 5, kind: input, shape index: {}]   ;;  %s2503_s6 = inlined_call_operand.vmem [shape: bf16[578,128], index: 6, kind: output, shape index: {}]  }
   0x1   :  { %s2117_s23 = smov 0  }
   0x2 LB: > { %s2126_s24 = sadd.s32 4294967295, %s2044_s23   ;;  %s2128_s25 = sadd.s32 1, %s2044_s23   ;;  %s2044_s23 = sphi %s2117_s23, %s2512_s23   ;;  %s2040_s22 = sphi %s2115_s22, %s2511_s22   ;;  %s2036_s21 = sphi %s2113_s21, %s2510_s21  }
   0x3   : > { %s156_s26 = ssub.s32 %s2044_s23, %s2128_s25  ;;  %s159_s27 = sadd.s32 1, %s2040_s22 }
   0x4   : > { %p157_p0 = scmp.eq.s32.totalorder %s156_s26, 0  ;;  %p169_p1 = scmp.ne.s32.totalorder %s2040_s22, %s2036_s21 }
   0x5   : > { %p170_p2 = scmp.eq.s32.totalorder %s2126_s24, 1  ;;  %p1495_p3 = scmp.ge.s32.totalorder %s2044_s23, 1 }
   0x6   : > { %s2136_s28 = scalar_select %p157_p0, %s2040_s22, %s159_s27  }
   0x7   : > { %p2138_p4 = por %p170_p2, %p169_p1  ;;  %p240_p5 = scmp.lt.s32.totalorder %s2044_s23, 3 }
   0x9   : > { %p241_p6 = pnand %p1495_p3, %p240_p5 }
   0xa   : > { %s2167_s26 = smul.u32 (!%p241_p6), 37, %s2126_s24  ;;  %s279_s16 = sand.u32 (!%p241_p6), 1, %s2036_s21  }
   0xb   : > { %244 = sbr.rel (%p241_p6) target bundleno = 400 (0x190), region = 44 }
   0xc   : > { %p287_p7 = scmp.lt.s32.totalorder (!%p241_p6), %s2167_s26, 72  ;;  %s1899_s17 = smul.u32 (!%p241_p6), 148, %s279_s16 }
  0x10   : > { %v1746_v0 = vld [vmem:[%s2498_s1 + $0x38] sm:$0xff]  ;;  %v1745_v2 = vld [vmem:[%s2498_s1 + $0x30] sm:$0xff]  ;;  %v1744_v4 = vld [vmem:[%s2498_s1 + $0x28] sm:$0xff]  ;;  %s288_s13 = scalar_select %p287_p7, %s2167_s26, 72 }
  0x11   : > { %v1772_v1 = vld [vmem:[%s2501_s4 + $0x38] sm:$0xff]  ;;  %532 = vmatpush.bf16.msra.mxu0 %v1746_v0  ;;  %1883 = vmatpush.bf16.msra.mxu2 %v1746_v0  ;;  %v1771_v3 = vld [vmem:[%s2501_s4 + $0x30] sm:$0xff]  ;;  %v1770_v5 = vld [vmem:[%s2501_s4 + $0x28] sm:$0xff]  ;;  %s1148_s21 = ssub.s32 (%p2138_p4), 73, %s2167_s26  ;;  %s1773_s19 = smul.u32 (%p2138_p4), 148, %s2126_s24 }
  0x12   : > { %848 = vmatpush.bf16.msra.mxu1 %v1772_v1  ;;  %1891 = vmatpush.bf16.msra.mxu3 %v1772_v1  ;;  %v1743_v6 = vld [vmem:[%s2498_s1 + $0x20] sm:$0xff]  ;;  %v1742_v8 = vld [vmem:[%s2498_s1 + $0x18] sm:$0xff]  ;;  %v1741_v10 = vld [vmem:[%s2498_s1 + $0x10] sm:$0xff]  ;;  %s1496_s18 = sshll.u32 %s288_s13, 2  ;;  %p1149_p8 = scmp.lt.s32.totalorder (%p2138_p4), %s1148_s21, 37 }
  0x13   : > { %v1769_v7 = vld [vmem:[%s2501_s4 + $0x20] sm:$0xff]  ;;  %v1768_v9 = vld [vmem:[%s2501_s4 + $0x18] sm:$0xff]  ;;  %v1767_v11 = vld [vmem:[%s2501_s4 + $0x10] sm:$0xff]  ;;  %s2195_s30 = scalar_lea.vmem %s2497_s0, %s1496_s18  ;;  %s2203_s11 = scalar_lea.vmem %s2500_s3, %s1496_s18 }
  0x14   : > { %v1740_v12 = vld [vmem:[%s2498_s1 + $0x8] sm:$0xff]  ;;  %v1739_v14 = vld [vmem:[%s2498_s1] sm:$0xff]  ;;  %v1757_v19 = vld [vmem:[%s2203_s11 + $0x50] sm:$0xff]  ;;  %s2262_s18 = scalar_lea.vmem [#allocation2], %s1899_s17   ;;  %s2362_s27 = scalar_lea.vmem (%p2138_p4), %s2503_s6, %s1773_s19  }
  0x15   : > { %533 = vmatpush.bf16.msra.mxu0 %v1745_v2  ;;  %1884 = vmatpush.bf16.msra.mxu2 %v1745_v2  ;;  %v1766_v13 = vld [vmem:[%s2501_s4 + $0x8] sm:$0xff]  ;;  %v1765_v15 = vld [vmem:[%s2501_s4] sm:$0xff]  ;;  %v1731_v21 = vld [vmem:[%s2195_s30 + $0x50] sm:$0xff] }
  0x16   : > { %849 = vmatpush.bf16.msra.mxu1 %v1771_v3  ;;  %1892 = vmatpush.bf16.msra.mxu3 %v1771_v3  ;;  %v1721_v16 = vld [vmem:[%s2195_s30] sm:$0xff]  ;;  %v1730_v17 = vld [vmem:[%s2195_s30 + $0x48] sm:$0xff]  ;;  %v1758_v23 = vld [vmem:[%s2203_s11 + $0x58] sm:$0xff] }
  0x17   : > { %v1747_v18 = vld [vmem:[%s2203_s11] sm:$0xff]  ;;  %v1722_v20 = vld [vmem:[%s2195_s30 + $0x8] sm:$0xff]  ;;  %v1723_v24 = vld [vmem:[%s2195_s30 + $0x10] sm:$0xff] }
  0x18   : > { %v1748_v22 = vld [vmem:[%s2203_s11 + $0x8] sm:$0xff]  ;;  %v1732_v25 = vld [vmem:[%s2195_s30 + $0x58] sm:$0xff]  ;;  %v1749_v26 = vld [vmem:[%s2203_s11 + $0x10] sm:$0xff] }
  0x19   : > { %534 = vmatpush.bf16.msra.mxu0 %v1744_v4  ;;  %1885 = vmatpush.bf16.msra.mxu2 %v1744_v4  ;;  %v1759_v27 = vld [vmem:[%s2203_s11 + $0x60] sm:$0xff]  ;;  %v1724_v28 = vld [vmem:[%s2195_s30 + $0x18] sm:$0xff]  ;;  %v1760_v31 = vld [vmem:[%s2203_s11 + $0x68] sm:$0xff] }
  0x1a   : > { %850 = vmatpush.bf16.msra.mxu1 %v1770_v5  ;;  %1893 = vmatpush.bf16.msra.mxu3 %v1770_v5  ;;  %v1733_v29 = vld [vmem:[%s2195_s30 + $0x60] sm:$0xff]  ;;  %v1750_v30 = vld [vmem:[%s2203_s11 + $0x18] sm:$0xff]  ;;  %v1734_v33 = vld [vmem:[%s2195_s30 + $0x68] sm:$0xff] }
  0x1b   : > { %v1725_v32 = vld [vmem:[%s2195_s30 + $0x20] sm:$0xff]  ;;  %v1761_v35 = vld [vmem:[%s2203_s11 + $0x70] sm:$0xff]  ;;  %v1726_v36 = vld [vmem:[%s2195_s30 + $0x28] sm:$0xff] }
  0x1c   : > { %v1751_v34 = vld [vmem:[%s2203_s11 + $0x20] sm:$0xff]  ;;  %v1735_v37 = vld [vmem:[%s2195_s30 + $0x70] sm:$0xff]  ;;  %v1752_v38 = vld [vmem:[%s2203_s11 + $0x28] sm:$0xff] }
  0x1d   : > { %535 = vmatpush.bf16.msra.mxu0 %v1743_v6  ;;  %1886 = vmatpush.bf16.msra.mxu2 %v1743_v6  ;;  %v1762_v39 = vld [vmem:[%s2203_s11 + $0x78] sm:$0xff]  ;;  %v1727_v40 = vld [vmem:[%s2195_s30 + $0x30] sm:$0xff]  ;;  %v1763_v43 = vld [vmem:[%s2203_s11 + $0x80] sm:$0xff] }
  0x1e   : > { %851 = vmatpush.bf16.msra.mxu1 %v1769_v7  ;;  %1894 = vmatpush.bf16.msra.mxu3 %v1769_v7  ;;  %v1736_v41 = vld [vmem:[%s2195_s30 + $0x78] sm:$0xff]  ;;  %v1753_v42 = vld [vmem:[%s2203_s11 + $0x30] sm:$0xff]  ;;  %v1737_v45 = vld [vmem:[%s2195_s30 + $0x80] sm:$0xff] }
  0x1f   : > { %v1728_v44 = vld [vmem:[%s2195_s30 + $0x38] sm:$0xff]  ;;  %v1764_v47 = vld [vmem:[%s2203_s11 + $0x88] sm:$0xff]  ;;  %v671_v48 = vld [vmem:[%s2203_s11 + $0x90] sm:$0xf] }
  0x20   : > { %v1754_v46 = vld [vmem:[%s2203_s11 + $0x38] sm:$0xff]  ;;  %v761_v49 = vunpack.c.l.b16 %v671_v48  ;;  %v2241_v50 = vld [vmem:[%s2499_s2] ss:$0 sm:$0xff]  ;;  %v1738_v52 = vld [vmem:[%s2195_s30 + $0x88] sm:$0xff] }
  0x21   : > { %536 = vmatpush.bf16.msra.mxu0 %v1742_v8  ;;  %1887 = vmatpush.bf16.msra.mxu2 %v1742_v8  ;;  %v1729_v51 = vld [vmem:[%s2195_s30 + $0x40] sm:$0xff]  ;;  %v351_v63 = vld [vmem:[%s2195_s30 + $0x90] sm:$0xf] }
  0x22   : > { %852 = vmatpush.bf16.msra.mxu1 %v1768_v9  ;;  %1895 = vmatpush.bf16.msra.mxu3 %v1768_v9  ;;  %v1755_v54 = vld [vmem:[%s2203_s11 + $0x40] sm:$0xff]  ;;  %v780_v55 = vpack.c.b16 %v761_v49, %v761_v49  ;;  %v445_v4 = vunpack.c.l.b16 %v351_v63 }
  0x23   : > { %v2252_v60 = vld [vmem:[%s2502_s5] ss:$0 sm:$0xff] }
  0x24   : > { %v464_v9 = vpack.c.b16 %v445_v4, %v445_v4 }
  0x25   : > { %537 = vmatpush.bf16.msra.mxu0 %v1741_v10  ;;  %1888 = vmatpush.bf16.msra.mxu2 %v1741_v10 }
  0x26   : > { %853 = vmatpush.bf16.msra.mxu1 %v1767_v11  ;;  %1896 = vmatpush.bf16.msra.mxu3 %v1767_v11 }
  0x29   : > { %538 = vmatpush.bf16.msra.mxu0 %v1740_v12  ;;  %1889 = vmatpush.bf16.msra.mxu2 %v1740_v12  ;;  %v1756_v12 = vld [vmem:[%s2203_s11 + $0x48] sm:$0xff] }
  0x2a   : > { %854 = vmatpush.bf16.msra.mxu1 %v1766_v13  ;;  %1897 = vmatpush.bf16.msra.mxu3 %v1766_v13 }
  0x2d   : > { %539 = vmatpush.bf16.msra.mxu0 %v1739_v14  ;;  %1890 = vmatpush.bf16.msra.mxu2 %v1739_v14 }
  0x2e   : > { %855 = vmatpush.bf16.msra.mxu1 %v1765_v15  ;;  %1898 = vmatpush.bf16.msra.mxu3 %v1765_v15 }
  0x30   : > { %540 = vmatmul.bf16.vlgmr.msra.gmra.mxu0 %v1721_v16  ;;  %585 = vmatmul.bf16.vlgmr.msra.gmra.mxu2 %v1730_v17 }
  0x31   : > { %856 = vmatmul.bf16.vlgmr.msra.gmra.mxu1 %v1747_v18  ;;  %906 = vmatmul.bf16.vlgmr.msra.gmra.mxu3 %v1757_v19 }
  0x40   : > { %545 = vmatmul.bf16.gmra.mxu0 %v1722_v20  ;;  %590 = vmatmul.bf16.gmra.mxu2 %v1731_v21 }
  0x41   : > { %861 = vmatmul.bf16.gmra.mxu1 %v1748_v22  ;;  %911 = vmatmul.bf16.gmra.mxu3 %v1758_v23 }
  0x50   : > { %550 = vmatmul.bf16.gmra.mxu0 %v1723_v24  ;;  %595 = vmatmul.bf16.gmra.mxu2 %v1732_v25 }
  0x51   : > { %866 = vmatmul.bf16.gmra.mxu1 %v1749_v26  ;;  %916 = vmatmul.bf16.gmra.mxu3 %v1759_v27 }
  0x60   : > { %555 = vmatmul.bf16.gmra.mxu0 %v1724_v28  ;;  %600 = vmatmul.bf16.gmra.mxu2 %v1733_v29 }
  0x61   : > { %871 = vmatmul.bf16.gmra.mxu1 %v1750_v30  ;;  %921 = vmatmul.bf16.gmra.mxu3 %v1760_v31 }
  0x70   : > { %560 = vmatmul.bf16.gmra.mxu0 %v1725_v32  ;;  %605 = vmatmul.bf16.gmra.mxu2 %v1734_v33 }
  0x71   : > { %876 = vmatmul.bf16.gmra.mxu1 %v1751_v34  ;;  %926 = vmatmul.bf16.gmra.mxu3 %v1761_v35 }
  0x80   : > { %565 = vmatmul.bf16.gmra.mxu0 %v1726_v36  ;;  %610 = vmatmul.bf16.gmra.mxu2 %v1735_v37 }
  0x81   : > { %881 = vmatmul.bf16.gmra.mxu1 %v1752_v38  ;;  %931 = vmatmul.bf16.gmra.mxu3 %v1762_v39 }
  0x90   : > { %570 = vmatmul.bf16.gmra.mxu0 %v1727_v40  ;;  %615 = vmatmul.bf16.gmra.mxu2 %v1736_v41 }
  0x91   : > { %886 = vmatmul.bf16.gmra.mxu1 %v1753_v42  ;;  %936 = vmatmul.bf16.gmra.mxu3 %v1763_v43 }
  0xa0   : > { %575 = vmatmul.bf16.gmra.mxu0 %v1728_v44  ;;  %620 = vmatmul.bf16.gmra.mxu2 %v1737_v45 }
  0xa1   : > { %891 = vmatmul.bf16.gmra.mxu1 %v1754_v46  ;;  %941 = vmatmul.bf16.gmra.mxu3 %v1764_v47 }
  0xad   : > { %v541_v53 = vpop.f32.mrf.mxu0 }
  0xae   : > { %v857_v56 = vpop.f32.mrf.mxu1  ;;  %v542_v57 = vadd.f32 %v2241_v50, %v541_v53 }
  0xb0   : > { %580 = vmatmul.bf16.gmra.mxu0 %v1729_v51  ;;  %625 = vmatmul.bf16.gmra.mxu2 %v1738_v52  ;;  %v951_v59 = vadd.f32 %v857_v56, %v542_v57 }
  0xb1   : > { %896 = vmatmul.bf16.gmra.mxu1 %v1755_v54  ;;  %946 = vmatmul.bf16.gmra.mxu3 %v780_v55 }
  0xb2   : > { %v992_v2 = vadd.f32 %v2252_v60, %v951_v59 }
  0xb3   : > { %v2247_v58 = vpop.f32.mrf.mxu2 }
  0xb4   : > { %v907_v61 = vpop.f32.mrf.mxu3  ;;  %v1029_v7 = vmax.f32 %v992_v2, 0.0 }
  0xb5   : > { %v543_v62 = vpop.f32.mrf.mxu0 }
  0xb6   : > { %v544_v0 = vadd.f32 %v2241_v50, %v543_v62  ;;  %v859_v1 = vpop.f32.mrf.mxu1 }
  0xb8   : > { %v952_v3 = vadd.f32 %v859_v1, %v544_v0 }
  0xba   : > { %v993_v5 = vadd.f32 %v2252_v60, %v952_v3 }
  0xbb   : > { %v2259_v6 = vpop.f32.mrf.mxu2 }
  0xbc   : > { %v1030_v8 = vmax.f32 %v993_v5, 0.0  ;;  %v909_v10 = vpop.f32.mrf.mxu3 }
  0xbd   : > { %v546_v11 = vpop.f32.mrf.mxu0 }
  0xbe   : > { %v1779_v13 = vpack.c.bf16 %v1030_v8, %v1029_v7  ;;  %v862_v14 = vpop.f32.mrf.mxu1  ;;  %v547_v15 = vadd.f32 %v2241_v50, %v546_v11 }
  0xc0   : > { %1780 = vst [vmem:[%s2262_s18] sm:$0xff] %v1779_v13   ;;  %630 = vmatmul.bf16.gmra.mxu2 %v464_v9  ;;  %v953_v17 = vadd.f32 %v862_v14, %v547_v15 }
  0xc1   : > { %901 = vmatmul.bf16.gmra.mxu1 %v1756_v12 }
  0xc2   : > { %v994_v23 = vadd.f32 %v2252_v60, %v953_v17 }
  0xc3   : > { %v591_v16 = vpop.f32.mrf.mxu2 }
  0xc4   : > { %v912_v18 = vpop.f32.mrf.mxu3  ;;  %v592_v20 = vadd.f32 %v2241_v50, %v591_v16  ;;  %v1031_v28 = vmax.f32 %v994_v23, 0.0 }
  0xc5   : > { %v548_v19 = vpop.f32.mrf.mxu0 }
  0xc6   : > { %v549_v21 = vadd.f32 %v2241_v50, %v548_v19  ;;  %v864_v22 = vpop.f32.mrf.mxu1  ;;  %v971_v25 = vadd.f32 %v907_v61, %v592_v20 }
  0xc8   : > { %v954_v24 = vadd.f32 %v864_v22, %v549_v21  ;;  %v1012_v33 = vadd.f32 %v2252_v60, %v971_v25 }
  0xca   : > { %v995_v26 = vadd.f32 %v2252_v60, %v954_v24  ;;  %v1049_v39 = vmax.f32 %v1012_v33, 0.0 }
  0xcb   : > { %v593_v27 = vpop.f32.mrf.mxu2 }
  0xcc   : > { %v1032_v29 = vmax.f32 %v995_v26, 0.0  ;;  %v594_v30 = vadd.f32 %v2241_v50, %v593_v27  ;;  %v914_v31 = vpop.f32.mrf.mxu3 }
  0xcd   : > { %v551_v32 = vpop.f32.mrf.mxu0 }
  0xce   : > { %v1784_v34 = vpack.c.bf16 %v1032_v29, %v1031_v28  ;;  %v972_v35 = vadd.f32 %v909_v10, %v594_v30  ;;  %v867_v36 = vpop.f32.mrf.mxu1  ;;  %v552_v38 = vadd.f32 %v2241_v50, %v551_v32 }
  0xd0   : > { %1866 = vst [vmem:[%s2262_s18 + $0x8] sm:$0xff] %v1784_v34   ;;  %v1013_v37 = vadd.f32 %v2252_v60, %v972_v35  ;;  %v955_v43 = vadd.f32 %v867_v36, %v552_v38 }
  0xd2   : > { %v1050_v40 = vmax.f32 %v1013_v37, 0.0  ;;  %v996_v49 = vadd.f32 %v2252_v60, %v955_v43 }
  0xd3   : > { %v596_v41 = vpop.f32.mrf.mxu2 }
  0xd4   : > { %v1829_v42 = vpack.c.bf16 %v1050_v40, %v1049_v39  ;;  %v917_v44 = vpop.f32.mrf.mxu3  ;;  %v597_v46 = vadd.f32 %v2241_v50, %v596_v41  ;;  %v1033_v55 = vmax.f32 %v996_v49, 0.0 }
  0xd5   : > { %v553_v45 = vpop.f32.mrf.mxu0 }
  0xd6   : > { %1875 = vst [vmem:[%s2262_s18 + $0x50] sm:$0xff] %v1829_v42   ;;  %v554_v47 = vadd.f32 %v2241_v50, %v553_v45  ;;  %v869_v48 = vpop.f32.mrf.mxu1  ;;  %v973_v52 = vadd.f32 %v912_v18, %v597_v46 }
  0xd8   : > { %v956_v51 = vadd.f32 %v869_v48, %v554_v47  ;;  %v1014_v62 = vadd.f32 %v2252_v60, %v973_v52 }
  0xda   : > { %v997_v53 = vadd.f32 %v2252_v60, %v956_v51  ;;  %v1051_v4 = vmax.f32 %v1014_v62, 0.0 }
  0xdb   : > { %v598_v54 = vpop.f32.mrf.mxu2 }
  0xdc   : > { %v1034_v56 = vmax.f32 %v997_v53, 0.0  ;;  %v599_v57 = vadd.f32 %v2241_v50, %v598_v54  ;;  %v919_v59 = vpop.f32.mrf.mxu3 }
  0xdd   : > { %v556_v61 = vpop.f32.mrf.mxu0 }
  0xde   : > { %v1789_v63 = vpack.c.bf16 %v1034_v56, %v1033_v55  ;;  %v974_v0 = vadd.f32 %v914_v31, %v599_v57  ;;  %v872_v1 = vpop.f32.mrf.mxu1  ;;  %v557_v3 = vadd.f32 %v2241_v50, %v556_v61 }
  0xe0   : > { %1867 = vst [vmem:[%s2262_s18 + $0x10] sm:$0xff] %v1789_v63   ;;  %v1015_v2 = vadd.f32 %v2252_v60, %v974_v0  ;;  %v957_v9 = vadd.f32 %v872_v1, %v557_v3 }
  0xe2   : > { %v1052_v5 = vmax.f32 %v1015_v2, 0.0  ;;  %v998_v15 = vadd.f32 %v2252_v60, %v957_v9 }
  0xe3   : > { %v601_v7 = vpop.f32.mrf.mxu2 }
  0xe4   : > { %v1834_v8 = vpack.c.bf16 %v1052_v5, %v1051_v4  ;;  %v922_v10 = vpop.f32.mrf.mxu3  ;;  %v602_v12 = vadd.f32 %v2241_v50, %v601_v7  ;;  %v1035_v20 = vmax.f32 %v998_v15, 0.0 }
  0xe5   : > { %v558_v11 = vpop.f32.mrf.mxu0 }
  0xe6   : > { %1876 = vst [vmem:[%s2262_s18 + $0x58] sm:$0xff] %v1834_v8   ;;  %v559_v13 = vadd.f32 %v2241_v50, %v558_v11  ;;  %v874_v14 = vpop.f32.mrf.mxu1  ;;  %v975_v17 = vadd.f32 %v917_v44, %v602_v12 }
  0xe8   : > { %v958_v16 = vadd.f32 %v874_v14, %v559_v13  ;;  %v1016_v25 = vadd.f32 %v2252_v60, %v975_v17 }
  0xea   : > { %v999_v18 = vadd.f32 %v2252_v60, %v958_v16  ;;  %v1053_v31 = vmax.f32 %v1016_v25, 0.0 }
  0xeb   : > { %v603_v19 = vpop.f32.mrf.mxu2 }
  0xec   : > { %v1036_v21 = vmax.f32 %v999_v18, 0.0  ;;  %v604_v22 = vadd.f32 %v2241_v50, %v603_v19  ;;  %v924_v23 = vpop.f32.mrf.mxu3 }
  0xed   : > { %v561_v24 = vpop.f32.mrf.mxu0 }
  0xee   : > { %v1794_v26 = vpack.c.bf16 %v1036_v21, %v1035_v20  ;;  %v976_v27 = vadd.f32 %v919_v59, %v604_v22  ;;  %v877_v28 = vpop.f32.mrf.mxu1  ;;  %v562_v30 = vadd.f32 %v2241_v50, %v561_v24 }
  0xf0   : > { %1868 = vst [vmem:[%s2262_s18 + $0x18] sm:$0xff] %v1794_v26   ;;  %v1017_v29 = vadd.f32 %v2252_v60, %v976_v27  ;;  %v959_v35 = vadd.f32 %v877_v28, %v562_v30 }
  0xf2   : > { %v1054_v32 = vmax.f32 %v1017_v29, 0.0  ;;  %v1000_v41 = vadd.f32 %v2252_v60, %v959_v35 }
  0xf3   : > { %v606_v33 = vpop.f32.mrf.mxu2 }
  0xf4   : > { %v1839_v34 = vpack.c.bf16 %v1054_v32, %v1053_v31  ;;  %v927_v36 = vpop.f32.mrf.mxu3  ;;  %v607_v38 = vadd.f32 %v2241_v50, %v606_v33  ;;  %v1037_v46 = vmax.f32 %v1000_v41, 0.0 }
  0xf5   : > { %v563_v37 = vpop.f32.mrf.mxu0 }
  0xf6   : > { %1877 = vst [vmem:[%s2262_s18 + $0x60] sm:$0xff] %v1839_v34   ;;  %v564_v39 = vadd.f32 %v2241_v50, %v563_v37  ;;  %v879_v40 = vpop.f32.mrf.mxu1  ;;  %v977_v43 = vadd.f32 %v922_v10, %v607_v38 }
  0xf8   : > { %v960_v42 = vadd.f32 %v879_v40, %v564_v39  ;;  %v1018_v52 = vadd.f32 %v2252_v60, %v977_v43 }
  0xfa   : > { %v1001_v44 = vadd.f32 %v2252_v60, %v960_v42  ;;  %v1055_v59 = vmax.f32 %v1018_v52, 0.0 }
  0xfb   : > { %v608_v45 = vpop.f32.mrf.mxu2 }
  0xfc   : > { %v1038_v47 = vmax.f32 %v1001_v44, 0.0  ;;  %v609_v48 = vadd.f32 %v2241_v50, %v608_v45  ;;  %v929_v49 = vpop.f32.mrf.mxu3 }
  0xfd   : > { %v566_v51 = vpop.f32.mrf.mxu0 }
  0xfe   : > { %v1799_v53 = vpack.c.bf16 %v1038_v47, %v1037_v46  ;;  %v978_v54 = vadd.f32 %v924_v23, %v609_v48  ;;  %v882_v55 = vpop.f32.mrf.mxu1  ;;  %v567_v57 = vadd.f32 %v2241_v50, %v566_v51 }
 0x100   : > { %1869 = vst [vmem:[%s2262_s18 + $0x20] sm:$0xff] %v1799_v53   ;;  %v1019_v56 = vadd.f32 %v2252_v60, %v978_v54  ;;  %v961_v0 = vadd.f32 %v882_v55, %v567_v57 }
 0x102   : > { %v1056_v61 = vmax.f32 %v1019_v56, 0.0  ;;  %v1002_v7 = vadd.f32 %v2252_v60, %v961_v0 }
 0x103   : > { %v611_v62 = vpop.f32.mrf.mxu2 }
 0x104   : > { %v1844_v63 = vpack.c.bf16 %v1056_v61, %v1055_v59  ;;  %v932_v1 = vpop.f32.mrf.mxu3  ;;  %v612_v3 = vadd.f32 %v2241_v50, %v611_v62  ;;  %v1039_v12 = vmax.f32 %v1002_v7, 0.0 }
 0x105   : > { %v568_v2 = vpop.f32.mrf.mxu0 }
 0x106   : > { %1878 = vst [vmem:[%s2262_s18 + $0x68] sm:$0xff] %v1844_v63   ;;  %v569_v4 = vadd.f32 %v2241_v50, %v568_v2  ;;  %v884_v5 = vpop.f32.mrf.mxu1  ;;  %v979_v9 = vadd.f32 %v927_v36, %v612_v3 }
 0x108   : > { %v962_v8 = vadd.f32 %v884_v5, %v569_v4  ;;  %v1020_v17 = vadd.f32 %v2252_v60, %v979_v9 }
 0x10a   : > { %v1003_v10 = vadd.f32 %v2252_v60, %v962_v8  ;;  %v1057_v23 = vmax.f32 %v1020_v17, 0.0 }
 0x10b   : > { %v613_v11 = vpop.f32.mrf.mxu2 }
 0x10c   : > { %v1040_v13 = vmax.f32 %v1003_v10, 0.0  ;;  %v614_v14 = vadd.f32 %v2241_v50, %v613_v11  ;;  %v934_v15 = vpop.f32.mrf.mxu3 }
 0x10d   : > { %v571_v16 = vpop.f32.mrf.mxu0 }
 0x10e   : > { %v1804_v18 = vpack.c.bf16 %v1040_v13, %v1039_v12  ;;  %v980_v19 = vadd.f32 %v929_v49, %v614_v14  ;;  %v887_v20 = vpop.f32.mrf.mxu1  ;;  %v572_v22 = vadd.f32 %v2241_v50, %v571_v16 }
 0x110   : > { %1870 = vst [vmem:[%s2262_s18 + $0x28] sm:$0xff] %v1804_v18   ;;  %v1021_v21 = vadd.f32 %v2252_v60, %v980_v19  ;;  %v963_v27 = vadd.f32 %v887_v20, %v572_v22 }
 0x112   : > { %v1058_v24 = vmax.f32 %v1021_v21, 0.0  ;;  %v1004_v33 = vadd.f32 %v2252_v60, %v963_v27 }
 0x113   : > { %v616_v25 = vpop.f32.mrf.mxu2 }
 0x114   : > { %v1849_v26 = vpack.c.bf16 %v1058_v24, %v1057_v23  ;;  %v937_v28 = vpop.f32.mrf.mxu3  ;;  %v617_v30 = vadd.f32 %v2241_v50, %v616_v25  ;;  %v1041_v38 = vmax.f32 %v1004_v33, 0.0 }
 0x115   : > { %v573_v29 = vpop.f32.mrf.mxu0 }
 0x116   : > { %1879 = vst [vmem:[%s2262_s18 + $0x70] sm:$0xff] %v1849_v26   ;;  %v574_v31 = vadd.f32 %v2241_v50, %v573_v29  ;;  %v889_v32 = vpop.f32.mrf.mxu1  ;;  %v981_v35 = vadd.f32 %v932_v1, %v617_v30 }
 0x118   : > { %v964_v34 = vadd.f32 %v889_v32, %v574_v31  ;;  %v1022_v43 = vadd.f32 %v2252_v60, %v981_v35 }
 0x11a   : > { %v1005_v36 = vadd.f32 %v2252_v60, %v964_v34  ;;  %v1059_v49 = vmax.f32 %v1022_v43, 0.0 }
 0x11b   : > { %v618_v37 = vpop.f32.mrf.mxu2 }
 0x11c   : > { %v1042_v39 = vmax.f32 %v1005_v36, 0.0  ;;  %v619_v40 = vadd.f32 %v2241_v50, %v618_v37  ;;  %v939_v41 = vpop.f32.mrf.mxu3 }
 0x11d   : > { %v576_v42 = vpop.f32.mrf.mxu0 }
 0x11e   : > { %v1809_v44 = vpack.c.bf16 %v1042_v39, %v1041_v38  ;;  %v982_v45 = vadd.f32 %v934_v15, %v619_v40  ;;  %v892_v46 = vpop.f32.mrf.mxu1  ;;  %v577_v48 = vadd.f32 %v2241_v50, %v576_v42  ;;  %v587_v39 = vadd.f32 %v2241_v50, %v2247_v58 }
 0x120   : > { %1871 = vst [vmem:[%s2262_s18 + $0x30] sm:$0xff] %v1809_v44   ;;  %v1023_v47 = vadd.f32 %v2252_v60, %v982_v45  ;;  %v965_v54 = vadd.f32 %v892_v46, %v577_v48  ;;  %v589_v46 = vadd.f32 %v2241_v50, %v2259_v6 }
 0x122   : > { %v1060_v51 = vmax.f32 %v1023_v47, 0.0  ;;  %v1006_v62 = vadd.f32 %v2252_v60, %v965_v54 }
 0x123   : > { %v621_v52 = vpop.f32.mrf.mxu2 }
 0x124   : > { %v1854_v53 = vpack.c.bf16 %v1060_v51, %v1059_v49  ;;  %v942_v55 = vpop.f32.mrf.mxu3  ;;  %v622_v57 = vadd.f32 %v2241_v50, %v621_v52  ;;  %v1043_v3 = vmax.f32 %v1006_v62, 0.0 }
 0x125   : > { %v578_v56 = vpop.f32.mrf.mxu0 }
 0x126   : > { %1880 = vst [vmem:[%s2262_s18 + $0x78] sm:$0xff] %v1854_v53   ;;  %v579_v59 = vadd.f32 %v2241_v50, %v578_v56  ;;  %v894_v61 = vpop.f32.mrf.mxu1  ;;  %v983_v0 = vadd.f32 %v937_v28, %v622_v57 }
 0x128   : > { %v966_v63 = vadd.f32 %v894_v61, %v579_v59  ;;  %v1024_v9 = vadd.f32 %v2252_v60, %v983_v0 }
 0x12a   : > { %v1007_v1 = vadd.f32 %v2252_v60, %v966_v63  ;;  %v1061_v15 = vmax.f32 %v1024_v9, 0.0 }
 0x12b   : > { %v623_v2 = vpop.f32.mrf.mxu2 }
 0x12c   : > { %v1044_v4 = vmax.f32 %v1007_v1, 0.0  ;;  %v624_v5 = vadd.f32 %v2241_v50, %v623_v2  ;;  %v944_v7 = vpop.f32.mrf.mxu3 }
 0x12d   : > { %v581_v8 = vpop.f32.mrf.mxu0 }
 0x12e   : > { %v1814_v10 = vpack.c.bf16 %v1044_v4, %v1043_v3  ;;  %v984_v11 = vadd.f32 %v939_v41, %v624_v5  ;;  %v897_v12 = vpop.f32.mrf.mxu1  ;;  %v582_v14 = vadd.f32 %v2241_v50, %v581_v8 }
 0x130   : > { %1872 = vst [vmem:[%s2262_s18 + $0x38] sm:$0xff] %v1814_v10   ;;  %v1025_v13 = vadd.f32 %v2252_v60, %v984_v11  ;;  %v967_v19 = vadd.f32 %v897_v12, %v582_v14 }
 0x132   : > { %v1062_v16 = vmax.f32 %v1025_v13, 0.0  ;;  %v1008_v25 = vadd.f32 %v2252_v60, %v967_v19 }
 0x133   : > { %v626_v17 = vpop.f32.mrf.mxu2 }
 0x134   : > { %v1859_v18 = vpack.c.bf16 %v1062_v16, %v1061_v15  ;;  %v947_v20 = vpop.f32.mrf.mxu3  ;;  %v627_v22 = vadd.f32 %v2241_v50, %v626_v17  ;;  %v1045_v30 = vmax.f32 %v1008_v25, 0.0 }
 0x135   : > { %v583_v21 = vpop.f32.mrf.mxu0 }
 0x136   : > { %1881 = vst [vmem:[%s2262_s18 + $0x80] sm:$0xff] %v1859_v18   ;;  %v584_v23 = vadd.f32 %v2241_v50, %v583_v21  ;;  %v899_v24 = vpop.f32.mrf.mxu1  ;;  %v985_v27 = vadd.f32 %v942_v55, %v627_v22 }
 0x138   : > { %v968_v26 = vadd.f32 %v899_v24, %v584_v23  ;;  %v1026_v34 = vadd.f32 %v2252_v60, %v985_v27 }
 0x13a   : > { %v1009_v28 = vadd.f32 %v2252_v60, %v968_v26  ;;  %v1063_v40 = vmax.f32 %v1026_v34, 0.0 }
 0x13b   : > { %v628_v29 = vpop.f32.mrf.mxu2 }
 0x13c   : > { %v1046_v31 = vmax.f32 %v1009_v28, 0.0  ;;  %v629_v32 = vadd.f32 %v2241_v50, %v628_v29  ;;  %v949_v33 = vpop.f32.mrf.mxu3 }
 0x13e   : > { %v1819_v35 = vpack.c.bf16 %v1046_v31, %v1045_v30  ;;  %v986_v36 = vadd.f32 %v944_v7, %v629_v32  ;;  %v902_v37 = vpop.f32.mrf.mxu1 }
 0x13f   : > { %v969_v42 = vadd.f32 %v902_v37, %v587_v39 }
 0x140   : > { %1873 = vst [vmem:[%s2262_s18 + $0x40] sm:$0xff] %v1819_v35   ;;  %v1027_v38 = vadd.f32 %v2252_v60, %v986_v36 }
 0x141   : > { %v1010_v49 = vadd.f32 %v2252_v60, %v969_v42 }
 0x142   : > { %v1064_v41 = vmax.f32 %v1027_v38, 0.0 }
 0x143   : > { %v631_v43 = vpop.f32.mrf.mxu2  ;;  %v1047_v54 = vmax.f32 %v1010_v49, 0.0 }
 0x144   : > { %v1864_v44 = vpack.c.bf16 %v1064_v41, %v1063_v40  ;;  %v632_v45 = vadd.f32 %v2241_v50, %v631_v43 }
 0x146   : > { %1882 = vst [vmem:[%s2262_s18 + $0x88] sm:$0xff] %v1864_v44   ;;  %v987_v47 = vadd.f32 %v947_v20, %v632_v45  ;;  %v904_v48 = vpop.f32.mrf.mxu1 }
 0x147   : > { %v970_v51 = vadd.f32 %v904_v48, %v589_v46 }
 0x148   : > { %v1028_v58 = vadd.f32 %v2252_v60, %v987_v47 }
 0x149   : > { %v1011_v52 = vadd.f32 %v2252_v60, %v970_v51 }
 0x14a   : > { %v1065_v53 = vmax.f32 %v1028_v58, 0.0 }
 0x14b   : > { %v1048_v55 = vmax.f32 %v1011_v52, 0.0  ;;  %v633_v56 = vpop.f32.mrf.mxu2  ;;  %1146 = sbr.rel (!%p2138_p4) target bundleno = 400 (0x190), region = 48 }
 0x14c   : > { %v1102_v57 = vpack.c.bf16 %v1065_v53, %v1065_v53 }
 0x14d   : > { %v1824_v59 = vpack.c.bf16 %v1048_v55, %v1047_v54 }
 0x14e   : > { %1139 = vst [vmem:[%s2262_s18 + $0x90] sm:$0xf] %v1102_v57 }
 0x14f   : > { %1874 = vst [vmem:[%s2262_s18 + $0x48] sm:$0xff] %v1824_v59  }
 0x150   : > { %s2514_s21 = smov (!%p1149_p8, %s1148_s21), 37 }
 0x151   : > { %s1706_s30 = sshll.u32 %s2514_s21, 2 }
 0x152   : > { %p1709_p9 = scmp.eq.s32.totalorder %s1706_s30, 0 }
 0x153   : > { %s2368_s7 = sshrl.u32 (!%p1709_p9), %s2514_s21, 5 }
 0x154   : > { %1157 = sbr.rel (%p1709_p9) target bundleno = 400 (0x190), region = 52  ;;  %p1710_p10 = scmp.le.s32.totalorder (!%p1709_p9), %s2368_s7, 0 }
 0x159   : > { %1442 = sbr.rel (%p1710_p10) target bundleno = 383 (0x17f), region = 127  ;;  %s2505_s24 = smov (!%p1710_p10), %s2362_s27 }
 0x15a   : > { %s2506_s29 = smov (!%p1710_p10), %s2262_s18  ;;  %s2377_s26 = smov (!%p1710_p10), 0  }
 0x15b   : > { %s2379_s8 = smov (!%p1710_p10), 0  }
 0x15e LB: >> { %v1174_v50 = vld [vmem:[%s2052_s29] sm:$0xf]  ;;  %v1176_v60 = vld [vmem:[%s2052_s29 + $0x4] sm:$0xf]  ;;  %v1178_v6 = vld [vmem:[%s2052_s29 + $0x8] sm:$0xf]  ;;  %s2060_s8 = sphi %s2379_s8, %s1168_s8   ;;  %s2056_s26 = sphi %s2377_s26, %s2509_s26   ;;  %s2052_s29 = sphi %s2506_s29, %s2508_s29   ;;  %s2048_s24 = sphi %s2505_s24, %s2507_s24  }
 0x15f   : >> { %1175 = vst [vmem:[%s2048_s24] sm:$0xf] %v1174_v50  ;;  %v1180_v61 = vld [vmem:[%s2052_s29 + $0xc] sm:$0xf]  ;;  %v1182_v62 = vld [vmem:[%s2052_s29 + $0x10] sm:$0xf]  ;;  %s1238_s9 = sadd.s32 1, %s2056_s26 }
 0x160   : >> { %1177 = vst [vmem:[%s2048_s24 + $0x4] sm:$0xf] %v1176_v60  ;;  %v1184_v63 = vld [vmem:[%s2052_s29 + $0x14] sm:$0xf]  ;;  %v1186_v0 = vld [vmem:[%s2052_s29 + $0x18] sm:$0xf]  ;;  %p1239_p11 = scmp.ge.s32.totalorder %s1238_s9, %s2368_s7 }
 0x161   : >> { %1179 = vst [vmem:[%s2048_s24 + $0x8] sm:$0xf] %v1178_v6  ;;  %v1188_v1 = vld [vmem:[%s2052_s29 + $0x1c] sm:$0xf]  ;;  %v1190_v2 = vld [vmem:[%s2052_s29 + $0x20] sm:$0xf] }
 0x162   : >> { %1181 = vst [vmem:[%s2048_s24 + $0xc] sm:$0xf] %v1180_v61  ;;  %v1192_v3 = vld [vmem:[%s2052_s29 + $0x24] sm:$0xf]  ;;  %v1194_v4 = vld [vmem:[%s2052_s29 + $0x28] sm:$0xf] }
 0x163   : >> { %1183 = vst [vmem:[%s2048_s24 + $0x10] sm:$0xf] %v1182_v62  ;;  %v1196_v5 = vld [vmem:[%s2052_s29 + $0x2c] sm:$0xf]  ;;  %v1198_v7 = vld [vmem:[%s2052_s29 + $0x30] sm:$0xf] }
 0x164   : >> { %1185 = vst [vmem:[%s2048_s24 + $0x14] sm:$0xf] %v1184_v63  ;;  %v1200_v8 = vld [vmem:[%s2052_s29 + $0x34] sm:$0xf]  ;;  %v1202_v9 = vld [vmem:[%s2052_s29 + $0x38] sm:$0xf] }
 0x165   : >> { %1187 = vst [vmem:[%s2048_s24 + $0x18] sm:$0xf] %v1186_v0  ;;  %v1204_v10 = vld [vmem:[%s2052_s29 + $0x3c] sm:$0xf]  ;;  %v1206_v11 = vld [vmem:[%s2052_s29 + $0x40] sm:$0xf] }
 0x166   : >> { %1189 = vst [vmem:[%s2048_s24 + $0x1c] sm:$0xf] %v1188_v1  ;;  %v1208_v12 = vld [vmem:[%s2052_s29 + $0x44] sm:$0xf]  ;;  %s2516_s9 = smov (%p1239_p11, %s1238_s9), 0  ;;  %s1168_s8 = sadd.s32 1, %s2060_s8  }
 0x167   : >> { %1191 = vst [vmem:[%s2048_s24 + $0x20] sm:$0xf] %v1190_v2  ;;  %v1210_v13 = vld [vmem:[%s2052_s29 + $0x48] sm:$0xf]  ;;  %v1212_v14 = vld [vmem:[%s2052_s29 + $0x4c] sm:$0xf]  ;;  %p1167_p12 = scmp.ge.s32.totalorder %s1168_s8, %s2368_s7  ;;  %s2509_s26 = smov %s2516_s9 }
 0x168   : >> { %1193 = vst [vmem:[%s2048_s24 + $0x24] sm:$0xf] %v1192_v3  ;;  %s1711_s10 = sshll.u32 %s2516_s9, 7  ;;  %v1214_v15 = vld [vmem:[%s2052_s29 + $0x50] sm:$0xf] }
 0x169   : >> { %1195 = vst [vmem:[%s2048_s24 + $0x28] sm:$0xf] %v1194_v4  ;;  %s2438_s11 = scalar_lea.vmem %s2262_s18, %s1711_s10 [#allocation2]   ;;  %s1244_s12 = scalar_lea.vmem %s2362_s27, %s1711_s10   ;;  %v1216_v16 = vld [vmem:[%s2052_s29 + $0x54] sm:$0xf]  ;;  %v1218_v17 = vld [vmem:[%s2052_s29 + $0x58] sm:$0xf] }
 0x16a   : >> { %1197 = vst [vmem:[%s2048_s24 + $0x2c] sm:$0xf] %v1196_v5  ;;  %v1220_v18 = vld [vmem:[%s2052_s29 + $0x5c] sm:$0xf]  ;;  %v1222_v19 = vld [vmem:[%s2052_s29 + $0x60] sm:$0xf] }
 0x16b   : >> { %1199 = vst [vmem:[%s2048_s24 + $0x30] sm:$0xf] %v1198_v7  ;;  %v1224_v20 = vld [vmem:[%s2052_s29 + $0x64] sm:$0xf]  ;;  %v1226_v21 = vld [vmem:[%s2052_s29 + $0x68] sm:$0xf] }
 0x16c   : >> { %1201 = vst [vmem:[%s2048_s24 + $0x34] sm:$0xf] %v1200_v8  ;;  %v1228_v22 = vld [vmem:[%s2052_s29 + $0x6c] sm:$0xf]  ;;  %v1230_v23 = vld [vmem:[%s2052_s29 + $0x70] sm:$0xf] }
 0x16d   : >> { %1203 = vst [vmem:[%s2048_s24 + $0x38] sm:$0xf] %v1202_v9  ;;  %v1232_v24 = vld [vmem:[%s2052_s29 + $0x74] sm:$0xf]  ;;  %v1234_v25 = vld [vmem:[%s2052_s29 + $0x78] sm:$0xf] }
 0x16e   : >> { %1205 = vst [vmem:[%s2048_s24 + $0x3c] sm:$0xf] %v1204_v10  ;;  %v1236_v26 = vld [vmem:[%s2052_s29 + $0x7c] sm:$0xf]  ;;  %s2508_s29 = smov %s2438_s11 }
 0x16f   : >> { %1207 = vst [vmem:[%s2048_s24 + $0x40] sm:$0xf] %v1206_v11 }
 0x170   : >> { %1209 = vst [vmem:[%s2048_s24 + $0x44] sm:$0xf] %v1208_v12 }
 0x171   : >> { %1211 = vst [vmem:[%s2048_s24 + $0x48] sm:$0xf] %v1210_v13 }
 0x172   : >> { %1213 = vst [vmem:[%s2048_s24 + $0x4c] sm:$0xf] %v1212_v14 }
 0x173   : >> { %1215 = vst [vmem:[%s2048_s24 + $0x50] sm:$0xf] %v1214_v15 }
 0x174   : >> { %1217 = vst [vmem:[%s2048_s24 + $0x54] sm:$0xf] %v1216_v16 }
 0x175   : >> { %1219 = vst [vmem:[%s2048_s24 + $0x58] sm:$0xf] %v1218_v17 }
 0x176   : >> { %1221 = vst [vmem:[%s2048_s24 + $0x5c] sm:$0xf] %v1220_v18 }
 0x177   : >> { %1223 = vst [vmem:[%s2048_s24 + $0x60] sm:$0xf] %v1222_v19 }
 0x178   : >> { %1225 = vst [vmem:[%s2048_s24 + $0x64] sm:$0xf] %v1224_v20 }
 0x179   : >> { %1227 = vst [vmem:[%s2048_s24 + $0x68] sm:$0xf] %v1226_v21 }
 0x17a   : >> { %1229 = vst [vmem:[%s2048_s24 + $0x6c] sm:$0xf] %v1228_v22  ;;  %1170 = sbr.rel (!%p1167_p12) target bundleno = 350 (0x15e), region = 133 }
 0x17b   : >> { %1231 = vst [vmem:[%s2048_s24 + $0x70] sm:$0xf] %v1230_v23 }
 0x17c   : >> { %1233 = vst [vmem:[%s2048_s24 + $0x74] sm:$0xf] %v1232_v24 }
 0x17d   : >> { %1235 = vst [vmem:[%s2048_s24 + $0x78] sm:$0xf] %v1234_v25 }
 0x17e   : >> { %1237 = vst [vmem:[%s2048_s24 + $0x7c] sm:$0xf] %v1236_v26  ;;  %s2507_s24 = smov %s1244_s12 }
 0x17f PF: > { %s2479_s13 = sand.u32 31, %s2514_s21   ;;  %s1774_s14 = sshll.u32 %s2368_s7, 7 }
 0x180   : > { %s1249_s15 = scalar_lea.vmem %s2262_s18, %s1774_s14 [#allocation2]   ;;  %s1251_s16 = scalar_lea.vmem %s2362_s27, %s1774_s14  }
 0x181   : > { %p1716_p13 = scmp.le.s32.totalorder %s2479_s13, 0 }
 0x182   : > { %s2062_s17 = smov (!%p1716_p13), %s1251_s16   ;;  %s2066_s19 = smov (!%p1716_p13), %s1249_s15  }
 0x183   : > { %1456 = sbr.rel (%p1716_p13) target bundleno = 400 (0x190), region = 138  ;;  %s2070_s20 = smov (!%p1716_p13), 0  }
 0x184   : > { %s2074_s23 = smov (!%p1716_p13), 0  }
 0x188 LB: >> { %v1261_v27 = vld [vmem:[%s2068_s19] sm:$0xf]  ;;  %s1263_s21 = sadd.s32 1, %s2072_s20  ;;  %s1255_s23 = sadd.s32 1, %s2076_s23   ;;  %s2076_s23 = sphi %s2074_s23, %s1255_s23   ;;  %s2072_s20 = sphi %s2070_s20, %s2071_s20   ;;  %s2068_s19 = sphi %s2066_s19, %s1268_s19   ;;  %s2064_s17 = sphi %s2062_s17, %s1269_s17  }
 0x189   : >> { %1262 = vst [vmem:[%s2064_s17] sm:$0xf] %v1261_v27  ;;  %p1264_p0 = scmp.ge.s32.totalorder %s1263_s21, %s2479_s13  ;;  %p1254_p1 = scmp.ge.s32.totalorder %s1255_s23, %s2479_s13 }
 0x18b   : >> { %s2518_s21 = smov (%p1264_p0, %s1263_s21), 0  ;;  %1257 = sbr.rel (!%p1254_p1) target bundleno = 392 (0x188), region = 144 }
 0x18c   : >> { %s1717_s18 = sshll.u32 %s2518_s21, 2  ;;  %s2071_s20 = smov %s2518_s21  }
 0x18d   : >> { %s1268_s19 = scalar_lea.vmem %s1249_s15, %s1717_s18 [#allocation2]   ;;  %s1269_s17 = scalar_lea.vmem %s1251_s16, %s1717_s18  }
 0x190 PF: > { %p13_p2 = scmp.ge.s32.totalorder %s2128_s25, 4   ;;  %s2510_s21 = smov %s2040_s22 }
 0x191   : > { %s2511_s22 = smov %s2136_s28  ;;  %s2512_s23 = smov %s2128_s25 }
 0x192   :  { %15 = sbr.rel (!%p13_p2) target bundleno = 2 (0x2), region = 155 }

// kernel: resnet_forward.27
= control target key start
LH: loop header
LB: loop body
LE: loop exit
PB: predicated region body
PF: predicated region fallthrough
CT: control target
= control target key end

     0   :  { %s1445_s12 = smov 0   ;;  %s1447_s13 = smov 0   ;;  %s1733_s0 = inlined_call_operand.vmem [shape: bf16[578,128], index: 0, kind: input, shape index: {}]   ;;  %s1734_s1 = inlined_call_operand.vmem [shape: bf16[128,128], index: 1, kind: input, shape index: {}]   ;;  %s1735_s2 = inlined_call_operand.vmem [shape: f32[1,128], index: 2, kind: input, shape index: {}]   ;;  %s1736_s3 = inlined_call_operand.vmem [shape: bf16[578,128], index: 3, kind: output, shape index: {}]  }
   0x1   :  { %s1449_s14 = smov 0  }
   0x2 LB: > { %s1458_s15 = sadd.s32 4294967295, %s1391_s14   ;;  %s1460_s16 = sadd.s32 1, %s1391_s14   ;;  %s1391_s14 = sphi %s1449_s14, %s1745_s14   ;;  %s1387_s13 = sphi %s1447_s13, %s1744_s13   ;;  %s1383_s12 = sphi %s1445_s12, %s1743_s12  }
   0x3   : > { %s85_s17 = ssub.s32 %s1391_s14, %s1460_s16  ;;  %s88_s18 = sadd.s32 1, %s1387_s13 }
   0x4   : > { %p86_p0 = scmp.eq.s32.totalorder %s85_s17, 0  ;;  %p98_p1 = scmp.ne.s32.totalorder %s1387_s13, %s1383_s12 }
   0x5   : > { %p99_p2 = scmp.eq.s32.totalorder %s1458_s15, 1  ;;  %p966_p3 = scmp.ge.s32.totalorder %s1391_s14, 1 }
   0x6   : > { %s1468_s19 = scalar_select %p86_p0, %s1387_s13, %s88_s18  }
   0x7   : > { %p1470_p4 = por %p99_p2, %p98_p1  ;;  %p146_p5 = scmp.lt.s32.totalorder %s1391_s14, 3 }
   0x9   : > { %p147_p6 = pnand %p966_p3, %p146_p5 }
   0xa   : > { %s1487_s29 = smul.u32 (!%p147_p6), 37, %s1458_s15  ;;  %s170_s24 = sand.u32 (!%p147_p6), 1, %s1383_s12  }
   0xb   : > { %150 = sbr.rel (%p147_p6) target bundleno = 323 (0x143), region = 32 }
   0xc   : > { %p178_p7 = scmp.lt.s32.totalorder (!%p147_p6), %s1487_s29, 72  ;;  %s1247_s25 = smul.u32 (!%p147_p6), 148, %s170_s24 }
   0xe   : > { %s1539_s12 = scalar_lea.vmem (!%p147_p6), [#allocation2], %s1247_s25  }
  0x10   : > { %v1112_v0 = vld [vmem:[%s1734_s1 + $0x38] sm:$0xff]  ;;  %v1111_v1 = vld [vmem:[%s1734_s1 + $0x30] sm:$0xff]  ;;  %v1110_v2 = vld [vmem:[%s1734_s1 + $0x28] sm:$0xff]  ;;  %s179_s7 = scalar_select %p178_p7, %s1487_s29, 72 }
  0x11   : > { %1223 = vmatpush.bf16.msra.mxu1 %v1112_v0  ;;  %1224 = vmatpush.bf16.msra.mxu2 %v1112_v0  ;;  %v1109_v3 = vld [vmem:[%s1734_s1 + $0x20] sm:$0xff]  ;;  %v1108_v4 = vld [vmem:[%s1734_s1 + $0x18] sm:$0xff]  ;;  %v1107_v5 = vld [vmem:[%s1734_s1 + $0x10] sm:$0xff]  ;;  %s631_s26 = ssub.s32 (%p1470_p4), 73, %s1487_s29  ;;  %s1113_s27 = smul.u32 (%p1470_p4), 148, %s1458_s15 }
  0x12   : > { %1225 = vmatpush.bf16.msra.mxu3 %v1112_v0  ;;  %409 = vmatpush.bf16.msra.mxu0 %v1112_v0  ;;  %v1106_v6 = vld [vmem:[%s1734_s1 + $0x8] sm:$0xff]  ;;  %s967_s10 = sshll.u32 %s179_s7, 2  ;;  %v1105_v7 = vld [vmem:[%s1734_s1] sm:$0xff]  ;;  %p632_p8 = scmp.lt.s32.totalorder (%p1470_p4), %s631_s26, 37 }
  0x13   : > { %s1506_s21 = scalar_lea.vmem %s1733_s0, %s967_s10  ;;  %v1530_v31 = vld [vmem:[%s1735_s2] ss:$0 sm:$0xff]  ;;  %s1598_s4 = scalar_lea.vmem (%p1470_p4), %s1736_s3, %s1113_s27  }
  0x14   : > { %v1091_v8 = vld [vmem:[%s1506_s21 + $0x20] sm:$0xff]  ;;  %v1096_v9 = vld [vmem:[%s1506_s21 + $0x48] sm:$0xff]  ;;  %v1101_v10 = vld [vmem:[%s1506_s21 + $0x70] sm:$0xff] }
  0x15   : > { %1226 = vmatpush.bf16.msra.mxu1 %v1111_v1  ;;  %1227 = vmatpush.bf16.msra.mxu2 %v1111_v1  ;;  %v1087_v11 = vld [vmem:[%s1506_s21] sm:$0xff]  ;;  %v1092_v12 = vld [vmem:[%s1506_s21 + $0x28] sm:$0xff]  ;;  %v1097_v13 = vld [vmem:[%s1506_s21 + $0x50] sm:$0xff] }
  0x16   : > { %1228 = vmatpush.bf16.msra.mxu3 %v1111_v1  ;;  %410 = vmatpush.bf16.msra.mxu0 %v1111_v1  ;;  %v1102_v14 = vld [vmem:[%s1506_s21 + $0x78] sm:$0xff]  ;;  %v1088_v15 = vld [vmem:[%s1506_s21 + $0x8] sm:$0xff]  ;;  %v1093_v16 = vld [vmem:[%s1506_s21 + $0x30] sm:$0xff] }
  0x17   : > { %v1098_v17 = vld [vmem:[%s1506_s21 + $0x58] sm:$0xff]  ;;  %v1103_v18 = vld [vmem:[%s1506_s21 + $0x80] sm:$0xff]  ;;  %v1089_v19 = vld [vmem:[%s1506_s21 + $0x10] sm:$0xff] }
  0x18   : > { %v1094_v20 = vld [vmem:[%s1506_s21 + $0x38] sm:$0xff]  ;;  %v1099_v21 = vld [vmem:[%s1506_s21 + $0x60] sm:$0xff]  ;;  %v1104_v22 = vld [vmem:[%s1506_s21 + $0x88] sm:$0xff] }
  0x19   : > { %1229 = vmatpush.bf16.msra.mxu1 %v1110_v2  ;;  %1230 = vmatpush.bf16.msra.mxu2 %v1110_v2  ;;  %v1090_v23 = vld [vmem:[%s1506_s21 + $0x18] sm:$0xff]  ;;  %v228_v24 = vld [vmem:[%s1506_s21 + $0x90] sm:$0xf]  ;;  %v1095_v26 = vld [vmem:[%s1506_s21 + $0x40] sm:$0xff] }
  0x1a   : > { %1231 = vmatpush.bf16.msra.mxu3 %v1110_v2  ;;  %411 = vmatpush.bf16.msra.mxu0 %v1110_v2  ;;  %v322_v25 = vunpack.c.l.b16 %v228_v24  ;;  %v1100_v27 = vld [vmem:[%s1506_s21 + $0x68] sm:$0xff] }
  0x1c   : > { %v341_v28 = vpack.c.b16 %v322_v25, %v322_v25 }
  0x1d   : > { %1232 = vmatpush.bf16.msra.mxu1 %v1109_v3  ;;  %1233 = vmatpush.bf16.msra.mxu2 %v1109_v3 }
  0x1e   : > { %1234 = vmatpush.bf16.msra.mxu3 %v1109_v3  ;;  %412 = vmatpush.bf16.msra.mxu0 %v1109_v3 }
  0x21   : > { %1235 = vmatpush.bf16.msra.mxu1 %v1108_v4  ;;  %1236 = vmatpush.bf16.msra.mxu2 %v1108_v4 }
  0x22   : > { %1237 = vmatpush.bf16.msra.mxu3 %v1108_v4  ;;  %413 = vmatpush.bf16.msra.mxu0 %v1108_v4 }
  0x25   : > { %1238 = vmatpush.bf16.msra.mxu1 %v1107_v5  ;;  %1239 = vmatpush.bf16.msra.mxu2 %v1107_v5 }
  0x26   : > { %1240 = vmatpush.bf16.msra.mxu3 %v1107_v5  ;;  %414 = vmatpush.bf16.msra.mxu0 %v1107_v5 }
  0x29   : > { %1241 = vmatpush.bf16.msra.mxu1 %v1106_v6  ;;  %1242 = vmatpush.bf16.msra.mxu2 %v1106_v6 }
  0x2a   : > { %1243 = vmatpush.bf16.msra.mxu3 %v1106_v6  ;;  %415 = vmatpush.bf16.msra.mxu0 %v1106_v6 }
  0x2d   : > { %1244 = vmatpush.bf16.msra.mxu1 %v1105_v7  ;;  %1245 = vmatpush.bf16.msra.mxu2 %v1105_v7 }
  0x2e   : > { %1246 = vmatpush.bf16.msra.mxu3 %v1105_v7  ;;  %416 = vmatpush.bf16.msra.mxu0 %v1105_v7 }
  0x30   : > { %437 = vmatmul.bf16.vlgmr.msra.gmra.mxu1 %v1091_v8  ;;  %462 = vmatmul.bf16.vlgmr.msra.gmra.mxu2 %v1096_v9 }
  0x31   : > { %487 = vmatmul.bf16.vlgmr.msra.gmra.mxu3 %v1101_v10  ;;  %417 = vmatmul.bf16.vlgmr.msra.gmra.mxu0 %v1087_v11 }
  0x40   : > { %442 = vmatmul.bf16.gmra.mxu1 %v1092_v12  ;;  %467 = vmatmul.bf16.gmra.mxu2 %v1097_v13 }
  0x41   : > { %492 = vmatmul.bf16.gmra.mxu3 %v1102_v14  ;;  %422 = vmatmul.bf16.gmra.mxu0 %v1088_v15 }
  0x50   : > { %447 = vmatmul.bf16.gmra.mxu1 %v1093_v16  ;;  %472 = vmatmul.bf16.gmra.mxu2 %v1098_v17 }
  0x51   : > { %497 = vmatmul.bf16.gmra.mxu3 %v1103_v18  ;;  %427 = vmatmul.bf16.gmra.mxu0 %v1089_v19 }
  0x60   : > { %452 = vmatmul.bf16.gmra.mxu1 %v1094_v20  ;;  %477 = vmatmul.bf16.gmra.mxu2 %v1099_v21 }
  0x61   : > { %502 = vmatmul.bf16.gmra.mxu3 %v1104_v22  ;;  %432 = vmatmul.bf16.gmra.mxu0 %v1090_v23 }
  0x70   : > { %457 = vmatmul.bf16.gmra.mxu1 %v1095_v26  ;;  %482 = vmatmul.bf16.gmra.mxu2 %v1100_v27 }
  0x71   : > { %507 = vmatmul.bf16.gmra.mxu3 %v341_v28 }
  0xad   : > { %v438_v29 = vpop.f32.mrf.mxu1 }
  0xae   : > { %v418_v30 = vpop.f32.mrf.mxu0  ;;  %v439_v34 = vadd.f32 %v1530_v31, %v438_v29 }
  0xaf   : > { %v419_v33 = vadd.f32 %v1530_v31, %v418_v30 }
  0xb0   : > { %v520_v41 = vmax.f32 %v439_v34, 0.0 }
  0xb1   : > { %v512_v39 = vmax.f32 %v419_v33, 0.0 }
  0xb3   : > { %v463_v32 = vpop.f32.mrf.mxu2 }
  0xb4   : > { %v488_v35 = vpop.f32.mrf.mxu3  ;;  %v464_v45 = vadd.f32 %v1530_v31, %v463_v32 }
  0xb5   : > { %v440_v36 = vpop.f32.mrf.mxu1  ;;  %v489_v43 = vadd.f32 %v1530_v31, %v488_v35 }
  0xb6   : > { %v441_v37 = vadd.f32 %v1530_v31, %v440_v36  ;;  %v420_v38 = vpop.f32.mrf.mxu0  ;;  %v530_v54 = vmax.f32 %v464_v45, 0.0 }
  0xb7   : > { %v421_v40 = vadd.f32 %v1530_v31, %v420_v38  ;;  %v540_v51 = vmax.f32 %v489_v43, 0.0 }
  0xb8   : > { %v521_v42 = vmax.f32 %v441_v37, 0.0 }
  0xb9   : > { %v513_v44 = vmax.f32 %v421_v40, 0.0 }
  0xba   : > { %v1139_v46 = vpack.c.bf16 %v521_v42, %v520_v41 }
  0xbb   : > { %v465_v47 = vpop.f32.mrf.mxu2  ;;  %v1119_v48 = vpack.c.bf16 %v513_v44, %v512_v39 }
  0xbc   : > { %1209 = vst [vmem:[%s1539_s12 + $0x20] sm:$0xff] %v1139_v46   ;;  %v466_v49 = vadd.f32 %v1530_v31, %v465_v47  ;;  %v490_v50 = vpop.f32.mrf.mxu3 }
  0xbd   : > { %v491_v52 = vadd.f32 %v1530_v31, %v490_v50  ;;  %v443_v53 = vpop.f32.mrf.mxu1  ;;  %1120 = vst [vmem:[%s1539_s12] sm:$0xff] %v1119_v48  }
  0xbe   : > { %v531_v55 = vmax.f32 %v466_v49, 0.0  ;;  %v423_v56 = vpop.f32.mrf.mxu0  ;;  %v444_v62 = vadd.f32 %v1530_v31, %v443_v53 }
  0xbf   : > { %v541_v57 = vmax.f32 %v491_v52, 0.0  ;;  %v424_v61 = vadd.f32 %v1530_v31, %v423_v56 }
  0xc0   : > { %v1164_v58 = vpack.c.bf16 %v531_v55, %v530_v54  ;;  %v522_v5 = vmax.f32 %v444_v62, 0.0 }
  0xc1   : > { %v1189_v59 = vpack.c.bf16 %v541_v57, %v540_v51  ;;  %v514_v3 = vmax.f32 %v424_v61, 0.0 }
  0xc2   : > { %1214 = vst [vmem:[%s1539_s12 + $0x48] sm:$0xff] %v1164_v58  }
  0xc3   : > { %1219 = vst [vmem:[%s1539_s12 + $0x70] sm:$0xff] %v1189_v59   ;;  %v468_v60 = vpop.f32.mrf.mxu2 }
  0xc4   : > { %v493_v63 = vpop.f32.mrf.mxu3  ;;  %v469_v9 = vadd.f32 %v1530_v31, %v468_v60 }
  0xc5   : > { %v445_v0 = vpop.f32.mrf.mxu1  ;;  %v494_v7 = vadd.f32 %v1530_v31, %v493_v63 }
  0xc6   : > { %v446_v1 = vadd.f32 %v1530_v31, %v445_v0  ;;  %v425_v2 = vpop.f32.mrf.mxu0  ;;  %v532_v18 = vmax.f32 %v469_v9, 0.0 }
  0xc7   : > { %v426_v4 = vadd.f32 %v1530_v31, %v425_v2  ;;  %v542_v15 = vmax.f32 %v494_v7, 0.0 }
  0xc8   : > { %v523_v6 = vmax.f32 %v446_v1, 0.0 }
  0xc9   : > { %v515_v8 = vmax.f32 %v426_v4, 0.0 }
  0xca   : > { %v1144_v10 = vpack.c.bf16 %v523_v6, %v522_v5 }
  0xcb   : > { %v470_v11 = vpop.f32.mrf.mxu2  ;;  %v1124_v12 = vpack.c.bf16 %v515_v8, %v514_v3 }
  0xcc   : > { %1210 = vst [vmem:[%s1539_s12 + $0x28] sm:$0xff] %v1144_v10   ;;  %v471_v13 = vadd.f32 %v1530_v31, %v470_v11  ;;  %v495_v14 = vpop.f32.mrf.mxu3 }
  0xcd   : > { %v496_v16 = vadd.f32 %v1530_v31, %v495_v14  ;;  %v448_v17 = vpop.f32.mrf.mxu1  ;;  %1206 = vst [vmem:[%s1539_s12 + $0x8] sm:$0xff] %v1124_v12  }
  0xce   : > { %v533_v19 = vmax.f32 %v471_v13, 0.0  ;;  %v428_v20 = vpop.f32.mrf.mxu0  ;;  %v449_v26 = vadd.f32 %v1530_v31, %v448_v17 }
  0xcf   : > { %v543_v21 = vmax.f32 %v496_v16, 0.0  ;;  %v429_v25 = vadd.f32 %v1530_v31, %v428_v20 }
  0xd0   : > { %v1169_v22 = vpack.c.bf16 %v533_v19, %v532_v18  ;;  %v524_v34 = vmax.f32 %v449_v26, 0.0 }
  0xd1   : > { %v1194_v23 = vpack.c.bf16 %v543_v21, %v542_v15  ;;  %v516_v32 = vmax.f32 %v429_v25, 0.0 }
  0xd2   : > { %1215 = vst [vmem:[%s1539_s12 + $0x50] sm:$0xff] %v1169_v22  }
  0xd3   : > { %1220 = vst [vmem:[%s1539_s12 + $0x78] sm:$0xff] %v1194_v23   ;;  %v473_v24 = vpop.f32.mrf.mxu2 }
  0xd4   : > { %v498_v27 = vpop.f32.mrf.mxu3  ;;  %v474_v38 = vadd.f32 %v1530_v31, %v473_v24 }
  0xd5   : > { %v450_v28 = vpop.f32.mrf.mxu1  ;;  %v499_v36 = vadd.f32 %v1530_v31, %v498_v27 }
  0xd6   : > { %v451_v29 = vadd.f32 %v1530_v31, %v450_v28  ;;  %v430_v30 = vpop.f32.mrf.mxu0  ;;  %v534_v47 = vmax.f32 %v474_v38, 0.0 }
  0xd7   : > { %v431_v33 = vadd.f32 %v1530_v31, %v430_v30  ;;  %v544_v44 = vmax.f32 %v499_v36, 0.0 }
  0xd8   : > { %v525_v35 = vmax.f32 %v451_v29, 0.0 }
  0xd9   : > { %v517_v37 = vmax.f32 %v431_v33, 0.0 }
  0xda   : > { %v1149_v39 = vpack.c.bf16 %v525_v35, %v524_v34 }
  0xdb   : > { %v475_v40 = vpop.f32.mrf.mxu2  ;;  %v1129_v41 = vpack.c.bf16 %v517_v37, %v516_v32 }
  0xdc   : > { %1211 = vst [vmem:[%s1539_s12 + $0x30] sm:$0xff] %v1149_v39   ;;  %v476_v42 = vadd.f32 %v1530_v31, %v475_v40  ;;  %v500_v43 = vpop.f32.mrf.mxu3 }
  0xdd   : > { %v501_v45 = vadd.f32 %v1530_v31, %v500_v43  ;;  %v453_v46 = vpop.f32.mrf.mxu1  ;;  %1207 = vst [vmem:[%s1539_s12 + $0x10] sm:$0xff] %v1129_v41  }
  0xde   : > { %v535_v48 = vmax.f32 %v476_v42, 0.0  ;;  %v433_v49 = vpop.f32.mrf.mxu0  ;;  %v454_v55 = vadd.f32 %v1530_v31, %v453_v46 }
  0xdf   : > { %v545_v50 = vmax.f32 %v501_v45, 0.0  ;;  %v434_v54 = vadd.f32 %v1530_v31, %v433_v49 }
  0xe0   : > { %v1174_v51 = vpack.c.bf16 %v535_v48, %v534_v47  ;;  %v526_v62 = vmax.f32 %v454_v55, 0.0 }
  0xe1   : > { %v1199_v52 = vpack.c.bf16 %v545_v50, %v544_v44  ;;  %v518_v60 = vmax.f32 %v434_v54, 0.0 }
  0xe2   : > { %1216 = vst [vmem:[%s1539_s12 + $0x58] sm:$0xff] %v1174_v51  }
  0xe3   : > { %1221 = vst [vmem:[%s1539_s12 + $0x80] sm:$0xff] %v1199_v52   ;;  %v478_v53 = vpop.f32.mrf.mxu2 }
  0xe4   : > { %v503_v56 = vpop.f32.mrf.mxu3  ;;  %v479_v2 = vadd.f32 %v1530_v31, %v478_v53 }
  0xe5   : > { %v455_v57 = vpop.f32.mrf.mxu1  ;;  %v504_v0 = vadd.f32 %v1530_v31, %v503_v56 }
  0xe6   : > { %v456_v58 = vadd.f32 %v1530_v31, %v455_v57  ;;  %v435_v59 = vpop.f32.mrf.mxu0  ;;  %v536_v11 = vmax.f32 %v479_v2, 0.0 }
  0xe7   : > { %v436_v61 = vadd.f32 %v1530_v31, %v435_v59  ;;  %v546_v8 = vmax.f32 %v504_v0, 0.0 }
  0xe8   : > { %v527_v63 = vmax.f32 %v456_v58, 0.0 }
  0xe9   : > { %v519_v1 = vmax.f32 %v436_v61, 0.0 }
  0xea   : > { %v1154_v3 = vpack.c.bf16 %v527_v63, %v526_v62 }
  0xeb   : > { %v480_v4 = vpop.f32.mrf.mxu2  ;;  %v1134_v5 = vpack.c.bf16 %v519_v1, %v518_v60 }
  0xec   : > { %1212 = vst [vmem:[%s1539_s12 + $0x38] sm:$0xff] %v1154_v3   ;;  %v481_v6 = vadd.f32 %v1530_v31, %v480_v4  ;;  %v505_v7 = vpop.f32.mrf.mxu3 }
  0xed   : > { %v506_v9 = vadd.f32 %v1530_v31, %v505_v7  ;;  %v458_v10 = vpop.f32.mrf.mxu1  ;;  %1208 = vst [vmem:[%s1539_s12 + $0x18] sm:$0xff] %v1134_v5  }
  0xee   : > { %v537_v12 = vmax.f32 %v481_v6, 0.0  ;;  %v459_v17 = vadd.f32 %v1530_v31, %v458_v10 }
  0xef   : > { %v547_v13 = vmax.f32 %v506_v9, 0.0 }
  0xf0   : > { %v1179_v14 = vpack.c.bf16 %v537_v12, %v536_v11  ;;  %v528_v23 = vmax.f32 %v459_v17, 0.0 }
  0xf1   : > { %v1204_v15 = vpack.c.bf16 %v547_v13, %v546_v8 }
  0xf2   : > { %1217 = vst [vmem:[%s1539_s12 + $0x60] sm:$0xff] %v1179_v14  }
  0xf3   : > { %1222 = vst [vmem:[%s1539_s12 + $0x88] sm:$0xff] %v1204_v15   ;;  %v483_v16 = vpop.f32.mrf.mxu2 }
  0xf4   : > { %v508_v18 = vpop.f32.mrf.mxu3  ;;  %v484_v26 = vadd.f32 %v1530_v31, %v483_v16 }
  0xf5   : > { %v509_v19 = vadd.f32 %v1530_v31, %v508_v18  ;;  %v460_v20 = vpop.f32.mrf.mxu1 }
  0xf6   : > { %v461_v21 = vadd.f32 %v1530_v31, %v460_v20  ;;  %v538_v32 = vmax.f32 %v484_v26, 0.0 }
  0xf7   : > { %v548_v22 = vmax.f32 %v509_v19, 0.0 }
  0xf8   : > { %v529_v24 = vmax.f32 %v461_v21, 0.0 }
  0xf9   : > { %v585_v25 = vpack.c.bf16 %v548_v22, %v548_v22 }
  0xfa   : > { %v1159_v27 = vpack.c.bf16 %v529_v24, %v528_v23 }
  0xfb   : > { %622 = vst [vmem:[%s1539_s12 + $0x90] sm:$0xf] %v585_v25  ;;  %v485_v28 = vpop.f32.mrf.mxu2 }
  0xfc   : > { %1213 = vst [vmem:[%s1539_s12 + $0x40] sm:$0xff] %v1159_v27   ;;  %v486_v29 = vadd.f32 %v1530_v31, %v485_v28  ;;  %v510_v30 = vpop.f32.mrf.mxu3 }
  0xfe   : > { %v539_v33 = vmax.f32 %v486_v29, 0.0  ;;  %629 = sbr.rel (!%p1470_p4) target bundleno = 323 (0x143), region = 36 }
 0x100   : > { %v1184_v34 = vpack.c.bf16 %v539_v33, %v538_v32 }
 0x102   : > { %1218 = vst [vmem:[%s1539_s12 + $0x68] sm:$0xff] %v1184_v34  }
 0x103   : > { %s1747_s26 = smov (!%p632_p8, %s631_s26), 37 }
 0x104   : > { %s1072_s5 = sshll.u32 %s1747_s26, 2 }
 0x105   : > { %p1075_p9 = scmp.eq.s32.totalorder %s1072_s5, 0 }
 0x106   : > { %s1604_s6 = sshrl.u32 (!%p1075_p9), %s1747_s26, 5 }
 0x107   : > { %640 = sbr.rel (%p1075_p9) target bundleno = 323 (0x143), region = 40  ;;  %p1076_p10 = scmp.le.s32.totalorder (!%p1075_p9), %s1604_s6, 0 }
 0x10c   : > { %919 = sbr.rel (%p1076_p10) target bundleno = 306 (0x132), region = 112  ;;  %s1738_s15 = smov (!%p1076_p10), %s1598_s4 }
 0x10d   : > { %s1739_s20 = smov (!%p1076_p10), %s1539_s12  ;;  %s1613_s29 = smov (!%p1076_p10), 0  }
 0x10e   : > { %s1615_s7 = smov (!%p1076_p10), 0  }
 0x111 LB: >> { %v657_v31 = vld [vmem:[%s1399_s20] sm:$0xf]  ;;  %v659_v35 = vld [vmem:[%s1399_s20 + $0x4] sm:$0xf]  ;;  %v661_v36 = vld [vmem:[%s1399_s20 + $0x8] sm:$0xf]  ;;  %s1407_s7 = sphi %s1615_s7, %s651_s7   ;;  %s1403_s29 = sphi %s1613_s29, %s1742_s29   ;;  %s1399_s20 = sphi %s1739_s20, %s1741_s20   ;;  %s1395_s15 = sphi %s1738_s15, %s1740_s15  }
 0x112   : >> { %658 = vst [vmem:[%s1395_s15] sm:$0xf] %v657_v31  ;;  %v663_v37 = vld [vmem:[%s1399_s20 + $0xc] sm:$0xf]  ;;  %v665_v38 = vld [vmem:[%s1399_s20 + $0x10] sm:$0xf]  ;;  %s721_s8 = sadd.s32 1, %s1403_s29 }
 0x113   : >> { %660 = vst [vmem:[%s1395_s15 + $0x4] sm:$0xf] %v659_v35  ;;  %v667_v39 = vld [vmem:[%s1399_s20 + $0x14] sm:$0xf]  ;;  %v669_v40 = vld [vmem:[%s1399_s20 + $0x18] sm:$0xf]  ;;  %p722_p11 = scmp.ge.s32.totalorder %s721_s8, %s1604_s6 }
 0x114   : >> { %662 = vst [vmem:[%s1395_s15 + $0x8] sm:$0xf] %v661_v36  ;;  %v671_v41 = vld [vmem:[%s1399_s20 + $0x1c] sm:$0xf]  ;;  %v673_v42 = vld [vmem:[%s1399_s20 + $0x20] sm:$0xf] }
 0x115   : >> { %664 = vst [vmem:[%s1395_s15 + $0xc] sm:$0xf] %v663_v37  ;;  %v675_v43 = vld [vmem:[%s1399_s20 + $0x24] sm:$0xf]  ;;  %v677_v44 = vld [vmem:[%s1399_s20 + $0x28] sm:$0xf] }
 0x116   : >> { %666 = vst [vmem:[%s1395_s15 + $0x10] sm:$0xf] %v665_v38  ;;  %v679_v45 = vld [vmem:[%s1399_s20 + $0x2c] sm:$0xf]  ;;  %v681_v46 = vld [vmem:[%s1399_s20 + $0x30] sm:$0xf] }
 0x117   : >> { %668 = vst [vmem:[%s1395_s15 + $0x14] sm:$0xf] %v667_v39  ;;  %v683_v47 = vld [vmem:[%s1399_s20 + $0x34] sm:$0xf]  ;;  %v685_v48 = vld [vmem:[%s1399_s20 + $0x38] sm:$0xf] }
 0x118   : >> { %670 = vst [vmem:[%s1395_s15 + $0x18] sm:$0xf] %v669_v40  ;;  %v687_v49 = vld [vmem:[%s1399_s20 + $0x3c] sm:$0xf]  ;;  %v689_v50 = vld [vmem:[%s1399_s20 + $0x40] sm:$0xf] }
 0x119   : >> { %672 = vst [vmem:[%s1395_s15 + $0x1c] sm:$0xf] %v671_v41  ;;  %v691_v51 = vld [vmem:[%s1399_s20 + $0x44] sm:$0xf]  ;;  %s1749_s8 = smov (%p722_p11, %s721_s8), 0  ;;  %s651_s7 = sadd.s32 1, %s1407_s7  }
 0x11a   : >> { %674 = vst [vmem:[%s1395_s15 + $0x20] sm:$0xf] %v673_v42  ;;  %v693_v52 = vld [vmem:[%s1399_s20 + $0x48] sm:$0xf]  ;;  %v695_v53 = vld [vmem:[%s1399_s20 + $0x4c] sm:$0xf]  ;;  %p650_p12 = scmp.ge.s32.totalorder %s651_s7, %s1604_s6  ;;  %s1742_s29 = smov %s1749_s8 }
 0x11b   : >> { %676 = vst [vmem:[%s1395_s15 + $0x24] sm:$0xf] %v675_v43  ;;  %s1077_s9 = sshll.u32 %s1749_s8, 7  ;;  %v697_v54 = vld [vmem:[%s1399_s20 + $0x50] sm:$0xf] }
 0x11c   : >> { %678 = vst [vmem:[%s1395_s15 + $0x28] sm:$0xf] %v677_v44  ;;  %s1674_s10 = scalar_lea.vmem %s1539_s12, %s1077_s9 [#allocation2]   ;;  %s727_s11 = scalar_lea.vmem %s1598_s4, %s1077_s9   ;;  %v699_v55 = vld [vmem:[%s1399_s20 + $0x54] sm:$0xf]  ;;  %v701_v56 = vld [vmem:[%s1399_s20 + $0x58] sm:$0xf] }
 0x11d   : >> { %680 = vst [vmem:[%s1395_s15 + $0x2c] sm:$0xf] %v679_v45  ;;  %v703_v57 = vld [vmem:[%s1399_s20 + $0x5c] sm:$0xf]  ;;  %v705_v58 = vld [vmem:[%s1399_s20 + $0x60] sm:$0xf] }
 0x11e   : >> { %682 = vst [vmem:[%s1395_s15 + $0x30] sm:$0xf] %v681_v46  ;;  %v707_v59 = vld [vmem:[%s1399_s20 + $0x64] sm:$0xf]  ;;  %v709_v60 = vld [vmem:[%s1399_s20 + $0x68] sm:$0xf] }
 0x11f   : >> { %684 = vst [vmem:[%s1395_s15 + $0x34] sm:$0xf] %v683_v47  ;;  %v711_v61 = vld [vmem:[%s1399_s20 + $0x6c] sm:$0xf]  ;;  %v713_v62 = vld [vmem:[%s1399_s20 + $0x70] sm:$0xf] }
 0x120   : >> { %686 = vst [vmem:[%s1395_s15 + $0x38] sm:$0xf] %v685_v48  ;;  %v715_v63 = vld [vmem:[%s1399_s20 + $0x74] sm:$0xf]  ;;  %v717_v0 = vld [vmem:[%s1399_s20 + $0x78] sm:$0xf] }
 0x121   : >> { %688 = vst [vmem:[%s1395_s15 + $0x3c] sm:$0xf] %v687_v49  ;;  %v719_v1 = vld [vmem:[%s1399_s20 + $0x7c] sm:$0xf]  ;;  %s1741_s20 = smov %s1674_s10 }
 0x122   : >> { %690 = vst [vmem:[%s1395_s15 + $0x40] sm:$0xf] %v689_v50 }
 0x123   : >> { %692 = vst [vmem:[%s1395_s15 + $0x44] sm:$0xf] %v691_v51 }
 0x124   : >> { %694 = vst [vmem:[%s1395_s15 + $0x48] sm:$0xf] %v693_v52 }
 0x125   : >> { %696 = vst [vmem:[%s1395_s15 + $0x4c] sm:$0xf] %v695_v53 }
 0x126   : >> { %698 = vst [vmem:[%s1395_s15 + $0x50] sm:$0xf] %v697_v54 }
 0x127   : >> { %700 = vst [vmem:[%s1395_s15 + $0x54] sm:$0xf] %v699_v55 }
 0x128   : >> { %702 = vst [vmem:[%s1395_s15 + $0x58] sm:$0xf] %v701_v56 }
 0x129   : >> { %704 = vst [vmem:[%s1395_s15 + $0x5c] sm:$0xf] %v703_v57 }
 0x12a   : >> { %706 = vst [vmem:[%s1395_s15 + $0x60] sm:$0xf] %v705_v58 }
 0x12b   : >> { %708 = vst [vmem:[%s1395_s15 + $0x64] sm:$0xf] %v707_v59 }
 0x12c   : >> { %710 = vst [vmem:[%s1395_s15 + $0x68] sm:$0xf] %v709_v60 }
 0x12d   : >> { %712 = vst [vmem:[%s1395_s15 + $0x6c] sm:$0xf] %v711_v61  ;;  %653 = sbr.rel (!%p650_p12) target bundleno = 273 (0x111), region = 118 }
 0x12e   : >> { %714 = vst [vmem:[%s1395_s15 + $0x70] sm:$0xf] %v713_v62 }
 0x12f   : >> { %716 = vst [vmem:[%s1395_s15 + $0x74] sm:$0xf] %v715_v63 }
 0x130   : >> { %718 = vst [vmem:[%s1395_s15 + $0x78] sm:$0xf] %v717_v0 }
 0x131   : >> { %720 = vst [vmem:[%s1395_s15 + $0x7c] sm:$0xf] %v719_v1  ;;  %s1740_s15 = smov %s727_s11 }
 0x132 PF: > { %s1715_s14 = sand.u32 31, %s1747_s26   ;;  %s1114_s17 = sshll.u32 %s1604_s6, 7 }
 0x133   : > { %s732_s18 = scalar_lea.vmem %s1539_s12, %s1114_s17 [#allocation2]   ;;  %s734_s21 = scalar_lea.vmem %s1598_s4, %s1114_s17  }
 0x134   : > { %p1082_p13 = scmp.le.s32.totalorder %s1715_s14, 0 }
 0x135   : > { %s1409_s22 = smov (!%p1082_p13), %s734_s21   ;;  %s1413_s23 = smov (!%p1082_p13), %s732_s18  }
 0x136   : > { %933 = sbr.rel (%p1082_p13) target bundleno = 323 (0x143), region = 123  ;;  %s1417_s24 = smov (!%p1082_p13), 0  }
 0x137   : > { %s1421_s25 = smov (!%p1082_p13), 0  }
 0x13b LB: >> { %v744_v2 = vld [vmem:[%s1415_s23] sm:$0xf]  ;;  %s746_s26 = sadd.s32 1, %s1419_s24  ;;  %s738_s25 = sadd.s32 1, %s1423_s25   ;;  %s1423_s25 = sphi %s1421_s25, %s738_s25   ;;  %s1419_s24 = sphi %s1417_s24, %s1418_s24   ;;  %s1415_s23 = sphi %s1413_s23, %s751_s23   ;;  %s1411_s22 = sphi %s1409_s22, %s752_s22  }
 0x13c   : >> { %745 = vst [vmem:[%s1411_s22] sm:$0xf] %v744_v2  ;;  %p747_p0 = scmp.ge.s32.totalorder %s746_s26, %s1715_s14  ;;  %p737_p1 = scmp.ge.s32.totalorder %s738_s25, %s1715_s14 }
 0x13e   : >> { %s1751_s26 = smov (%p747_p0, %s746_s26), 0  ;;  %740 = sbr.rel (!%p737_p1) target bundleno = 315 (0x13b), region = 129 }
 0x13f   : >> { %s1083_s12 = sshll.u32 %s1751_s26, 2  ;;  %s1418_s24 = smov %s1751_s26  }
 0x140   : >> { %s751_s23 = scalar_lea.vmem %s732_s18, %s1083_s12 [#allocation2]   ;;  %s752_s22 = scalar_lea.vmem %s734_s21, %s1083_s12  }
 0x143 PF: > { %p10_p2 = scmp.ge.s32.totalorder %s1460_s16, 4   ;;  %s1743_s12 = smov %s1387_s13 }
 0x144   : > { %s1744_s13 = smov %s1468_s19  ;;  %s1745_s14 = smov %s1460_s16 }
 0x145   :  { %12 = sbr.rel (!%p10_p2) target bundleno = 2 (0x2), region = 140 }

// kernel: resnet_forward.28
= control target key start
LH: loop header
LB: loop body
LE: loop exit
PB: predicated region body
PF: predicated region fallthrough
CT: control target
= control target key end

     0   :  { %vm163_vm0 = vcmask 1043456   ;;  %vm129_vm1 = vcmask 588800   ;;  %s591_s1 = inlined_call_operand.vmem [shape: bf16[72,128], index: 1, kind: input, shape index: {}]   ;;  %s592_s2 = inlined_call_operand.vmem [shape: f32[1,128], index: 2, kind: input, shape index: {}]   ;;  %s593_s0 = inlined_call_operand.vmem [shape: bf16[162,72], index: 0, kind: input, shape index: {}]   ;;  %s594_s3 = inlined_call_operand.vmem [shape: bf16[162,128], index: 3, kind: output, shape index: {}]  }
   0x1   :  { %v44_v0 = vld [vmem:[%s591_s1 + $0x20] sm:$0xf]  ;;  %v377_v4 = vld [vmem:[%s591_s1 + $0x18] sm:$0xff]  ;;  %v376_v5 = vld [vmem:[%s591_s1 + $0x10] sm:$0xff] }
   0x2   :  { %v119_v1 = vunpack.c.l.b16 %v44_v0  ;;  %v375_v6 = vld [vmem:[%s591_s1 + $0x8] sm:$0xff]  ;;  %v374_v7 = vld [vmem:[%s591_s1] sm:$0xff]  ;;  %v367_v9 = vld [vmem:[%s593_s0 + $0x18] sm:$0xff] }
   0x3   :  { %v364_v8 = vld [vmem:[%s593_s0] sm:$0xff]  ;;  %v370_v10 = vld [vmem:[%s593_s0 + $0x30] sm:$0xff]  ;;  %v373_v11 = vld [vmem:[%s593_s0 + $0x48] sm:$0xff] }
   0x4   :  { %v124_v2 = vpack.c.b16 %v119_v1, %v119_v1  ;;  %v35_v12 = vld [vmem:[%s593_s0 + $0x50] sm:$0x1]  ;;  %v365_v14 = vld [vmem:[%s593_s0 + $0x8] sm:$0xff]  ;;  %v368_v15 = vld [vmem:[%s593_s0 + $0x20] sm:$0xff] }
   0x5   :  { %v90_v13 = vunpack.c.l.b16 %v35_v12  ;;  %v371_v16 = vld [vmem:[%s593_s0 + $0x38] sm:$0xff]  ;;  %v366_v18 = vld [vmem:[%s593_s0 + $0x10] sm:$0xff]  ;;  %v369_v19 = vld [vmem:[%s593_s0 + $0x28] sm:$0xff] }
   0x6   :  { %v165_v3 = vsel %vm163_vm0, %v124_v2, 0  ;;  %v372_v20 = vld [vmem:[%s593_s0 + $0x40] sm:$0xff] }
   0x7   :  { %170 = vmatpush.bf16.msra.mxu0 %v165_v3  ;;  %437 = vmatpush.bf16.msra.mxu1 %v165_v3  ;;  %v101_v17 = vpack.c.b16 %v90_v13, %v90_v13  ;;  %v535_v23 = vld [vmem:[%s592_s2] ss:$0 sm:$0xff] }
   0x8   :  { %438 = vmatpush.bf16.msra.mxu2 %v165_v3  ;;  %439 = vmatpush.bf16.msra.mxu3 %v165_v3 }
   0xb   :  { %171 = vmatpush.bf16.msra.mxu0 %v377_v4  ;;  %440 = vmatpush.bf16.msra.mxu1 %v377_v4 }
   0xc   :  { %441 = vmatpush.bf16.msra.mxu2 %v377_v4  ;;  %442 = vmatpush.bf16.msra.mxu3 %v377_v4 }
   0xf   :  { %172 = vmatpush.bf16.msra.mxu0 %v376_v5  ;;  %443 = vmatpush.bf16.msra.mxu1 %v376_v5 }
  0x10   :  { %444 = vmatpush.bf16.msra.mxu2 %v376_v5  ;;  %445 = vmatpush.bf16.msra.mxu3 %v376_v5 }
  0x13   :  { %173 = vmatpush.bf16.msra.mxu0 %v375_v6  ;;  %446 = vmatpush.bf16.msra.mxu1 %v375_v6 }
  0x14   :  { %447 = vmatpush.bf16.msra.mxu2 %v375_v6  ;;  %448 = vmatpush.bf16.msra.mxu3 %v375_v6 }
  0x17   :  { %174 = vmatpush.bf16.msra.mxu0 %v374_v7  ;;  %449 = vmatpush.bf16.msra.mxu1 %v374_v7 }
  0x18   :  { %450 = vmatpush.bf16.msra.mxu2 %v374_v7  ;;  %451 = vmatpush.bf16.msra.mxu3 %v374_v7 }
  0x1a   :  { %353 = vmatmul.msk.bf16.vlgmr.msra.gmra.mxu0 %vm129_vm1, %v364_v8  ;;  %356 = vmatmul.msk.bf16.vlgmr.msra.gmra.mxu1 %vm129_vm1, %v367_v9 }
  0x1b   :  { %359 = vmatmul.msk.bf16.vlgmr.msra.gmra.mxu2 %vm129_vm1, %v370_v10  ;;  %362 = vmatmul.msk.bf16.vlgmr.msra.gmra.mxu3 %vm129_vm1, %v373_v11 }
  0x2a   :  { %354 = vmatmul.msk.bf16.gmra.mxu0 %vm129_vm1, %v365_v14  ;;  %357 = vmatmul.msk.bf16.gmra.mxu1 %vm129_vm1, %v368_v15 }
  0x2b   :  { %360 = vmatmul.msk.bf16.gmra.mxu2 %vm129_vm1, %v371_v16  ;;  %363 = vmatmul.msk.bf16.gmra.mxu3 %vm129_vm1, %v101_v17 }
  0x3a   :  { %355 = vmatmul.msk.bf16.gmra.mxu0 %vm129_vm1, %v366_v18  ;;  %358 = vmatmul.msk.bf16.gmra.mxu1 %vm129_vm1, %v369_v19 }
  0x3b   :  { %361 = vmatmul.msk.bf16.gmra.mxu2 %vm129_vm1, %v372_v20 }
  0x97   :  { %v176_v21 = vpop.f32.mrf.mxu0  ;;  %v191_v22 = vpop.f32.mrf.mxu1 }
  0x98   :  { %v177_v24 = vadd.f32 %v535_v23, %v176_v21  ;;  %v192_v25 = vadd.f32 %v535_v23, %v191_v22 }
  0x9a   :  { %v230_v32 = vmax.f32 %v177_v24, 0.0  ;;  %v236_v33 = vmax.f32 %v192_v25, 0.0 }
  0x9e   :  { %v206_v26 = vpop.f32.mrf.mxu2  ;;  %v221_v27 = vpop.f32.mrf.mxu3 }
  0x9f   :  { %v178_v28 = vpop.f32.mrf.mxu0  ;;  %v193_v29 = vpop.f32.mrf.mxu1  ;;  %v222_v36 = vadd.f32 %v535_v23, %v221_v27  ;;  %v207_v39 = vadd.f32 %v535_v23, %v206_v26 }
  0xa0   :  { %v179_v30 = vadd.f32 %v535_v23, %v178_v28  ;;  %v194_v31 = vadd.f32 %v535_v23, %v193_v29 }
  0xa1   :  { %v248_v45 = vmax.f32 %v222_v36, 0.0  ;;  %v242_v47 = vmax.f32 %v207_v39, 0.0 }
  0xa2   :  { %v231_v34 = vmax.f32 %v179_v30, 0.0  ;;  %v237_v35 = vmax.f32 %v194_v31, 0.0 }
  0xa4   :  { %v381_v37 = vpack.c.bf16 %v231_v34, %v230_v32  ;;  %v396_v38 = vpack.c.bf16 %v237_v35, %v236_v33 }
  0xa6   :  { %382 = vst [vmem:[%s594_s3] sm:$0xff] %v381_v37   ;;  %v208_v40 = vpop.f32.mrf.mxu2  ;;  %v223_v41 = vpop.f32.mrf.mxu3 }
  0xa7   :  { %430 = vst [vmem:[%s594_s3 + $0x18] sm:$0xff] %v396_v38   ;;  %v209_v42 = vadd.f32 %v535_v23, %v208_v40  ;;  %v181_v43 = vpop.f32.mrf.mxu0  ;;  %v196_v44 = vpop.f32.mrf.mxu1  ;;  %v224_v46 = vadd.f32 %v535_v23, %v223_v41 }
  0xa8   :  { %v182_v52 = vadd.f32 %v535_v23, %v181_v43  ;;  %v197_v53 = vadd.f32 %v535_v23, %v196_v44 }
  0xa9   :  { %v243_v48 = vmax.f32 %v209_v42, 0.0  ;;  %v249_v49 = vmax.f32 %v224_v46, 0.0 }
  0xaa   :  { %v232_v62 = vmax.f32 %v182_v52, 0.0  ;;  %v238_v63 = vmax.f32 %v197_v53, 0.0 }
  0xab   :  { %v411_v50 = vpack.c.bf16 %v243_v48, %v242_v47  ;;  %v426_v51 = vpack.c.bf16 %v249_v49, %v248_v45 }
  0xad   :  { %433 = vst [vmem:[%s594_s3 + $0x30] sm:$0xff] %v411_v50  }
  0xae   :  { %v211_v54 = vpop.f32.mrf.mxu2  ;;  %436 = vst [vmem:[%s594_s3 + $0x48] sm:$0xff] %v426_v51   ;;  %v226_v55 = vpop.f32.mrf.mxu3 }
  0xaf   :  { %v183_v56 = vpop.f32.mrf.mxu0  ;;  %v198_v57 = vpop.f32.mrf.mxu1  ;;  %v227_v58 = vadd.f32 %v535_v23, %v226_v55  ;;  %v212_v5 = vadd.f32 %v535_v23, %v211_v54 }
  0xb0   :  { %v184_v59 = vadd.f32 %v535_v23, %v183_v56  ;;  %v199_v60 = vadd.f32 %v535_v23, %v198_v57 }
  0xb1   :  { %v250_v61 = vmax.f32 %v227_v58, 0.0  ;;  %v244_v11 = vmax.f32 %v212_v5, 0.0 }
  0xb2   :  { %v233_v0 = vmax.f32 %v184_v59, 0.0  ;;  %v239_v1 = vmax.f32 %v199_v60, 0.0 }
  0xb3   :  { %v271_v2 = vpack.c.bf16 %v250_v61, %v250_v61 }
  0xb4   :  { %v386_v3 = vpack.c.bf16 %v233_v0, %v232_v62  ;;  %v401_v4 = vpack.c.bf16 %v239_v1, %v238_v63 }
  0xb5   :  { %292 = vst [vmem:[%s594_s3 + $0x50] sm:$0x1] %v271_v2 }
  0xb6   :  { %428 = vst [vmem:[%s594_s3 + $0x8] sm:$0xff] %v386_v3   ;;  %v213_v6 = vpop.f32.mrf.mxu2  ;;  %v228_v7 = vpop.f32.mrf.mxu3 }
  0xb7   :  { %431 = vst [vmem:[%s594_s3 + $0x20] sm:$0xff] %v401_v4   ;;  %v214_v8 = vadd.f32 %v535_v23, %v213_v6  ;;  %v186_v9 = vpop.f32.mrf.mxu0  ;;  %v201_v10 = vpop.f32.mrf.mxu1 }
  0xb8   :  { %v187_v14 = vadd.f32 %v535_v23, %v186_v9  ;;  %v202_v15 = vadd.f32 %v535_v23, %v201_v10 }
  0xb9   :  { %v245_v12 = vmax.f32 %v214_v8, 0.0 }
  0xba   :  { %v234_v21 = vmax.f32 %v187_v14, 0.0  ;;  %v240_v22 = vmax.f32 %v202_v15, 0.0 }
  0xbb   :  { %v416_v13 = vpack.c.bf16 %v245_v12, %v244_v11 }
  0xbd   :  { %434 = vst [vmem:[%s594_s3 + $0x38] sm:$0xff] %v416_v13  }
  0xbe   :  { %v216_v16 = vpop.f32.mrf.mxu2 }
  0xbf   :  { %v188_v17 = vpop.f32.mrf.mxu0  ;;  %v203_v18 = vpop.f32.mrf.mxu1  ;;  %v217_v28 = vadd.f32 %v535_v23, %v216_v16 }
  0xc0   :  { %v189_v19 = vadd.f32 %v535_v23, %v188_v17  ;;  %v204_v20 = vadd.f32 %v535_v23, %v203_v18 }
  0xc1   :  { %v246_v31 = vmax.f32 %v217_v28, 0.0 }
  0xc2   :  { %v235_v24 = vmax.f32 %v189_v19, 0.0  ;;  %v241_v25 = vmax.f32 %v204_v20, 0.0 }
  0xc4   :  { %v391_v26 = vpack.c.bf16 %v235_v24, %v234_v21  ;;  %v406_v27 = vpack.c.bf16 %v241_v25, %v240_v22 }
  0xc6   :  { %429 = vst [vmem:[%s594_s3 + $0x10] sm:$0xff] %v391_v26   ;;  %v218_v29 = vpop.f32.mrf.mxu2 }
  0xc7   :  { %432 = vst [vmem:[%s594_s3 + $0x28] sm:$0xff] %v406_v27   ;;  %v219_v30 = vadd.f32 %v535_v23, %v218_v29 }
  0xc9   :  { %v247_v32 = vmax.f32 %v219_v30, 0.0 }
  0xcb   :  { %v421_v33 = vpack.c.bf16 %v247_v32, %v246_v31 }
  0xcd   :  { %435 = vst [vmem:[%s594_s3 + $0x40] sm:$0xff] %v421_v33  }

// kernel: resnet_forward.29
= control target key start
LH: loop header
LB: loop body
LE: loop exit
PB: predicated region body
PF: predicated region fallthrough
CT: control target
= control target key end

     0   :  { %s1061_s1 = inlined_call_operand.vmem [shape: bf16[128,128], index: 1, kind: input, shape index: {}]   ;;  %s1062_s4 = inlined_call_operand.vmem [shape: bf16[128,128], index: 4, kind: input, shape index: {}]   ;;  %s1063_s2 = inlined_call_operand.vmem [shape: f32[1,128], index: 2, kind: input, shape index: {}]   ;;  %s1064_s0 = inlined_call_operand.vmem [shape: bf16[162,128], index: 0, kind: input, shape index: {}]   ;;  %s1065_s3 = inlined_call_operand.vmem [shape: bf16[162,128], index: 3, kind: input, shape index: {}]   ;;  %s1066_s5 = inlined_call_operand.vmem [shape: f32[1,128], index: 5, kind: input, shape index: {}]   ;;  %s1067_s6 = inlined_call_operand.vmem [shape: bf16[162,128], index: 6, kind: output, shape index: {}]  }
   0x1   :  { %v725_v0 = vld [vmem:[%s1061_s1 + $0x38] sm:$0xff]  ;;  %v724_v2 = vld [vmem:[%s1061_s1 + $0x30] sm:$0xff]  ;;  %v723_v4 = vld [vmem:[%s1061_s1 + $0x28] sm:$0xff] }
   0x2   :  { %v743_v1 = vld [vmem:[%s1062_s4 + $0x38] sm:$0xff]  ;;  %176 = vmatpush.bf16.msra.mxu0 %v725_v0  ;;  %803 = vmatpush.bf16.msra.mxu2 %v725_v0  ;;  %v742_v3 = vld [vmem:[%s1062_s4 + $0x30] sm:$0xff]  ;;  %v741_v5 = vld [vmem:[%s1062_s4 + $0x28] sm:$0xff] }
   0x3   :  { %388 = vmatpush.bf16.msra.mxu1 %v743_v1  ;;  %811 = vmatpush.bf16.msra.mxu3 %v743_v1  ;;  %v722_v6 = vld [vmem:[%s1061_s1 + $0x20] sm:$0xff]  ;;  %v721_v8 = vld [vmem:[%s1061_s1 + $0x18] sm:$0xff]  ;;  %v720_v10 = vld [vmem:[%s1061_s1 + $0x10] sm:$0xff] }
   0x4   :  { %v740_v7 = vld [vmem:[%s1062_s4 + $0x20] sm:$0xff]  ;;  %v739_v9 = vld [vmem:[%s1062_s4 + $0x18] sm:$0xff]  ;;  %v738_v11 = vld [vmem:[%s1062_s4 + $0x10] sm:$0xff] }
   0x5   :  { %v719_v12 = vld [vmem:[%s1061_s1 + $0x8] sm:$0xff]  ;;  %v718_v14 = vld [vmem:[%s1061_s1] sm:$0xff]  ;;  %v732_v19 = vld [vmem:[%s1065_s3 + $0x30] sm:$0xff] }
   0x6   :  { %177 = vmatpush.bf16.msra.mxu0 %v724_v2  ;;  %804 = vmatpush.bf16.msra.mxu2 %v724_v2  ;;  %v737_v13 = vld [vmem:[%s1062_s4 + $0x8] sm:$0xff]  ;;  %v736_v15 = vld [vmem:[%s1062_s4] sm:$0xff]  ;;  %v714_v21 = vld [vmem:[%s1064_s0 + $0x30] sm:$0xff] }
   0x7   :  { %389 = vmatpush.bf16.msra.mxu1 %v742_v3  ;;  %812 = vmatpush.bf16.msra.mxu3 %v742_v3  ;;  %v708_v16 = vld [vmem:[%s1064_s0] sm:$0xff]  ;;  %v713_v17 = vld [vmem:[%s1064_s0 + $0x28] sm:$0xff]  ;;  %v733_v23 = vld [vmem:[%s1065_s3 + $0x38] sm:$0xff] }
   0x8   :  { %v726_v18 = vld [vmem:[%s1065_s3] sm:$0xff]  ;;  %v709_v20 = vld [vmem:[%s1064_s0 + $0x8] sm:$0xff]  ;;  %v710_v24 = vld [vmem:[%s1064_s0 + $0x10] sm:$0xff] }
   0x9   :  { %v727_v22 = vld [vmem:[%s1065_s3 + $0x8] sm:$0xff]  ;;  %v715_v25 = vld [vmem:[%s1064_s0 + $0x38] sm:$0xff]  ;;  %v728_v26 = vld [vmem:[%s1065_s3 + $0x10] sm:$0xff] }
   0xa   :  { %178 = vmatpush.bf16.msra.mxu0 %v723_v4  ;;  %805 = vmatpush.bf16.msra.mxu2 %v723_v4  ;;  %v734_v27 = vld [vmem:[%s1065_s3 + $0x40] sm:$0xff]  ;;  %v711_v28 = vld [vmem:[%s1064_s0 + $0x18] sm:$0xff]  ;;  %v735_v31 = vld [vmem:[%s1065_s3 + $0x48] sm:$0xff] }
   0xb   :  { %390 = vmatpush.bf16.msra.mxu1 %v741_v5  ;;  %813 = vmatpush.bf16.msra.mxu3 %v741_v5  ;;  %v716_v29 = vld [vmem:[%s1064_s0 + $0x40] sm:$0xff]  ;;  %v729_v30 = vld [vmem:[%s1065_s3 + $0x18] sm:$0xff]  ;;  %v259_v32 = vld [vmem:[%s1065_s3 + $0x50] sm:$0x1] }
   0xc   :  { %v317_v33 = vunpack.c.l.b16 %v259_v32  ;;  %v712_v34 = vld [vmem:[%s1064_s0 + $0x20] sm:$0xff]  ;;  %v717_v35 = vld [vmem:[%s1064_s0 + $0x48] sm:$0xff]  ;;  %v43_v38 = vld [vmem:[%s1064_s0 + $0x50] sm:$0x1] }
   0xd   :  { %v730_v36 = vld [vmem:[%s1065_s3 + $0x20] sm:$0xff]  ;;  %v105_v39 = vunpack.c.l.b16 %v43_v38  ;;  %v731_v41 = vld [vmem:[%s1065_s3 + $0x28] sm:$0xff] }
   0xe   :  { %179 = vmatpush.bf16.msra.mxu0 %v722_v6  ;;  %806 = vmatpush.bf16.msra.mxu2 %v722_v6  ;;  %v328_v37 = vpack.c.b16 %v317_v33, %v317_v33  ;;  %v973_v42 = vld [vmem:[%s1063_s2] ss:$0 sm:$0xff] }
   0xf   :  { %391 = vmatpush.bf16.msra.mxu1 %v740_v7  ;;  %814 = vmatpush.bf16.msra.mxu3 %v740_v7  ;;  %v116_v40 = vpack.c.b16 %v105_v39, %v105_v39  ;;  %v981_v48 = vld [vmem:[%s1066_s5] ss:$0 sm:$0xff] }
  0x12   :  { %180 = vmatpush.bf16.msra.mxu0 %v721_v8  ;;  %807 = vmatpush.bf16.msra.mxu2 %v721_v8 }
  0x13   :  { %392 = vmatpush.bf16.msra.mxu1 %v739_v9  ;;  %815 = vmatpush.bf16.msra.mxu3 %v739_v9 }
  0x16   :  { %181 = vmatpush.bf16.msra.mxu0 %v720_v10  ;;  %808 = vmatpush.bf16.msra.mxu2 %v720_v10 }
  0x17   :  { %393 = vmatpush.bf16.msra.mxu1 %v738_v11  ;;  %816 = vmatpush.bf16.msra.mxu3 %v738_v11 }
  0x1a   :  { %182 = vmatpush.bf16.msra.mxu0 %v719_v12  ;;  %809 = vmatpush.bf16.msra.mxu2 %v719_v12 }
  0x1b   :  { %394 = vmatpush.bf16.msra.mxu1 %v737_v13  ;;  %817 = vmatpush.bf16.msra.mxu3 %v737_v13 }
  0x1e   :  { %183 = vmatpush.bf16.msra.mxu0 %v718_v14  ;;  %810 = vmatpush.bf16.msra.mxu2 %v718_v14 }
  0x1f   :  { %395 = vmatpush.bf16.msra.mxu1 %v736_v15  ;;  %818 = vmatpush.bf16.msra.mxu3 %v736_v15 }
  0x21   :  { %184 = vmatmul.bf16.vlgmr.msra.gmra.mxu0 %v708_v16  ;;  %209 = vmatmul.bf16.vlgmr.msra.gmra.mxu2 %v713_v17 }
  0x22   :  { %396 = vmatmul.bf16.vlgmr.msra.gmra.mxu1 %v726_v18  ;;  %426 = vmatmul.bf16.vlgmr.msra.gmra.mxu3 %v732_v19 }
  0x31   :  { %189 = vmatmul.bf16.gmra.mxu0 %v709_v20  ;;  %214 = vmatmul.bf16.gmra.mxu2 %v714_v21 }
  0x32   :  { %401 = vmatmul.bf16.gmra.mxu1 %v727_v22  ;;  %431 = vmatmul.bf16.gmra.mxu3 %v733_v23 }
  0x41   :  { %194 = vmatmul.bf16.gmra.mxu0 %v710_v24  ;;  %219 = vmatmul.bf16.gmra.mxu2 %v715_v25 }
  0x42   :  { %406 = vmatmul.bf16.gmra.mxu1 %v728_v26  ;;  %436 = vmatmul.bf16.gmra.mxu3 %v734_v27 }
  0x51   :  { %199 = vmatmul.bf16.gmra.mxu0 %v711_v28  ;;  %224 = vmatmul.bf16.gmra.mxu2 %v716_v29 }
  0x52   :  { %411 = vmatmul.bf16.gmra.mxu1 %v729_v30  ;;  %441 = vmatmul.bf16.gmra.mxu3 %v735_v31 }
  0x61   :  { %204 = vmatmul.bf16.gmra.mxu0 %v712_v34  ;;  %229 = vmatmul.bf16.gmra.mxu2 %v717_v35 }
  0x62   :  { %416 = vmatmul.bf16.gmra.mxu1 %v730_v36  ;;  %446 = vmatmul.bf16.gmra.mxu3 %v328_v37 }
  0x71   :  { %234 = vmatmul.bf16.gmra.mxu2 %v116_v40 }
  0x72   :  { %421 = vmatmul.bf16.gmra.mxu1 %v731_v41 }
  0x9e   :  { %v185_v43 = vpop.f32.mrf.mxu0 }
  0x9f   :  { %v397_v44 = vpop.f32.mrf.mxu1  ;;  %v186_v45 = vadd.f32 %v973_v42, %v185_v43 }
  0xa1   :  { %v451_v47 = vadd.f32 %v397_v44, %v186_v45 }
  0xa3   :  { %v476_v53 = vadd.f32 %v981_v48, %v451_v47 }
  0xa4   :  { %v976_v46 = vpop.f32.mrf.mxu2 }
  0xa5   :  { %v427_v49 = vpop.f32.mrf.mxu3  ;;  %v497_v57 = vmax.f32 %v476_v53, 0.0 }
  0xa6   :  { %v187_v50 = vpop.f32.mrf.mxu0 }
  0xa7   :  { %v188_v51 = vadd.f32 %v973_v42, %v187_v50  ;;  %v399_v52 = vpop.f32.mrf.mxu1 }
  0xa9   :  { %v452_v54 = vadd.f32 %v399_v52, %v188_v51 }
  0xab   :  { %v477_v55 = vadd.f32 %v981_v48, %v452_v54 }
  0xac   :  { %v986_v56 = vpop.f32.mrf.mxu2 }
  0xad   :  { %v498_v58 = vmax.f32 %v477_v55, 0.0  ;;  %v429_v59 = vpop.f32.mrf.mxu3 }
  0xae   :  { %v190_v60 = vpop.f32.mrf.mxu0 }
  0xaf   :  { %v747_v61 = vpack.c.bf16 %v498_v58, %v497_v57  ;;  %v402_v62 = vpop.f32.mrf.mxu1  ;;  %v191_v63 = vadd.f32 %v973_v42, %v190_v60 }
  0xb1   :  { %748 = vst [vmem:[%s1067_s6] sm:$0xff] %v747_v61   ;;  %v453_v1 = vadd.f32 %v402_v62, %v191_v63 }
  0xb3   :  { %v478_v7 = vadd.f32 %v981_v48, %v453_v1 }
  0xb4   :  { %v215_v0 = vpop.f32.mrf.mxu2 }
  0xb5   :  { %v432_v2 = vpop.f32.mrf.mxu3  ;;  %v216_v4 = vadd.f32 %v973_v42, %v215_v0  ;;  %v499_v12 = vmax.f32 %v478_v7, 0.0 }
  0xb6   :  { %v192_v3 = vpop.f32.mrf.mxu0 }
  0xb7   :  { %v193_v5 = vadd.f32 %v973_v42, %v192_v3  ;;  %v404_v6 = vpop.f32.mrf.mxu1  ;;  %v463_v9 = vadd.f32 %v427_v49, %v216_v4 }
  0xb9   :  { %v454_v8 = vadd.f32 %v404_v6, %v193_v5  ;;  %v488_v17 = vadd.f32 %v981_v48, %v463_v9 }
  0xbb   :  { %v479_v10 = vadd.f32 %v981_v48, %v454_v8  ;;  %v509_v23 = vmax.f32 %v488_v17, 0.0 }
  0xbc   :  { %v217_v11 = vpop.f32.mrf.mxu2 }
  0xbd   :  { %v500_v13 = vmax.f32 %v479_v10, 0.0  ;;  %v218_v14 = vadd.f32 %v973_v42, %v217_v11  ;;  %v434_v15 = vpop.f32.mrf.mxu3 }
  0xbe   :  { %v195_v16 = vpop.f32.mrf.mxu0 }
  0xbf   :  { %v752_v18 = vpack.c.bf16 %v500_v13, %v499_v12  ;;  %v464_v19 = vadd.f32 %v429_v59, %v218_v14  ;;  %v407_v20 = vpop.f32.mrf.mxu1  ;;  %v196_v22 = vadd.f32 %v973_v42, %v195_v16 }
  0xc1   :  { %794 = vst [vmem:[%s1067_s6 + $0x8] sm:$0xff] %v752_v18   ;;  %v489_v21 = vadd.f32 %v981_v48, %v464_v19  ;;  %v455_v27 = vadd.f32 %v407_v20, %v196_v22 }
  0xc3   :  { %v510_v24 = vmax.f32 %v489_v21, 0.0  ;;  %v480_v33 = vadd.f32 %v981_v48, %v455_v27 }
  0xc4   :  { %v220_v25 = vpop.f32.mrf.mxu2 }
  0xc5   :  { %v777_v26 = vpack.c.bf16 %v510_v24, %v509_v23  ;;  %v437_v28 = vpop.f32.mrf.mxu3  ;;  %v221_v30 = vadd.f32 %v973_v42, %v220_v25  ;;  %v501_v38 = vmax.f32 %v480_v33, 0.0 }
  0xc6   :  { %v197_v29 = vpop.f32.mrf.mxu0 }
  0xc7   :  { %799 = vst [vmem:[%s1067_s6 + $0x30] sm:$0xff] %v777_v26   ;;  %v198_v31 = vadd.f32 %v973_v42, %v197_v29  ;;  %v409_v32 = vpop.f32.mrf.mxu1  ;;  %v465_v35 = vadd.f32 %v432_v2, %v221_v30 }
  0xc9   :  { %v456_v34 = vadd.f32 %v409_v32, %v198_v31  ;;  %v490_v44 = vadd.f32 %v981_v48, %v465_v35 }
  0xcb   :  { %v481_v36 = vadd.f32 %v981_v48, %v456_v34  ;;  %v511_v52 = vmax.f32 %v490_v44, 0.0 }
  0xcc   :  { %v222_v37 = vpop.f32.mrf.mxu2 }
  0xcd   :  { %v502_v39 = vmax.f32 %v481_v36, 0.0  ;;  %v223_v40 = vadd.f32 %v973_v42, %v222_v37  ;;  %v439_v41 = vpop.f32.mrf.mxu3 }
  0xce   :  { %v200_v43 = vpop.f32.mrf.mxu0 }
  0xcf   :  { %v757_v45 = vpack.c.bf16 %v502_v39, %v501_v38  ;;  %v466_v47 = vadd.f32 %v434_v15, %v223_v40  ;;  %v412_v49 = vpop.f32.mrf.mxu1  ;;  %v201_v51 = vadd.f32 %v973_v42, %v200_v43  ;;  %v211_v39 = vadd.f32 %v973_v42, %v976_v46 }
  0xd1   :  { %795 = vst [vmem:[%s1067_s6 + $0x10] sm:$0xff] %v757_v45   ;;  %v491_v50 = vadd.f32 %v981_v48, %v466_v47  ;;  %v457_v57 = vadd.f32 %v412_v49, %v201_v51  ;;  %v213_v49 = vadd.f32 %v973_v42, %v986_v56 }
  0xd3   :  { %v512_v53 = vmax.f32 %v491_v50, 0.0  ;;  %v482_v63 = vadd.f32 %v981_v48, %v457_v57 }
  0xd4   :  { %v225_v54 = vpop.f32.mrf.mxu2 }
  0xd5   :  { %v782_v55 = vpack.c.bf16 %v512_v53, %v511_v52  ;;  %v442_v58 = vpop.f32.mrf.mxu3  ;;  %v226_v60 = vadd.f32 %v973_v42, %v225_v54  ;;  %v503_v4 = vmax.f32 %v482_v63, 0.0 }
  0xd6   :  { %v202_v59 = vpop.f32.mrf.mxu0 }
  0xd7   :  { %800 = vst [vmem:[%s1067_s6 + $0x38] sm:$0xff] %v782_v55   ;;  %v203_v61 = vadd.f32 %v973_v42, %v202_v59  ;;  %v414_v62 = vpop.f32.mrf.mxu1  ;;  %v467_v1 = vadd.f32 %v437_v28, %v226_v60 }
  0xd9   :  { %v458_v0 = vadd.f32 %v414_v62, %v203_v61  ;;  %v492_v9 = vadd.f32 %v981_v48, %v467_v1 }
  0xdb   :  { %v483_v2 = vadd.f32 %v981_v48, %v458_v0  ;;  %v513_v15 = vmax.f32 %v492_v9, 0.0 }
  0xdc   :  { %v227_v3 = vpop.f32.mrf.mxu2 }
  0xdd   :  { %v504_v5 = vmax.f32 %v483_v2, 0.0  ;;  %v228_v6 = vadd.f32 %v973_v42, %v227_v3  ;;  %v444_v7 = vpop.f32.mrf.mxu3 }
  0xde   :  { %v205_v8 = vpop.f32.mrf.mxu0 }
  0xdf   :  { %v762_v10 = vpack.c.bf16 %v504_v5, %v503_v4  ;;  %v468_v11 = vadd.f32 %v439_v41, %v228_v6  ;;  %v417_v12 = vpop.f32.mrf.mxu1  ;;  %v206_v14 = vadd.f32 %v973_v42, %v205_v8 }
  0xe1   :  { %796 = vst [vmem:[%s1067_s6 + $0x18] sm:$0xff] %v762_v10   ;;  %v493_v13 = vadd.f32 %v981_v48, %v468_v11  ;;  %v459_v19 = vadd.f32 %v417_v12, %v206_v14 }
  0xe3   :  { %v514_v16 = vmax.f32 %v493_v13, 0.0  ;;  %v484_v25 = vadd.f32 %v981_v48, %v459_v19 }
  0xe4   :  { %v230_v17 = vpop.f32.mrf.mxu2 }
  0xe5   :  { %v787_v18 = vpack.c.bf16 %v514_v16, %v513_v15  ;;  %v447_v20 = vpop.f32.mrf.mxu3  ;;  %v231_v22 = vadd.f32 %v973_v42, %v230_v17  ;;  %v505_v30 = vmax.f32 %v484_v25, 0.0 }
  0xe6   :  { %v207_v21 = vpop.f32.mrf.mxu0 }
  0xe7   :  { %801 = vst [vmem:[%s1067_s6 + $0x40] sm:$0xff] %v787_v18   ;;  %v208_v23 = vadd.f32 %v973_v42, %v207_v21  ;;  %v419_v24 = vpop.f32.mrf.mxu1  ;;  %v469_v27 = vadd.f32 %v442_v58, %v231_v22 }
  0xe9   :  { %v460_v26 = vadd.f32 %v419_v24, %v208_v23  ;;  %v494_v34 = vadd.f32 %v981_v48, %v469_v27 }
  0xeb   :  { %v485_v28 = vadd.f32 %v981_v48, %v460_v26  ;;  %v515_v40 = vmax.f32 %v494_v34, 0.0 }
  0xec   :  { %v232_v29 = vpop.f32.mrf.mxu2 }
  0xed   :  { %v506_v31 = vmax.f32 %v485_v28, 0.0  ;;  %v233_v32 = vadd.f32 %v973_v42, %v232_v29  ;;  %v449_v33 = vpop.f32.mrf.mxu3 }
  0xef   :  { %v767_v35 = vpack.c.bf16 %v506_v31, %v505_v30  ;;  %v470_v36 = vadd.f32 %v444_v7, %v233_v32  ;;  %v422_v37 = vpop.f32.mrf.mxu1 }
  0xf0   :  { %v461_v43 = vadd.f32 %v422_v37, %v211_v39 }
  0xf1   :  { %797 = vst [vmem:[%s1067_s6 + $0x20] sm:$0xff] %v767_v35   ;;  %v495_v38 = vadd.f32 %v981_v48, %v470_v36 }
  0xf2   :  { %v486_v52 = vadd.f32 %v981_v48, %v461_v43 }
  0xf3   :  { %v516_v41 = vmax.f32 %v495_v38, 0.0 }
  0xf4   :  { %v235_v44 = vpop.f32.mrf.mxu2  ;;  %v507_v57 = vmax.f32 %v486_v52, 0.0 }
  0xf5   :  { %v792_v45 = vpack.c.bf16 %v516_v41, %v515_v40  ;;  %v236_v47 = vadd.f32 %v973_v42, %v235_v44 }
  0xf7   :  { %802 = vst [vmem:[%s1067_s6 + $0x48] sm:$0xff] %v792_v45   ;;  %v471_v50 = vadd.f32 %v447_v20, %v236_v47  ;;  %v424_v51 = vpop.f32.mrf.mxu1 }
  0xf8   :  { %v462_v53 = vadd.f32 %v424_v51, %v213_v49 }
  0xf9   :  { %v496_v46 = vadd.f32 %v981_v48, %v471_v50 }
  0xfa   :  { %v487_v54 = vadd.f32 %v981_v48, %v462_v53 }
  0xfb   :  { %v517_v55 = vmax.f32 %v496_v46, 0.0 }
  0xfc   :  { %v508_v58 = vmax.f32 %v487_v54, 0.0  ;;  %v237_v59 = vpop.f32.mrf.mxu2 }
  0xfd   :  { %v538_v60 = vpack.c.bf16 %v517_v55, %v517_v55 }
  0xfe   :  { %v772_v61 = vpack.c.bf16 %v508_v58, %v507_v57 }
  0xff   :  { %559 = vst [vmem:[%s1067_s6 + $0x50] sm:$0x1] %v538_v60 }
 0x100   :  { %798 = vst [vmem:[%s1067_s6 + $0x28] sm:$0xff] %v772_v61  }

// kernel: resnet_forward.30
= control target key start
LH: loop header
LB: loop body
LE: loop exit
PB: predicated region body
PF: predicated region fallthrough
CT: control target
= control target key end

     0   :  { %s607_s1 = inlined_call_operand.vmem [shape: bf16[128,128], index: 1, kind: input, shape index: {}]   ;;  %s608_s2 = inlined_call_operand.vmem [shape: f32[1,128], index: 2, kind: input, shape index: {}]   ;;  %s609_s0 = inlined_call_operand.vmem [shape: bf16[162,128], index: 0, kind: input, shape index: {}]   ;;  %s610_s3 = inlined_call_operand.vmem [shape: bf16[162,128], index: 3, kind: output, shape index: {}]  }
   0x1   :  { %v386_v0 = vld [vmem:[%s607_s1 + $0x38] sm:$0xff]  ;;  %v385_v1 = vld [vmem:[%s607_s1 + $0x30] sm:$0xff]  ;;  %v384_v2 = vld [vmem:[%s607_s1 + $0x28] sm:$0xff] }
   0x2   :  { %446 = vmatpush.bf16.msra.mxu1 %v386_v0  ;;  %447 = vmatpush.bf16.msra.mxu2 %v386_v0  ;;  %v383_v3 = vld [vmem:[%s607_s1 + $0x20] sm:$0xff]  ;;  %v382_v4 = vld [vmem:[%s607_s1 + $0x18] sm:$0xff]  ;;  %v381_v5 = vld [vmem:[%s607_s1 + $0x10] sm:$0xff] }
   0x3   :  { %448 = vmatpush.bf16.msra.mxu3 %v386_v0  ;;  %167 = vmatpush.bf16.msra.mxu0 %v386_v0  ;;  %v380_v6 = vld [vmem:[%s607_s1 + $0x8] sm:$0xff]  ;;  %v379_v7 = vld [vmem:[%s607_s1] sm:$0xff]  ;;  %v371_v8 = vld [vmem:[%s609_s0 + $0x10] sm:$0xff] }
   0x4   :  { %v374_v9 = vld [vmem:[%s609_s0 + $0x28] sm:$0xff]  ;;  %v377_v10 = vld [vmem:[%s609_s0 + $0x40] sm:$0xff]  ;;  %v372_v12 = vld [vmem:[%s609_s0 + $0x18] sm:$0xff] }
   0x5   :  { %v369_v11 = vld [vmem:[%s609_s0] sm:$0xff]  ;;  %v375_v13 = vld [vmem:[%s609_s0 + $0x30] sm:$0xff]  ;;  %v378_v14 = vld [vmem:[%s609_s0 + $0x48] sm:$0xff] }
   0x6   :  { %449 = vmatpush.bf16.msra.mxu1 %v385_v1  ;;  %450 = vmatpush.bf16.msra.mxu2 %v385_v1  ;;  %v370_v15 = vld [vmem:[%s609_s0 + $0x8] sm:$0xff]  ;;  %v34_v16 = vld [vmem:[%s609_s0 + $0x50] sm:$0x1]  ;;  %v373_v18 = vld [vmem:[%s609_s0 + $0x20] sm:$0xff] }
   0x7   :  { %451 = vmatpush.bf16.msra.mxu3 %v385_v1  ;;  %168 = vmatpush.bf16.msra.mxu0 %v385_v1  ;;  %v96_v17 = vunpack.c.l.b16 %v34_v16  ;;  %v376_v19 = vld [vmem:[%s609_s0 + $0x38] sm:$0xff]  ;;  %v551_v23 = vld [vmem:[%s608_s2] ss:$0 sm:$0xff] }
   0x9   :  { %v107_v20 = vpack.c.b16 %v96_v17, %v96_v17 }
   0xa   :  { %452 = vmatpush.bf16.msra.mxu1 %v384_v2  ;;  %453 = vmatpush.bf16.msra.mxu2 %v384_v2 }
   0xb   :  { %454 = vmatpush.bf16.msra.mxu3 %v384_v2  ;;  %169 = vmatpush.bf16.msra.mxu0 %v384_v2 }
   0xe   :  { %455 = vmatpush.bf16.msra.mxu1 %v383_v3  ;;  %456 = vmatpush.bf16.msra.mxu2 %v383_v3 }
   0xf   :  { %457 = vmatpush.bf16.msra.mxu3 %v383_v3  ;;  %170 = vmatpush.bf16.msra.mxu0 %v383_v3 }
  0x12   :  { %458 = vmatpush.bf16.msra.mxu1 %v382_v4  ;;  %459 = vmatpush.bf16.msra.mxu2 %v382_v4 }
  0x13   :  { %460 = vmatpush.bf16.msra.mxu3 %v382_v4  ;;  %171 = vmatpush.bf16.msra.mxu0 %v382_v4 }
  0x16   :  { %461 = vmatpush.bf16.msra.mxu1 %v381_v5  ;;  %462 = vmatpush.bf16.msra.mxu2 %v381_v5 }
  0x17   :  { %463 = vmatpush.bf16.msra.mxu3 %v381_v5  ;;  %172 = vmatpush.bf16.msra.mxu0 %v381_v5 }
  0x1a   :  { %464 = vmatpush.bf16.msra.mxu1 %v380_v6  ;;  %465 = vmatpush.bf16.msra.mxu2 %v380_v6 }
  0x1b   :  { %466 = vmatpush.bf16.msra.mxu3 %v380_v6  ;;  %173 = vmatpush.bf16.msra.mxu0 %v380_v6 }
  0x1e   :  { %467 = vmatpush.bf16.msra.mxu1 %v379_v7  ;;  %468 = vmatpush.bf16.msra.mxu2 %v379_v7 }
  0x1f   :  { %469 = vmatpush.bf16.msra.mxu3 %v379_v7  ;;  %174 = vmatpush.bf16.msra.mxu0 %v379_v7 }
  0x21   :  { %185 = vmatmul.bf16.vlgmr.msra.gmra.mxu1 %v371_v8  ;;  %200 = vmatmul.bf16.vlgmr.msra.gmra.mxu2 %v374_v9 }
  0x22   :  { %215 = vmatmul.bf16.vlgmr.msra.gmra.mxu3 %v377_v10  ;;  %175 = vmatmul.bf16.vlgmr.msra.gmra.mxu0 %v369_v11 }
  0x31   :  { %190 = vmatmul.bf16.gmra.mxu1 %v372_v12  ;;  %205 = vmatmul.bf16.gmra.mxu2 %v375_v13 }
  0x32   :  { %220 = vmatmul.bf16.gmra.mxu3 %v378_v14  ;;  %180 = vmatmul.bf16.gmra.mxu0 %v370_v15 }
  0x41   :  { %195 = vmatmul.bf16.gmra.mxu1 %v373_v18  ;;  %210 = vmatmul.bf16.gmra.mxu2 %v376_v19 }
  0x42   :  { %225 = vmatmul.bf16.gmra.mxu3 %v107_v20 }
  0x9e   :  { %v186_v21 = vpop.f32.mrf.mxu1 }
  0x9f   :  { %v176_v22 = vpop.f32.mrf.mxu0  ;;  %v187_v26 = vadd.f32 %v551_v23, %v186_v21 }
  0xa0   :  { %v177_v25 = vadd.f32 %v551_v23, %v176_v22 }
  0xa1   :  { %v234_v33 = vmax.f32 %v187_v26, 0.0 }
  0xa2   :  { %v230_v31 = vmax.f32 %v177_v25, 0.0 }
  0xa4   :  { %v201_v24 = vpop.f32.mrf.mxu2 }
  0xa5   :  { %v216_v27 = vpop.f32.mrf.mxu3  ;;  %v202_v37 = vadd.f32 %v551_v23, %v201_v24 }
  0xa6   :  { %v188_v28 = vpop.f32.mrf.mxu1  ;;  %v217_v35 = vadd.f32 %v551_v23, %v216_v27 }
  0xa7   :  { %v189_v29 = vadd.f32 %v551_v23, %v188_v28  ;;  %v178_v30 = vpop.f32.mrf.mxu0  ;;  %v240_v46 = vmax.f32 %v202_v37, 0.0 }
  0xa8   :  { %v179_v32 = vadd.f32 %v551_v23, %v178_v30  ;;  %v246_v43 = vmax.f32 %v217_v35, 0.0 }
  0xa9   :  { %v235_v34 = vmax.f32 %v189_v29, 0.0 }
  0xaa   :  { %v231_v36 = vmax.f32 %v179_v32, 0.0 }
  0xab   :  { %v400_v38 = vpack.c.bf16 %v235_v34, %v234_v33 }
  0xac   :  { %v203_v39 = vpop.f32.mrf.mxu2  ;;  %v390_v40 = vpack.c.bf16 %v231_v36, %v230_v31 }
  0xad   :  { %438 = vst [vmem:[%s610_s3 + $0x10] sm:$0xff] %v400_v38   ;;  %v204_v41 = vadd.f32 %v551_v23, %v203_v39  ;;  %v218_v42 = vpop.f32.mrf.mxu3 }
  0xae   :  { %v219_v44 = vadd.f32 %v551_v23, %v218_v42  ;;  %v191_v45 = vpop.f32.mrf.mxu1  ;;  %391 = vst [vmem:[%s610_s3] sm:$0xff] %v390_v40  }
  0xaf   :  { %v241_v47 = vmax.f32 %v204_v41, 0.0  ;;  %v181_v48 = vpop.f32.mrf.mxu0  ;;  %v192_v54 = vadd.f32 %v551_v23, %v191_v45 }
  0xb0   :  { %v247_v49 = vmax.f32 %v219_v44, 0.0  ;;  %v182_v53 = vadd.f32 %v551_v23, %v181_v48 }
  0xb1   :  { %v415_v50 = vpack.c.bf16 %v241_v47, %v240_v46  ;;  %v236_v61 = vmax.f32 %v192_v54, 0.0 }
  0xb2   :  { %v430_v51 = vpack.c.bf16 %v247_v49, %v246_v43  ;;  %v232_v59 = vmax.f32 %v182_v53, 0.0 }
  0xb3   :  { %441 = vst [vmem:[%s610_s3 + $0x28] sm:$0xff] %v415_v50  }
  0xb4   :  { %444 = vst [vmem:[%s610_s3 + $0x40] sm:$0xff] %v430_v51   ;;  %v206_v52 = vpop.f32.mrf.mxu2 }
  0xb5   :  { %v221_v55 = vpop.f32.mrf.mxu3  ;;  %v207_v1 = vadd.f32 %v551_v23, %v206_v52 }
  0xb6   :  { %v193_v56 = vpop.f32.mrf.mxu1  ;;  %v222_v63 = vadd.f32 %v551_v23, %v221_v55 }
  0xb7   :  { %v194_v57 = vadd.f32 %v551_v23, %v193_v56  ;;  %v183_v58 = vpop.f32.mrf.mxu0  ;;  %v242_v10 = vmax.f32 %v207_v1, 0.0 }
  0xb8   :  { %v184_v60 = vadd.f32 %v551_v23, %v183_v58  ;;  %v248_v7 = vmax.f32 %v222_v63, 0.0 }
  0xb9   :  { %v237_v62 = vmax.f32 %v194_v57, 0.0 }
  0xba   :  { %v233_v0 = vmax.f32 %v184_v60, 0.0 }
  0xbb   :  { %v405_v2 = vpack.c.bf16 %v237_v62, %v236_v61 }
  0xbc   :  { %v208_v3 = vpop.f32.mrf.mxu2  ;;  %v395_v4 = vpack.c.bf16 %v233_v0, %v232_v59 }
  0xbd   :  { %439 = vst [vmem:[%s610_s3 + $0x18] sm:$0xff] %v405_v2   ;;  %v209_v5 = vadd.f32 %v551_v23, %v208_v3  ;;  %v223_v6 = vpop.f32.mrf.mxu3 }
  0xbe   :  { %v224_v8 = vadd.f32 %v551_v23, %v223_v6  ;;  %v196_v9 = vpop.f32.mrf.mxu1  ;;  %437 = vst [vmem:[%s610_s3 + $0x8] sm:$0xff] %v395_v4  }
  0xbf   :  { %v243_v11 = vmax.f32 %v209_v5, 0.0  ;;  %v197_v16 = vadd.f32 %v551_v23, %v196_v9 }
  0xc0   :  { %v249_v12 = vmax.f32 %v224_v8, 0.0 }
  0xc1   :  { %v420_v13 = vpack.c.bf16 %v243_v11, %v242_v10  ;;  %v238_v22 = vmax.f32 %v197_v16, 0.0 }
  0xc2   :  { %v435_v14 = vpack.c.bf16 %v249_v12, %v248_v7 }
  0xc3   :  { %442 = vst [vmem:[%s610_s3 + $0x30] sm:$0xff] %v420_v13  }
  0xc4   :  { %445 = vst [vmem:[%s610_s3 + $0x48] sm:$0xff] %v435_v14   ;;  %v211_v15 = vpop.f32.mrf.mxu2 }
  0xc5   :  { %v226_v17 = vpop.f32.mrf.mxu3  ;;  %v212_v26 = vadd.f32 %v551_v23, %v211_v15 }
  0xc6   :  { %v227_v18 = vadd.f32 %v551_v23, %v226_v17  ;;  %v198_v19 = vpop.f32.mrf.mxu1 }
  0xc7   :  { %v199_v20 = vadd.f32 %v551_v23, %v198_v19  ;;  %v244_v31 = vmax.f32 %v212_v26, 0.0 }
  0xc8   :  { %v250_v21 = vmax.f32 %v227_v18, 0.0 }
  0xc9   :  { %v239_v24 = vmax.f32 %v199_v20, 0.0 }
  0xca   :  { %v271_v25 = vpack.c.bf16 %v250_v21, %v250_v21 }
  0xcb   :  { %v410_v27 = vpack.c.bf16 %v239_v24, %v238_v22 }
  0xcc   :  { %292 = vst [vmem:[%s610_s3 + $0x50] sm:$0x1] %v271_v25  ;;  %v213_v28 = vpop.f32.mrf.mxu2 }
  0xcd   :  { %440 = vst [vmem:[%s610_s3 + $0x20] sm:$0xff] %v410_v27   ;;  %v214_v29 = vadd.f32 %v551_v23, %v213_v28  ;;  %v228_v30 = vpop.f32.mrf.mxu3 }
  0xcf   :  { %v245_v32 = vmax.f32 %v214_v29, 0.0 }
  0xd1   :  { %v425_v33 = vpack.c.bf16 %v245_v32, %v244_v31 }
  0xd3   :  { %443 = vst [vmem:[%s610_s3 + $0x38] sm:$0xff] %v425_v33  }

// kernel: resnet_forward.31
= control target key start
LH: loop header
LB: loop body
LE: loop exit
PB: predicated region body
PF: predicated region fallthrough
CT: control target
= control target key end

     0   :  { %vm131_vm0 = vcmask 130048   ;;  %s436_s1 = inlined_call_operand.vmem [shape: bf16[144,128], index: 1, kind: input, shape index: {}]   ;;  %s437_s0 = inlined_call_operand.vmem [shape: bf16[50,144], index: 0, kind: input, shape index: {}]   ;;  %s438_s2 = inlined_call_operand.vmem [shape: f32[1,128], index: 2, kind: input, shape index: {}]   ;;  %s439_s3 = inlined_call_operand.vmem [shape: bf16[50,128], index: 3, kind: output, shape index: {}]  }
   0x1   :  { %v302_v0 = vld [vmem:[%s436_s1 + $0x38] sm:$0xff]  ;;  %v303_v1 = vld [vmem:[%s436_s1 + $0x40] sm:$0xff]  ;;  %v291_v2 = vld [vmem:[%s437_s0 + $0x14] sm:$0xf] }
   0x2   :  { %v237_v3 = vld [vmem:[%s437_s0 + $0x18] sm:$0xf0]  ;;  %144 = vmatpush.bf16.msra.mxu0 %v302_v0  ;;  %321 = vmatpush.bf16.msra.mxu2 %v302_v0  ;;  %v301_v4 = vld [vmem:[%s436_s1 + $0x30] sm:$0xff]  ;;  %v289_v6 = vld [vmem:[%s437_s0 + $0x4] sm:$0xf] }
   0x3   :  { %329 = vmatpush.bf16.msra.mxu3 %v303_v1  ;;  %v240_v5 = vor.u32 %v291_v2, %v237_v3  ;;  %179 = vmatpush.bf16.msra.mxu1 %v303_v1  ;;  %v300_v7 = vld [vmem:[%s436_s1 + $0x28] sm:$0xff]  ;;  %v299_v10 = vld [vmem:[%s436_s1 + $0x20] sm:$0xff]  ;;  %v298_v11 = vld [vmem:[%s436_s1 + $0x18] sm:$0xff] }
   0x4   :  { %v229_v8 = vld [vmem:[%s437_s0 + $0x8] sm:$0xf0]  ;;  %v293_v12 = vld [vmem:[%s437_s0 + $0x24] sm:$0xf]  ;;  %v297_v14 = vld [vmem:[%s436_s1 + $0x10] sm:$0xff] }
   0x5   :  { %v232_v9 = vor.u32 %v289_v6, %v229_v8  ;;  %v245_v13 = vld [vmem:[%s437_s0 + $0x28] sm:$0xf0]  ;;  %v295_v17 = vld [vmem:[%s436_s1] sm:$0xff]  ;;  %v290_v19 = vld [vmem:[%s437_s0 + $0x4] sm:$0xf0] }
   0x6   :  { %145 = vmatpush.bf16.msra.mxu0 %v301_v4  ;;  %322 = vmatpush.bf16.msra.mxu2 %v301_v4  ;;  %v248_v15 = vor.u32 %v293_v12, %v245_v13  ;;  %v296_v16 = vld [vmem:[%s436_s1 + $0x8] sm:$0xff]  ;;  %v227_v18 = vld [vmem:[%s437_s0] sm:$0xf]  ;;  %v21_v22 = vld [vmem:[%s437_s0 + $0x30] sm:$0x11] }
   0x7   :  { %286 = vmatmul.msk.bf16.vlgmr.msra.gmra.mxu3 %vm131_vm0, %v240_v5  ;;  %285 = vmatmul.msk.bf16.vlgmr.msra.gmra.mxu1 %vm131_vm0, %v232_v9  ;;  %v243_v20 = vld [vmem:[%s437_s0 + $0x20] sm:$0xf]  ;;  %v294_v21 = vld [vmem:[%s437_s0 + $0x24] sm:$0xf0]  ;;  %v228_v23 = vor.u32 %v290_v19, %v227_v18  ;;  %v64_v25 = vunpack.c.h.b16 %v21_v22  ;;  %v63_v27 = vunpack.c.l.b16 %v21_v22  ;;  %v235_v28 = vld [vmem:[%s437_s0 + $0x10] sm:$0xf] }
   0x8   :  { %v244_v24 = vor.u32 %v294_v21, %v243_v20  ;;  %v292_v29 = vld [vmem:[%s437_s0 + $0x14] sm:$0xf0]  ;;  %v330_v37 = vld [vmem:[%s438_s2] ss:$0 sm:$0xff] }
   0x9   :  { %v72_v26 = vpack.c.b16 %v64_v25, %v64_v25  ;;  %v236_v30 = vor.u32 %v292_v29, %v235_v28  ;;  %v71_v31 = vpack.c.b16 %v63_v27, %v63_v27 }
   0xa   :  { %146 = vmatpush.bf16.msra.mxu0 %v300_v7  ;;  %323 = vmatpush.bf16.msra.mxu2 %v300_v7 }
   0xe   :  { %147 = vmatpush.bf16.msra.mxu0 %v299_v10  ;;  %324 = vmatpush.bf16.msra.mxu2 %v299_v10 }
  0x12   :  { %148 = vmatpush.bf16.msra.mxu0 %v298_v11  ;;  %325 = vmatpush.bf16.msra.mxu2 %v298_v11 }
  0x16   :  { %149 = vmatpush.bf16.msra.mxu0 %v297_v14  ;;  %326 = vmatpush.bf16.msra.mxu2 %v297_v14 }
  0x17   :  { %287 = vmatmul.msk.bf16.gmra.mxu3 %vm131_vm0, %v248_v15 }
  0x1a   :  { %150 = vmatpush.bf16.msra.mxu0 %v296_v16  ;;  %327 = vmatpush.bf16.msra.mxu2 %v296_v16 }
  0x1e   :  { %151 = vmatpush.bf16.msra.mxu0 %v295_v17  ;;  %328 = vmatpush.bf16.msra.mxu2 %v295_v17 }
  0x21   :  { %152 = vmatmul.bf16.vlgmr.msra.gmra.mxu0 %v228_v23  ;;  %162 = vmatmul.bf16.vlgmr.msra.gmra.mxu2 %v244_v24 }
  0x27   :  { %288 = vmatmul.msk.bf16.gmra.mxu3 %vm131_vm0, %v72_v26 }
  0x31   :  { %157 = vmatmul.bf16.gmra.mxu0 %v236_v30  ;;  %167 = vmatmul.bf16.gmra.mxu2 %v71_v31 }
  0x84   :  { %v181_v35 = vpop.f32.mrf.mxu1 }
  0x8a   :  { %v186_v32 = vpop.f32.mrf.mxu3 }
  0x8c   :  { %v183_v42 = vpop.f32.mrf.mxu1 }
  0x92   :  { %v188_v33 = vpop.f32.mrf.mxu3 }
  0x9a   :  { %v191_v34 = vpop.f32.mrf.mxu3 }
  0x9e   :  { %v153_v36 = vpop.f32.mrf.mxu0 }
  0x9f   :  { %v154_v39 = vadd.f32 %v330_v37, %v153_v36 }
  0xa1   :  { %v182_v43 = vadd.f32 %v181_v35, %v154_v39 }
  0xa2   :  { %v193_v38 = vpop.f32.mrf.mxu3 }
  0xa3   :  { %v200_v48 = vmax.f32 %v182_v43, 0.0 }
  0xa4   :  { %v163_v40 = vpop.f32.mrf.mxu2 }
  0xa5   :  { %v164_v45 = vadd.f32 %v330_v37, %v163_v40 }
  0xa6   :  { %v155_v41 = vpop.f32.mrf.mxu0 }
  0xa7   :  { %v156_v44 = vadd.f32 %v330_v37, %v155_v41  ;;  %v192_v51 = vadd.f32 %v191_v34, %v164_v45 }
  0xa9   :  { %v184_v46 = vadd.f32 %v183_v42, %v156_v44  ;;  %v204_v56 = vmax.f32 %v192_v51, 0.0 }
  0xaa   :  { %v196_v47 = vpop.f32.mrf.mxu3 }
  0xab   :  { %v201_v49 = vmax.f32 %v184_v46, 0.0 }
  0xac   :  { %v165_v50 = vpop.f32.mrf.mxu2 }
  0xad   :  { %v307_v52 = vpack.c.bf16 %v201_v49, %v200_v48  ;;  %v166_v53 = vadd.f32 %v330_v37, %v165_v50 }
  0xae   :  { %v158_v54 = vpop.f32.mrf.mxu0 }
  0xaf   :  { %308 = vst [vmem:[%s439_s3] sm:$0xff] %v307_v52   ;;  %v194_v55 = vadd.f32 %v193_v38, %v166_v53  ;;  %v159_v60 = vadd.f32 %v330_v37, %v158_v54 }
  0xb1   :  { %v205_v57 = vmax.f32 %v194_v55, 0.0  ;;  %v187_v0 = vadd.f32 %v186_v32, %v159_v60 }
  0xb2   :  { %v198_v58 = vpop.f32.mrf.mxu3 }
  0xb3   :  { %v317_v59 = vpack.c.bf16 %v205_v57, %v204_v56  ;;  %v202_v5 = vmax.f32 %v187_v0, 0.0 }
  0xb4   :  { %v168_v61 = vpop.f32.mrf.mxu2 }
  0xb5   :  { %320 = vst [vmem:[%s439_s3 + $0x10] sm:$0xff] %v317_v59   ;;  %v169_v62 = vadd.f32 %v330_v37, %v168_v61 }
  0xb6   :  { %v160_v63 = vpop.f32.mrf.mxu0 }
  0xb7   :  { %v197_v1 = vadd.f32 %v196_v47, %v169_v62  ;;  %v161_v2 = vadd.f32 %v330_v37, %v160_v63 }
  0xb9   :  { %v206_v3 = vmax.f32 %v197_v1, 0.0  ;;  %v189_v4 = vadd.f32 %v188_v33, %v161_v2 }
  0xbb   :  { %v213_v6 = vpack.c.bf16 %v206_v3, %v206_v3  ;;  %v203_v7 = vmax.f32 %v189_v4, 0.0 }
  0xbc   :  { %v170_v8 = vpop.f32.mrf.mxu2 }
  0xbd   :  { %220 = vst [vmem:[%s439_s3 + $0x18] sm:$0x1] %v213_v6  ;;  %v312_v9 = vpack.c.bf16 %v203_v7, %v202_v5 }
  0xbf   :  { %319 = vst [vmem:[%s439_s3 + $0x8] sm:$0xff] %v312_v9  }

// kernel: resnet_forward.32
= control target key start
LH: loop header
LB: loop body
LE: loop exit
PB: predicated region body
PF: predicated region fallthrough
CT: control target
= control target key end

     0   :  { %s582_s1 = inlined_call_operand.vmem [shape: bf16[128,128], index: 1, kind: input, shape index: {}]   ;;  %s583_s4 = inlined_call_operand.vmem [shape: bf16[128,128], index: 4, kind: input, shape index: {}]   ;;  %s584_s2 = inlined_call_operand.vmem [shape: f32[1,128], index: 2, kind: input, shape index: {}]   ;;  %s585_s0 = inlined_call_operand.vmem [shape: bf16[50,128], index: 0, kind: input, shape index: {}]   ;;  %s586_s3 = inlined_call_operand.vmem [shape: bf16[50,128], index: 3, kind: input, shape index: {}]   ;;  %s587_s5 = inlined_call_operand.vmem [shape: f32[1,128], index: 5, kind: input, shape index: {}]   ;;  %s588_s6 = inlined_call_operand.vmem [shape: bf16[50,128], index: 6, kind: output, shape index: {}]  }
   0x1   :  { %v410_v0 = vld [vmem:[%s582_s1 + $0x38] sm:$0xff]  ;;  %v409_v2 = vld [vmem:[%s582_s1 + $0x30] sm:$0xff]  ;;  %v408_v4 = vld [vmem:[%s582_s1 + $0x28] sm:$0xff] }
   0x2   :  { %v421_v1 = vld [vmem:[%s583_s4 + $0x38] sm:$0xff]  ;;  %120 = vmatpush.bf16.msra.mxu0 %v410_v0  ;;  %439 = vmatpush.bf16.msra.mxu2 %v410_v0  ;;  %v420_v3 = vld [vmem:[%s583_s4 + $0x30] sm:$0xff]  ;;  %v419_v5 = vld [vmem:[%s583_s4 + $0x28] sm:$0xff] }
   0x3   :  { %241 = vmatpush.bf16.msra.mxu1 %v421_v1  ;;  %447 = vmatpush.bf16.msra.mxu3 %v421_v1  ;;  %v407_v6 = vld [vmem:[%s582_s1 + $0x20] sm:$0xff]  ;;  %v406_v8 = vld [vmem:[%s582_s1 + $0x18] sm:$0xff]  ;;  %v405_v10 = vld [vmem:[%s582_s1 + $0x10] sm:$0xff] }
   0x4   :  { %v418_v7 = vld [vmem:[%s583_s4 + $0x20] sm:$0xff]  ;;  %v417_v9 = vld [vmem:[%s583_s4 + $0x18] sm:$0xff]  ;;  %v416_v11 = vld [vmem:[%s583_s4 + $0x10] sm:$0xff] }
   0x5   :  { %v404_v12 = vld [vmem:[%s582_s1 + $0x8] sm:$0xff]  ;;  %v403_v14 = vld [vmem:[%s582_s1] sm:$0xff]  ;;  %v402_v17 = vld [vmem:[%s585_s0 + $0x10] sm:$0xff] }
   0x6   :  { %121 = vmatpush.bf16.msra.mxu0 %v409_v2  ;;  %440 = vmatpush.bf16.msra.mxu2 %v409_v2  ;;  %v415_v13 = vld [vmem:[%s583_s4 + $0x8] sm:$0xff]  ;;  %v414_v15 = vld [vmem:[%s583_s4] sm:$0xff]  ;;  %v413_v19 = vld [vmem:[%s586_s3 + $0x10] sm:$0xff] }
   0x7   :  { %242 = vmatpush.bf16.msra.mxu1 %v420_v3  ;;  %448 = vmatpush.bf16.msra.mxu3 %v420_v3  ;;  %v400_v16 = vld [vmem:[%s585_s0] sm:$0xff]  ;;  %v29_v20 = vld [vmem:[%s585_s0 + $0x18] sm:$0x1]  ;;  %v401_v24 = vld [vmem:[%s585_s0 + $0x8] sm:$0xff] }
   0x8   :  { %v411_v18 = vld [vmem:[%s586_s3] sm:$0xff]  ;;  %v154_v21 = vld [vmem:[%s586_s3 + $0x18] sm:$0x1]  ;;  %v63_v22 = vunpack.c.l.b16 %v29_v20  ;;  %v412_v26 = vld [vmem:[%s586_s3 + $0x8] sm:$0xff] }
   0x9   :  { %v184_v23 = vunpack.c.l.b16 %v154_v21  ;;  %v455_v28 = vld [vmem:[%s584_s2] ss:$0 sm:$0xff] }
   0xa   :  { %122 = vmatpush.bf16.msra.mxu0 %v408_v4  ;;  %441 = vmatpush.bf16.msra.mxu2 %v408_v4  ;;  %v67_v25 = vpack.c.b16 %v63_v22, %v63_v22  ;;  %v456_v34 = vld [vmem:[%s587_s5] ss:$0 sm:$0xff] }
   0xb   :  { %243 = vmatpush.bf16.msra.mxu1 %v419_v5  ;;  %449 = vmatpush.bf16.msra.mxu3 %v419_v5  ;;  %v188_v27 = vpack.c.b16 %v184_v23, %v184_v23 }
   0xe   :  { %123 = vmatpush.bf16.msra.mxu0 %v407_v6  ;;  %442 = vmatpush.bf16.msra.mxu2 %v407_v6 }
   0xf   :  { %244 = vmatpush.bf16.msra.mxu1 %v418_v7  ;;  %450 = vmatpush.bf16.msra.mxu3 %v418_v7 }
  0x12   :  { %124 = vmatpush.bf16.msra.mxu0 %v406_v8  ;;  %443 = vmatpush.bf16.msra.mxu2 %v406_v8 }
  0x13   :  { %245 = vmatpush.bf16.msra.mxu1 %v417_v9  ;;  %451 = vmatpush.bf16.msra.mxu3 %v417_v9 }
  0x16   :  { %125 = vmatpush.bf16.msra.mxu0 %v405_v10  ;;  %444 = vmatpush.bf16.msra.mxu2 %v405_v10 }
  0x17   :  { %246 = vmatpush.bf16.msra.mxu1 %v416_v11  ;;  %452 = vmatpush.bf16.msra.mxu3 %v416_v11 }
  0x1a   :  { %126 = vmatpush.bf16.msra.mxu0 %v404_v12  ;;  %445 = vmatpush.bf16.msra.mxu2 %v404_v12 }
  0x1b   :  { %247 = vmatpush.bf16.msra.mxu1 %v415_v13  ;;  %453 = vmatpush.bf16.msra.mxu3 %v415_v13 }
  0x1e   :  { %127 = vmatpush.bf16.msra.mxu0 %v403_v14  ;;  %446 = vmatpush.bf16.msra.mxu2 %v403_v14 }
  0x1f   :  { %248 = vmatpush.bf16.msra.mxu1 %v414_v15  ;;  %454 = vmatpush.bf16.msra.mxu3 %v414_v15 }
  0x21   :  { %128 = vmatmul.bf16.vlgmr.msra.gmra.mxu0 %v400_v16  ;;  %138 = vmatmul.bf16.vlgmr.msra.gmra.mxu2 %v402_v17 }
  0x22   :  { %249 = vmatmul.bf16.vlgmr.msra.gmra.mxu1 %v411_v18  ;;  %259 = vmatmul.bf16.vlgmr.msra.gmra.mxu3 %v413_v19 }
  0x31   :  { %133 = vmatmul.bf16.gmra.mxu0 %v401_v24  ;;  %143 = vmatmul.bf16.gmra.mxu2 %v67_v25 }
  0x32   :  { %254 = vmatmul.bf16.gmra.mxu1 %v412_v26  ;;  %264 = vmatmul.bf16.gmra.mxu3 %v188_v27 }
  0x9e   :  { %v129_v29 = vpop.f32.mrf.mxu0 }
  0x9f   :  { %v250_v30 = vpop.f32.mrf.mxu1  ;;  %v130_v31 = vadd.f32 %v455_v28, %v129_v29 }
  0xa1   :  { %v269_v33 = vadd.f32 %v250_v30, %v130_v31 }
  0xa3   :  { %v280_v40 = vadd.f32 %v456_v34, %v269_v33 }
  0xa4   :  { %v139_v32 = vpop.f32.mrf.mxu2 }
  0xa5   :  { %v260_v35 = vpop.f32.mrf.mxu3  ;;  %v140_v37 = vadd.f32 %v455_v28, %v139_v32  ;;  %v287_v45 = vmax.f32 %v280_v40, 0.0 }
  0xa6   :  { %v131_v36 = vpop.f32.mrf.mxu0 }
  0xa7   :  { %v132_v38 = vadd.f32 %v455_v28, %v131_v36  ;;  %v252_v39 = vpop.f32.mrf.mxu1  ;;  %v273_v42 = vadd.f32 %v260_v35, %v140_v37 }
  0xa9   :  { %v270_v41 = vadd.f32 %v252_v39, %v132_v38  ;;  %v284_v50 = vadd.f32 %v456_v34, %v273_v42 }
  0xab   :  { %v281_v43 = vadd.f32 %v456_v34, %v270_v41  ;;  %v291_v56 = vmax.f32 %v284_v50, 0.0 }
  0xac   :  { %v141_v44 = vpop.f32.mrf.mxu2 }
  0xad   :  { %v288_v46 = vmax.f32 %v281_v43, 0.0  ;;  %v142_v47 = vadd.f32 %v455_v28, %v141_v44  ;;  %v262_v48 = vpop.f32.mrf.mxu3 }
  0xae   :  { %v134_v49 = vpop.f32.mrf.mxu0 }
  0xaf   :  { %v425_v51 = vpack.c.bf16 %v288_v46, %v287_v45  ;;  %v274_v52 = vadd.f32 %v262_v48, %v142_v47  ;;  %v255_v53 = vpop.f32.mrf.mxu1  ;;  %v135_v55 = vadd.f32 %v455_v28, %v134_v49 }
  0xb1   :  { %426 = vst [vmem:[%s588_s6] sm:$0xff] %v425_v51   ;;  %v285_v54 = vadd.f32 %v456_v34, %v274_v52  ;;  %v271_v60 = vadd.f32 %v255_v53, %v135_v55 }
  0xb3   :  { %v292_v57 = vmax.f32 %v285_v54, 0.0  ;;  %v282_v3 = vadd.f32 %v456_v34, %v271_v60 }
  0xb4   :  { %v144_v58 = vpop.f32.mrf.mxu2 }
  0xb5   :  { %v435_v59 = vpack.c.bf16 %v292_v57, %v291_v56  ;;  %v145_v61 = vadd.f32 %v455_v28, %v144_v58  ;;  %v265_v62 = vpop.f32.mrf.mxu3  ;;  %v289_v9 = vmax.f32 %v282_v3, 0.0 }
  0xb6   :  { %v136_v63 = vpop.f32.mrf.mxu0 }
  0xb7   :  { %438 = vst [vmem:[%s588_s6 + $0x10] sm:$0xff] %v435_v59   ;;  %v275_v0 = vadd.f32 %v265_v62, %v145_v61  ;;  %v137_v1 = vadd.f32 %v455_v28, %v136_v63  ;;  %v257_v2 = vpop.f32.mrf.mxu1 }
  0xb9   :  { %v286_v4 = vadd.f32 %v456_v34, %v275_v0  ;;  %v272_v5 = vadd.f32 %v257_v2, %v137_v1 }
  0xbb   :  { %v293_v6 = vmax.f32 %v286_v4, 0.0  ;;  %v283_v7 = vadd.f32 %v456_v34, %v272_v5 }
  0xbc   :  { %v146_v8 = vpop.f32.mrf.mxu2 }
  0xbd   :  { %v300_v10 = vpack.c.bf16 %v293_v6, %v293_v6  ;;  %v290_v11 = vmax.f32 %v283_v7, 0.0  ;;  %v267_v12 = vpop.f32.mrf.mxu3 }
  0xbf   :  { %307 = vst [vmem:[%s588_s6 + $0x18] sm:$0x1] %v300_v10  ;;  %v430_v13 = vpack.c.bf16 %v290_v11, %v289_v9 }
  0xc1   :  { %437 = vst [vmem:[%s588_s6 + $0x8] sm:$0xff] %v430_v13  }

// kernel: resnet_forward.33
= control target key start
LH: loop header
LB: loop body
LE: loop exit
PB: predicated region body
PF: predicated region fallthrough
CT: control target
= control target key end

     0   :  { %s1006_s0 = inlined_call_operand.vmem [shape: bf16[2,800], index: 0, kind: input, shape index: {}]   ;;  %s1007_s1 = inlined_call_operand.vmem [shape: bf16[800,128], index: 1, kind: input, shape index: {}]   ;;  %s1008_s2 = inlined_call_operand.vmem [shape: f32[1,128], index: 2, kind: input, shape index: {}]   ;;  %s1009_s3 = inlined_call_operand.hbm [shape: f32[2,128], index: 3, kind: output, shape index: {}]  }
   0x1   :  { %v755_v0 = vld [vmem:[%s1007_s1 + $0x38] sm:$0xff]  ;;  %v754_v3 = vld [vmem:[%s1007_s1 + $0x30] sm:$0xff]  ;;  %v753_v8 = vld [vmem:[%s1007_s1 + $0x28] sm:$0xff] }
   0x2   :  { %v763_v1 = vld [vmem:[%s1007_s1 + $0x78] sm:$0xff]  ;;  %439 = vmatpush.bf16.msra.mxu0 %v755_v0  ;;  %v762_v4 = vld [vmem:[%s1007_s1 + $0x70] sm:$0xff]  ;;  %v761_v9 = vld [vmem:[%s1007_s1 + $0x68] sm:$0xff] }
   0x3   :  { %v771_v2 = vld [vmem:[%s1007_s1 + $0xb8] sm:$0xff]  ;;  %452 = vmatpush.bf16.msra.mxu1 %v763_v1  ;;  %v770_v5 = vld [vmem:[%s1007_s1 + $0xb0] sm:$0xff]  ;;  %v769_v10 = vld [vmem:[%s1007_s1 + $0xa8] sm:$0xff] }
   0x4   :  { %465 = vmatpush.bf16.msra.mxu2 %v771_v2  ;;  %v779_v6 = vld [vmem:[%s1007_s1 + $0xf8] sm:$0xff]  ;;  %v778_v7 = vld [vmem:[%s1007_s1 + $0xf0] sm:$0xff]  ;;  %v777_v11 = vld [vmem:[%s1007_s1 + $0xe8] sm:$0xff] }
   0x5   :  { %478 = vmatpush.bf16.msra.mxu3 %v779_v6  ;;  %v752_v12 = vld [vmem:[%s1007_s1 + $0x20] sm:$0xff]  ;;  %v751_v17 = vld [vmem:[%s1007_s1 + $0x18] sm:$0xff] }
   0x6   :  { %440 = vmatpush.bf16.msra.mxu0 %v754_v3  ;;  %v760_v13 = vld [vmem:[%s1007_s1 + $0x60] sm:$0xff]  ;;  %v759_v18 = vld [vmem:[%s1007_s1 + $0x58] sm:$0xff] }
   0x7   :  { %453 = vmatpush.bf16.msra.mxu1 %v762_v4  ;;  %v16_v14 = vld [vmem:[%s1006_s0] sm:$0x7f]  ;;  %v767_v19 = vld [vmem:[%s1007_s1 + $0x98] sm:$0xff] }
   0x8   :  { %466 = vmatpush.bf16.msra.mxu2 %v770_v5  ;;  %v768_v15 = vld [vmem:[%s1007_s1 + $0xa0] sm:$0xff]  ;;  %122 = vst [vmem:[#allocation1] ss:$9 sm:$0xff] %v16_v14 }
   0x9   :  { %479 = vmatpush.bf16.msra.mxu3 %v778_v7  ;;  %v776_v16 = vld [vmem:[%s1007_s1 + $0xe0] sm:$0xff] }
   0xa   :  { %441 = vmatpush.bf16.msra.mxu0 %v753_v8 }
   0xb   :  { %454 = vmatpush.bf16.msra.mxu1 %v761_v9 }
   0xc   :  { %467 = vmatpush.bf16.msra.mxu2 %v769_v10 }
   0xd   :  { %480 = vmatpush.bf16.msra.mxu3 %v777_v11 }
   0xe   :  { %442 = vmatpush.bf16.msra.mxu0 %v752_v12 }
   0xf   :  { %455 = vmatpush.bf16.msra.mxu1 %v760_v13 }
  0x10   :  { %468 = vmatpush.bf16.msra.mxu2 %v768_v15 }
  0x11   :  { %8 = vsyncpa [#allocation3], 0  ;;  %481 = vmatpush.bf16.msra.mxu3 %v776_v16  ;;  %v775_v20 = vld [vmem:[%s1007_s1 + $0xd8] sm:$0xff]  ;;  %v750_v21 = vld [vmem:[%s1007_s1 + $0x10] sm:$0xff]  ;;  %vm436_vm0 = vcmask 261120   ;;  %s538_s8 = sshll.u32 %s1009_s3, 4  ;;  %s539_s8 = int_to_ptr.hbm [resolvable:$true] %s538_s8 }
  0x12   :  { %443 = vmatpush.bf16.msra.mxu0 %v751_v17  ;;  %v758_v22 = vld [vmem:[%s1007_s1 + $0x50] sm:$0xff]  ;;  %v749_v25 = vld [vmem:[%s1007_s1 + $0x8] sm:$0xff]  ;;  %v748_v29 = vld [vmem:[%s1007_s1] sm:$0xff] }
  0x13   :  { %456 = vmatpush.bf16.msra.mxu1 %v759_v18  ;;  %v766_v23 = vld [vmem:[%s1007_s1 + $0x90] sm:$0xff]  ;;  %v757_v26 = vld [vmem:[%s1007_s1 + $0x48] sm:$0xff]  ;;  %v756_v30 = vld [vmem:[%s1007_s1 + $0x40] sm:$0xff] }
  0x14   :  { %469 = vmatpush.bf16.msra.mxu2 %v767_v19  ;;  %v774_v24 = vld [vmem:[%s1007_s1 + $0xd0] sm:$0xff]  ;;  %v765_v27 = vld [vmem:[%s1007_s1 + $0x88] sm:$0xff]  ;;  %v764_v31 = vld [vmem:[%s1007_s1 + $0x80] sm:$0xff] }
  0x15   :  { %482 = vmatpush.bf16.msra.mxu3 %v775_v20  ;;  %v773_v28 = vld [vmem:[%s1007_s1 + $0xc8] sm:$0xff]  ;;  %v787_v32 = vld [vmem:[%s1007_s1 + $0x138] sm:$0xff]  ;;  %v123_v35 = vld [vmem:[#allocation1] sm:$0xff] }
  0x16   :  { %444 = vmatpush.bf16.msra.mxu0 %v750_v21  ;;  %v795_v33 = vld [vmem:[%s1007_s1 + $0x178] sm:$0xff]  ;;  %v797_v34 = vld [vmem:[%s1007_s1 + $0x188] sm:$0xff]  ;;  %v772_v37 = vld [vmem:[%s1007_s1 + $0xc0] sm:$0xff] }
  0x17   :  { %457 = vmatpush.bf16.msra.mxu1 %v758_v22  ;;  %v124_v36 = vld [vmem:[#allocation1 + $0x9] sm:$0xff]  ;;  %v125_v38 = vld [vmem:[#allocation1 + $0x12] sm:$0xff]  ;;  %v796_v41 = vld [vmem:[%s1007_s1 + $0x180] sm:$0xff] }
  0x18   :  { %470 = vmatpush.bf16.msra.mxu2 %v766_v23  ;;  %v786_v39 = vld [vmem:[%s1007_s1 + $0x130] sm:$0xff]  ;;  %v126_v42 = vld [vmem:[#allocation1 + $0x1b] sm:$0xff]  ;;  %v785_v43 = vld [vmem:[%s1007_s1 + $0x128] sm:$0xff] }
  0x19   :  { %483 = vmatpush.bf16.msra.mxu3 %v774_v24  ;;  %v794_v40 = vld [vmem:[%s1007_s1 + $0x170] sm:$0xff]  ;;  %v793_v44 = vld [vmem:[%s1007_s1 + $0x168] sm:$0xff]  ;;  %v784_v45 = vld [vmem:[%s1007_s1 + $0x120] sm:$0xff] }
  0x1a   :  { %445 = vmatpush.bf16.msra.mxu0 %v749_v25  ;;  %v792_v46 = vld [vmem:[%s1007_s1 + $0x160] sm:$0xff]  ;;  %v783_v47 = vld [vmem:[%s1007_s1 + $0x118] sm:$0xff]  ;;  %v782_v50 = vld [vmem:[%s1007_s1 + $0x110] sm:$0xff] }
  0x1b   :  { %458 = vmatpush.bf16.msra.mxu1 %v757_v26  ;;  %v791_v48 = vld [vmem:[%s1007_s1 + $0x158] sm:$0xff]  ;;  %v790_v51 = vld [vmem:[%s1007_s1 + $0x150] sm:$0xff]  ;;  %v781_v52 = vld [vmem:[%s1007_s1 + $0x108] sm:$0xff] }
  0x1c   :  { %471 = vmatpush.bf16.msra.mxu2 %v765_v27  ;;  %v129_v49 = vld [vmem:[#allocation1 + $0x36] sm:$0xff]  ;;  %v789_v53 = vld [vmem:[%s1007_s1 + $0x148] sm:$0xff]  ;;  %v780_v54 = vld [vmem:[%s1007_s1 + $0x100] sm:$0xff] }
  0x1d   :  { %484 = vmatpush.bf16.msra.mxu3 %v773_v28  ;;  %v788_v55 = vld [vmem:[%s1007_s1 + $0x140] sm:$0xff]  ;;  %v128_v57 = vld [vmem:[#allocation1 + $0x2d] sm:$0xff]  ;;  %s826_s1 = smov [#allocation2]  }
  0x1e   :  { %446 = vmatpush.bf16.msra.mxu0 %v748_v29  ;;  %v127_v56 = vld [vmem:[#allocation1 + $0x24] sm:$0xff]  ;;  %v799_v0 = vld [vmem:[%s1008_s2] ss:$0 sm:$0xff]  ;;  %s536_s5 = sshll.u32 %s826_s1, 4  ;;  %s537_s5 = int_to_ptr.vmem [resolvable:$true] %s536_s5 }
  0x1f   :  { %459 = vmatpush.bf16.msra.mxu1 %v756_v30 }
  0x20   :  { %472 = vmatpush.bf16.msra.mxu2 %v764_v31 }
  0x21   :  { %447 = vmatmul.bf16.vlgmr.msra.gmra.mxu0 %v123_v35  ;;  %485 = vmatpush.bf16.msra.mxu3 %v772_v37 }
  0x22   :  { %491 = vmatpush.bf16.msrb.mxu0 %v787_v32  ;;  %460 = vmatmul.bf16.vlgmr.msra.gmra.mxu1 %v124_v36 }
  0x23   :  { %504 = vmatpush.bf16.msrb.mxu1 %v795_v33  ;;  %473 = vmatmul.bf16.vlgmr.msra.gmra.mxu2 %v125_v38 }
  0x24   :  { %523 = vmatpush.bf16.msrb.mxu2 %v797_v34  ;;  %486 = vmatmul.bf16.vlgmr.msra.gmra.mxu3 %v126_v42 }
  0x26   :  { %492 = vmatpush.bf16.msrb.mxu0 %v786_v39 }
  0x27   :  { %505 = vmatpush.bf16.msrb.mxu1 %v794_v40 }
  0x28   :  { %524 = vmatpush.bf16.msrb.mxu2 %v796_v41 }
  0x2a   :  { %493 = vmatpush.bf16.msrb.mxu0 %v785_v43 }
  0x2b   :  { %506 = vmatpush.bf16.msrb.mxu1 %v793_v44 }
  0x2e   :  { %494 = vmatpush.bf16.msrb.mxu0 %v784_v45 }
  0x2f   :  { %507 = vmatpush.bf16.msrb.mxu1 %v792_v46 }
  0x32   :  { %495 = vmatpush.bf16.msrb.mxu0 %v783_v47 }
  0x33   :  { %508 = vmatpush.bf16.msrb.mxu1 %v791_v48  ;;  %747 = vmatmul.msk.bf16.vlgmr.msrb.gmra.mxu2 %vm436_vm0, %v129_v49 }
  0x36   :  { %496 = vmatpush.bf16.msrb.mxu0 %v782_v50 }
  0x37   :  { %509 = vmatpush.bf16.msrb.mxu1 %v790_v51 }
  0x3a   :  { %497 = vmatpush.bf16.msrb.mxu0 %v781_v52 }
  0x3b   :  { %510 = vmatpush.bf16.msrb.mxu1 %v789_v53 }
  0x3e   :  { %498 = vmatpush.bf16.msrb.mxu0 %v780_v54 }
  0x3f   :  { %511 = vmatpush.bf16.msrb.mxu1 %v788_v55 }
  0x41   :  { %499 = vmatmul.bf16.vlgmr.msrb.gmra.mxu0 %v127_v56 }
  0x42   :  { %512 = vmatmul.bf16.vlgmr.msrb.gmra.mxu1 %v128_v57 }
  0x9e   :  { %v448_v58 = vpop.f32.mrf.mxu0 }
  0x9f   :  { %v461_v59 = vpop.f32.mrf.mxu1  ;;  %v449_v2 = vadd.f32 %v799_v0, %v448_v58 }
  0xa1   :  { %v462_v4 = vadd.f32 %v461_v59, %v449_v2 }
  0xa6   :  { %v474_v60 = vpop.f32.mrf.mxu2  ;;  %v450_v61 = vpop.f32.mrf.mxu0 }
  0xa7   :  { %v463_v62 = vpop.f32.mrf.mxu1  ;;  %v487_v63 = vpop.f32.mrf.mxu3  ;;  %v475_v6 = vadd.f32 %v474_v60, %v462_v4 }
  0xa9   :  { %v488_v7 = vadd.f32 %v487_v63, %v475_v6 }
  0xae   :  { %v476_v1 = vpop.f32.mrf.mxu2 }
  0xaf   :  { %v489_v3 = vpop.f32.mrf.mxu3 }
  0xb6   :  { %v526_v5 = vpop.f32.mrf.mxu2 }
  0xbe   :  { %v500_v8 = vpop.f32.mrf.mxu0  ;;  %v528_v11 = vpop.f32.mrf.mxu2 }
  0xbf   :  { %v501_v9 = vadd.f32 %v500_v8, %v488_v7  ;;  %v513_v10 = vpop.f32.mrf.mxu1 }
  0xc1   :  { %v514_v12 = vadd.f32 %v513_v10, %v501_v9 }
  0xc3   :  { %v527_v13 = vadd.f32 %v526_v5, %v514_v12 }
  0xc5   :  { %530 = vst [vmem:[#allocation2] sm:$0x3] %v527_v13 }
  0xc6   :  { %v502_v14 = vpop.f32.mrf.mxu0  ;;  %541 = dma.vmem_to_hbm [thread:$0]  %s537_s5, 32, %s539_s8, [#allocation3]  }
  0xc7   :  { %v515_v15 = vpop.f32.mrf.mxu1 }
  0xc8   :  { %824 = dma.done.wait [#allocation3], 32  }
  0xc9   :  { %825 = vsyncadd [#allocation3], 4294967264 }
  0xca   :  { %546 = vsyncpa [#allocation3], 1 }

</bundles_post_ra>
